<compile_context>
chip_gen: v5e
topology: v5e:2x2
jax: 0.10.0
libtpu: 0.0.40
codegen_flags: <defaults>
</compile_context>

<pallas_src>
import jax
import jax.numpy as jnp
from jax import lax
from jax.experimental import pallas as pl
from jax.experimental.pallas import tpu as pltpu


# ------------------------- fused conv3x3 + bias + ReLU -----------------------

def _conv3x3_relu_kernel(x_ref, w_ref, b_ref, o_ref):
    # x_ref: (H+2, W+2, Cin)  zero-padded input, one batch element
    # w_ref: (9, Cin, Cout)   taps flattened as kh*3 + kw
    # b_ref: (1, Cout)
    # o_ref: (H, W, Cout)
    H, W, Cout = o_ref.shape
    bias = b_ref[...]                                    # (1, Cout)

    def row_body(h, carry):
        acc = jnp.zeros((W, Cout), jnp.float32)
        for kh in range(3):                              # static, unrolled
            row = x_ref[h + kh]                          # (W+2, Cin)
            for kw in range(3):
                patch = row[kw:kw + W, :]                # (W, Cin)
                acc = acc + jnp.dot(patch, w_ref[kh * 3 + kw],
                                    preferred_element_type=jnp.float32)
        o_ref[h] = jnp.maximum(acc + bias, 0.0).astype(o_ref.dtype)
        return carry

    lax.fori_loop(0, H, row_body, 0)


def conv3x3_relu(x, w, b):
    """x: (B, H, W, Cin) NHWC;  w: (3, 3, Cin, Cout) HWIO;  b: (Cout,)."""
    B, H, W, Cin = x.shape
    Cout = w.shape[-1]

    # Pad the channel (lane / matmul-K) axis to a multiple of 8 — only the
    # first layer (Cin == 3) is affected.  Zero padding leaves results exact.
    cpad = (-Cin) % 8
    if cpad:
        x = jnp.pad(x, ((0, 0), (0, 0), (0, 0), (0, cpad)))
        w = jnp.pad(w, ((0, 0), (0, 0), (0, cpad), (0, 0)))
        Cin += cpad

    xp = jnp.pad(x, ((0, 0), (1, 1), (1, 1), (0, 0)))     # SAME padding
    wk = w.reshape(9, Cin, Cout)
    b2 = b.reshape(1, Cout)

    return pl.pallas_call(
        _conv3x3_relu_kernel,
        out_shape=jax.ShapeDtypeStruct((B, H, W, Cout), x.dtype),
        grid=(B,),
        in_specs=[
            pl.BlockSpec((None, H + 2, W + 2, Cin), lambda bb: (bb, 0, 0, 0)),
            pl.BlockSpec((9, Cin, Cout), lambda bb: (0, 0, 0)),   # resident
            pl.BlockSpec((1, Cout), lambda bb: (0, 0)),           # resident
        ],
        out_specs=pl.BlockSpec((None, H, W, Cout), lambda bb: (bb, 0, 0, 0)),
        compiler_params=pltpu.CompilerParams(
            dimension_semantics=("parallel",)),
    )(xp, wk, b2)


# --------------------------------- maxpool 2x2 -------------------------------

def _maxpool2x2_kernel(x_ref, o_ref):
    # x_ref: (4, H2, W2, C) — the 4 elements of each 2x2 window on axis 0.
    a = jnp.maximum(x_ref[0], x_ref[1])
    b = jnp.maximum(x_ref[2], x_ref[3])
    o_ref[...] = jnp.maximum(a, b)


def maxpool2x2(x):
    """x: (B, H, W, C) NHWC -> (B, H//2, W//2, C)."""
    B, H, W, C = x.shape
    H2, W2 = H // 2, W // 2
    # Wrapper-side layout plumbing: put the 2x2 window on a leading axis so the
    # kernel does only lane-dense elementwise maxima (no sublane-strided slices).
    xw = (x.reshape(B, H2, 2, W2, 2, C)
            .transpose(0, 2, 4, 1, 3, 5)
            .reshape(B, 4, H2, W2, C))
    return pl.pallas_call(
        _maxpool2x2_kernel,
        out_shape=jax.ShapeDtypeStruct((B, H2, W2, C), x.dtype),
        grid=(B,),
        in_specs=[pl.BlockSpec((None, 4, H2, W2, C),
                               lambda bb: (bb, 0, 0, 0, 0))],
        out_specs=pl.BlockSpec((None, H2, W2, C), lambda bb: (bb, 0, 0, 0)),
        compiler_params=pltpu.CompilerParams(
            dimension_semantics=("parallel",)),
    )(xw)


# ------------------------------ EncoderCNN forward ---------------------------

@jax.jit
def encoder_cnn(X, params):
    """X: (B, 3, H, W) NCHW (torch layout).  params: list of 7 (w, b) pairs."""
    x = jnp.transpose(X, (0, 2, 3, 1))                    # NCHW -> NHWC
    x = conv3x3_relu(x, *params[0])                       # 3   -> 64
    x = conv3x3_relu(x, *params[1])                       # 64  -> 64
    x = maxpool2x2(x)
    x = conv3x3_relu(x, *params[2])                       # 64  -> 128
    x = conv3x3_relu(x, *params[3])                       # 128 -> 128
    x = maxpool2x2(x)
    x = conv3x3_relu(x, *params[4])                       # 128 -> 256
    x = conv3x3_relu(x, *params[5])                       # 256 -> 256
    x = conv3x3_relu(x, *params[6])                       # 256 -> 256
    x = jnp.transpose(x, (0, 3, 1, 2))                    # back to NCHW
    return x.reshape(-1, 16, 28, 28)                      # torch .view(-1,16,28,28)


# --------------------------------- reference ---------------------------------

def _reference(X, params):
    x = jnp.transpose(X, (0, 2, 3, 1))

    def conv(x, w, b):
        y = lax.conv_general_dilated(
            x, w, (1, 1), "SAME",
            dimension_numbers=("NHWC", "HWIO", "NHWC"),
            precision=lax.Precision.HIGHEST)
        return jnp.maximum(y + b, 0.0)

    def pool(x):
        return lax.reduce_window(x, -jnp.inf, lax.max,
                                 (1, 2, 2, 1), (1, 2, 2, 1), "VALID")

    x = conv(x, *params[0]); x = conv(x, *params[1]); x = pool(x)
    x = conv(x, *params[2]); x = conv(x, *params[3]); x = pool(x)
    x = conv(x, *params[4]); x = conv(x, *params[5]); x = conv(x, *params[6])
    x = jnp.transpose(x, (0, 3, 1, 2))
    return x.reshape(-1, 16, 28, 28)


if __name__ == "__main__":
    key = jax.random.PRNGKey(0)
    B, C0, H0, W0 = 2, 3, 28, 28   # small; 28x28 -> 7x7x256, views to (-1,16,28,28)
    kx, kp = jax.random.split(key)
    X = jax.random.normal(kx, (B, C0, H0, W0), dtype=jnp.float32)

    # VGG16 features[:16] conv channel plan.
    cfg = [(3, 64), (64, 64), (64, 128), (128, 128), (128, 256), (256, 256), (256, 256)]
    params = []
    k = kp
    for cin, cout in cfg:
        k, kw_, kb_ = jax.random.split(k, 3)
        w = jax.random.normal(kw_, (3, 3, cin, cout), jnp.float32) * (2.0 / (9 * cin)) ** 0.5
        b = jax.random.normal(kb_, (cout,), jnp.float32) * 0.01
        params.append((w, b))

    out = encoder_cnn(X, params)
    out = jax.block_until_ready(out)

    ref = _reference(X, params)
    assert out.shape == (2, 16, 28, 28), out.shape
    assert jnp.allclose(out, ref, atol=5e-3, rtol=5e-3), \
        float(jnp.max(jnp.abs(out - ref)))

    print("KERNEL_OK")
</pallas_src>

<mosaic_0001>
module attributes {stable_mosaic.version = 11 : i64} {
  func.func @_conv3x3_relu_kernel(%arg0: i32, %arg1: memref<1x30x30x8xf32, #tpu.memory_space<vmem>>, %arg2: memref<9x8x64xf32, #tpu.memory_space<vmem>>, %arg3: memref<1x64xf32, #tpu.memory_space<vmem>>, %arg4: memref<1x28x28x64xf32, #tpu.memory_space<vmem>>) attributes {dimension_semantics = [#tpu.dimension_semantics<parallel>], iteration_bounds = array<i64: 2>, scalar_prefetch = 0 : i64, scratch_operands = 0 : i64, tpu.core_type = #tpu.core_type<tc>, window_params = [{transform_indices = @transform_0, window_bounds = array<i64: 1, 30, 30, 8>}, {pipeline_mode = #tpu.pipeline_mode<synchronous>, transform_indices = @transform_1, window_bounds = array<i64: 9, 8, 64>}, {pipeline_mode = #tpu.pipeline_mode<synchronous>, transform_indices = @transform_2, window_bounds = array<i64: 1, 64>}, {transform_indices = @transform_3, window_bounds = array<i64: 1, 28, 28, 64>}]} {
    %c0 = arith.constant 0 : index
    %c0_0 = arith.constant 0 : index
    %0 = vector.load %arg3[%c0, %c0_0] : memref<1x64xf32, #tpu.memory_space<vmem>>, vector<1x64xf32>
    %c0_i32 = arith.constant 0 : i32
    %c28_i32 = arith.constant 28 : i32
    %1 = arith.addi %c0_i32, %c28_i32 : i32
    %c1_i32 = arith.constant 1 : i32
    scf.for %arg5 = %c0_i32 to %1 step %c1_i32  : i32 {
      %cst = arith.constant 0.000000e+00 : f32
      %2 = vector.broadcast %cst : f32 to vector<28x64xf32>
      %c0_i32_2 = arith.constant 0 : i32
      %3 = arith.addi %arg5, %c0_i32_2 : i32
      %c0_3 = arith.constant 0 : index
      %4 = arith.index_cast %3 : i32 to index
      %c0_4 = arith.constant 0 : index
      %c0_5 = arith.constant 0 : index
      %5 = vector.load %arg1[%c0_3, %4, %c0_4, %c0_5] : memref<1x30x30x8xf32, #tpu.memory_space<vmem>>, vector<1x1x30x8xf32>
      %6 = vector.shape_cast %5 : vector<1x1x30x8xf32> to vector<30x8xf32>
      %7 = vector.extract_strided_slice %6 {offsets = [0, 0], sizes = [28, 8], strides = [1, 1]} : vector<30x8xf32> to vector<28x8xf32>
      %c0_6 = arith.constant 0 : index
      %c0_7 = arith.constant 0 : index
      %c0_8 = arith.constant 0 : index
      %8 = vector.load %arg2[%c0_6, %c0_7, %c0_8] : memref<9x8x64xf32, #tpu.memory_space<vmem>>, vector<1x8x64xf32>
      %9 = vector.shape_cast %8 : vector<1x8x64xf32> to vector<8x64xf32>
      %cst_9 = arith.constant dense<0.000000e+00> : vector<28x64xf32>
      %10 = tpu.matmul %7, %9, %cst_9 {dimension_numbers = #tpu.dot_dimension_numbers<[1], [0], [0], [1], [0, 0, 1, 1], [], []>} : vector<28x8xf32>, vector<8x64xf32>, vector<28x64xf32> -> vector<28x64xf32>
      %11 = arith.addf %2, %10 : vector<28x64xf32>
      %12 = vector.extract_strided_slice %6 {offsets = [1, 0], sizes = [28, 8], strides = [1, 1]} : vector<30x8xf32> to vector<28x8xf32>
      %c1 = arith.constant 1 : index
      %c0_10 = arith.constant 0 : index
      %c0_11 = arith.constant 0 : index
      %13 = vector.load %arg2[%c1, %c0_10, %c0_11] : memref<9x8x64xf32, #tpu.memory_space<vmem>>, vector<1x8x64xf32>
      %14 = vector.shape_cast %13 : vector<1x8x64xf32> to vector<8x64xf32>
      %cst_12 = arith.constant dense<0.000000e+00> : vector<28x64xf32>
      %15 = tpu.matmul %12, %14, %cst_12 {dimension_numbers = #tpu.dot_dimension_numbers<[1], [0], [0], [1], [0, 0, 1, 1], [], []>} : vector<28x8xf32>, vector<8x64xf32>, vector<28x64xf32> -> vector<28x64xf32>
      %16 = arith.addf %11, %15 : vector<28x64xf32>
      %17 = vector.extract_strided_slice %6 {offsets = [2, 0], sizes = [28, 8], strides = [1, 1]} : vector<30x8xf32> to vector<28x8xf32>
      %c2 = arith.constant 2 : index
      %c0_13 = arith.constant 0 : index
      %c0_14 = arith.constant 0 : index
      %18 = vector.load %arg2[%c2, %c0_13, %c0_14] : memref<9x8x64xf32, #tpu.memory_space<vmem>>, vector<1x8x64xf32>
      %19 = vector.shape_cast %18 : vector<1x8x64xf32> to vector<8x64xf32>
      %cst_15 = arith.constant dense<0.000000e+00> : vector<28x64xf32>
      %20 = tpu.matmul %17, %19, %cst_15 {dimension_numbers = #tpu.dot_dimension_numbers<[1], [0], [0], [1], [0, 0, 1, 1], [], []>} : vector<28x8xf32>, vector<8x64xf32>, vector<28x64xf32> -> vector<28x64xf32>
      %21 = arith.addf %16, %20 : vector<28x64xf32>
      %c1_i32_16 = arith.constant 1 : i32
      %22 = arith.addi %arg5, %c1_i32_16 : i32
      %c0_17 = arith.constant 0 : index
      %23 = arith.index_cast %22 : i32 to index
      %c0_18 = arith.constant 0 : index
      %c0_19 = arith.constant 0 : index
      %24 = vector.load %arg1[%c0_17, %23, %c0_18, %c0_19] : memref<1x30x30x8xf32, #tpu.memory_space<vmem>>, vector<1x1x30x8xf32>
      %25 = vector.shape_cast %24 : vector<1x1x30x8xf32> to vector<30x8xf32>
      %26 = vector.extract_strided_slice %25 {offsets = [0, 0], sizes = [28, 8], strides = [1, 1]} : vector<30x8xf32> to vector<28x8xf32>
      %c3 = arith.constant 3 : index
      %c0_20 = arith.constant 0 : index
      %c0_21 = arith.constant 0 : index
      %27 = vector.load %arg2[%c3, %c0_20, %c0_21] : memref<9x8x64xf32, #tpu.memory_space<vmem>>, vector<1x8x64xf32>
      %28 = vector.shape_cast %27 : vector<1x8x64xf32> to vector<8x64xf32>
      %cst_22 = arith.constant dense<0.000000e+00> : vector<28x64xf32>
      %29 = tpu.matmul %26, %28, %cst_22 {dimension_numbers = #tpu.dot_dimension_numbers<[1], [0], [0], [1], [0, 0, 1, 1], [], []>} : vector<28x8xf32>, vector<8x64xf32>, vector<28x64xf32> -> vector<28x64xf32>
      %30 = arith.addf %21, %29 : vector<28x64xf32>
      %31 = vector.extract_strided_slice %25 {offsets = [1, 0], sizes = [28, 8], strides = [1, 1]} : vector<30x8xf32> to vector<28x8xf32>
      %c4 = arith.constant 4 : index
      %c0_23 = arith.constant 0 : index
      %c0_24 = arith.constant 0 : index
      %32 = vector.load %arg2[%c4, %c0_23, %c0_24] : memref<9x8x64xf32, #tpu.memory_space<vmem>>, vector<1x8x64xf32>
      %33 = vector.shape_cast %32 : vector<1x8x64xf32> to vector<8x64xf32>
      %cst_25 = arith.constant dense<0.000000e+00> : vector<28x64xf32>
      %34 = tpu.matmul %31, %33, %cst_25 {dimension_numbers = #tpu.dot_dimension_numbers<[1], [0], [0], [1], [0, 0, 1, 1], [], []>} : vector<28x8xf32>, vector<8x64xf32>, vector<28x64xf32> -> vector<28x64xf32>
      %35 = arith.addf %30, %34 : vector<28x64xf32>
      %36 = vector.extract_strided_slice %25 {offsets = [2, 0], sizes = [28, 8], strides = [1, 1]} : vector<30x8xf32> to vector<28x8xf32>
      %c5 = arith.constant 5 : index
      %c0_26 = arith.constant 0 : index
      %c0_27 = arith.constant 0 : index
      %37 = vector.load %arg2[%c5, %c0_26, %c0_27] : memref<9x8x64xf32, #tpu.memory_space<vmem>>, vector<1x8x64xf32>
      %38 = vector.shape_cast %37 : vector<1x8x64xf32> to vector<8x64xf32>
      %cst_28 = arith.constant dense<0.000000e+00> : vector<28x64xf32>
      %39 = tpu.matmul %36, %38, %cst_28 {dimension_numbers = #tpu.dot_dimension_numbers<[1], [0], [0], [1], [0, 0, 1, 1], [], []>} : vector<28x8xf32>, vector<8x64xf32>, vector<28x64xf32> -> vector<28x64xf32>
      %40 = arith.addf %35, %39 : vector<28x64xf32>
      %c2_i32 = arith.constant 2 : i32
      %41 = arith.addi %arg5, %c2_i32 : i32
      %c0_29 = arith.constant 0 : index
      %42 = arith.index_cast %41 : i32 to index
      %c0_30 = arith.constant 0 : index
      %c0_31 = arith.constant 0 : index
      %43 = vector.load %arg1[%c0_29, %42, %c0_30, %c0_31] : memref<1x30x30x8xf32, #tpu.memory_space<vmem>>, vector<1x1x30x8xf32>
      %44 = vector.shape_cast %43 : vector<1x1x30x8xf32> to vector<30x8xf32>
      %45 = vector.extract_strided_slice %44 {offsets = [0, 0], sizes = [28, 8], strides = [1, 1]} : vector<30x8xf32> to vector<28x8xf32>
      %c6 = arith.constant 6 : index
      %c0_32 = arith.constant 0 : index
      %c0_33 = arith.constant 0 : index
      %46 = vector.load %arg2[%c6, %c0_32, %c0_33] : memref<9x8x64xf32, #tpu.memory_space<vmem>>, vector<1x8x64xf32>
      %47 = vector.shape_cast %46 : vector<1x8x64xf32> to vector<8x64xf32>
      %cst_34 = arith.constant dense<0.000000e+00> : vector<28x64xf32>
      %48 = tpu.matmul %45, %47, %cst_34 {dimension_numbers = #tpu.dot_dimension_numbers<[1], [0], [0], [1], [0, 0, 1, 1], [], []>} : vector<28x8xf32>, vector<8x64xf32>, vector<28x64xf32> -> vector<28x64xf32>
      %49 = arith.addf %40, %48 : vector<28x64xf32>
      %50 = vector.extract_strided_slice %44 {offsets = [1, 0], sizes = [28, 8], strides = [1, 1]} : vector<30x8xf32> to vector<28x8xf32>
      %c7 = arith.constant 7 : index
      %c0_35 = arith.constant 0 : index
      %c0_36 = arith.constant 0 : index
      %51 = vector.load %arg2[%c7, %c0_35, %c0_36] : memref<9x8x64xf32, #tpu.memory_space<vmem>>, vector<1x8x64xf32>
      %52 = vector.shape_cast %51 : vector<1x8x64xf32> to vector<8x64xf32>
      %cst_37 = arith.constant dense<0.000000e+00> : vector<28x64xf32>
      %53 = tpu.matmul %50, %52, %cst_37 {dimension_numbers = #tpu.dot_dimension_numbers<[1], [0], [0], [1], [0, 0, 1, 1], [], []>} : vector<28x8xf32>, vector<8x64xf32>, vector<28x64xf32> -> vector<28x64xf32>
      %54 = arith.addf %49, %53 : vector<28x64xf32>
      %55 = vector.extract_strided_slice %44 {offsets = [2, 0], sizes = [28, 8], strides = [1, 1]} : vector<30x8xf32> to vector<28x8xf32>
      %c8 = arith.constant 8 : index
      %c0_38 = arith.constant 0 : index
      %c0_39 = arith.constant 0 : index
      %56 = vector.load %arg2[%c8, %c0_38, %c0_39] : memref<9x8x64xf32, #tpu.memory_space<vmem>>, vector<1x8x64xf32>
      %57 = vector.shape_cast %56 : vector<1x8x64xf32> to vector<8x64xf32>
      %cst_40 = arith.constant dense<0.000000e+00> : vector<28x64xf32>
      %58 = tpu.matmul %55, %57, %cst_40 {dimension_numbers = #tpu.dot_dimension_numbers<[1], [0], [0], [1], [0, 0, 1, 1], [], []>} : vector<28x8xf32>, vector<8x64xf32>, vector<28x64xf32> -> vector<28x64xf32>
      %59 = arith.addf %54, %58 : vector<28x64xf32>
      %60 = vector.broadcast %0 : vector<1x64xf32> to vector<28x64xf32>
      %61 = arith.addf %59, %60 : vector<28x64xf32>
      %cst_41 = arith.constant 0.000000e+00 : f32
      %62 = vector.broadcast %cst_41 : f32 to vector<28x64xf32>
      %63 = arith.maximumf %61, %62 : vector<28x64xf32>
      %c0_42 = arith.constant 0 : index
      %64 = arith.index_cast %arg5 : i32 to index
      %c0_43 = arith.constant 0 : index
      %c0_44 = arith.constant 0 : index
      %65 = vector.load %arg4[%c0_42, %64, %c0_43, %c0_44] : memref<1x28x28x64xf32, #tpu.memory_space<vmem>>, vector<1x1x28x64xf32>
      %66 = vector.shape_cast %65 : vector<1x1x28x64xf32> to vector<28x64xf32>
      %67 = vector.shape_cast %63 : vector<28x64xf32> to vector<1x1x28x64xf32>
      tpu.vector_store %arg4[%c0_42, %64, %c0_43, %c0_44], %67 {strides = array<i32>} : memref<1x28x28x64xf32, #tpu.memory_space<vmem>>, vector<1x1x28x64xf32>,
    }
    %c28_i32_1 = arith.constant 28 : i32
    return
  }
  func.func @transform_0(%arg0: i32) -> (i32, i32, i32, i32) {
    %c0_i32 = arith.constant 0 : i32
    %c0_i32_0 = arith.constant 0 : i32
    %c0_i32_1 = arith.constant 0 : i32
    %c0_i32_2 = arith.constant 0 : i32
    return %arg0, %c0_i32, %c0_i32_0, %c0_i32_1 : i32, i32, i32, i32
  }
  func.func @transform_1(%arg0: i32) -> (i32, i32, i32) {
    %c0_i32 = arith.constant 0 : i32
    %c0_i32_0 = arith.constant 0 : i32
    %c0_i32_1 = arith.constant 0 : i32
    %c0_i32_2 = arith.constant 0 : i32
    return %c0_i32, %c0_i32_0, %c0_i32_1 : i32, i32, i32
  }
  func.func @transform_2(%arg0: i32) -> (i32, i32) {
    %c0_i32 = arith.constant 0 : i32
    %c0_i32_0 = arith.constant 0 : i32
    %c0_i32_1 = arith.constant 0 : i32
    return %c0_i32, %c0_i32_0 : i32, i32
  }
  func.func @transform_3(%arg0: i32) -> (i32, i32, i32, i32) {
    %c0_i32 = arith.constant 0 : i32
    %c0_i32_0 = arith.constant 0 : i32
    %c0_i32_1 = arith.constant 0 : i32
    %c0_i32_2 = arith.constant 0 : i32
    return %arg0, %c0_i32, %c0_i32_0, %c0_i32_1 : i32, i32, i32, i32
  }
}

module attributes {stable_mosaic.version = 11 : i64} {
  func.func @_conv3x3_relu_kernel(%arg0: i32, %arg1: memref<1x30x30x64xf32, #tpu.memory_space<vmem>>, %arg2: memref<9x64x64xf32, #tpu.memory_space<vmem>>, %arg3: memref<1x64xf32, #tpu.memory_space<vmem>>, %arg4: memref<1x28x28x64xf32, #tpu.memory_space<vmem>>) attributes {dimension_semantics = [#tpu.dimension_semantics<parallel>], iteration_bounds = array<i64: 2>, scalar_prefetch = 0 : i64, scratch_operands = 0 : i64, tpu.core_type = #tpu.core_type<tc>, window_params = [{transform_indices = @transform_0, window_bounds = array<i64: 1, 30, 30, 64>}, {pipeline_mode = #tpu.pipeline_mode<synchronous>, transform_indices = @transform_1, window_bounds = array<i64: 9, 64, 64>}, {pipeline_mode = #tpu.pipeline_mode<synchronous>, transform_indices = @transform_2, window_bounds = array<i64: 1, 64>}, {transform_indices = @transform_3, window_bounds = array<i64: 1, 28, 28, 64>}]} {
    %c0 = arith.constant 0 : index
    %c0_0 = arith.constant 0 : index
    %0 = vector.load %arg3[%c0, %c0_0] : memref<1x64xf32, #tpu.memory_space<vmem>>, vector<1x64xf32>
    %c0_i32 = arith.constant 0 : i32
    %c28_i32 = arith.constant 28 : i32
    %1 = arith.addi %c0_i32, %c28_i32 : i32
    %c1_i32 = arith.constant 1 : i32
    scf.for %arg5 = %c0_i32 to %1 step %c1_i32  : i32 {
      %cst = arith.constant 0.000000e+00 : f32
      %2 = vector.broadcast %cst : f32 to vector<28x64xf32>
      %c0_i32_2 = arith.constant 0 : i32
      %3 = arith.addi %arg5, %c0_i32_2 : i32
      %c0_3 = arith.constant 0 : index
      %4 = arith.index_cast %3 : i32 to index
      %c0_4 = arith.constant 0 : index
      %c0_5 = arith.constant 0 : index
      %5 = vector.load %arg1[%c0_3, %4, %c0_4, %c0_5] : memref<1x30x30x64xf32, #tpu.memory_space<vmem>>, vector<1x1x30x64xf32>
      %6 = vector.shape_cast %5 : vector<1x1x30x64xf32> to vector<30x64xf32>
      %7 = vector.extract_strided_slice %6 {offsets = [0, 0], sizes = [28, 64], strides = [1, 1]} : vector<30x64xf32> to vector<28x64xf32>
      %c0_6 = arith.constant 0 : index
      %c0_7 = arith.constant 0 : index
      %c0_8 = arith.constant 0 : index
      %8 = vector.load %arg2[%c0_6, %c0_7, %c0_8] : memref<9x64x64xf32, #tpu.memory_space<vmem>>, vector<1x64x64xf32>
      %9 = vector.shape_cast %8 : vector<1x64x64xf32> to vector<64x64xf32>
      %cst_9 = arith.constant dense<0.000000e+00> : vector<28x64xf32>
      %10 = tpu.matmul %7, %9, %cst_9 {dimension_numbers = #tpu.dot_dimension_numbers<[1], [0], [0], [1], [0, 0, 1, 1], [], []>} : vector<28x64xf32>, vector<64x64xf32>, vector<28x64xf32> -> vector<28x64xf32>
      %11 = arith.addf %2, %10 : vector<28x64xf32>
      %12 = vector.extract_strided_slice %6 {offsets = [1, 0], sizes = [28, 64], strides = [1, 1]} : vector<30x64xf32> to vector<28x64xf32>
      %c1 = arith.constant 1 : index
      %c0_10 = arith.constant 0 : index
      %c0_11 = arith.constant 0 : index
      %13 = vector.load %arg2[%c1, %c0_10, %c0_11] : memref<9x64x64xf32, #tpu.memory_space<vmem>>, vector<1x64x64xf32>
      %14 = vector.shape_cast %13 : vector<1x64x64xf32> to vector<64x64xf32>
      %cst_12 = arith.constant dense<0.000000e+00> : vector<28x64xf32>
      %15 = tpu.matmul %12, %14, %cst_12 {dimension_numbers = #tpu.dot_dimension_numbers<[1], [0], [0], [1], [0, 0, 1, 1], [], []>} : vector<28x64xf32>, vector<64x64xf32>, vector<28x64xf32> -> vector<28x64xf32>
      %16 = arith.addf %11, %15 : vector<28x64xf32>
      %17 = vector.extract_strided_slice %6 {offsets = [2, 0], sizes = [28, 64], strides = [1, 1]} : vector<30x64xf32> to vector<28x64xf32>
      %c2 = arith.constant 2 : index
      %c0_13 = arith.constant 0 : index
      %c0_14 = arith.constant 0 : index
      %18 = vector.load %arg2[%c2, %c0_13, %c0_14] : memref<9x64x64xf32, #tpu.memory_space<vmem>>, vector<1x64x64xf32>
      %19 = vector.shape_cast %18 : vector<1x64x64xf32> to vector<64x64xf32>
      %cst_15 = arith.constant dense<0.000000e+00> : vector<28x64xf32>
      %20 = tpu.matmul %17, %19, %cst_15 {dimension_numbers = #tpu.dot_dimension_numbers<[1], [0], [0], [1], [0, 0, 1, 1], [], []>} : vector<28x64xf32>, vector<64x64xf32>, vector<28x64xf32> -> vector<28x64xf32>
      %21 = arith.addf %16, %20 : vector<28x64xf32>
      %c1_i32_16 = arith.constant 1 : i32
      %22 = arith.addi %arg5, %c1_i32_16 : i32
      %c0_17 = arith.constant 0 : index
      %23 = arith.index_cast %22 : i32 to index
      %c0_18 = arith.constant 0 : index
      %c0_19 = arith.constant 0 : index
      %24 = vector.load %arg1[%c0_17, %23, %c0_18, %c0_19] : memref<1x30x30x64xf32, #tpu.memory_space<vmem>>, vector<1x1x30x64xf32>
      %25 = vector.shape_cast %24 : vector<1x1x30x64xf32> to vector<30x64xf32>
      %26 = vector.extract_strided_slice %25 {offsets = [0, 0], sizes = [28, 64], strides = [1, 1]} : vector<30x64xf32> to vector<28x64xf32>
      %c3 = arith.constant 3 : index
      %c0_20 = arith.constant 0 : index
      %c0_21 = arith.constant 0 : index
      %27 = vector.load %arg2[%c3, %c0_20, %c0_21] : memref<9x64x64xf32, #tpu.memory_space<vmem>>, vector<1x64x64xf32>
      %28 = vector.shape_cast %27 : vector<1x64x64xf32> to vector<64x64xf32>
      %cst_22 = arith.constant dense<0.000000e+00> : vector<28x64xf32>
      %29 = tpu.matmul %26, %28, %cst_22 {dimension_numbers = #tpu.dot_dimension_numbers<[1], [0], [0], [1], [0, 0, 1, 1], [], []>} : vector<28x64xf32>, vector<64x64xf32>, vector<28x64xf32> -> vector<28x64xf32>
      %30 = arith.addf %21, %29 : vector<28x64xf32>
      %31 = vector.extract_strided_slice %25 {offsets = [1, 0], sizes = [28, 64], strides = [1, 1]} : vector<30x64xf32> to vector<28x64xf32>
      %c4 = arith.constant 4 : index
      %c0_23 = arith.constant 0 : index
      %c0_24 = arith.constant 0 : index
      %32 = vector.load %arg2[%c4, %c0_23, %c0_24] : memref<9x64x64xf32, #tpu.memory_space<vmem>>, vector<1x64x64xf32>
      %33 = vector.shape_cast %32 : vector<1x64x64xf32> to vector<64x64xf32>
      %cst_25 = arith.constant dense<0.000000e+00> : vector<28x64xf32>
      %34 = tpu.matmul %31, %33, %cst_25 {dimension_numbers = #tpu.dot_dimension_numbers<[1], [0], [0], [1], [0, 0, 1, 1], [], []>} : vector<28x64xf32>, vector<64x64xf32>, vector<28x64xf32> -> vector<28x64xf32>
      %35 = arith.addf %30, %34 : vector<28x64xf32>
      %36 = vector.extract_strided_slice %25 {offsets = [2, 0], sizes = [28, 64], strides = [1, 1]} : vector<30x64xf32> to vector<28x64xf32>
      %c5 = arith.constant 5 : index
      %c0_26 = arith.constant 0 : index
      %c0_27 = arith.constant 0 : index
      %37 = vector.load %arg2[%c5, %c0_26, %c0_27] : memref<9x64x64xf32, #tpu.memory_space<vmem>>, vector<1x64x64xf32>
      %38 = vector.shape_cast %37 : vector<1x64x64xf32> to vector<64x64xf32>
      %cst_28 = arith.constant dense<0.000000e+00> : vector<28x64xf32>
      %39 = tpu.matmul %36, %38, %cst_28 {dimension_numbers = #tpu.dot_dimension_numbers<[1], [0], [0], [1], [0, 0, 1, 1], [], []>} : vector<28x64xf32>, vector<64x64xf32>, vector<28x64xf32> -> vector<28x64xf32>
      %40 = arith.addf %35, %39 : vector<28x64xf32>
      %c2_i32 = arith.constant 2 : i32
      %41 = arith.addi %arg5, %c2_i32 : i32
      %c0_29 = arith.constant 0 : index
      %42 = arith.index_cast %41 : i32 to index
      %c0_30 = arith.constant 0 : index
      %c0_31 = arith.constant 0 : index
      %43 = vector.load %arg1[%c0_29, %42, %c0_30, %c0_31] : memref<1x30x30x64xf32, #tpu.memory_space<vmem>>, vector<1x1x30x64xf32>
      %44 = vector.shape_cast %43 : vector<1x1x30x64xf32> to vector<30x64xf32>
      %45 = vector.extract_strided_slice %44 {offsets = [0, 0], sizes = [28, 64], strides = [1, 1]} : vector<30x64xf32> to vector<28x64xf32>
      %c6 = arith.constant 6 : index
      %c0_32 = arith.constant 0 : index
      %c0_33 = arith.constant 0 : index
      %46 = vector.load %arg2[%c6, %c0_32, %c0_33] : memref<9x64x64xf32, #tpu.memory_space<vmem>>, vector<1x64x64xf32>
      %47 = vector.shape_cast %46 : vector<1x64x64xf32> to vector<64x64xf32>
      %cst_34 = arith.constant dense<0.000000e+00> : vector<28x64xf32>
      %48 = tpu.matmul %45, %47, %cst_34 {dimension_numbers = #tpu.dot_dimension_numbers<[1], [0], [0], [1], [0, 0, 1, 1], [], []>} : vector<28x64xf32>, vector<64x64xf32>, vector<28x64xf32> -> vector<28x64xf32>
      %49 = arith.addf %40, %48 : vector<28x64xf32>
      %50 = vector.extract_strided_slice %44 {offsets = [1, 0], sizes = [28, 64], strides = [1, 1]} : vector<30x64xf32> to vector<28x64xf32>
      %c7 = arith.constant 7 : index
      %c0_35 = arith.constant 0 : index
      %c0_36 = arith.constant 0 : index
      %51 = vector.load %arg2[%c7, %c0_35, %c0_36] : memref<9x64x64xf32, #tpu.memory_space<vmem>>, vector<1x64x64xf32>
      %52 = vector.shape_cast %51 : vector<1x64x64xf32> to vector<64x64xf32>
      %cst_37 = arith.constant dense<0.000000e+00> : vector<28x64xf32>
      %53 = tpu.matmul %50, %52, %cst_37 {dimension_numbers = #tpu.dot_dimension_numbers<[1], [0], [0], [1], [0, 0, 1, 1], [], []>} : vector<28x64xf32>, vector<64x64xf32>, vector<28x64xf32> -> vector<28x64xf32>
      %54 = arith.addf %49, %53 : vector<28x64xf32>
      %55 = vector.extract_strided_slice %44 {offsets = [2, 0], sizes = [28, 64], strides = [1, 1]} : vector<30x64xf32> to vector<28x64xf32>
      %c8 = arith.constant 8 : index
      %c0_38 = arith.constant 0 : index
      %c0_39 = arith.constant 0 : index
      %56 = vector.load %arg2[%c8, %c0_38, %c0_39] : memref<9x64x64xf32, #tpu.memory_space<vmem>>, vector<1x64x64xf32>
      %57 = vector.shape_cast %56 : vector<1x64x64xf32> to vector<64x64xf32>
      %cst_40 = arith.constant dense<0.000000e+00> : vector<28x64xf32>
      %58 = tpu.matmul %55, %57, %cst_40 {dimension_numbers = #tpu.dot_dimension_numbers<[1], [0], [0], [1], [0, 0, 1, 1], [], []>} : vector<28x64xf32>, vector<64x64xf32>, vector<28x64xf32> -> vector<28x64xf32>
      %59 = arith.addf %54, %58 : vector<28x64xf32>
      %60 = vector.broadcast %0 : vector<1x64xf32> to vector<28x64xf32>
      %61 = arith.addf %59, %60 : vector<28x64xf32>
      %cst_41 = arith.constant 0.000000e+00 : f32
      %62 = vector.broadcast %cst_41 : f32 to vector<28x64xf32>
      %63 = arith.maximumf %61, %62 : vector<28x64xf32>
      %c0_42 = arith.constant 0 : index
      %64 = arith.index_cast %arg5 : i32 to index
      %c0_43 = arith.constant 0 : index
      %c0_44 = arith.constant 0 : index
      %65 = vector.load %arg4[%c0_42, %64, %c0_43, %c0_44] : memref<1x28x28x64xf32, #tpu.memory_space<vmem>>, vector<1x1x28x64xf32>
      %66 = vector.shape_cast %65 : vector<1x1x28x64xf32> to vector<28x64xf32>
      %67 = vector.shape_cast %63 : vector<28x64xf32> to vector<1x1x28x64xf32>
      tpu.vector_store %arg4[%c0_42, %64, %c0_43, %c0_44], %67 {strides = array<i32>} : memref<1x28x28x64xf32, #tpu.memory_space<vmem>>, vector<1x1x28x64xf32>,
    }
    %c28_i32_1 = arith.constant 28 : i32
    return
  }
  func.func @transform_0(%arg0: i32) -> (i32, i32, i32, i32) {
    %c0_i32 = arith.constant 0 : i32
    %c0_i32_0 = arith.constant 0 : i32
    %c0_i32_1 = arith.constant 0 : i32
    %c0_i32_2 = arith.constant 0 : i32
    return %arg0, %c0_i32, %c0_i32_0, %c0_i32_1 : i32, i32, i32, i32
  }
  func.func @transform_1(%arg0: i32) -> (i32, i32, i32) {
    %c0_i32 = arith.constant 0 : i32
    %c0_i32_0 = arith.constant 0 : i32
    %c0_i32_1 = arith.constant 0 : i32
    %c0_i32_2 = arith.constant 0 : i32
    return %c0_i32, %c0_i32_0, %c0_i32_1 : i32, i32, i32
  }
  func.func @transform_2(%arg0: i32) -> (i32, i32) {
    %c0_i32 = arith.constant 0 : i32
    %c0_i32_0 = arith.constant 0 : i32
    %c0_i32_1 = arith.constant 0 : i32
    return %c0_i32, %c0_i32_0 : i32, i32
  }
  func.func @transform_3(%arg0: i32) -> (i32, i32, i32, i32) {
    %c0_i32 = arith.constant 0 : i32
    %c0_i32_0 = arith.constant 0 : i32
    %c0_i32_1 = arith.constant 0 : i32
    %c0_i32_2 = arith.constant 0 : i32
    return %arg0, %c0_i32, %c0_i32_0, %c0_i32_1 : i32, i32, i32, i32
  }
}

module attributes {stable_mosaic.version = 11 : i64} {
  func.func @_maxpool2x2_kernel(%arg0: i32, %arg1: memref<1x4x14x14x64xf32, #tpu.memory_space<vmem>>, %arg2: memref<1x14x14x64xf32, #tpu.memory_space<vmem>>) attributes {dimension_semantics = [#tpu.dimension_semantics<parallel>], iteration_bounds = array<i64: 2>, scalar_prefetch = 0 : i64, scratch_operands = 0 : i64, tpu.core_type = #tpu.core_type<tc>, window_params = [{transform_indices = @transform_0, window_bounds = array<i64: 1, 4, 14, 14, 64>}, {transform_indices = @transform_1, window_bounds = array<i64: 1, 14, 14, 64>}]} {
    %c0 = arith.constant 0 : index
    %c0_0 = arith.constant 0 : index
    %c0_1 = arith.constant 0 : index
    %c0_2 = arith.constant 0 : index
    %c0_3 = arith.constant 0 : index
    %0 = vector.load %arg1[%c0, %c0_0, %c0_1, %c0_2, %c0_3] : memref<1x4x14x14x64xf32, #tpu.memory_space<vmem>>, vector<1x1x14x14x64xf32>
    %1 = vector.shape_cast %0 : vector<1x1x14x14x64xf32> to vector<14x14x64xf32>
    %c0_4 = arith.constant 0 : index
    %c1 = arith.constant 1 : index
    %c0_5 = arith.constant 0 : index
    %c0_6 = arith.constant 0 : index
    %c0_7 = arith.constant 0 : index
    %2 = vector.load %arg1[%c0_4, %c1, %c0_5, %c0_6, %c0_7] : memref<1x4x14x14x64xf32, #tpu.memory_space<vmem>>, vector<1x1x14x14x64xf32>
    %3 = vector.shape_cast %2 : vector<1x1x14x14x64xf32> to vector<14x14x64xf32>
    %4 = arith.maximumf %1, %3 : vector<14x14x64xf32>
    %c0_8 = arith.constant 0 : index
    %c2 = arith.constant 2 : index
    %c0_9 = arith.constant 0 : index
    %c0_10 = arith.constant 0 : index
    %c0_11 = arith.constant 0 : index
    %5 = vector.load %arg1[%c0_8, %c2, %c0_9, %c0_10, %c0_11] : memref<1x4x14x14x64xf32, #tpu.memory_space<vmem>>, vector<1x1x14x14x64xf32>
    %6 = vector.shape_cast %5 : vector<1x1x14x14x64xf32> to vector<14x14x64xf32>
    %c0_12 = arith.constant 0 : index
    %c3 = arith.constant 3 : index
    %c0_13 = arith.constant 0 : index
    %c0_14 = arith.constant 0 : index
    %c0_15 = arith.constant 0 : index
    %7 = vector.load %arg1[%c0_12, %c3, %c0_13, %c0_14, %c0_15] : memref<1x4x14x14x64xf32, #tpu.memory_space<vmem>>, vector<1x1x14x14x64xf32>
    %8 = vector.shape_cast %7 : vector<1x1x14x14x64xf32> to vector<14x14x64xf32>
    %9 = arith.maximumf %6, %8 : vector<14x14x64xf32>
    %10 = arith.maximumf %4, %9 : vector<14x14x64xf32>
    %c0_16 = arith.constant 0 : index
    %c0_17 = arith.constant 0 : index
    %c0_18 = arith.constant 0 : index
    %c0_19 = arith.constant 0 : index
    %11 = vector.load %arg2[%c0_16, %c0_17, %c0_18, %c0_19] : memref<1x14x14x64xf32, #tpu.memory_space<vmem>>, vector<1x14x14x64xf32>
    %12 = vector.shape_cast %11 : vector<1x14x14x64xf32> to vector<14x14x64xf32>
    %13 = vector.shape_cast %10 : vector<14x14x64xf32> to vector<1x14x14x64xf32>
    tpu.vector_store %arg2[%c0_16, %c0_17, %c0_18, %c0_19], %13 {strides = array<i32>} : memref<1x14x14x64xf32, #tpu.memory_space<vmem>>, vector<1x14x14x64xf32>,
    return
  }
  func.func @transform_0(%arg0: i32) -> (i32, i32, i32, i32, i32) {
    %c0_i32 = arith.constant 0 : i32
    %c0_i32_0 = arith.constant 0 : i32
    %c0_i32_1 = arith.constant 0 : i32
    %c0_i32_2 = arith.constant 0 : i32
    %c0_i32_3 = arith.constant 0 : i32
    return %arg0, %c0_i32, %c0_i32_0, %c0_i32_1, %c0_i32_2 : i32, i32, i32, i32, i32
  }
  func.func @transform_1(%arg0: i32) -> (i32, i32, i32, i32) {
    %c0_i32 = arith.constant 0 : i32
    %c0_i32_0 = arith.constant 0 : i32
    %c0_i32_1 = arith.constant 0 : i32
    %c0_i32_2 = arith.constant 0 : i32
    return %arg0, %c0_i32, %c0_i32_0, %c0_i32_1 : i32, i32, i32, i32
  }
}

module attributes {stable_mosaic.version = 11 : i64} {
  func.func @_conv3x3_relu_kernel(%arg0: i32, %arg1: memref<1x16x16x64xf32, #tpu.memory_space<vmem>>, %arg2: memref<9x64x128xf32, #tpu.memory_space<vmem>>, %arg3: memref<1x128xf32, #tpu.memory_space<vmem>>, %arg4: memref<1x14x14x128xf32, #tpu.memory_space<vmem>>) attributes {dimension_semantics = [#tpu.dimension_semantics<parallel>], iteration_bounds = array<i64: 2>, scalar_prefetch = 0 : i64, scratch_operands = 0 : i64, tpu.core_type = #tpu.core_type<tc>, window_params = [{transform_indices = @transform_0, window_bounds = array<i64: 1, 16, 16, 64>}, {pipeline_mode = #tpu.pipeline_mode<synchronous>, transform_indices = @transform_1, window_bounds = array<i64: 9, 64, 128>}, {pipeline_mode = #tpu.pipeline_mode<synchronous>, transform_indices = @transform_2, window_bounds = array<i64: 1, 128>}, {transform_indices = @transform_3, window_bounds = array<i64: 1, 14, 14, 128>}]} {
    %c0 = arith.constant 0 : index
    %c0_0 = arith.constant 0 : index
    %0 = vector.load %arg3[%c0, %c0_0] : memref<1x128xf32, #tpu.memory_space<vmem>>, vector<1x128xf32>
    %c0_i32 = arith.constant 0 : i32
    %c14_i32 = arith.constant 14 : i32
    %1 = arith.addi %c0_i32, %c14_i32 : i32
    %c1_i32 = arith.constant 1 : i32
    scf.for %arg5 = %c0_i32 to %1 step %c1_i32  : i32 {
      %cst = arith.constant 0.000000e+00 : f32
      %2 = vector.broadcast %cst : f32 to vector<14x128xf32>
      %c0_i32_2 = arith.constant 0 : i32
      %3 = arith.addi %arg5, %c0_i32_2 : i32
      %c0_3 = arith.constant 0 : index
      %4 = arith.index_cast %3 : i32 to index
      %c0_4 = arith.constant 0 : index
      %c0_5 = arith.constant 0 : index
      %5 = vector.load %arg1[%c0_3, %4, %c0_4, %c0_5] : memref<1x16x16x64xf32, #tpu.memory_space<vmem>>, vector<1x1x16x64xf32>
      %6 = vector.shape_cast %5 : vector<1x1x16x64xf32> to vector<16x64xf32>
      %7 = vector.extract_strided_slice %6 {offsets = [0, 0], sizes = [14, 64], strides = [1, 1]} : vector<16x64xf32> to vector<14x64xf32>
      %c0_6 = arith.constant 0 : index
      %c0_7 = arith.constant 0 : index
      %c0_8 = arith.constant 0 : index
      %8 = vector.load %arg2[%c0_6, %c0_7, %c0_8] : memref<9x64x128xf32, #tpu.memory_space<vmem>>, vector<1x64x128xf32>
      %9 = vector.shape_cast %8 : vector<1x64x128xf32> to vector<64x128xf32>
      %cst_9 = arith.constant dense<0.000000e+00> : vector<14x128xf32>
      %10 = tpu.matmul %7, %9, %cst_9 {dimension_numbers = #tpu.dot_dimension_numbers<[1], [0], [0], [1], [0, 0, 1, 1], [], []>} : vector<14x64xf32>, vector<64x128xf32>, vector<14x128xf32> -> vector<14x128xf32>
      %11 = arith.addf %2, %10 : vector<14x128xf32>
      %12 = vector.extract_strided_slice %6 {offsets = [1, 0], sizes = [14, 64], strides = [1, 1]} : vector<16x64xf32> to vector<14x64xf32>
      %c1 = arith.constant 1 : index
      %c0_10 = arith.constant 0 : index
      %c0_11 = arith.constant 0 : index
      %13 = vector.load %arg2[%c1, %c0_10, %c0_11] : memref<9x64x128xf32, #tpu.memory_space<vmem>>, vector<1x64x128xf32>
      %14 = vector.shape_cast %13 : vector<1x64x128xf32> to vector<64x128xf32>
      %cst_12 = arith.constant dense<0.000000e+00> : vector<14x128xf32>
      %15 = tpu.matmul %12, %14, %cst_12 {dimension_numbers = #tpu.dot_dimension_numbers<[1], [0], [0], [1], [0, 0, 1, 1], [], []>} : vector<14x64xf32>, vector<64x128xf32>, vector<14x128xf32> -> vector<14x128xf32>
      %16 = arith.addf %11, %15 : vector<14x128xf32>
      %17 = vector.extract_strided_slice %6 {offsets = [2, 0], sizes = [14, 64], strides = [1, 1]} : vector<16x64xf32> to vector<14x64xf32>
      %c2 = arith.constant 2 : index
      %c0_13 = arith.constant 0 : index
      %c0_14 = arith.constant 0 : index
      %18 = vector.load %arg2[%c2, %c0_13, %c0_14] : memref<9x64x128xf32, #tpu.memory_space<vmem>>, vector<1x64x128xf32>
      %19 = vector.shape_cast %18 : vector<1x64x128xf32> to vector<64x128xf32>
      %cst_15 = arith.constant dense<0.000000e+00> : vector<14x128xf32>
      %20 = tpu.matmul %17, %19, %cst_15 {dimension_numbers = #tpu.dot_dimension_numbers<[1], [0], [0], [1], [0, 0, 1, 1], [], []>} : vector<14x64xf32>, vector<64x128xf32>, vector<14x128xf32> -> vector<14x128xf32>
      %21 = arith.addf %16, %20 : vector<14x128xf32>
      %c1_i32_16 = arith.constant 1 : i32
      %22 = arith.addi %arg5, %c1_i32_16 : i32
      %c0_17 = arith.constant 0 : index
      %23 = arith.index_cast %22 : i32 to index
      %c0_18 = arith.constant 0 : index
      %c0_19 = arith.constant 0 : index
      %24 = vector.load %arg1[%c0_17, %23, %c0_18, %c0_19] : memref<1x16x16x64xf32, #tpu.memory_space<vmem>>, vector<1x1x16x64xf32>
      %25 = vector.shape_cast %24 : vector<1x1x16x64xf32> to vector<16x64xf32>
      %26 = vector.extract_strided_slice %25 {offsets = [0, 0], sizes = [14, 64], strides = [1, 1]} : vector<16x64xf32> to vector<14x64xf32>
      %c3 = arith.constant 3 : index
      %c0_20 = arith.constant 0 : index
      %c0_21 = arith.constant 0 : index
      %27 = vector.load %arg2[%c3, %c0_20, %c0_21] : memref<9x64x128xf32, #tpu.memory_space<vmem>>, vector<1x64x128xf32>
      %28 = vector.shape_cast %27 : vector<1x64x128xf32> to vector<64x128xf32>
      %cst_22 = arith.constant dense<0.000000e+00> : vector<14x128xf32>
      %29 = tpu.matmul %26, %28, %cst_22 {dimension_numbers = #tpu.dot_dimension_numbers<[1], [0], [0], [1], [0, 0, 1, 1], [], []>} : vector<14x64xf32>, vector<64x128xf32>, vector<14x128xf32> -> vector<14x128xf32>
      %30 = arith.addf %21, %29 : vector<14x128xf32>
      %31 = vector.extract_strided_slice %25 {offsets = [1, 0], sizes = [14, 64], strides = [1, 1]} : vector<16x64xf32> to vector<14x64xf32>
      %c4 = arith.constant 4 : index
      %c0_23 = arith.constant 0 : index
      %c0_24 = arith.constant 0 : index
      %32 = vector.load %arg2[%c4, %c0_23, %c0_24] : memref<9x64x128xf32, #tpu.memory_space<vmem>>, vector<1x64x128xf32>
      %33 = vector.shape_cast %32 : vector<1x64x128xf32> to vector<64x128xf32>
      %cst_25 = arith.constant dense<0.000000e+00> : vector<14x128xf32>
      %34 = tpu.matmul %31, %33, %cst_25 {dimension_numbers = #tpu.dot_dimension_numbers<[1], [0], [0], [1], [0, 0, 1, 1], [], []>} : vector<14x64xf32>, vector<64x128xf32>, vector<14x128xf32> -> vector<14x128xf32>
      %35 = arith.addf %30, %34 : vector<14x128xf32>
      %36 = vector.extract_strided_slice %25 {offsets = [2, 0], sizes = [14, 64], strides = [1, 1]} : vector<16x64xf32> to vector<14x64xf32>
      %c5 = arith.constant 5 : index
      %c0_26 = arith.constant 0 : index
      %c0_27 = arith.constant 0 : index
      %37 = vector.load %arg2[%c5, %c0_26, %c0_27] : memref<9x64x128xf32, #tpu.memory_space<vmem>>, vector<1x64x128xf32>
      %38 = vector.shape_cast %37 : vector<1x64x128xf32> to vector<64x128xf32>
      %cst_28 = arith.constant dense<0.000000e+00> : vector<14x128xf32>
      %39 = tpu.matmul %36, %38, %cst_28 {dimension_numbers = #tpu.dot_dimension_numbers<[1], [0], [0], [1], [0, 0, 1, 1], [], []>} : vector<14x64xf32>, vector<64x128xf32>, vector<14x128xf32> -> vector<14x128xf32>
      %40 = arith.addf %35, %39 : vector<14x128xf32>
      %c2_i32 = arith.constant 2 : i32
      %41 = arith.addi %arg5, %c2_i32 : i32
      %c0_29 = arith.constant 0 : index
      %42 = arith.index_cast %41 : i32 to index
      %c0_30 = arith.constant 0 : index
      %c0_31 = arith.constant 0 : index
      %43 = vector.load %arg1[%c0_29, %42, %c0_30, %c0_31] : memref<1x16x16x64xf32, #tpu.memory_space<vmem>>, vector<1x1x16x64xf32>
      %44 = vector.shape_cast %43 : vector<1x1x16x64xf32> to vector<16x64xf32>
      %45 = vector.extract_strided_slice %44 {offsets = [0, 0], sizes = [14, 64], strides = [1, 1]} : vector<16x64xf32> to vector<14x64xf32>
      %c6 = arith.constant 6 : index
      %c0_32 = arith.constant 0 : index
      %c0_33 = arith.constant 0 : index
      %46 = vector.load %arg2[%c6, %c0_32, %c0_33] : memref<9x64x128xf32, #tpu.memory_space<vmem>>, vector<1x64x128xf32>
      %47 = vector.shape_cast %46 : vector<1x64x128xf32> to vector<64x128xf32>
      %cst_34 = arith.constant dense<0.000000e+00> : vector<14x128xf32>
      %48 = tpu.matmul %45, %47, %cst_34 {dimension_numbers = #tpu.dot_dimension_numbers<[1], [0], [0], [1], [0, 0, 1, 1], [], []>} : vector<14x64xf32>, vector<64x128xf32>, vector<14x128xf32> -> vector<14x128xf32>
      %49 = arith.addf %40, %48 : vector<14x128xf32>
      %50 = vector.extract_strided_slice %44 {offsets = [1, 0], sizes = [14, 64], strides = [1, 1]} : vector<16x64xf32> to vector<14x64xf32>
      %c7 = arith.constant 7 : index
      %c0_35 = arith.constant 0 : index
      %c0_36 = arith.constant 0 : index
      %51 = vector.load %arg2[%c7, %c0_35, %c0_36] : memref<9x64x128xf32, #tpu.memory_space<vmem>>, vector<1x64x128xf32>
      %52 = vector.shape_cast %51 : vector<1x64x128xf32> to vector<64x128xf32>
      %cst_37 = arith.constant dense<0.000000e+00> : vector<14x128xf32>
      %53 = tpu.matmul %50, %52, %cst_37 {dimension_numbers = #tpu.dot_dimension_numbers<[1], [0], [0], [1], [0, 0, 1, 1], [], []>} : vector<14x64xf32>, vector<64x128xf32>, vector<14x128xf32> -> vector<14x128xf32>
      %54 = arith.addf %49, %53 : vector<14x128xf32>
      %55 = vector.extract_strided_slice %44 {offsets = [2, 0], sizes = [14, 64], strides = [1, 1]} : vector<16x64xf32> to vector<14x64xf32>
      %c8 = arith.constant 8 : index
      %c0_38 = arith.constant 0 : index
      %c0_39 = arith.constant 0 : index
      %56 = vector.load %arg2[%c8, %c0_38, %c0_39] : memref<9x64x128xf32, #tpu.memory_space<vmem>>, vector<1x64x128xf32>
      %57 = vector.shape_cast %56 : vector<1x64x128xf32> to vector<64x128xf32>
      %cst_40 = arith.constant dense<0.000000e+00> : vector<14x128xf32>
      %58 = tpu.matmul %55, %57, %cst_40 {dimension_numbers = #tpu.dot_dimension_numbers<[1], [0], [0], [1], [0, 0, 1, 1], [], []>} : vector<14x64xf32>, vector<64x128xf32>, vector<14x128xf32> -> vector<14x128xf32>
      %59 = arith.addf %54, %58 : vector<14x128xf32>
      %60 = vector.broadcast %0 : vector<1x128xf32> to vector<14x128xf32>
      %61 = arith.addf %59, %60 : vector<14x128xf32>
      %cst_41 = arith.constant 0.000000e+00 : f32
      %62 = vector.broadcast %cst_41 : f32 to vector<14x128xf32>
      %63 = arith.maximumf %61, %62 : vector<14x128xf32>
      %c0_42 = arith.constant 0 : index
      %64 = arith.index_cast %arg5 : i32 to index
      %c0_43 = arith.constant 0 : index
      %c0_44 = arith.constant 0 : index
      %65 = vector.load %arg4[%c0_42, %64, %c0_43, %c0_44] : memref<1x14x14x128xf32, #tpu.memory_space<vmem>>, vector<1x1x14x128xf32>
      %66 = vector.shape_cast %65 : vector<1x1x14x128xf32> to vector<14x128xf32>
      %67 = vector.shape_cast %63 : vector<14x128xf32> to vector<1x1x14x128xf32>
      tpu.vector_store %arg4[%c0_42, %64, %c0_43, %c0_44], %67 {strides = array<i32>} : memref<1x14x14x128xf32, #tpu.memory_space<vmem>>, vector<1x1x14x128xf32>,
    }
    %c14_i32_1 = arith.constant 14 : i32
    return
  }
  func.func @transform_0(%arg0: i32) -> (i32, i32, i32, i32) {
    %c0_i32 = arith.constant 0 : i32
    %c0_i32_0 = arith.constant 0 : i32
    %c0_i32_1 = arith.constant 0 : i32
    %c0_i32_2 = arith.constant 0 : i32
    return %arg0, %c0_i32, %c0_i32_0, %c0_i32_1 : i32, i32, i32, i32
  }
  func.func @transform_1(%arg0: i32) -> (i32, i32, i32) {
    %c0_i32 = arith.constant 0 : i32
    %c0_i32_0 = arith.constant 0 : i32
    %c0_i32_1 = arith.constant 0 : i32
    %c0_i32_2 = arith.constant 0 : i32
    return %c0_i32, %c0_i32_0, %c0_i32_1 : i32, i32, i32
  }
  func.func @transform_2(%arg0: i32) -> (i32, i32) {
    %c0_i32 = arith.constant 0 : i32
    %c0_i32_0 = arith.constant 0 : i32
    %c0_i32_1 = arith.constant 0 : i32
    return %c0_i32, %c0_i32_0 : i32, i32
  }
  func.func @transform_3(%arg0: i32) -> (i32, i32, i32, i32) {
    %c0_i32 = arith.constant 0 : i32
    %c0_i32_0 = arith.constant 0 : i32
    %c0_i32_1 = arith.constant 0 : i32
    %c0_i32_2 = arith.constant 0 : i32
    return %arg0, %c0_i32, %c0_i32_0, %c0_i32_1 : i32, i32, i32, i32
  }
}

module attributes {stable_mosaic.version = 11 : i64} {
  func.func @_conv3x3_relu_kernel(%arg0: i32, %arg1: memref<1x16x16x128xf32, #tpu.memory_space<vmem>>, %arg2: memref<9x128x128xf32, #tpu.memory_space<vmem>>, %arg3: memref<1x128xf32, #tpu.memory_space<vmem>>, %arg4: memref<1x14x14x128xf32, #tpu.memory_space<vmem>>) attributes {dimension_semantics = [#tpu.dimension_semantics<parallel>], iteration_bounds = array<i64: 2>, scalar_prefetch = 0 : i64, scratch_operands = 0 : i64, tpu.core_type = #tpu.core_type<tc>, window_params = [{transform_indices = @transform_0, window_bounds = array<i64: 1, 16, 16, 128>}, {pipeline_mode = #tpu.pipeline_mode<synchronous>, transform_indices = @transform_1, window_bounds = array<i64: 9, 128, 128>}, {pipeline_mode = #tpu.pipeline_mode<synchronous>, transform_indices = @transform_2, window_bounds = array<i64: 1, 128>}, {transform_indices = @transform_3, window_bounds = array<i64: 1, 14, 14, 128>}]} {
    %c0 = arith.constant 0 : index
    %c0_0 = arith.constant 0 : index
    %0 = vector.load %arg3[%c0, %c0_0] : memref<1x128xf32, #tpu.memory_space<vmem>>, vector<1x128xf32>
    %c0_i32 = arith.constant 0 : i32
    %c14_i32 = arith.constant 14 : i32
    %1 = arith.addi %c0_i32, %c14_i32 : i32
    %c1_i32 = arith.constant 1 : i32
    scf.for %arg5 = %c0_i32 to %1 step %c1_i32  : i32 {
      %cst = arith.constant 0.000000e+00 : f32
      %2 = vector.broadcast %cst : f32 to vector<14x128xf32>
      %c0_i32_2 = arith.constant 0 : i32
      %3 = arith.addi %arg5, %c0_i32_2 : i32
      %c0_3 = arith.constant 0 : index
      %4 = arith.index_cast %3 : i32 to index
      %c0_4 = arith.constant 0 : index
      %c0_5 = arith.constant 0 : index
      %5 = vector.load %arg1[%c0_3, %4, %c0_4, %c0_5] : memref<1x16x16x128xf32, #tpu.memory_space<vmem>>, vector<1x1x16x128xf32>
      %6 = vector.shape_cast %5 : vector<1x1x16x128xf32> to vector<16x128xf32>
      %7 = vector.extract_strided_slice %6 {offsets = [0, 0], sizes = [14, 128], strides = [1, 1]} : vector<16x128xf32> to vector<14x128xf32>
      %c0_6 = arith.constant 0 : index
      %c0_7 = arith.constant 0 : index
      %c0_8 = arith.constant 0 : index
      %8 = vector.load %arg2[%c0_6, %c0_7, %c0_8] : memref<9x128x128xf32, #tpu.memory_space<vmem>>, vector<1x128x128xf32>
      %9 = vector.shape_cast %8 : vector<1x128x128xf32> to vector<128x128xf32>
      %cst_9 = arith.constant dense<0.000000e+00> : vector<14x128xf32>
      %10 = tpu.matmul %7, %9, %cst_9 {dimension_numbers = #tpu.dot_dimension_numbers<[1], [0], [0], [1], [0, 0, 1, 1], [], []>} : vector<14x128xf32>, vector<128x128xf32>, vector<14x128xf32> -> vector<14x128xf32>
      %11 = arith.addf %2, %10 : vector<14x128xf32>
      %12 = vector.extract_strided_slice %6 {offsets = [1, 0], sizes = [14, 128], strides = [1, 1]} : vector<16x128xf32> to vector<14x128xf32>
      %c1 = arith.constant 1 : index
      %c0_10 = arith.constant 0 : index
      %c0_11 = arith.constant 0 : index
      %13 = vector.load %arg2[%c1, %c0_10, %c0_11] : memref<9x128x128xf32, #tpu.memory_space<vmem>>, vector<1x128x128xf32>
      %14 = vector.shape_cast %13 : vector<1x128x128xf32> to vector<128x128xf32>
      %cst_12 = arith.constant dense<0.000000e+00> : vector<14x128xf32>
      %15 = tpu.matmul %12, %14, %cst_12 {dimension_numbers = #tpu.dot_dimension_numbers<[1], [0], [0], [1], [0, 0, 1, 1], [], []>} : vector<14x128xf32>, vector<128x128xf32>, vector<14x128xf32> -> vector<14x128xf32>
      %16 = arith.addf %11, %15 : vector<14x128xf32>
      %17 = vector.extract_strided_slice %6 {offsets = [2, 0], sizes = [14, 128], strides = [1, 1]} : vector<16x128xf32> to vector<14x128xf32>
      %c2 = arith.constant 2 : index
      %c0_13 = arith.constant 0 : index
      %c0_14 = arith.constant 0 : index
      %18 = vector.load %arg2[%c2, %c0_13, %c0_14] : memref<9x128x128xf32, #tpu.memory_space<vmem>>, vector<1x128x128xf32>
      %19 = vector.shape_cast %18 : vector<1x128x128xf32> to vector<128x128xf32>
      %cst_15 = arith.constant dense<0.000000e+00> : vector<14x128xf32>
      %20 = tpu.matmul %17, %19, %cst_15 {dimension_numbers = #tpu.dot_dimension_numbers<[1], [0], [0], [1], [0, 0, 1, 1], [], []>} : vector<14x128xf32>, vector<128x128xf32>, vector<14x128xf32> -> vector<14x128xf32>
      %21 = arith.addf %16, %20 : vector<14x128xf32>
      %c1_i32_16 = arith.constant 1 : i32
      %22 = arith.addi %arg5, %c1_i32_16 : i32
      %c0_17 = arith.constant 0 : index
      %23 = arith.index_cast %22 : i32 to index
      %c0_18 = arith.constant 0 : index
      %c0_19 = arith.constant 0 : index
      %24 = vector.load %arg1[%c0_17, %23, %c0_18, %c0_19] : memref<1x16x16x128xf32, #tpu.memory_space<vmem>>, vector<1x1x16x128xf32>
      %25 = vector.shape_cast %24 : vector<1x1x16x128xf32> to vector<16x128xf32>
      %26 = vector.extract_strided_slice %25 {offsets = [0, 0], sizes = [14, 128], strides = [1, 1]} : vector<16x128xf32> to vector<14x128xf32>
      %c3 = arith.constant 3 : index
      %c0_20 = arith.constant 0 : index
      %c0_21 = arith.constant 0 : index
      %27 = vector.load %arg2[%c3, %c0_20, %c0_21] : memref<9x128x128xf32, #tpu.memory_space<vmem>>, vector<1x128x128xf32>
      %28 = vector.shape_cast %27 : vector<1x128x128xf32> to vector<128x128xf32>
      %cst_22 = arith.constant dense<0.000000e+00> : vector<14x128xf32>
      %29 = tpu.matmul %26, %28, %cst_22 {dimension_numbers = #tpu.dot_dimension_numbers<[1], [0], [0], [1], [0, 0, 1, 1], [], []>} : vector<14x128xf32>, vector<128x128xf32>, vector<14x128xf32> -> vector<14x128xf32>
      %30 = arith.addf %21, %29 : vector<14x128xf32>
      %31 = vector.extract_strided_slice %25 {offsets = [1, 0], sizes = [14, 128], strides = [1, 1]} : vector<16x128xf32> to vector<14x128xf32>
      %c4 = arith.constant 4 : index
      %c0_23 = arith.constant 0 : index
      %c0_24 = arith.constant 0 : index
      %32 = vector.load %arg2[%c4, %c0_23, %c0_24] : memref<9x128x128xf32, #tpu.memory_space<vmem>>, vector<1x128x128xf32>
      %33 = vector.shape_cast %32 : vector<1x128x128xf32> to vector<128x128xf32>
      %cst_25 = arith.constant dense<0.000000e+00> : vector<14x128xf32>
      %34 = tpu.matmul %31, %33, %cst_25 {dimension_numbers = #tpu.dot_dimension_numbers<[1], [0], [0], [1], [0, 0, 1, 1], [], []>} : vector<14x128xf32>, vector<128x128xf32>, vector<14x128xf32> -> vector<14x128xf32>
      %35 = arith.addf %30, %34 : vector<14x128xf32>
      %36 = vector.extract_strided_slice %25 {offsets = [2, 0], sizes = [14, 128], strides = [1, 1]} : vector<16x128xf32> to vector<14x128xf32>
      %c5 = arith.constant 5 : index
      %c0_26 = arith.constant 0 : index
      %c0_27 = arith.constant 0 : index
      %37 = vector.load %arg2[%c5, %c0_26, %c0_27] : memref<9x128x128xf32, #tpu.memory_space<vmem>>, vector<1x128x128xf32>
      %38 = vector.shape_cast %37 : vector<1x128x128xf32> to vector<128x128xf32>
      %cst_28 = arith.constant dense<0.000000e+00> : vector<14x128xf32>
      %39 = tpu.matmul %36, %38, %cst_28 {dimension_numbers = #tpu.dot_dimension_numbers<[1], [0], [0], [1], [0, 0, 1, 1], [], []>} : vector<14x128xf32>, vector<128x128xf32>, vector<14x128xf32> -> vector<14x128xf32>
      %40 = arith.addf %35, %39 : vector<14x128xf32>
      %c2_i32 = arith.constant 2 : i32
      %41 = arith.addi %arg5, %c2_i32 : i32
      %c0_29 = arith.constant 0 : index
      %42 = arith.index_cast %41 : i32 to index
      %c0_30 = arith.constant 0 : index
      %c0_31 = arith.constant 0 : index
      %43 = vector.load %arg1[%c0_29, %42, %c0_30, %c0_31] : memref<1x16x16x128xf32, #tpu.memory_space<vmem>>, vector<1x1x16x128xf32>
      %44 = vector.shape_cast %43 : vector<1x1x16x128xf32> to vector<16x128xf32>
      %45 = vector.extract_strided_slice %44 {offsets = [0, 0], sizes = [14, 128], strides = [1, 1]} : vector<16x128xf32> to vector<14x128xf32>
      %c6 = arith.constant 6 : index
      %c0_32 = arith.constant 0 : index
      %c0_33 = arith.constant 0 : index
      %46 = vector.load %arg2[%c6, %c0_32, %c0_33] : memref<9x128x128xf32, #tpu.memory_space<vmem>>, vector<1x128x128xf32>
      %47 = vector.shape_cast %46 : vector<1x128x128xf32> to vector<128x128xf32>
      %cst_34 = arith.constant dense<0.000000e+00> : vector<14x128xf32>
      %48 = tpu.matmul %45, %47, %cst_34 {dimension_numbers = #tpu.dot_dimension_numbers<[1], [0], [0], [1], [0, 0, 1, 1], [], []>} : vector<14x128xf32>, vector<128x128xf32>, vector<14x128xf32> -> vector<14x128xf32>
      %49 = arith.addf %40, %48 : vector<14x128xf32>
      %50 = vector.extract_strided_slice %44 {offsets = [1, 0], sizes = [14, 128], strides = [1, 1]} : vector<16x128xf32> to vector<14x128xf32>
      %c7 = arith.constant 7 : index
      %c0_35 = arith.constant 0 : index
      %c0_36 = arith.constant 0 : index
      %51 = vector.load %arg2[%c7, %c0_35, %c0_36] : memref<9x128x128xf32, #tpu.memory_space<vmem>>, vector<1x128x128xf32>
      %52 = vector.shape_cast %51 : vector<1x128x128xf32> to vector<128x128xf32>
      %cst_37 = arith.constant dense<0.000000e+00> : vector<14x128xf32>
      %53 = tpu.matmul %50, %52, %cst_37 {dimension_numbers = #tpu.dot_dimension_numbers<[1], [0], [0], [1], [0, 0, 1, 1], [], []>} : vector<14x128xf32>, vector<128x128xf32>, vector<14x128xf32> -> vector<14x128xf32>
      %54 = arith.addf %49, %53 : vector<14x128xf32>
      %55 = vector.extract_strided_slice %44 {offsets = [2, 0], sizes = [14, 128], strides = [1, 1]} : vector<16x128xf32> to vector<14x128xf32>
      %c8 = arith.constant 8 : index
      %c0_38 = arith.constant 0 : index
      %c0_39 = arith.constant 0 : index
      %56 = vector.load %arg2[%c8, %c0_38, %c0_39] : memref<9x128x128xf32, #tpu.memory_space<vmem>>, vector<1x128x128xf32>
      %57 = vector.shape_cast %56 : vector<1x128x128xf32> to vector<128x128xf32>
      %cst_40 = arith.constant dense<0.000000e+00> : vector<14x128xf32>
      %58 = tpu.matmul %55, %57, %cst_40 {dimension_numbers = #tpu.dot_dimension_numbers<[1], [0], [0], [1], [0, 0, 1, 1], [], []>} : vector<14x128xf32>, vector<128x128xf32>, vector<14x128xf32> -> vector<14x128xf32>
      %59 = arith.addf %54, %58 : vector<14x128xf32>
      %60 = vector.broadcast %0 : vector<1x128xf32> to vector<14x128xf32>
      %61 = arith.addf %59, %60 : vector<14x128xf32>
      %cst_41 = arith.constant 0.000000e+00 : f32
      %62 = vector.broadcast %cst_41 : f32 to vector<14x128xf32>
      %63 = arith.maximumf %61, %62 : vector<14x128xf32>
      %c0_42 = arith.constant 0 : index
      %64 = arith.index_cast %arg5 : i32 to index
      %c0_43 = arith.constant 0 : index
      %c0_44 = arith.constant 0 : index
      %65 = vector.load %arg4[%c0_42, %64, %c0_43, %c0_44] : memref<1x14x14x128xf32, #tpu.memory_space<vmem>>, vector<1x1x14x128xf32>
      %66 = vector.shape_cast %65 : vector<1x1x14x128xf32> to vector<14x128xf32>
      %67 = vector.shape_cast %63 : vector<14x128xf32> to vector<1x1x14x128xf32>
      tpu.vector_store %arg4[%c0_42, %64, %c0_43, %c0_44], %67 {strides = array<i32>} : memref<1x14x14x128xf32, #tpu.memory_space<vmem>>, vector<1x1x14x128xf32>,
    }
    %c14_i32_1 = arith.constant 14 : i32
    return
  }
  func.func @transform_0(%arg0: i32) -> (i32, i32, i32, i32) {
    %c0_i32 = arith.constant 0 : i32
    %c0_i32_0 = arith.constant 0 : i32
    %c0_i32_1 = arith.constant 0 : i32
    %c0_i32_2 = arith.constant 0 : i32
    return %arg0, %c0_i32, %c0_i32_0, %c0_i32_1 : i32, i32, i32, i32
  }
  func.func @transform_1(%arg0: i32) -> (i32, i32, i32) {
    %c0_i32 = arith.constant 0 : i32
    %c0_i32_0 = arith.constant 0 : i32
    %c0_i32_1 = arith.constant 0 : i32
    %c0_i32_2 = arith.constant 0 : i32
    return %c0_i32, %c0_i32_0, %c0_i32_1 : i32, i32, i32
  }
  func.func @transform_2(%arg0: i32) -> (i32, i32) {
    %c0_i32 = arith.constant 0 : i32
    %c0_i32_0 = arith.constant 0 : i32
    %c0_i32_1 = arith.constant 0 : i32
    return %c0_i32, %c0_i32_0 : i32, i32
  }
  func.func @transform_3(%arg0: i32) -> (i32, i32, i32, i32) {
    %c0_i32 = arith.constant 0 : i32
    %c0_i32_0 = arith.constant 0 : i32
    %c0_i32_1 = arith.constant 0 : i32
    %c0_i32_2 = arith.constant 0 : i32
    return %arg0, %c0_i32, %c0_i32_0, %c0_i32_1 : i32, i32, i32, i32
  }
}

module attributes {stable_mosaic.version = 11 : i64} {
  func.func @_maxpool2x2_kernel(%arg0: i32, %arg1: memref<1x4x7x7x128xf32, #tpu.memory_space<vmem>>, %arg2: memref<1x7x7x128xf32, #tpu.memory_space<vmem>>) attributes {dimension_semantics = [#tpu.dimension_semantics<parallel>], iteration_bounds = array<i64: 2>, scalar_prefetch = 0 : i64, scratch_operands = 0 : i64, tpu.core_type = #tpu.core_type<tc>, window_params = [{transform_indices = @transform_0, window_bounds = array<i64: 1, 4, 7, 7, 128>}, {transform_indices = @transform_1, window_bounds = array<i64: 1, 7, 7, 128>}]} {
    %c0 = arith.constant 0 : index
    %c0_0 = arith.constant 0 : index
    %c0_1 = arith.constant 0 : index
    %c0_2 = arith.constant 0 : index
    %c0_3 = arith.constant 0 : index
    %0 = vector.load %arg1[%c0, %c0_0, %c0_1, %c0_2, %c0_3] : memref<1x4x7x7x128xf32, #tpu.memory_space<vmem>>, vector<1x1x7x7x128xf32>
    %1 = vector.shape_cast %0 : vector<1x1x7x7x128xf32> to vector<7x7x128xf32>
    %c0_4 = arith.constant 0 : index
    %c1 = arith.constant 1 : index
    %c0_5 = arith.constant 0 : index
    %c0_6 = arith.constant 0 : index
    %c0_7 = arith.constant 0 : index
    %2 = vector.load %arg1[%c0_4, %c1, %c0_5, %c0_6, %c0_7] : memref<1x4x7x7x128xf32, #tpu.memory_space<vmem>>, vector<1x1x7x7x128xf32>
    %3 = vector.shape_cast %2 : vector<1x1x7x7x128xf32> to vector<7x7x128xf32>
    %4 = arith.maximumf %1, %3 : vector<7x7x128xf32>
    %c0_8 = arith.constant 0 : index
    %c2 = arith.constant 2 : index
    %c0_9 = arith.constant 0 : index
    %c0_10 = arith.constant 0 : index
    %c0_11 = arith.constant 0 : index
    %5 = vector.load %arg1[%c0_8, %c2, %c0_9, %c0_10, %c0_11] : memref<1x4x7x7x128xf32, #tpu.memory_space<vmem>>, vector<1x1x7x7x128xf32>
    %6 = vector.shape_cast %5 : vector<1x1x7x7x128xf32> to vector<7x7x128xf32>
    %c0_12 = arith.constant 0 : index
    %c3 = arith.constant 3 : index
    %c0_13 = arith.constant 0 : index
    %c0_14 = arith.constant 0 : index
    %c0_15 = arith.constant 0 : index
    %7 = vector.load %arg1[%c0_12, %c3, %c0_13, %c0_14, %c0_15] : memref<1x4x7x7x128xf32, #tpu.memory_space<vmem>>, vector<1x1x7x7x128xf32>
    %8 = vector.shape_cast %7 : vector<1x1x7x7x128xf32> to vector<7x7x128xf32>
    %9 = arith.maximumf %6, %8 : vector<7x7x128xf32>
    %10 = arith.maximumf %4, %9 : vector<7x7x128xf32>
    %c0_16 = arith.constant 0 : index
    %c0_17 = arith.constant 0 : index
    %c0_18 = arith.constant 0 : index
    %c0_19 = arith.constant 0 : index
    %11 = vector.load %arg2[%c0_16, %c0_17, %c0_18, %c0_19] : memref<1x7x7x128xf32, #tpu.memory_space<vmem>>, vector<1x7x7x128xf32>
    %12 = vector.shape_cast %11 : vector<1x7x7x128xf32> to vector<7x7x128xf32>
    %13 = vector.shape_cast %10 : vector<7x7x128xf32> to vector<1x7x7x128xf32>
    tpu.vector_store %arg2[%c0_16, %c0_17, %c0_18, %c0_19], %13 {strides = array<i32>} : memref<1x7x7x128xf32, #tpu.memory_space<vmem>>, vector<1x7x7x128xf32>,
    return
  }
  func.func @transform_0(%arg0: i32) -> (i32, i32, i32, i32, i32) {
    %c0_i32 = arith.constant 0 : i32
    %c0_i32_0 = arith.constant 0 : i32
    %c0_i32_1 = arith.constant 0 : i32
    %c0_i32_2 = arith.constant 0 : i32
    %c0_i32_3 = arith.constant 0 : i32
    return %arg0, %c0_i32, %c0_i32_0, %c0_i32_1, %c0_i32_2 : i32, i32, i32, i32, i32
  }
  func.func @transform_1(%arg0: i32) -> (i32, i32, i32, i32) {
    %c0_i32 = arith.constant 0 : i32
    %c0_i32_0 = arith.constant 0 : i32
    %c0_i32_1 = arith.constant 0 : i32
    %c0_i32_2 = arith.constant 0 : i32
    return %arg0, %c0_i32, %c0_i32_0, %c0_i32_1 : i32, i32, i32, i32
  }
}

module attributes {stable_mosaic.version = 11 : i64} {
  func.func @_conv3x3_relu_kernel(%arg0: i32, %arg1: memref<1x9x9x128xf32, #tpu.memory_space<vmem>>, %arg2: memref<9x128x256xf32, #tpu.memory_space<vmem>>, %arg3: memref<1x256xf32, #tpu.memory_space<vmem>>, %arg4: memref<1x7x7x256xf32, #tpu.memory_space<vmem>>) attributes {dimension_semantics = [#tpu.dimension_semantics<parallel>], iteration_bounds = array<i64: 2>, scalar_prefetch = 0 : i64, scratch_operands = 0 : i64, tpu.core_type = #tpu.core_type<tc>, window_params = [{transform_indices = @transform_0, window_bounds = array<i64: 1, 9, 9, 128>}, {pipeline_mode = #tpu.pipeline_mode<synchronous>, transform_indices = @transform_1, window_bounds = array<i64: 9, 128, 256>}, {pipeline_mode = #tpu.pipeline_mode<synchronous>, transform_indices = @transform_2, window_bounds = array<i64: 1, 256>}, {transform_indices = @transform_3, window_bounds = array<i64: 1, 7, 7, 256>}]} {
    %c0 = arith.constant 0 : index
    %c0_0 = arith.constant 0 : index
    %0 = vector.load %arg3[%c0, %c0_0] : memref<1x256xf32, #tpu.memory_space<vmem>>, vector<1x256xf32>
    %c0_i32 = arith.constant 0 : i32
    %c7_i32 = arith.constant 7 : i32
    %1 = arith.addi %c0_i32, %c7_i32 : i32
    %c1_i32 = arith.constant 1 : i32
    scf.for %arg5 = %c0_i32 to %1 step %c1_i32  : i32 {
      %cst = arith.constant 0.000000e+00 : f32
      %2 = vector.broadcast %cst : f32 to vector<7x256xf32>
      %c0_i32_2 = arith.constant 0 : i32
      %3 = arith.addi %arg5, %c0_i32_2 : i32
      %c0_3 = arith.constant 0 : index
      %4 = arith.index_cast %3 : i32 to index
      %c0_4 = arith.constant 0 : index
      %c0_5 = arith.constant 0 : index
      %5 = vector.load %arg1[%c0_3, %4, %c0_4, %c0_5] : memref<1x9x9x128xf32, #tpu.memory_space<vmem>>, vector<1x1x9x128xf32>
      %6 = vector.shape_cast %5 : vector<1x1x9x128xf32> to vector<9x128xf32>
      %7 = vector.extract_strided_slice %6 {offsets = [0, 0], sizes = [7, 128], strides = [1, 1]} : vector<9x128xf32> to vector<7x128xf32>
      %c0_6 = arith.constant 0 : index
      %c0_7 = arith.constant 0 : index
      %c0_8 = arith.constant 0 : index
      %8 = vector.load %arg2[%c0_6, %c0_7, %c0_8] : memref<9x128x256xf32, #tpu.memory_space<vmem>>, vector<1x128x256xf32>
      %9 = vector.shape_cast %8 : vector<1x128x256xf32> to vector<128x256xf32>
      %cst_9 = arith.constant dense<0.000000e+00> : vector<7x256xf32>
      %10 = tpu.matmul %7, %9, %cst_9 {dimension_numbers = #tpu.dot_dimension_numbers<[1], [0], [0], [1], [0, 0, 1, 1], [], []>} : vector<7x128xf32>, vector<128x256xf32>, vector<7x256xf32> -> vector<7x256xf32>
      %11 = arith.addf %2, %10 : vector<7x256xf32>
      %12 = vector.extract_strided_slice %6 {offsets = [1, 0], sizes = [7, 128], strides = [1, 1]} : vector<9x128xf32> to vector<7x128xf32>
      %c1 = arith.constant 1 : index
      %c0_10 = arith.constant 0 : index
      %c0_11 = arith.constant 0 : index
      %13 = vector.load %arg2[%c1, %c0_10, %c0_11] : memref<9x128x256xf32, #tpu.memory_space<vmem>>, vector<1x128x256xf32>
      %14 = vector.shape_cast %13 : vector<1x128x256xf32> to vector<128x256xf32>
      %cst_12 = arith.constant dense<0.000000e+00> : vector<7x256xf32>
      %15 = tpu.matmul %12, %14, %cst_12 {dimension_numbers = #tpu.dot_dimension_numbers<[1], [0], [0], [1], [0, 0, 1, 1], [], []>} : vector<7x128xf32>, vector<128x256xf32>, vector<7x256xf32> -> vector<7x256xf32>
      %16 = arith.addf %11, %15 : vector<7x256xf32>
      %17 = vector.extract_strided_slice %6 {offsets = [2, 0], sizes = [7, 128], strides = [1, 1]} : vector<9x128xf32> to vector<7x128xf32>
      %c2 = arith.constant 2 : index
      %c0_13 = arith.constant 0 : index
      %c0_14 = arith.constant 0 : index
      %18 = vector.load %arg2[%c2, %c0_13, %c0_14] : memref<9x128x256xf32, #tpu.memory_space<vmem>>, vector<1x128x256xf32>
      %19 = vector.shape_cast %18 : vector<1x128x256xf32> to vector<128x256xf32>
      %cst_15 = arith.constant dense<0.000000e+00> : vector<7x256xf32>
      %20 = tpu.matmul %17, %19, %cst_15 {dimension_numbers = #tpu.dot_dimension_numbers<[1], [0], [0], [1], [0, 0, 1, 1], [], []>} : vector<7x128xf32>, vector<128x256xf32>, vector<7x256xf32> -> vector<7x256xf32>
      %21 = arith.addf %16, %20 : vector<7x256xf32>
      %c1_i32_16 = arith.constant 1 : i32
      %22 = arith.addi %arg5, %c1_i32_16 : i32
      %c0_17 = arith.constant 0 : index
      %23 = arith.index_cast %22 : i32 to index
      %c0_18 = arith.constant 0 : index
      %c0_19 = arith.constant 0 : index
      %24 = vector.load %arg1[%c0_17, %23, %c0_18, %c0_19] : memref<1x9x9x128xf32, #tpu.memory_space<vmem>>, vector<1x1x9x128xf32>
      %25 = vector.shape_cast %24 : vector<1x1x9x128xf32> to vector<9x128xf32>
      %26 = vector.extract_strided_slice %25 {offsets = [0, 0], sizes = [7, 128], strides = [1, 1]} : vector<9x128xf32> to vector<7x128xf32>
      %c3 = arith.constant 3 : index
      %c0_20 = arith.constant 0 : index
      %c0_21 = arith.constant 0 : index
      %27 = vector.load %arg2[%c3, %c0_20, %c0_21] : memref<9x128x256xf32, #tpu.memory_space<vmem>>, vector<1x128x256xf32>
      %28 = vector.shape_cast %27 : vector<1x128x256xf32> to vector<128x256xf32>
      %cst_22 = arith.constant dense<0.000000e+00> : vector<7x256xf32>
      %29 = tpu.matmul %26, %28, %cst_22 {dimension_numbers = #tpu.dot_dimension_numbers<[1], [0], [0], [1], [0, 0, 1, 1], [], []>} : vector<7x128xf32>, vector<128x256xf32>, vector<7x256xf32> -> vector<7x256xf32>
      %30 = arith.addf %21, %29 : vector<7x256xf32>
      %31 = vector.extract_strided_slice %25 {offsets = [1, 0], sizes = [7, 128], strides = [1, 1]} : vector<9x128xf32> to vector<7x128xf32>
      %c4 = arith.constant 4 : index
      %c0_23 = arith.constant 0 : index
      %c0_24 = arith.constant 0 : index
      %32 = vector.load %arg2[%c4, %c0_23, %c0_24] : memref<9x128x256xf32, #tpu.memory_space<vmem>>, vector<1x128x256xf32>
      %33 = vector.shape_cast %32 : vector<1x128x256xf32> to vector<128x256xf32>
      %cst_25 = arith.constant dense<0.000000e+00> : vector<7x256xf32>
      %34 = tpu.matmul %31, %33, %cst_25 {dimension_numbers = #tpu.dot_dimension_numbers<[1], [0], [0], [1], [0, 0, 1, 1], [], []>} : vector<7x128xf32>, vector<128x256xf32>, vector<7x256xf32> -> vector<7x256xf32>
      %35 = arith.addf %30, %34 : vector<7x256xf32>
      %36 = vector.extract_strided_slice %25 {offsets = [2, 0], sizes = [7, 128], strides = [1, 1]} : vector<9x128xf32> to vector<7x128xf32>
      %c5 = arith.constant 5 : index
      %c0_26 = arith.constant 0 : index
      %c0_27 = arith.constant 0 : index
      %37 = vector.load %arg2[%c5, %c0_26, %c0_27] : memref<9x128x256xf32, #tpu.memory_space<vmem>>, vector<1x128x256xf32>
      %38 = vector.shape_cast %37 : vector<1x128x256xf32> to vector<128x256xf32>
      %cst_28 = arith.constant dense<0.000000e+00> : vector<7x256xf32>
      %39 = tpu.matmul %36, %38, %cst_28 {dimension_numbers = #tpu.dot_dimension_numbers<[1], [0], [0], [1], [0, 0, 1, 1], [], []>} : vector<7x128xf32>, vector<128x256xf32>, vector<7x256xf32> -> vector<7x256xf32>
      %40 = arith.addf %35, %39 : vector<7x256xf32>
      %c2_i32 = arith.constant 2 : i32
      %41 = arith.addi %arg5, %c2_i32 : i32
      %c0_29 = arith.constant 0 : index
      %42 = arith.index_cast %41 : i32 to index
      %c0_30 = arith.constant 0 : index
      %c0_31 = arith.constant 0 : index
      %43 = vector.load %arg1[%c0_29, %42, %c0_30, %c0_31] : memref<1x9x9x128xf32, #tpu.memory_space<vmem>>, vector<1x1x9x128xf32>
      %44 = vector.shape_cast %43 : vector<1x1x9x128xf32> to vector<9x128xf32>
      %45 = vector.extract_strided_slice %44 {offsets = [0, 0], sizes = [7, 128], strides = [1, 1]} : vector<9x128xf32> to vector<7x128xf32>
      %c6 = arith.constant 6 : index
      %c0_32 = arith.constant 0 : index
      %c0_33 = arith.constant 0 : index
      %46 = vector.load %arg2[%c6, %c0_32, %c0_33] : memref<9x128x256xf32, #tpu.memory_space<vmem>>, vector<1x128x256xf32>
      %47 = vector.shape_cast %46 : vector<1x128x256xf32> to vector<128x256xf32>
      %cst_34 = arith.constant dense<0.000000e+00> : vector<7x256xf32>
      %48 = tpu.matmul %45, %47, %cst_34 {dimension_numbers = #tpu.dot_dimension_numbers<[1], [0], [0], [1], [0, 0, 1, 1], [], []>} : vector<7x128xf32>, vector<128x256xf32>, vector<7x256xf32> -> vector<7x256xf32>
      %49 = arith.addf %40, %48 : vector<7x256xf32>
      %50 = vector.extract_strided_slice %44 {offsets = [1, 0], sizes = [7, 128], strides = [1, 1]} : vector<9x128xf32> to vector<7x128xf32>
      %c7 = arith.constant 7 : index
      %c0_35 = arith.constant 0 : index
      %c0_36 = arith.constant 0 : index
      %51 = vector.load %arg2[%c7, %c0_35, %c0_36] : memref<9x128x256xf32, #tpu.memory_space<vmem>>, vector<1x128x256xf32>
      %52 = vector.shape_cast %51 : vector<1x128x256xf32> to vector<128x256xf32>
      %cst_37 = arith.constant dense<0.000000e+00> : vector<7x256xf32>
      %53 = tpu.matmul %50, %52, %cst_37 {dimension_numbers = #tpu.dot_dimension_numbers<[1], [0], [0], [1], [0, 0, 1, 1], [], []>} : vector<7x128xf32>, vector<128x256xf32>, vector<7x256xf32> -> vector<7x256xf32>
      %54 = arith.addf %49, %53 : vector<7x256xf32>
      %55 = vector.extract_strided_slice %44 {offsets = [2, 0], sizes = [7, 128], strides = [1, 1]} : vector<9x128xf32> to vector<7x128xf32>
      %c8 = arith.constant 8 : index
      %c0_38 = arith.constant 0 : index
      %c0_39 = arith.constant 0 : index
      %56 = vector.load %arg2[%c8, %c0_38, %c0_39] : memref<9x128x256xf32, #tpu.memory_space<vmem>>, vector<1x128x256xf32>
      %57 = vector.shape_cast %56 : vector<1x128x256xf32> to vector<128x256xf32>
      %cst_40 = arith.constant dense<0.000000e+00> : vector<7x256xf32>
      %58 = tpu.matmul %55, %57, %cst_40 {dimension_numbers = #tpu.dot_dimension_numbers<[1], [0], [0], [1], [0, 0, 1, 1], [], []>} : vector<7x128xf32>, vector<128x256xf32>, vector<7x256xf32> -> vector<7x256xf32>
      %59 = arith.addf %54, %58 : vector<7x256xf32>
      %60 = vector.broadcast %0 : vector<1x256xf32> to vector<7x256xf32>
      %61 = arith.addf %59, %60 : vector<7x256xf32>
      %cst_41 = arith.constant 0.000000e+00 : f32
      %62 = vector.broadcast %cst_41 : f32 to vector<7x256xf32>
      %63 = arith.maximumf %61, %62 : vector<7x256xf32>
      %c0_42 = arith.constant 0 : index
      %64 = arith.index_cast %arg5 : i32 to index
      %c0_43 = arith.constant 0 : index
      %c0_44 = arith.constant 0 : index
      %65 = vector.load %arg4[%c0_42, %64, %c0_43, %c0_44] : memref<1x7x7x256xf32, #tpu.memory_space<vmem>>, vector<1x1x7x256xf32>
      %66 = vector.shape_cast %65 : vector<1x1x7x256xf32> to vector<7x256xf32>
      %67 = vector.shape_cast %63 : vector<7x256xf32> to vector<1x1x7x256xf32>
      tpu.vector_store %arg4[%c0_42, %64, %c0_43, %c0_44], %67 {strides = array<i32>} : memref<1x7x7x256xf32, #tpu.memory_space<vmem>>, vector<1x1x7x256xf32>,
    }
    %c7_i32_1 = arith.constant 7 : i32
    return
  }
  func.func @transform_0(%arg0: i32) -> (i32, i32, i32, i32) {
    %c0_i32 = arith.constant 0 : i32
    %c0_i32_0 = arith.constant 0 : i32
    %c0_i32_1 = arith.constant 0 : i32
    %c0_i32_2 = arith.constant 0 : i32
    return %arg0, %c0_i32, %c0_i32_0, %c0_i32_1 : i32, i32, i32, i32
  }
  func.func @transform_1(%arg0: i32) -> (i32, i32, i32) {
    %c0_i32 = arith.constant 0 : i32
    %c0_i32_0 = arith.constant 0 : i32
    %c0_i32_1 = arith.constant 0 : i32
    %c0_i32_2 = arith.constant 0 : i32
    return %c0_i32, %c0_i32_0, %c0_i32_1 : i32, i32, i32
  }
  func.func @transform_2(%arg0: i32) -> (i32, i32) {
    %c0_i32 = arith.constant 0 : i32
    %c0_i32_0 = arith.constant 0 : i32
    %c0_i32_1 = arith.constant 0 : i32
    return %c0_i32, %c0_i32_0 : i32, i32
  }
  func.func @transform_3(%arg0: i32) -> (i32, i32, i32, i32) {
    %c0_i32 = arith.constant 0 : i32
    %c0_i32_0 = arith.constant 0 : i32
    %c0_i32_1 = arith.constant 0 : i32
    %c0_i32_2 = arith.constant 0 : i32
    return %arg0, %c0_i32, %c0_i32_0, %c0_i32_1 : i32, i32, i32, i32
  }
}

module attributes {stable_mosaic.version = 11 : i64} {
  func.func @_conv3x3_relu_kernel(%arg0: i32, %arg1: memref<1x9x9x256xf32, #tpu.memory_space<vmem>>, %arg2: memref<9x256x256xf32, #tpu.memory_space<vmem>>, %arg3: memref<1x256xf32, #tpu.memory_space<vmem>>, %arg4: memref<1x7x7x256xf32, #tpu.memory_space<vmem>>) attributes {dimension_semantics = [#tpu.dimension_semantics<parallel>], iteration_bounds = array<i64: 2>, scalar_prefetch = 0 : i64, scratch_operands = 0 : i64, tpu.core_type = #tpu.core_type<tc>, window_params = [{transform_indices = @transform_0, window_bounds = array<i64: 1, 9, 9, 256>}, {pipeline_mode = #tpu.pipeline_mode<synchronous>, transform_indices = @transform_1, window_bounds = array<i64: 9, 256, 256>}, {pipeline_mode = #tpu.pipeline_mode<synchronous>, transform_indices = @transform_2, window_bounds = array<i64: 1, 256>}, {transform_indices = @transform_3, window_bounds = array<i64: 1, 7, 7, 256>}]} {
    %c0 = arith.constant 0 : index
    %c0_0 = arith.constant 0 : index
    %0 = vector.load %arg3[%c0, %c0_0] : memref<1x256xf32, #tpu.memory_space<vmem>>, vector<1x256xf32>
    %c0_i32 = arith.constant 0 : i32
    %c7_i32 = arith.constant 7 : i32
    %1 = arith.addi %c0_i32, %c7_i32 : i32
    %c1_i32 = arith.constant 1 : i32
    scf.for %arg5 = %c0_i32 to %1 step %c1_i32  : i32 {
      %cst = arith.constant 0.000000e+00 : f32
      %2 = vector.broadcast %cst : f32 to vector<7x256xf32>
      %c0_i32_2 = arith.constant 0 : i32
      %3 = arith.addi %arg5, %c0_i32_2 : i32
      %c0_3 = arith.constant 0 : index
      %4 = arith.index_cast %3 : i32 to index
      %c0_4 = arith.constant 0 : index
      %c0_5 = arith.constant 0 : index
      %5 = vector.load %arg1[%c0_3, %4, %c0_4, %c0_5] : memref<1x9x9x256xf32, #tpu.memory_space<vmem>>, vector<1x1x9x256xf32>
      %6 = vector.shape_cast %5 : vector<1x1x9x256xf32> to vector<9x256xf32>
      %7 = vector.extract_strided_slice %6 {offsets = [0, 0], sizes = [7, 256], strides = [1, 1]} : vector<9x256xf32> to vector<7x256xf32>
      %c0_6 = arith.constant 0 : index
      %c0_7 = arith.constant 0 : index
      %c0_8 = arith.constant 0 : index
      %8 = vector.load %arg2[%c0_6, %c0_7, %c0_8] : memref<9x256x256xf32, #tpu.memory_space<vmem>>, vector<1x256x256xf32>
      %9 = vector.shape_cast %8 : vector<1x256x256xf32> to vector<256x256xf32>
      %cst_9 = arith.constant dense<0.000000e+00> : vector<7x256xf32>
      %10 = tpu.matmul %7, %9, %cst_9 {dimension_numbers = #tpu.dot_dimension_numbers<[1], [0], [0], [1], [0, 0, 1, 1], [], []>} : vector<7x256xf32>, vector<256x256xf32>, vector<7x256xf32> -> vector<7x256xf32>
      %11 = arith.addf %2, %10 : vector<7x256xf32>
      %12 = vector.extract_strided_slice %6 {offsets = [1, 0], sizes = [7, 256], strides = [1, 1]} : vector<9x256xf32> to vector<7x256xf32>
      %c1 = arith.constant 1 : index
      %c0_10 = arith.constant 0 : index
      %c0_11 = arith.constant 0 : index
      %13 = vector.load %arg2[%c1, %c0_10, %c0_11] : memref<9x256x256xf32, #tpu.memory_space<vmem>>, vector<1x256x256xf32>
      %14 = vector.shape_cast %13 : vector<1x256x256xf32> to vector<256x256xf32>
      %cst_12 = arith.constant dense<0.000000e+00> : vector<7x256xf32>
      %15 = tpu.matmul %12, %14, %cst_12 {dimension_numbers = #tpu.dot_dimension_numbers<[1], [0], [0], [1], [0, 0, 1, 1], [], []>} : vector<7x256xf32>, vector<256x256xf32>, vector<7x256xf32> -> vector<7x256xf32>
      %16 = arith.addf %11, %15 : vector<7x256xf32>
      %17 = vector.extract_strided_slice %6 {offsets = [2, 0], sizes = [7, 256], strides = [1, 1]} : vector<9x256xf32> to vector<7x256xf32>
      %c2 = arith.constant 2 : index
      %c0_13 = arith.constant 0 : index
      %c0_14 = arith.constant 0 : index
      %18 = vector.load %arg2[%c2, %c0_13, %c0_14] : memref<9x256x256xf32, #tpu.memory_space<vmem>>, vector<1x256x256xf32>
      %19 = vector.shape_cast %18 : vector<1x256x256xf32> to vector<256x256xf32>
      %cst_15 = arith.constant dense<0.000000e+00> : vector<7x256xf32>
      %20 = tpu.matmul %17, %19, %cst_15 {dimension_numbers = #tpu.dot_dimension_numbers<[1], [0], [0], [1], [0, 0, 1, 1], [], []>} : vector<7x256xf32>, vector<256x256xf32>, vector<7x256xf32> -> vector<7x256xf32>
      %21 = arith.addf %16, %20 : vector<7x256xf32>
      %c1_i32_16 = arith.constant 1 : i32
      %22 = arith.addi %arg5, %c1_i32_16 : i32
      %c0_17 = arith.constant 0 : index
      %23 = arith.index_cast %22 : i32 to index
      %c0_18 = arith.constant 0 : index
      %c0_19 = arith.constant 0 : index
      %24 = vector.load %arg1[%c0_17, %23, %c0_18, %c0_19] : memref<1x9x9x256xf32, #tpu.memory_space<vmem>>, vector<1x1x9x256xf32>
      %25 = vector.shape_cast %24 : vector<1x1x9x256xf32> to vector<9x256xf32>
      %26 = vector.extract_strided_slice %25 {offsets = [0, 0], sizes = [7, 256], strides = [1, 1]} : vector<9x256xf32> to vector<7x256xf32>
      %c3 = arith.constant 3 : index
      %c0_20 = arith.constant 0 : index
      %c0_21 = arith.constant 0 : index
      %27 = vector.load %arg2[%c3, %c0_20, %c0_21] : memref<9x256x256xf32, #tpu.memory_space<vmem>>, vector<1x256x256xf32>
      %28 = vector.shape_cast %27 : vector<1x256x256xf32> to vector<256x256xf32>
      %cst_22 = arith.constant dense<0.000000e+00> : vector<7x256xf32>
      %29 = tpu.matmul %26, %28, %cst_22 {dimension_numbers = #tpu.dot_dimension_numbers<[1], [0], [0], [1], [0, 0, 1, 1], [], []>} : vector<7x256xf32>, vector<256x256xf32>, vector<7x256xf32> -> vector<7x256xf32>
      %30 = arith.addf %21, %29 : vector<7x256xf32>
      %31 = vector.extract_strided_slice %25 {offsets = [1, 0], sizes = [7, 256], strides = [1, 1]} : vector<9x256xf32> to vector<7x256xf32>
      %c4 = arith.constant 4 : index
      %c0_23 = arith.constant 0 : index
      %c0_24 = arith.constant 0 : index
      %32 = vector.load %arg2[%c4, %c0_23, %c0_24] : memref<9x256x256xf32, #tpu.memory_space<vmem>>, vector<1x256x256xf32>
      %33 = vector.shape_cast %32 : vector<1x256x256xf32> to vector<256x256xf32>
      %cst_25 = arith.constant dense<0.000000e+00> : vector<7x256xf32>
      %34 = tpu.matmul %31, %33, %cst_25 {dimension_numbers = #tpu.dot_dimension_numbers<[1], [0], [0], [1], [0, 0, 1, 1], [], []>} : vector<7x256xf32>, vector<256x256xf32>, vector<7x256xf32> -> vector<7x256xf32>
      %35 = arith.addf %30, %34 : vector<7x256xf32>
      %36 = vector.extract_strided_slice %25 {offsets = [2, 0], sizes = [7, 256], strides = [1, 1]} : vector<9x256xf32> to vector<7x256xf32>
      %c5 = arith.constant 5 : index
      %c0_26 = arith.constant 0 : index
      %c0_27 = arith.constant 0 : index
      %37 = vector.load %arg2[%c5, %c0_26, %c0_27] : memref<9x256x256xf32, #tpu.memory_space<vmem>>, vector<1x256x256xf32>
      %38 = vector.shape_cast %37 : vector<1x256x256xf32> to vector<256x256xf32>
      %cst_28 = arith.constant dense<0.000000e+00> : vector<7x256xf32>
      %39 = tpu.matmul %36, %38, %cst_28 {dimension_numbers = #tpu.dot_dimension_numbers<[1], [0], [0], [1], [0, 0, 1, 1], [], []>} : vector<7x256xf32>, vector<256x256xf32>, vector<7x256xf32> -> vector<7x256xf32>
      %40 = arith.addf %35, %39 : vector<7x256xf32>
      %c2_i32 = arith.constant 2 : i32
      %41 = arith.addi %arg5, %c2_i32 : i32
      %c0_29 = arith.constant 0 : index
      %42 = arith.index_cast %41 : i32 to index
      %c0_30 = arith.constant 0 : index
      %c0_31 = arith.constant 0 : index
      %43 = vector.load %arg1[%c0_29, %42, %c0_30, %c0_31] : memref<1x9x9x256xf32, #tpu.memory_space<vmem>>, vector<1x1x9x256xf32>
      %44 = vector.shape_cast %43 : vector<1x1x9x256xf32> to vector<9x256xf32>
      %45 = vector.extract_strided_slice %44 {offsets = [0, 0], sizes = [7, 256], strides = [1, 1]} : vector<9x256xf32> to vector<7x256xf32>
      %c6 = arith.constant 6 : index
      %c0_32 = arith.constant 0 : index
      %c0_33 = arith.constant 0 : index
      %46 = vector.load %arg2[%c6, %c0_32, %c0_33] : memref<9x256x256xf32, #tpu.memory_space<vmem>>, vector<1x256x256xf32>
      %47 = vector.shape_cast %46 : vector<1x256x256xf32> to vector<256x256xf32>
      %cst_34 = arith.constant dense<0.000000e+00> : vector<7x256xf32>
      %48 = tpu.matmul %45, %47, %cst_34 {dimension_numbers = #tpu.dot_dimension_numbers<[1], [0], [0], [1], [0, 0, 1, 1], [], []>} : vector<7x256xf32>, vector<256x256xf32>, vector<7x256xf32> -> vector<7x256xf32>
      %49 = arith.addf %40, %48 : vector<7x256xf32>
      %50 = vector.extract_strided_slice %44 {offsets = [1, 0], sizes = [7, 256], strides = [1, 1]} : vector<9x256xf32> to vector<7x256xf32>
      %c7 = arith.constant 7 : index
      %c0_35 = arith.constant 0 : index
      %c0_36 = arith.constant 0 : index
      %51 = vector.load %arg2[%c7, %c0_35, %c0_36] : memref<9x256x256xf32, #tpu.memory_space<vmem>>, vector<1x256x256xf32>
      %52 = vector.shape_cast %51 : vector<1x256x256xf32> to vector<256x256xf32>
      %cst_37 = arith.constant dense<0.000000e+00> : vector<7x256xf32>
      %53 = tpu.matmul %50, %52, %cst_37 {dimension_numbers = #tpu.dot_dimension_numbers<[1], [0], [0], [1], [0, 0, 1, 1], [], []>} : vector<7x256xf32>, vector<256x256xf32>, vector<7x256xf32> -> vector<7x256xf32>
      %54 = arith.addf %49, %53 : vector<7x256xf32>
      %55 = vector.extract_strided_slice %44 {offsets = [2, 0], sizes = [7, 256], strides = [1, 1]} : vector<9x256xf32> to vector<7x256xf32>
      %c8 = arith.constant 8 : index
      %c0_38 = arith.constant 0 : index
      %c0_39 = arith.constant 0 : index
      %56 = vector.load %arg2[%c8, %c0_38, %c0_39] : memref<9x256x256xf32, #tpu.memory_space<vmem>>, vector<1x256x256xf32>
      %57 = vector.shape_cast %56 : vector<1x256x256xf32> to vector<256x256xf32>
      %cst_40 = arith.constant dense<0.000000e+00> : vector<7x256xf32>
      %58 = tpu.matmul %55, %57, %cst_40 {dimension_numbers = #tpu.dot_dimension_numbers<[1], [0], [0], [1], [0, 0, 1, 1], [], []>} : vector<7x256xf32>, vector<256x256xf32>, vector<7x256xf32> -> vector<7x256xf32>
      %59 = arith.addf %54, %58 : vector<7x256xf32>
      %60 = vector.broadcast %0 : vector<1x256xf32> to vector<7x256xf32>
      %61 = arith.addf %59, %60 : vector<7x256xf32>
      %cst_41 = arith.constant 0.000000e+00 : f32
      %62 = vector.broadcast %cst_41 : f32 to vector<7x256xf32>
      %63 = arith.maximumf %61, %62 : vector<7x256xf32>
      %c0_42 = arith.constant 0 : index
      %64 = arith.index_cast %arg5 : i32 to index
      %c0_43 = arith.constant 0 : index
      %c0_44 = arith.constant 0 : index
      %65 = vector.load %arg4[%c0_42, %64, %c0_43, %c0_44] : memref<1x7x7x256xf32, #tpu.memory_space<vmem>>, vector<1x1x7x256xf32>
      %66 = vector.shape_cast %65 : vector<1x1x7x256xf32> to vector<7x256xf32>
      %67 = vector.shape_cast %63 : vector<7x256xf32> to vector<1x1x7x256xf32>
      tpu.vector_store %arg4[%c0_42, %64, %c0_43, %c0_44], %67 {strides = array<i32>} : memref<1x7x7x256xf32, #tpu.memory_space<vmem>>, vector<1x1x7x256xf32>,
    }
    %c7_i32_1 = arith.constant 7 : i32
    return
  }
  func.func @transform_0(%arg0: i32) -> (i32, i32, i32, i32) {
    %c0_i32 = arith.constant 0 : i32
    %c0_i32_0 = arith.constant 0 : i32
    %c0_i32_1 = arith.constant 0 : i32
    %c0_i32_2 = arith.constant 0 : i32
    return %arg0, %c0_i32, %c0_i32_0, %c0_i32_1 : i32, i32, i32, i32
  }
  func.func @transform_1(%arg0: i32) -> (i32, i32, i32) {
    %c0_i32 = arith.constant 0 : i32
    %c0_i32_0 = arith.constant 0 : i32
    %c0_i32_1 = arith.constant 0 : i32
    %c0_i32_2 = arith.constant 0 : i32
    return %c0_i32, %c0_i32_0, %c0_i32_1 : i32, i32, i32
  }
  func.func @transform_2(%arg0: i32) -> (i32, i32) {
    %c0_i32 = arith.constant 0 : i32
    %c0_i32_0 = arith.constant 0 : i32
    %c0_i32_1 = arith.constant 0 : i32
    return %c0_i32, %c0_i32_0 : i32, i32
  }
  func.func @transform_3(%arg0: i32) -> (i32, i32, i32, i32) {
    %c0_i32 = arith.constant 0 : i32
    %c0_i32_0 = arith.constant 0 : i32
    %c0_i32_1 = arith.constant 0 : i32
    %c0_i32_2 = arith.constant 0 : i32
    return %arg0, %c0_i32, %c0_i32_0, %c0_i32_1 : i32, i32, i32, i32
  }
}

</mosaic_0001>

<bundles_post_ra>
// kernel: encoder_cnn.9
= control target key start
LH: loop header
LB: loop body
LE: loop exit
PB: predicated region body
PF: predicated region fallthrough
CT: control target
= control target key end

     0   :  { %s842_s12 = smov 0   ;;  %s993_s0 = inlined_call_operand.vmem [shape: f32[2,30,30,8], index: 0, kind: input, shape index: {}]   ;;  %s994_s1 = inlined_call_operand.vmem [shape: f32[9,8,64], index: 1, kind: input, shape index: {}]   ;;  %s995_s2 = inlined_call_operand.vmem [shape: f32[1,64], index: 2, kind: input, shape index: {}]   ;;  %s996_s3 = inlined_call_operand.vmem [shape: f32[2,28,28,64], index: 3, kind: output, shape index: {}]  }
   0x1 LB: > { %s721_s13 = sadd.s32 4294967295, %s816_s12   ;;  %p725_p0 = scmp.ge.s32.totalorder %s816_s12, 1  ;;  %s816_s12 = sphi %s842_s12, %s13_s12  }
   0x2   : > { %p137_p1 = scmp.lt.s32.totalorder %s816_s12, 3 }
   0x4   : > { %p138_p2 = pnand %p725_p0, %p137_p1 }
   0x5   : > { %p161_p3 = scmp.lt.s32.totalorder (!%p138_p2), %s721_s13, 1  ;;  %s865_s24 = smov (!%p138_p2), 0  }
   0x6   : > { %141 = sbr.rel (%p138_p2) target bundleno = 230 (0xe6), region = 32 }
   0xb   : > { %v853_v0 = vld [vmem:[%s995_s2] sm:$0x1]  ;;  %s998_s13 = smov (!%p161_p3, %s721_s13), 1 }
   0xc   : > { %s788_s16 = smul.u32 960, %s998_s13 }
   0xd   : > { %s789_s17 = smul.u32 896, %s998_s13 }
   0xe   : > { %s858_s20 = scalar_lea.vmem %s993_s0, %s788_s16 }
   0xf   : > { %s863_s23 = scalar_lea.vmem %s996_s3, %s789_s17 }
  0x10 LB: >> { %v729_v1 = vld [vmem:[%s994_s1 + $0x8] sm:$0xff]  ;;  %v738_v2 = vld [vmem:[%s994_s1 + $0x10] sm:$0xff]  ;;  %v748_v3 = vld [vmem:[%s994_s1 + $0x18] sm:$0xff]  ;;  %s728_s6 = sshll.u32 %s820_s24, 5  ;;  %vm191_vm0 = vcmask 1046528   ;;  %vm199_vm1 = vcmask 64512   ;;  %s820_s24 = sphi %s865_s24, %s177_s24  }
  0x11   : >> { %785 = vmatpush.msra.mxu1 %v729_v1  ;;  %786 = vmatpush.msra.mxu2 %v729_v1  ;;  %v184_v4 = vld [vmem:[%s994_s1] sm:$0xff]  ;;  %s889_s9 = scalar_lea.vmem %s858_s20, %s728_s6  ;;  %v768_v14 = vld [vmem:[%s994_s1 + $0x30] sm:$0xff]  ;;  %v773_v17 = vld [vmem:[%s994_s1 + $0x38] sm:$0xff]  ;;  %vm276_vm2 = vcmask 1045504   ;;  %s978_s19 = scalar_lea.vmem %s863_s23, %s728_s6  ;;  %vm645_vm3 = vcmask 523264   ;;  %vm649_vm4 = vcmask 519168  }
  0x12   : >> { %787 = vmatpush.msra.mxu3 %v729_v1  ;;  %v753_v5 = vld [vmem:[%s994_s1 + $0x20] sm:$0xff]  ;;  %v181_v6 = vld [vmem:[%s889_s9 + $0x8] sm:$0xff]  ;;  %v182_v7 = vld [vmem:[%s889_s9 + $0x10] sm:$0xff]  ;;  %223 = vmatpush.msra.mxu0 %v729_v1  ;;  %s177_s24 = sadd.s32 1, %s820_s24  }
  0x13   : >> { %307 = vmatpush.msrb.mxu2 %v738_v2  ;;  %260 = vmatpush.msrb.mxu1 %v184_v4  ;;  %v183_v8 = vld [vmem:[%s889_s9 + $0x18] sm:$0x3f]  ;;  %v193_v9 = vrot.slane %v181_v6, 1  ;;  %v195_v10 = vrot.slane %v182_v7, 1  ;;  %v180_v12 = vld [vmem:[%s889_s9] sm:$0xff]  ;;  %v758_v18 = vld [vmem:[%s994_s1 + $0x28] sm:$0xff] }
  0x14   : >> { %361 = vmatpush.msrb.mxu3 %v748_v3  ;;  %v197_v11 = vrot.slane %v183_v8, 1  ;;  %411 = vmatpush.msrb.mxu0 %v753_v5  ;;  %v192_v13 = vrot.slane %v180_v12, 1  ;;  %v908_v19 = vld [vmem:[%s889_s9 + $0x28] sm:$0xff]  ;;  %v778_v21 = vld [vmem:[%s994_s1 + $0x40] sm:$0xff]  ;;  %v277_v22 = vrot.slane %v180_v12, 2  ;;  %v278_v23 = vrot.slane %v181_v6, 2 }
  0x15   : >> { %v196_v15 = vsel %vm191_vm0, %v193_v9, %v195_v10  ;;  %v744_v24 = vld [vmem:[%s889_s9 + $0x20] sm:$0xff]  ;;  %v382_v26 = vrot.slane %v908_v19, 1  ;;  %v746_v29 = vld [vmem:[%s889_s9 + $0x30] sm:$0xff]  ;;  %v280_v30 = vrot.slane %v182_v7, 2  ;;  %v747_v34 = vld [vmem:[%s889_s9 + $0x38] sm:$0x3f] }
  0x16   : >> { %v198_v16 = vsel %vm191_vm0, %v195_v10, %v197_v11  ;;  %733 = vmatmul.msk.f32.vlgmr.msra.gmra.mxu3 %vm199_vm1, %v197_v11  ;;  %731 = vmatmul.msk.f32.vlgmr.msra.gmra.mxu1 %vm199_vm1, %v196_v15  ;;  %v194_v20 = vsel %vm191_vm0, %v192_v13, %v193_v9  ;;  %v381_v25 = vrot.slane %v744_v24, 1  ;;  %v279_v27 = vsel %vm276_vm2, %v277_v22, %v278_v23  ;;  %v764_v39 = vld [vmem:[%s889_s9 + $0x40] sm:$0xff]  ;;  %v765_v40 = vld [vmem:[%s889_s9 + $0x48] sm:$0xff]  ;;  %v766_v49 = vld [vmem:[%s889_s9 + $0x50] sm:$0xff]  ;;  %p174_p4 = scmp.ge.s32.totalorder %s177_s24, 28  }
  0x17   : >> { %732 = vmatmul.msk.f32.vlgmr.msra.gmra.mxu2 %vm199_vm1, %v198_v16  ;;  %730 = vmatmul.msk.f32.vlgmr.msra.gmra.mxu0 %vm199_vm1, %v194_v20  ;;  %v384_v31 = vrot.slane %v746_v29, 1  ;;  %v281_v32 = vsel %vm276_vm2, %v278_v23, %v280_v30  ;;  %v282_v35 = vrot.slane %v183_v8, 2  ;;  %v386_v36 = vrot.slane %v747_v34, 1  ;;  %v767_v56 = vld [vmem:[%s889_s9 + $0x58] sm:$0x3f] }
  0x18   : >> { %515 = vmatpush.msra.mxu2 %v768_v14  ;;  %565 = vmatpush.msra.mxu3 %v773_v17  ;;  %v383_v28 = vsel %vm191_vm0, %v381_v25, %v382_v26  ;;  %v535_v41 = vrot.slane %v764_v39, 1  ;;  %v536_v42 = vrot.slane %v765_v40, 1  ;;  %v431_v43 = vrot.slane %v744_v24, 2 }
  0x19   : >> { %461 = vmatpush.msra.mxu1 %v758_v18  ;;  %615 = vmatpush.msra.mxu0 %v778_v21  ;;  %v385_v33 = vsel %vm191_vm0, %v382_v26, %v384_v31  ;;  %v283_v37 = vsel %vm276_vm2, %v280_v30, %v282_v35  ;;  %v387_v38 = vsel %vm191_vm0, %v384_v31, %v386_v36  ;;  %v432_v44 = vrot.slane %v908_v19, 2 }
  0x1a   : >> { %v585_v45 = vrot.slane %v764_v39, 2  ;;  %v586_v46 = vrot.slane %v765_v40, 2  ;;  %v537_v47 = vsel %vm191_vm0, %v535_v41, %v536_v42  ;;  %v538_v51 = vrot.slane %v766_v49, 1 }
  0x1b   : >> { %v433_v48 = vsel %vm276_vm2, %v431_v43, %v432_v44  ;;  %v434_v52 = vrot.slane %v746_v29, 2  ;;  %v588_v53 = vrot.slane %v766_v49, 2  ;;  %v540_v58 = vrot.slane %v767_v56, 1 }
  0x1c   : >> { %v587_v50 = vsel %vm276_vm2, %v585_v45, %v586_v46  ;;  %v539_v54 = vsel %vm191_vm0, %v536_v42, %v538_v51  ;;  %v436_v59 = vrot.slane %v747_v34, 2  ;;  %v590_v60 = vrot.slane %v767_v56, 2 }
  0x1d   : >> { %v435_v55 = vsel %vm276_vm2, %v432_v44, %v434_v52  ;;  %v589_v57 = vsel %vm276_vm2, %v586_v46, %v588_v53  ;;  %v541_v61 = vsel %vm191_vm0, %v538_v51, %v540_v58 }
  0x1e   : >> { %749 = vmatmul.msk.f32.vlgmr.msrb.gmra.mxu3 %vm199_vm1, %v744_v24  ;;  %734 = vmatmul.msk.f32.vlgmr.msrb.gmra.mxu1 %vm199_vm1, %v180_v12  ;;  %v437_v62 = vsel %vm276_vm2, %v434_v52, %v436_v59  ;;  %v591_v63 = vsel %vm276_vm2, %v588_v53, %v590_v60 }
  0x1f   : >> { %739 = vmatmul.msk.f32.vlgmr.msrb.gmra.mxu2 %vm199_vm1, %v279_v27  ;;  %754 = vmatmul.msk.f32.vlgmr.msrb.gmra.mxu0 %vm199_vm1, %v383_v28 }
  0x26   : >> { %750 = vmatmul.msk.f32.gmra.mxu3 %vm199_vm1, %v908_v19  ;;  %735 = vmatmul.msk.f32.gmra.mxu1 %vm199_vm1, %v181_v6 }
  0x27   : >> { %740 = vmatmul.msk.f32.gmra.mxu2 %vm199_vm1, %v281_v32  ;;  %755 = vmatmul.msk.f32.gmra.mxu0 %vm199_vm1, %v385_v33 }
  0x2e   : >> { %751 = vmatmul.msk.f32.gmra.mxu3 %vm199_vm1, %v746_v29  ;;  %736 = vmatmul.msk.f32.gmra.mxu1 %vm199_vm1, %v182_v7 }
  0x2f   : >> { %741 = vmatmul.msk.f32.gmra.mxu2 %vm199_vm1, %v283_v37  ;;  %756 = vmatmul.msk.f32.gmra.mxu0 %vm199_vm1, %v387_v38  ;;  %v634_v37 = vperm.slane %v853_v0, 0 }
  0x36   : >> { %752 = vmatmul.msk.f32.gmra.mxu3 %vm199_vm1, %v747_v34  ;;  %737 = vmatmul.msk.f32.gmra.mxu1 %vm199_vm1, %v183_v8 }
  0x37   : >> { %742 = vmatmul.msk.f32.gmra.mxu2 %vm199_vm1, %v282_v35  ;;  %757 = vmatmul.msk.f32.gmra.mxu0 %vm199_vm1, %v386_v36 }
  0x3e   : >> { %774 = vmatmul.msk.f32.vlgmr.msra.gmra.mxu3 %vm199_vm1, %v537_v47  ;;  %759 = vmatmul.msk.f32.vlgmr.msra.gmra.mxu1 %vm199_vm1, %v433_v48 }
  0x3f   : >> { %769 = vmatmul.msk.f32.vlgmr.msra.gmra.mxu2 %vm199_vm1, %v764_v39  ;;  %779 = vmatmul.msk.f32.vlgmr.msra.gmra.mxu0 %vm199_vm1, %v587_v50 }
  0x46   : >> { %775 = vmatmul.msk.f32.gmra.mxu3 %vm199_vm1, %v539_v54  ;;  %760 = vmatmul.msk.f32.gmra.mxu1 %vm199_vm1, %v435_v55 }
  0x47   : >> { %770 = vmatmul.msk.f32.gmra.mxu2 %vm199_vm1, %v765_v40  ;;  %780 = vmatmul.msk.f32.gmra.mxu0 %vm199_vm1, %v589_v57 }
  0x4e   : >> { %776 = vmatmul.msk.f32.gmra.mxu3 %vm199_vm1, %v541_v61  ;;  %761 = vmatmul.msk.f32.gmra.mxu1 %vm199_vm1, %v437_v62 }
  0x4f   : >> { %771 = vmatmul.msk.f32.gmra.mxu2 %vm199_vm1, %v766_v49  ;;  %781 = vmatmul.msk.f32.gmra.mxu0 %vm199_vm1, %v591_v63 }
  0x56   : >> { %777 = vmatmul.msk.f32.gmra.mxu3 %vm199_vm1, %v540_v58  ;;  %762 = vmatmul.msk.f32.gmra.mxu1 %vm199_vm1, %v436_v59 }
  0x57   : >> { %772 = vmatmul.msk.f32.gmra.mxu2 %vm199_vm1, %v767_v56  ;;  %782 = vmatmul.msk.f32.gmra.mxu0 %vm199_vm1, %v590_v60 }
  0x93   : >> { %v228_v1 = vpop.f32.mrf.mxu1 }
  0x94   : >> { %v225_v2 = vpop.f32.mrf.mxu0 }
  0x99   : >> { %v234_v3 = vpop.f32.mrf.mxu3 }
  0x9a   : >> { %v231_v4 = vpop.f32.mrf.mxu2 }
  0x9b   : >> { %v262_v5 = vpop.f32.mrf.mxu1 }
  0x9c   : >> { %v413_v6 = vpop.f32.mrf.mxu0  ;;  %v263_v18 = vadd.f32 %v262_v5, %v225_v2 }
  0xa1   : >> { %v363_v7 = vpop.f32.mrf.mxu3 }
  0xa2   : >> { %v309_v8 = vpop.f32.mrf.mxu2 }
  0xa3   : >> { %v265_v9 = vpop.f32.mrf.mxu1  ;;  %v321_v20 = vadd.f32 %v309_v8, %v263_v18 }
  0xa4   : >> { %v416_v10 = vpop.f32.mrf.mxu0  ;;  %v266_v25 = vadd.f32 %v265_v9, %v228_v1 }
  0xa5   : >> { %v375_v23 = vadd.f32 %v363_v7, %v321_v20 }
  0xa7   : >> { %v425_v27 = vadd.f32 %v413_v6, %v375_v23 }
  0xa9   : >> { %v366_v11 = vpop.f32.mrf.mxu3 }
  0xaa   : >> { %v312_v12 = vpop.f32.mrf.mxu2 }
  0xab   : >> { %v268_v13 = vpop.f32.mrf.mxu1  ;;  %v322_v28 = vadd.f32 %v312_v12, %v266_v25 }
  0xac   : >> { %v419_v14 = vpop.f32.mrf.mxu0  ;;  %v269_v35 = vadd.f32 %v268_v13, %v231_v4 }
  0xad   : >> { %v376_v32 = vadd.f32 %v366_v11, %v322_v28 }
  0xaf   : >> { %v426_v38 = vadd.f32 %v416_v10, %v376_v32 }
  0xb1   : >> { %v369_v15 = vpop.f32.mrf.mxu3 }
  0xb2   : >> { %v315_v16 = vpop.f32.mrf.mxu2 }
  0xb3   : >> { %v271_v17 = vpop.f32.mrf.mxu1  ;;  %v323_v39 = vadd.f32 %v315_v16, %v269_v35 }
  0xb4   : >> { %v422_v19 = vpop.f32.mrf.mxu0  ;;  %v272_v50 = vadd.f32 %v271_v17, %v234_v3 }
  0xb5   : >> { %v377_v46 = vadd.f32 %v369_v15, %v323_v39 }
  0xb7   : >> { %v427_v52 = vadd.f32 %v419_v14, %v377_v46 }
  0xb9   : >> { %v372_v21 = vpop.f32.mrf.mxu3 }
  0xba   : >> { %v318_v22 = vpop.f32.mrf.mxu2 }
  0xbb   : >> { %v463_v24 = vpop.f32.mrf.mxu1  ;;  %v324_v53 = vadd.f32 %v318_v22, %v272_v50 }
  0xbc   : >> { %v617_v26 = vpop.f32.mrf.mxu0  ;;  %v475_v29 = vadd.f32 %v463_v24, %v425_v27 }
  0xbd   : >> { %v378_v60 = vadd.f32 %v372_v21, %v324_v53 }
  0xbf   : >> { %v428_v2 = vadd.f32 %v422_v19, %v378_v60 }
  0xc1   : >> { %v567_v30 = vpop.f32.mrf.mxu3 }
  0xc2   : >> { %v517_v31 = vpop.f32.mrf.mxu2 }
  0xc3   : >> { %v529_v33 = vadd.f32 %v517_v31, %v475_v29  ;;  %v466_v34 = vpop.f32.mrf.mxu1 }
  0xc4   : >> { %v620_v41 = vpop.f32.mrf.mxu0  ;;  %v476_v42 = vadd.f32 %v466_v34, %v426_v38 }
  0xc5   : >> { %v579_v36 = vadd.f32 %v567_v30, %v529_v33 }
  0xc7   : >> { %v629_v40 = vadd.f32 %v617_v26, %v579_v36 }
  0xc9   : >> { %v636_v43 = vadd.f32 %v634_v37, %v629_v40  ;;  %v570_v44 = vpop.f32.mrf.mxu3 }
  0xca   : >> { %v520_v45 = vpop.f32.mrf.mxu2 }
  0xcb   : >> { %v640_v47 = vmax.f32 %v636_v43, 0.0  ;;  %v530_v48 = vadd.f32 %v520_v45, %v476_v42  ;;  %v469_v49 = vpop.f32.mrf.mxu1 }
  0xcc   : >> { %v477_v55 = vadd.f32 %v469_v49, %v427_v52  ;;  %v623_v59 = vpop.f32.mrf.mxu0 }
  0xcd   : >> { %646 = vst.msk [vmem:[%s978_s19] sm:$0xff] %vm645_vm3, %v640_v47  ;;  %v580_v51 = vadd.f32 %v570_v44, %v530_v48 }
  0xcf   : >> { %v630_v54 = vadd.f32 %v620_v41, %v580_v51 }
  0xd1   : >> { %v637_v56 = vadd.f32 %v634_v37, %v630_v54  ;;  %v573_v57 = vpop.f32.mrf.mxu3 }
  0xd2   : >> { %v523_v58 = vpop.f32.mrf.mxu2 }
  0xd3   : >> { %v641_v61 = vmax.f32 %v637_v56, 0.0  ;;  %v531_v62 = vadd.f32 %v523_v58, %v477_v55  ;;  %v472_v1 = vpop.f32.mrf.mxu1 }
  0xd4   : >> { %v478_v4 = vadd.f32 %v472_v1, %v428_v2  ;;  %v626_v10 = vpop.f32.mrf.mxu0 }
  0xd5   : >> { %647 = vst.msk [vmem:[%s978_s19 + $0x8] sm:$0xff] %vm645_vm3, %v641_v61  ;;  %v581_v63 = vadd.f32 %v573_v57, %v531_v62 }
  0xd7   : >> { %v631_v3 = vadd.f32 %v623_v59, %v581_v63 }
  0xd9   : >> { %v638_v5 = vadd.f32 %v634_v37, %v631_v3  ;;  %v576_v7 = vpop.f32.mrf.mxu3 }
  0xda   : >> { %v526_v6 = vpop.f32.mrf.mxu2 }
  0xdb   : >> { %v642_v8 = vmax.f32 %v638_v5, 0.0  ;;  %v532_v9 = vadd.f32 %v526_v6, %v478_v4 }
  0xdd   : >> { %648 = vst.msk [vmem:[%s978_s19 + $0x10] sm:$0xff] %vm645_vm3, %v642_v8  ;;  %v582_v11 = vadd.f32 %v576_v7, %v532_v9 }
  0xdf   : >> { %v632_v12 = vadd.f32 %v626_v10, %v582_v11 }
  0xe1   : >> { %v639_v13 = vadd.f32 %v634_v37, %v632_v12  ;;  %176 = sbr.rel (!%p174_p4) target bundleno = 16 (0x10), region = 81 }
  0xe3   : >> { %v643_v14 = vmax.f32 %v639_v13, 0.0 }
  0xe5   : >> { %650 = vst.msk [vmem:[%s978_s19 + $0x18] sm:$0xf] %vm649_vm4, %v643_v14 }
  0xe6 PF: > { %s13_s12 = sadd.s32 1, %s816_s12  }
  0xe7   : > { %p10_p5 = scmp.ge.s32.totalorder %s13_s12, 4  }
  0xe9   :  { %12 = sbr.rel (!%p10_p5) target bundleno = 1 (0x1), region = 92 }

// kernel: encoder_cnn.10
= control target key start
LH: loop header
LB: loop body
LE: loop exit
PB: predicated region body
PF: predicated region fallthrough
CT: control target
= control target key end

     0   :  { %s973_s12 = smov 0   ;;  %s1356_s0 = inlined_call_operand.vmem [shape: f32[2,30,30,64], index: 0, kind: input, shape index: {}]   ;;  %s1357_s1 = inlined_call_operand.vmem [shape: f32[9,64,64], index: 1, kind: input, shape index: {}]   ;;  %s1358_s2 = inlined_call_operand.vmem [shape: f32[1,64], index: 2, kind: input, shape index: {}]   ;;  %s1359_s3 = inlined_call_operand.vmem [shape: f32[2,28,28,64], index: 3, kind: output, shape index: {}]  }
   0x1 LB: > { %s783_s13 = sadd.s32 4294967295, %s947_s12   ;;  %p787_p0 = scmp.ge.s32.totalorder %s947_s12, 1  ;;  %s947_s12 = sphi %s973_s12, %s13_s12  }
   0x2   : > { %p137_p1 = scmp.lt.s32.totalorder %s947_s12, 3 }
   0x4   : > { %p138_p2 = pnand %p787_p0, %p137_p1 }
   0x5   : > { %p161_p3 = scmp.lt.s32.totalorder (!%p138_p2), %s783_s13, 1  ;;  %s996_s24 = smov (!%p138_p2), 0  }
   0x6   : > { %141 = sbr.rel (%p138_p2) target bundleno = 243 (0xf3), region = 32 }
   0xb   : > { %v984_v0 = vld [vmem:[%s1358_s2] sm:$0x1]  ;;  %s1361_s13 = smov (!%p161_p3, %s783_s13), 1 }
   0xc   : > { %s919_s16 = smul.u32 960, %s1361_s13 }
   0xd   : > { %s920_s17 = smul.u32 896, %s1361_s13 }
   0xe   : > { %s989_s20 = scalar_lea.vmem %s1356_s0, %s919_s16 }
   0xf   : > { %s994_s23 = scalar_lea.vmem %s1359_s3, %s920_s17 }
  0x10 LB: >> { %v798_v1 = vld [vmem:[%s1357_s1 + $0x78] sm:$0xff]  ;;  %v797_v2 = vld [vmem:[%s1357_s1 + $0x70] sm:$0xff]  ;;  %v796_v4 = vld [vmem:[%s1357_s1 + $0x68] sm:$0xff]  ;;  %s790_s8 = sshll.u32 %s951_s24, 5  ;;  %vm205_vm0 = vcmask 1046528   ;;  %vm297_vm1 = vcmask 1045504   ;;  %s951_s24 = sphi %s996_s24, %s177_s24  }
  0x11   : >> { %903 = vmatpush.msra.mxu1 %v798_v1  ;;  %230 = vmatpush.msra.mxu0 %v798_v1  ;;  %v814_v3 = vld [vmem:[%s1357_s1 + $0xb8] sm:$0xff]  ;;  %v813_v5 = vld [vmem:[%s1357_s1 + $0xb0] sm:$0xff]  ;;  %v812_v6 = vld [vmem:[%s1357_s1 + $0xa8] sm:$0xff]  ;;  %s1023_s11 = scalar_lea.vmem %s989_s20, %s790_s8  ;;  %vm213_vm2 = vcmask 523264   ;;  %vm711_vm3 = vcmask 519168   ;;  %s177_s24 = sadd.s32 1, %s951_s24  }
  0x12   : >> { %321 = vmatpush.msra.mxu2 %v814_v3  ;;  %v795_v7 = vld [vmem:[%s1357_s1 + $0x60] sm:$0xff]  ;;  %v831_v8 = vld [vmem:[%s1357_s1 + $0xf8] sm:$0xff]  ;;  %v830_v10 = vld [vmem:[%s1357_s1 + $0xf0] sm:$0xff]  ;;  %p174_p4 = scmp.ge.s32.totalorder %s177_s24, 28  }
  0x13   : >> { %904 = vmatpush.msra.mxu1 %v797_v2  ;;  %231 = vmatpush.msra.mxu0 %v797_v2  ;;  %v811_v9 = vld [vmem:[%s1357_s1 + $0xa0] sm:$0xff]  ;;  %v794_v11 = vld [vmem:[%s1357_s1 + $0x58] sm:$0xff]  ;;  %v1041_v12 = vld [vmem:[%s1023_s11 + $0x10] sm:$0xff] }
  0x14   : >> { %322 = vmatpush.msra.mxu2 %v813_v5  ;;  %382 = vmatpush.msra.mxu3 %v831_v8  ;;  %v1044_v13 = vld [vmem:[%s1023_s11 + $0x18] sm:$0x3f]  ;;  %v829_v15 = vld [vmem:[%s1357_s1 + $0xe8] sm:$0xff]  ;;  %v793_v16 = vld [vmem:[%s1357_s1 + $0x50] sm:$0xff]  ;;  %v209_v19 = vrot.slane %v1041_v12, 1  ;;  %v301_v48 = vrot.slane %v1041_v12, 2 }
  0x15   : >> { %905 = vmatpush.msra.mxu1 %v796_v4  ;;  %232 = vmatpush.msra.mxu0 %v796_v4  ;;  %v810_v14 = vld [vmem:[%s1357_s1 + $0x98] sm:$0xff]  ;;  %v1056_v17 = vld [vmem:[%s1023_s11] sm:$0xff]  ;;  %v1059_v18 = vld [vmem:[%s1023_s11 + $0x8] sm:$0xff]  ;;  %v211_v20 = vrot.slane %v1044_v13, 1  ;;  %v303_v4 = vrot.slane %v1044_v13, 2 }
  0x16   : >> { %323 = vmatpush.msra.mxu2 %v812_v6  ;;  %383 = vmatpush.msra.mxu3 %v830_v10  ;;  %v809_v21 = vld [vmem:[%s1357_s1 + $0x90] sm:$0xff]  ;;  %v828_v22 = vld [vmem:[%s1357_s1 + $0xe0] sm:$0xff]  ;;  %v206_v23 = vrot.slane %v1056_v17, 1  ;;  %v207_v24 = vrot.slane %v1059_v18, 1  ;;  %v792_v25 = vld [vmem:[%s1357_s1 + $0x48] sm:$0xff]  ;;  %v298_v28 = vrot.slane %v1056_v17, 2 }
  0x17   : >> { %906 = vmatpush.msra.mxu1 %v795_v7  ;;  %233 = vmatpush.msra.mxu0 %v795_v7  ;;  %v808_v26 = vld [vmem:[%s1357_s1 + $0x88] sm:$0xff]  ;;  %v827_v27 = vld [vmem:[%s1357_s1 + $0xd8] sm:$0xff]  ;;  %v299_v29 = vrot.slane %v1059_v18, 2  ;;  %v791_v30 = vld [vmem:[%s1357_s1 + $0x40] sm:$0xff]  ;;  %v212_v31 = vsel %vm205_vm0, %v209_v19, %v211_v20  ;;  %v304_v10 = vsel %vm297_vm1, %v301_v48, %v303_v4 }
  0x18   : >> { %324 = vmatpush.msra.mxu2 %v811_v9  ;;  %384 = vmatpush.msra.mxu3 %v829_v15  ;;  %v208_v32 = vsel %vm205_vm0, %v206_v23, %v207_v24  ;;  %v191_v33 = vld [vmem:[%s1357_s1 + $0x38] sm:$0xff]  ;;  %v807_v34 = vld [vmem:[%s1357_s1 + $0x80] sm:$0xff]  ;;  %v190_v37 = vld [vmem:[%s1357_s1 + $0x30] sm:$0xff]  ;;  %v210_v51 = vsel %vm205_vm0, %v207_v24, %v209_v19 }
  0x19   : >> { %907 = vmatpush.msra.mxu1 %v794_v11  ;;  %234 = vmatpush.msra.mxu0 %v794_v11  ;;  %v843_v35 = vld [vmem:[%s1357_s1 + $0x138] sm:$0xff]  ;;  %v300_v36 = vsel %vm297_vm1, %v298_v28, %v299_v29  ;;  %v826_v39 = vld [vmem:[%s1357_s1 + $0xd0] sm:$0xff]  ;;  %v189_v41 = vld [vmem:[%s1357_s1 + $0x28] sm:$0xff]  ;;  %v302_v56 = vsel %vm297_vm1, %v299_v29, %v301_v48 }
  0x1a   : >> { %325 = vmatpush.msra.mxu2 %v810_v14  ;;  %385 = vmatpush.msra.mxu3 %v828_v22  ;;  %v872_v38 = vld [vmem:[%s1357_s1 + $0x1b8] sm:$0xff]  ;;  %v842_v40 = vld [vmem:[%s1357_s1 + $0x130] sm:$0xff]  ;;  %v825_v43 = vld [vmem:[%s1357_s1 + $0xc8] sm:$0xff] }
  0x1b   : >> { %908 = vmatpush.msra.mxu1 %v793_v16  ;;  %235 = vmatpush.msra.mxu0 %v793_v16  ;;  %v871_v42 = vld [vmem:[%s1357_s1 + $0x1b0] sm:$0xff]  ;;  %v841_v44 = vld [vmem:[%s1357_s1 + $0x128] sm:$0xff]  ;;  %v188_v45 = vld [vmem:[%s1357_s1 + $0x20] sm:$0xff] }
  0x1c   : >> { %326 = vmatpush.msra.mxu2 %v809_v21  ;;  %386 = vmatpush.msra.mxu3 %v827_v27  ;;  %v870_v46 = vld [vmem:[%s1357_s1 + $0x1a8] sm:$0xff]  ;;  %v824_v47 = vld [vmem:[%s1357_s1 + $0xc0] sm:$0xff]  ;;  %v187_v49 = vld [vmem:[%s1357_s1 + $0x18] sm:$0xff] }
  0x1d   : >> { %909 = vmatpush.msra.mxu1 %v792_v25  ;;  %236 = vmatpush.msra.mxu0 %v792_v25  ;;  %v840_v50 = vld [vmem:[%s1357_s1 + $0x120] sm:$0xff]  ;;  %v186_v53 = vld [vmem:[%s1357_s1 + $0x10] sm:$0xff]  ;;  %v884_v54 = vld [vmem:[%s1357_s1 + $0x1f8] sm:$0xff] }
  0x1e   : >> { %327 = vmatpush.msra.mxu2 %v808_v26  ;;  %387 = vmatpush.msra.mxu3 %v826_v39  ;;  %v1148_v52 = vld [vmem:[%s1023_s11 + $0x20] sm:$0xff]  ;;  %v839_v55 = vld [vmem:[%s1357_s1 + $0x118] sm:$0xff]  ;;  %v1164_v57 = vld [vmem:[%s1023_s11 + $0x28] sm:$0xff] }
  0x1f   : >> { %910 = vmatpush.msra.mxu1 %v791_v30  ;;  %237 = vmatpush.msra.mxu0 %v791_v30  ;;  %v185_v58 = vld [vmem:[%s1357_s1 + $0x8] sm:$0xff]  ;;  %v883_v59 = vld [vmem:[%s1357_s1 + $0x1f0] sm:$0xff]  ;;  %v869_v61 = vld [vmem:[%s1357_s1 + $0x1a0] sm:$0xff]  ;;  %v416_v63 = vrot.slane %v1148_v52, 1  ;;  %v417_v1 = vrot.slane %v1164_v57, 1 }
  0x20   : >> { %801 = vmatmul.msk.f32.vlgmr.msra.gmra.mxu1 %vm213_vm2, %v212_v31  ;;  %799 = vmatmul.msk.f32.vlgmr.msra.gmra.mxu0 %vm213_vm2, %v208_v32  ;;  %v838_v60 = vld [vmem:[%s1357_s1 + $0x110] sm:$0xff]  ;;  %v184_v62 = vld [vmem:[%s1357_s1] sm:$0xff]  ;;  %v882_v2 = vld [vmem:[%s1357_s1 + $0x1e8] sm:$0xff] }
  0x21   : >> { %267 = vmatpush.msrb.mxu1 %v191_v33  ;;  %328 = vmatpush.msra.mxu2 %v807_v34  ;;  %v837_v3 = vld [vmem:[%s1357_s1 + $0x108] sm:$0xff]  ;;  %v855_v5 = vld [vmem:[%s1357_s1 + $0x178] sm:$0xff]  ;;  %v836_v7 = vld [vmem:[%s1357_s1 + $0x100] sm:$0xff]  ;;  %v418_v9 = vsel %vm205_vm0, %v416_v63, %v417_v1 }
  0x22   : >> { %439 = vmatpush.msrb.mxu0 %v843_v35  ;;  %815 = vmatmul.msk.f32.vlgmr.msra.gmra.mxu2 %vm213_vm2, %v300_v36  ;;  %v868_v6 = vld [vmem:[%s1357_s1 + $0x198] sm:$0xff]  ;;  %v854_v8 = vld [vmem:[%s1357_s1 + $0x170] sm:$0xff]  ;;  %v881_v11 = vld [vmem:[%s1357_s1 + $0x1e0] sm:$0xff] }
  0x23   : >> { %268 = vmatpush.msrb.mxu1 %v190_v37  ;;  %557 = vmatpush.msrb.mxu2 %v872_v38  ;;  %v1214_v14 = vld [vmem:[%s1023_s11 + $0x30] sm:$0xff]  ;;  %v853_v15 = vld [vmem:[%s1357_s1 + $0x168] sm:$0xff]  ;;  %v896_v19 = vld [vmem:[%s1357_s1 + $0x238] sm:$0xff] }
  0x24   : >> { %440 = vmatpush.msrb.mxu0 %v842_v40  ;;  %388 = vmatpush.msra.mxu3 %v825_v43  ;;  %v867_v16 = vld [vmem:[%s1357_s1 + $0x190] sm:$0xff]  ;;  %v419_v21 = vrot.slane %v1214_v14, 1  ;;  %v866_v22 = vld [vmem:[%s1357_s1 + $0x188] sm:$0xff]  ;;  %v851_v24 = vld [vmem:[%s1357_s1 + $0x158] sm:$0xff] }
  0x25   : >> { %269 = vmatpush.msrb.mxu1 %v189_v41  ;;  %558 = vmatpush.msrb.mxu2 %v871_v42  ;;  %v879_v23 = vld [vmem:[%s1357_s1 + $0x1d0] sm:$0xff]  ;;  %v865_v26 = vld [vmem:[%s1357_s1 + $0x180] sm:$0xff]  ;;  %v1258_v29 = vld [vmem:[%s1023_s11 + $0x38] sm:$0x3f] }
  0x26   : >> { %441 = vmatpush.msrb.mxu0 %v841_v44  ;;  %389 = vmatpush.msra.mxu3 %v824_v47  ;;  %v895_v25 = vld [vmem:[%s1357_s1 + $0x230] sm:$0xff]  ;;  %v420_v27 = vsel %vm205_vm0, %v417_v1, %v419_v21  ;;  %v878_v30 = vld [vmem:[%s1357_s1 + $0x1c8] sm:$0xff]  ;;  %v877_v32 = vld [vmem:[%s1357_s1 + $0x1c0] sm:$0xff]  ;;  %v421_v33 = vrot.slane %v1258_v29, 1  ;;  %v474_v47 = vrot.slane %v1164_v57, 2 }
  0x27   : >> { %270 = vmatpush.msrb.mxu1 %v188_v45  ;;  %559 = vmatpush.msrb.mxu2 %v870_v46  ;;  %v850_v28 = vld [vmem:[%s1357_s1 + $0x150] sm:$0xff]  ;;  %v849_v31 = vld [vmem:[%s1357_s1 + $0x148] sm:$0xff]  ;;  %v893_v34 = vld [vmem:[%s1357_s1 + $0x220] sm:$0xff]  ;;  %v473_v46 = vrot.slane %v1148_v52, 2 }
  0x28   : >> { %802 = vmatmul.msk.f32.gmra.mxu1 %vm213_vm2, %v211_v20  ;;  %442 = vmatpush.msrb.mxu0 %v840_v50  ;;  %v852_v20 = vld [vmem:[%s1357_s1 + $0x160] sm:$0xff]  ;;  %v892_v36 = vld [vmem:[%s1357_s1 + $0x218] sm:$0xff]  ;;  %v422_v37 = vsel %vm205_vm0, %v419_v21, %v421_v33  ;;  %v862_v38 = vld [vmem:[%s1023_s11 + $0x48] sm:$0xff] }
  0x29   : >> { %271 = vmatpush.msrb.mxu1 %v187_v49  ;;  %800 = vmatmul.msk.f32.gmra.mxu0 %vm213_vm2, %v210_v51  ;;  %v848_v35 = vld [vmem:[%s1357_s1 + $0x140] sm:$0xff]  ;;  %v891_v40 = vld [vmem:[%s1357_s1 + $0x210] sm:$0xff]  ;;  %v592_v42 = vrot.slane %v862_v38, 1  ;;  %v649_v50 = vrot.slane %v862_v38, 2 }
  0x2a   : >> { %832 = vmatmul.msk.f32.vlgmr.msra.gmra.mxu3 %vm213_vm2, %v1148_v52  ;;  %443 = vmatpush.msrb.mxu0 %v839_v55  ;;  %v861_v39 = vld [vmem:[%s1023_s11 + $0x40] sm:$0xff]  ;;  %v863_v45 = vld [vmem:[%s1023_s11 + $0x50] sm:$0xff] }
  0x2b   : >> { %272 = vmatpush.msrb.mxu1 %v186_v53  ;;  %614 = vmatpush.msrb.mxu3 %v884_v54  ;;  %v591_v41 = vrot.slane %v861_v39, 1  ;;  %v889_v43 = vld [vmem:[%s1357_s1 + $0x200] sm:$0xff]  ;;  %v594_v48 = vrot.slane %v863_v45, 1  ;;  %v648_v49 = vrot.slane %v861_v39, 2  ;;  %v864_v53 = vld [vmem:[%s1023_s11 + $0x58] sm:$0x3f]  ;;  %s1341_s11 = scalar_lea.vmem %s994_s23, %s790_s8 }
  0x2c   : >> { %816 = vmatmul.msk.f32.gmra.mxu2 %vm213_vm2, %v302_v56  ;;  %444 = vmatpush.msrb.mxu0 %v838_v60  ;;  %v476_v54 = vrot.slane %v1214_v14, 2  ;;  %v596_v55 = vrot.slane %v864_v53, 1  ;;  %v651_v56 = vrot.slane %v863_v45, 2  ;;  %v478_v60 = vrot.slane %v1258_v29, 2 }
  0x2d   : >> { %273 = vmatpush.msrb.mxu1 %v185_v58  ;;  %615 = vmatpush.msrb.mxu3 %v883_v59  ;;  %v593_v44 = vsel %vm205_vm0, %v591_v41, %v592_v42  ;;  %v595_v51 = vsel %vm205_vm0, %v592_v42, %v594_v48  ;;  %v650_v52 = vsel %vm297_vm1, %v648_v49, %v649_v50 }
  0x2e   : >> { %560 = vmatpush.msrb.mxu2 %v869_v61  ;;  %445 = vmatpush.msrb.mxu0 %v837_v3  ;;  %v597_v58 = vsel %vm205_vm0, %v594_v48, %v596_v55  ;;  %v652_v59 = vsel %vm297_vm1, %v649_v50, %v651_v56  ;;  %v653_v61 = vrot.slane %v864_v53, 2 }
  0x2f   : >> { %274 = vmatpush.msrb.mxu1 %v184_v62  ;;  %616 = vmatpush.msrb.mxu3 %v882_v2  ;;  %v479_v62 = vsel %vm297_vm1, %v476_v54, %v478_v60 }
  0x30   : >> { %803 = vmatmul.msk.f32.vlgmr.msrb.gmra.mxu1 %vm213_vm2, %v1056_v17  ;;  %561 = vmatpush.msrb.mxu2 %v868_v6  ;;  %v880_v17 = vld [vmem:[%s1357_s1 + $0x1d8] sm:$0xff]  ;;  %v654_v63 = vsel %vm297_vm1, %v651_v56, %v653_v61 }
  0x31   : >> { %496 = vmatpush.msra.mxu1 %v855_v5  ;;  %446 = vmatpush.msrb.mxu0 %v836_v7 }
  0x32   : >> { %833 = vmatmul.msk.f32.gmra.mxu3 %vm213_vm2, %v1164_v57  ;;  %844 = vmatmul.msk.f32.vlgmr.msrb.gmra.mxu0 %vm213_vm2, %v418_v9  ;;  %v477_v57 = vsel %vm297_vm1, %v474_v47, %v476_v54 }
  0x33   : >> { %497 = vmatpush.msra.mxu1 %v854_v8  ;;  %617 = vmatpush.msrb.mxu3 %v881_v11 }
  0x34   : >> { %817 = vmatmul.msk.f32.gmra.mxu2 %vm213_vm2, %v304_v10  ;;  %671 = vmatpush.msra.mxu0 %v896_v19 }
  0x35   : >> { %498 = vmatpush.msra.mxu1 %v853_v15  ;;  %562 = vmatpush.msrb.mxu2 %v867_v16 }
  0x36   : >> { %618 = vmatpush.msrb.mxu3 %v880_v17  ;;  %672 = vmatpush.msra.mxu0 %v895_v25 }
  0x37   : >> { %499 = vmatpush.msra.mxu1 %v852_v20  ;;  %563 = vmatpush.msrb.mxu2 %v866_v22 }
  0x38   : >> { %804 = vmatmul.msk.f32.gmra.mxu1 %vm213_vm2, %v1059_v18  ;;  %619 = vmatpush.msrb.mxu3 %v879_v23  ;;  %v894_v18 = vld [vmem:[%s1357_s1 + $0x228] sm:$0xff] }
  0x39   : >> { %500 = vmatpush.msra.mxu1 %v851_v24  ;;  %564 = vmatpush.msrb.mxu2 %v865_v26 }
  0x3a   : >> { %834 = vmatmul.msk.f32.gmra.mxu3 %vm213_vm2, %v1214_v14  ;;  %845 = vmatmul.msk.f32.gmra.mxu0 %vm213_vm2, %v420_v27 }
  0x3b   : >> { %501 = vmatpush.msra.mxu1 %v850_v28  ;;  %620 = vmatpush.msrb.mxu3 %v878_v30 }
  0x3c   : >> { %818 = vmatmul.msk.f32.gmra.mxu2 %vm213_vm2, %v303_v4  ;;  %673 = vmatpush.msra.mxu0 %v894_v18 }
  0x3d   : >> { %502 = vmatpush.msra.mxu1 %v849_v31  ;;  %911 = vmatpush.msra.mxu2 %v896_v19 }
  0x3e   : >> { %621 = vmatpush.msrb.mxu3 %v877_v32  ;;  %674 = vmatpush.msra.mxu0 %v893_v34 }
  0x3f   : >> { %503 = vmatpush.msra.mxu1 %v848_v35  ;;  %912 = vmatpush.msra.mxu2 %v895_v25 }
  0x40   : >> { %805 = vmatmul.msk.f32.gmra.mxu1 %vm213_vm2, %v1041_v12  ;;  %675 = vmatpush.msra.mxu0 %v892_v36  ;;  %v890_v12 = vld [vmem:[%s1357_s1 + $0x208] sm:$0xff] }
  0x41   : >> { %913 = vmatpush.msra.mxu2 %v894_v18 }
  0x42   : >> { %835 = vmatmul.msk.f32.gmra.mxu3 %vm213_vm2, %v1258_v29  ;;  %846 = vmatmul.msk.f32.gmra.mxu0 %vm213_vm2, %v422_v37 }
  0x43   : >> { %676 = vmatpush.msra.mxu0 %v891_v40  ;;  %914 = vmatpush.msra.mxu2 %v893_v34 }
  0x44   : >> { %873 = vmatmul.msk.f32.vlgmr.msrb.gmra.mxu2 %vm213_vm2, %v861_v39  ;;  %v697_v39 = vperm.slane %v984_v0, 0 }
  0x45   : >> { %677 = vmatpush.msra.mxu0 %v890_v12  ;;  %915 = vmatpush.msra.mxu2 %v892_v36 }
  0x47   : >> { %678 = vmatpush.msra.mxu0 %v889_v43  ;;  %916 = vmatpush.msra.mxu2 %v891_v40 }
  0x48   : >> { %806 = vmatmul.msk.f32.gmra.mxu1 %vm213_vm2, %v1044_v13  ;;  %v475_v13 = vsel %vm297_vm1, %v473_v46, %v474_v47 }
  0x49   : >> { %917 = vmatpush.msra.mxu2 %v890_v12 }
  0x4a   : >> { %885 = vmatmul.msk.f32.vlgmr.msrb.gmra.mxu3 %vm213_vm2, %v593_v44  ;;  %847 = vmatmul.msk.f32.gmra.mxu0 %vm213_vm2, %v421_v33 }
  0x4b   : >> { %918 = vmatpush.msra.mxu2 %v889_v43 }
  0x4c   : >> { %874 = vmatmul.msk.f32.gmra.mxu2 %vm213_vm2, %v862_v38 }
  0x50   : >> { %856 = vmatmul.msk.f32.vlgmr.msra.gmra.mxu1 %vm213_vm2, %v475_v13 }
  0x52   : >> { %886 = vmatmul.msk.f32.gmra.mxu3 %vm213_vm2, %v595_v51  ;;  %897 = vmatmul.msk.f32.vlgmr.msra.gmra.mxu0 %vm213_vm2, %v650_v52 }
  0x54   : >> { %875 = vmatmul.msk.f32.gmra.mxu2 %vm213_vm2, %v863_v45 }
  0x58   : >> { %857 = vmatmul.msk.f32.gmra.mxu1 %vm213_vm2, %v477_v57 }
  0x5a   : >> { %887 = vmatmul.msk.f32.gmra.mxu3 %vm213_vm2, %v597_v58  ;;  %898 = vmatmul.msk.f32.gmra.mxu0 %vm213_vm2, %v652_v59 }
  0x5c   : >> { %876 = vmatmul.msk.f32.gmra.mxu2 %vm213_vm2, %v864_v53 }
  0x60   : >> { %858 = vmatmul.msk.f32.gmra.mxu1 %vm213_vm2, %v479_v62 }
  0x62   : >> { %888 = vmatmul.msk.f32.gmra.mxu3 %vm213_vm2, %v596_v55  ;;  %899 = vmatmul.msk.f32.gmra.mxu0 %vm213_vm2, %v654_v63 }
  0x64   : >> { %900 = vmatmul.msk.f32.vlgmr.msra.gmra.mxu2 %vm213_vm2, %v653_v61 }
  0x68   : >> { %859 = vmatmul.msk.f32.gmra.mxu1 %vm213_vm2, %v478_v60 }
  0x9d   : >> { %v245_v1 = vpop.f32.mrf.mxu1  ;;  %v239_v2 = vpop.f32.mrf.mxu0 }
  0xa5   : >> { %v248_v3 = vpop.f32.mrf.mxu1  ;;  %v330_v4 = vpop.f32.mrf.mxu2 }
  0xa6   : >> { %v242_v5 = vpop.f32.mrf.mxu0 }
  0xad   : >> { %v276_v6 = vpop.f32.mrf.mxu1  ;;  %v391_v7 = vpop.f32.mrf.mxu3 }
  0xae   : >> { %v277_v20 = vadd.f32 %v276_v6, %v239_v2 }
  0xaf   : >> { %v333_v8 = vpop.f32.mrf.mxu2  ;;  %v448_v9 = vpop.f32.mrf.mxu0 }
  0xb0   : >> { %v342_v22 = vadd.f32 %v330_v4, %v277_v20 }
  0xb2   : >> { %v403_v26 = vadd.f32 %v391_v7, %v342_v22 }
  0xb4   : >> { %v460_v29 = vadd.f32 %v448_v9, %v403_v26 }
  0xb5   : >> { %v279_v10 = vpop.f32.mrf.mxu1  ;;  %v394_v11 = vpop.f32.mrf.mxu3 }
  0xb6   : >> { %v280_v27 = vadd.f32 %v279_v10, %v242_v5 }
  0xb7   : >> { %v336_v14 = vpop.f32.mrf.mxu2  ;;  %v451_v15 = vpop.f32.mrf.mxu0 }
  0xb8   : >> { %v343_v30 = vadd.f32 %v333_v8, %v280_v27 }
  0xba   : >> { %v404_v34 = vadd.f32 %v394_v11, %v343_v30 }
  0xbc   : >> { %v461_v40 = vadd.f32 %v451_v15, %v404_v34 }
  0xbd   : >> { %v282_v16 = vpop.f32.mrf.mxu1  ;;  %v397_v17 = vpop.f32.mrf.mxu3 }
  0xbe   : >> { %v283_v35 = vadd.f32 %v282_v16, %v245_v1 }
  0xbf   : >> { %v339_v19 = vpop.f32.mrf.mxu2  ;;  %v454_v21 = vpop.f32.mrf.mxu0 }
  0xc0   : >> { %v344_v41 = vadd.f32 %v336_v14, %v283_v35 }
  0xc2   : >> { %v405_v47 = vadd.f32 %v397_v17, %v344_v41 }
  0xc4   : >> { %v462_v52 = vadd.f32 %v454_v21, %v405_v47 }
  0xc5   : >> { %v285_v23 = vpop.f32.mrf.mxu1  ;;  %v400_v24 = vpop.f32.mrf.mxu3 }
  0xc6   : >> { %v286_v48 = vadd.f32 %v285_v23, %v248_v3 }
  0xc7   : >> { %v566_v25 = vpop.f32.mrf.mxu2  ;;  %v457_v28 = vpop.f32.mrf.mxu0 }
  0xc8   : >> { %v345_v53 = vadd.f32 %v339_v19, %v286_v48 }
  0xca   : >> { %v406_v60 = vadd.f32 %v400_v24, %v345_v53 }
  0xcc   : >> { %v463_v2 = vadd.f32 %v457_v28, %v406_v60 }
  0xcd   : >> { %v505_v18 = vpop.f32.mrf.mxu1  ;;  %v623_v31 = vpop.f32.mrf.mxu3 }
  0xce   : >> { %v517_v32 = vadd.f32 %v505_v18, %v460_v29 }
  0xcf   : >> { %v569_v33 = vpop.f32.mrf.mxu2  ;;  %v680_v37 = vpop.f32.mrf.mxu0 }
  0xd0   : >> { %v578_v36 = vadd.f32 %v566_v25, %v517_v32 }
  0xd2   : >> { %v635_v38 = vadd.f32 %v623_v31, %v578_v36 }
  0xd4   : >> { %v692_v42 = vadd.f32 %v680_v37, %v635_v38 }
  0xd5   : >> { %v508_v12 = vpop.f32.mrf.mxu1  ;;  %v626_v43 = vpop.f32.mrf.mxu3 }
  0xd6   : >> { %v699_v44 = vadd.f32 %v697_v39, %v692_v42  ;;  %v518_v45 = vadd.f32 %v508_v12, %v461_v40 }
  0xd7   : >> { %v572_v46 = vpop.f32.mrf.mxu2  ;;  %v683_v13 = vpop.f32.mrf.mxu0 }
  0xd8   : >> { %v703_v49 = vmax.f32 %v699_v44, 0.0  ;;  %v579_v50 = vadd.f32 %v569_v33, %v518_v45 }
  0xda   : >> { %708 = vst.msk [vmem:[%s1341_s11] sm:$0xff] %vm213_vm2, %v703_v49  ;;  %v636_v51 = vadd.f32 %v626_v43, %v579_v50 }
  0xdc   : >> { %v693_v54 = vadd.f32 %v683_v13, %v636_v51 }
  0xdd   : >> { %v511_v55 = vpop.f32.mrf.mxu1  ;;  %v629_v56 = vpop.f32.mrf.mxu3 }
  0xde   : >> { %v700_v57 = vadd.f32 %v697_v39, %v693_v54  ;;  %v519_v58 = vadd.f32 %v511_v55, %v462_v52 }
  0xdf   : >> { %v575_v59 = vpop.f32.mrf.mxu2  ;;  %v686_v63 = vpop.f32.mrf.mxu0 }
  0xe0   : >> { %v704_v61 = vmax.f32 %v700_v57, 0.0  ;;  %v580_v62 = vadd.f32 %v572_v46, %v519_v58 }
  0xe2   : >> { %709 = vst.msk [vmem:[%s1341_s11 + $0x8] sm:$0xff] %vm213_vm2, %v704_v61  ;;  %v637_v1 = vadd.f32 %v629_v56, %v580_v62 }
  0xe4   : >> { %v694_v3 = vadd.f32 %v686_v63, %v637_v1 }
  0xe5   : >> { %v514_v4 = vpop.f32.mrf.mxu1  ;;  %v632_v7 = vpop.f32.mrf.mxu3 }
  0xe6   : >> { %v701_v5 = vadd.f32 %v697_v39, %v694_v3  ;;  %v520_v6 = vadd.f32 %v514_v4, %v463_v2 }
  0xe7   : >> { %v689_v10 = vpop.f32.mrf.mxu2 }
  0xe8   : >> { %v705_v8 = vmax.f32 %v701_v5, 0.0  ;;  %v581_v9 = vadd.f32 %v575_v59, %v520_v6 }
  0xea   : >> { %710 = vst.msk [vmem:[%s1341_s11 + $0x10] sm:$0xff] %vm213_vm2, %v705_v8  ;;  %v638_v11 = vadd.f32 %v632_v7, %v581_v9 }
  0xec   : >> { %v695_v14 = vadd.f32 %v689_v10, %v638_v11 }
  0xee   : >> { %v702_v15 = vadd.f32 %v697_v39, %v695_v14  ;;  %176 = sbr.rel (!%p174_p4) target bundleno = 16 (0x10), region = 81 }
  0xf0   : >> { %v706_v16 = vmax.f32 %v702_v15, 0.0 }
  0xf2   : >> { %712 = vst.msk [vmem:[%s1341_s11 + $0x18] sm:$0xf] %vm711_vm3, %v706_v16 }
  0xf3 PF: > { %s13_s12 = sadd.s32 1, %s947_s12  }
  0xf4   : > { %p10_p5 = scmp.ge.s32.totalorder %s13_s12, 4  }
  0xf6   :  { %12 = sbr.rel (!%p10_p5) target bundleno = 1 (0x1), region = 92 }

// kernel: encoder_cnn.11
= control target key start
LH: loop header
LB: loop body
LE: loop exit
PB: predicated region body
PF: predicated region fallthrough
CT: control target
= control target key end

     0   :  { %s522_s6 = smov 0   ;;  %s711_s0 = inlined_call_operand.vmem [shape: f32[2,4,14,14,64], index: 0, kind: input, shape index: {}]   ;;  %s712_s1 = inlined_call_operand.vmem [shape: f32[2,14,14,64], index: 1, kind: output, shape index: {}]  }
   0x1 LB: > { %s401_s7 = sadd.s32 4294967295, %s510_s6   ;;  %p405_p0 = scmp.ge.s32.totalorder %s510_s6, 1  ;;  %s510_s6 = sphi %s522_s6, %s11_s6  }
   0x2   : > { %p87_p1 = scmp.lt.s32.totalorder %s510_s6, 3 }
   0x4   : > { %p88_p2 = pnand %p405_p0, %p87_p1 }
   0x5   : > { %p107_p3 = scmp.lt.s32.totalorder (!%p88_p2), %s401_s7, 1 }
   0x6   : > { %91 = sbr.rel (%p88_p2) target bundleno = 59 (0x3b), region = 24 }
   0xb   : > { %s714_s7 = smov (!%p107_p3, %s401_s7), 1  ;;  %vm316_vm0 = vcmask 523264   ;;  %vm318_vm1 = vcmask 521216  }
   0xc   : > { %s494_s8 = smul.u32 896, %s714_s7 }
   0xd   : > { %s495_s12 = smul.u32 224, %s714_s7 }
   0xe   : > { %s533_s11 = scalar_lea.vmem %s711_s0, %s494_s8 }
   0xf   : > { %v117_v0 = vld [vmem:[%s533_s11] sm:$0xff]  ;;  %v118_v5 = vld [vmem:[%s533_s11 + $0x8] sm:$0x3f]  ;;  %v119_v11 = vld [vmem:[%s533_s11 + $0x10] sm:$0xff]  ;;  %s547_s15 = scalar_lea.vmem %s712_s1, %s495_s12 }
  0x10   : > { %v408_v1 = vld [vmem:[%s533_s11 + $0xe0] sm:$0xff]  ;;  %v409_v6 = vld [vmem:[%s533_s11 + $0xe8] sm:$0x3f]  ;;  %v410_v13 = vld [vmem:[%s533_s11 + $0xf0] sm:$0xff] }
  0x11   : > { %v436_v2 = vld [vmem:[%s533_s11 + $0x1c0] sm:$0xff]  ;;  %v174_v3 = vmax.f32 %v117_v0, %v408_v1  ;;  %v175_v8 = vmax.f32 %v118_v5, %v409_v6  ;;  %v437_v9 = vld [vmem:[%s533_s11 + $0x1c8] sm:$0x3f]  ;;  %v438_v14 = vld [vmem:[%s533_s11 + $0x1d0] sm:$0xff]  ;;  %v176_v17 = vmax.f32 %v119_v11, %v410_v13 }
  0x12   : > { %v464_v4 = vld [vmem:[%s533_s11 + $0x2a0] sm:$0xff]  ;;  %v465_v10 = vld [vmem:[%s533_s11 + $0x2a8] sm:$0x3f]  ;;  %v466_v15 = vld [vmem:[%s533_s11 + $0x2b0] sm:$0xff] }
  0x13   : > { %v260_v7 = vmax.f32 %v436_v2, %v464_v4  ;;  %v261_v12 = vmax.f32 %v437_v9, %v465_v10  ;;  %v262_v18 = vmax.f32 %v438_v14, %v466_v15  ;;  %v120_v19 = vld [vmem:[%s533_s11 + $0x18] sm:$0x3f]  ;;  %v121_v25 = vld [vmem:[%s533_s11 + $0x20] sm:$0xff]  ;;  %v122_v32 = vld [vmem:[%s533_s11 + $0x28] sm:$0x3f] }
  0x14   : > { %v411_v20 = vld [vmem:[%s533_s11 + $0xf8] sm:$0x3f]  ;;  %v412_v26 = vld [vmem:[%s533_s11 + $0x100] sm:$0xff]  ;;  %v413_v34 = vld [vmem:[%s533_s11 + $0x108] sm:$0x3f] }
  0x15   : > { %v288_v16 = vmax.f32 %v174_v3, %v260_v7  ;;  %v439_v21 = vld [vmem:[%s533_s11 + $0x1d8] sm:$0x3f]  ;;  %v289_v22 = vmax.f32 %v175_v8, %v261_v12  ;;  %v177_v23 = vmax.f32 %v120_v19, %v411_v20  ;;  %v290_v27 = vmax.f32 %v176_v17, %v262_v18  ;;  %v440_v30 = vld [vmem:[%s533_s11 + $0x1e0] sm:$0xff]  ;;  %v441_v35 = vld [vmem:[%s533_s11 + $0x1e8] sm:$0x3f] }
  0x16   : > { %v467_v24 = vld [vmem:[%s533_s11 + $0x2b8] sm:$0x3f]  ;;  %v178_v29 = vmax.f32 %v121_v25, %v412_v26  ;;  %v468_v31 = vld [vmem:[%s533_s11 + $0x2c0] sm:$0xff]  ;;  %v179_v37 = vmax.f32 %v122_v32, %v413_v34  ;;  %v469_v38 = vld [vmem:[%s533_s11 + $0x2c8] sm:$0x3f] }
  0x17   : > { %317 = vst.msk [vmem:[%s547_s15] sm:$0xff] %vm316_vm0, %v288_v16  ;;  %v263_v28 = vmax.f32 %v439_v21, %v467_v24  ;;  %v264_v33 = vmax.f32 %v440_v30, %v468_v31  ;;  %v123_v39 = vld [vmem:[%s533_s11 + $0x30] sm:$0xff]  ;;  %v265_v42 = vmax.f32 %v441_v35, %v469_v38  ;;  %v124_v46 = vld [vmem:[%s533_s11 + $0x38] sm:$0x3f]  ;;  %v125_v53 = vld [vmem:[%s533_s11 + $0x40] sm:$0xff] }
  0x18   : > { %319 = vst.msk [vmem:[%s547_s15 + $0x8] sm:$0x3f] %vm318_vm1, %v289_v22  ;;  %v414_v40 = vld [vmem:[%s533_s11 + $0x110] sm:$0xff]  ;;  %v415_v48 = vld [vmem:[%s533_s11 + $0x118] sm:$0x3f]  ;;  %v416_v54 = vld [vmem:[%s533_s11 + $0x120] sm:$0xff] }
  0x19   : > { %320 = vst.msk [vmem:[%s547_s15 + $0x10] sm:$0xff] %vm316_vm0, %v290_v27  ;;  %v291_v36 = vmax.f32 %v177_v23, %v263_v28  ;;  %v292_v41 = vmax.f32 %v178_v29, %v264_v33  ;;  %v180_v43 = vmax.f32 %v123_v39, %v414_v40  ;;  %v442_v44 = vld [vmem:[%s533_s11 + $0x1f0] sm:$0xff]  ;;  %v443_v49 = vld [vmem:[%s533_s11 + $0x1f8] sm:$0x3f]  ;;  %v293_v50 = vmax.f32 %v179_v37, %v265_v42  ;;  %v444_v58 = vld [vmem:[%s533_s11 + $0x200] sm:$0xff] }
  0x1a   : > { %v470_v45 = vld [vmem:[%s533_s11 + $0x2d0] sm:$0xff]  ;;  %v181_v51 = vmax.f32 %v124_v46, %v415_v48  ;;  %v471_v52 = vld [vmem:[%s533_s11 + $0x2d8] sm:$0x3f]  ;;  %v182_v57 = vmax.f32 %v125_v53, %v416_v54  ;;  %v472_v59 = vld [vmem:[%s533_s11 + $0x2e0] sm:$0xff] }
  0x1b   : > { %321 = vst.msk [vmem:[%s547_s15 + $0x18] sm:$0x3f] %vm318_vm1, %v291_v36  ;;  %v266_v47 = vmax.f32 %v442_v44, %v470_v45  ;;  %v267_v56 = vmax.f32 %v443_v49, %v471_v52  ;;  %v126_v60 = vld [vmem:[%s533_s11 + $0x48] sm:$0x3f]  ;;  %v268_v61 = vmax.f32 %v444_v58, %v472_v59  ;;  %v127_v3 = vld [vmem:[%s533_s11 + $0x50] sm:$0xff]  ;;  %v129_v17 = vld [vmem:[%s533_s11 + $0x60] sm:$0xff] }
  0x1c   : > { %322 = vst.msk [vmem:[%s547_s15 + $0x20] sm:$0xff] %vm316_vm0, %v292_v41  ;;  %v417_v62 = vld [vmem:[%s533_s11 + $0x128] sm:$0x3f]  ;;  %v418_v4 = vld [vmem:[%s533_s11 + $0x130] sm:$0xff]  ;;  %v128_v10 = vld [vmem:[%s533_s11 + $0x58] sm:$0x3f] }
  0x1d   : > { %v294_v55 = vmax.f32 %v180_v43, %v266_v47  ;;  %323 = vst.msk [vmem:[%s547_s15 + $0x28] sm:$0x3f] %vm318_vm1, %v293_v50  ;;  %v445_v63 = vld [vmem:[%s533_s11 + $0x208] sm:$0x3f]  ;;  %v295_v0 = vmax.f32 %v181_v51, %v267_v56  ;;  %v183_v1 = vmax.f32 %v126_v60, %v417_v62  ;;  %v296_v5 = vmax.f32 %v182_v57, %v268_v61  ;;  %v446_v8 = vld [vmem:[%s533_s11 + $0x210] sm:$0xff]  ;;  %v420_v18 = vld [vmem:[%s533_s11 + $0x140] sm:$0xff] }
  0x1e   : > { %v473_v2 = vld [vmem:[%s533_s11 + $0x2e8] sm:$0x3f]  ;;  %v184_v7 = vmax.f32 %v127_v3, %v418_v4  ;;  %v474_v9 = vld [vmem:[%s533_s11 + $0x2f0] sm:$0xff]  ;;  %v419_v12 = vld [vmem:[%s533_s11 + $0x138] sm:$0x3f]  ;;  %v186_v21 = vmax.f32 %v129_v17, %v420_v18 }
  0x1f   : > { %324 = vst.msk [vmem:[%s547_s15 + $0x30] sm:$0xff] %vm316_vm0, %v294_v55  ;;  %v269_v6 = vmax.f32 %v445_v63, %v473_v2  ;;  %v270_v11 = vmax.f32 %v446_v8, %v474_v9  ;;  %v447_v13 = vld [vmem:[%s533_s11 + $0x218] sm:$0x3f]  ;;  %v185_v15 = vmax.f32 %v128_v10, %v419_v12  ;;  %v448_v22 = vld [vmem:[%s533_s11 + $0x220] sm:$0xff]  ;;  %v130_v24 = vld [vmem:[%s533_s11 + $0x68] sm:$0x3f] }
  0x20   : > { %325 = vst.msk [vmem:[%s547_s15 + $0x38] sm:$0x3f] %vm318_vm1, %v295_v0  ;;  %v475_v16 = vld [vmem:[%s533_s11 + $0x2f8] sm:$0x3f]  ;;  %v476_v23 = vld [vmem:[%s533_s11 + $0x300] sm:$0xff]  ;;  %v131_v31 = vld [vmem:[%s533_s11 + $0x70] sm:$0xff] }
  0x21   : > { %326 = vst.msk [vmem:[%s547_s15 + $0x40] sm:$0xff] %vm316_vm0, %v296_v5  ;;  %v297_v14 = vmax.f32 %v183_v1, %v269_v6  ;;  %v298_v19 = vmax.f32 %v184_v7, %v270_v11  ;;  %v271_v20 = vmax.f32 %v447_v13, %v475_v16  ;;  %v272_v25 = vmax.f32 %v448_v22, %v476_v23  ;;  %v421_v26 = vld [vmem:[%s533_s11 + $0x148] sm:$0x3f]  ;;  %v422_v32 = vld [vmem:[%s533_s11 + $0x150] sm:$0xff]  ;;  %v132_v38 = vld [vmem:[%s533_s11 + $0x78] sm:$0x3f] }
  0x22   : > { %v449_v27 = vld [vmem:[%s533_s11 + $0x228] sm:$0x3f]  ;;  %v187_v29 = vmax.f32 %v130_v24, %v421_v26  ;;  %v188_v35 = vmax.f32 %v131_v31, %v422_v32  ;;  %v450_v36 = vld [vmem:[%s533_s11 + $0x230] sm:$0xff]  ;;  %v423_v40 = vld [vmem:[%s533_s11 + $0x158] sm:$0x3f] }
  0x23   : > { %327 = vst.msk [vmem:[%s547_s15 + $0x48] sm:$0x3f] %vm318_vm1, %v297_v14  ;;  %v299_v28 = vmax.f32 %v185_v15, %v271_v20  ;;  %v477_v30 = vld [vmem:[%s533_s11 + $0x308] sm:$0x3f]  ;;  %v300_v33 = vmax.f32 %v186_v21, %v272_v25  ;;  %v478_v37 = vld [vmem:[%s533_s11 + $0x310] sm:$0xff]  ;;  %v189_v43 = vmax.f32 %v132_v38, %v423_v40  ;;  %v133_v45 = vld [vmem:[%s533_s11 + $0x80] sm:$0xff] }
  0x24   : > { %328 = vst.msk [vmem:[%s547_s15 + $0x50] sm:$0xff] %vm316_vm0, %v298_v19  ;;  %v273_v34 = vmax.f32 %v449_v27, %v477_v30  ;;  %v274_v39 = vmax.f32 %v450_v36, %v478_v37  ;;  %v451_v41 = vld [vmem:[%s533_s11 + $0x238] sm:$0x3f]  ;;  %v424_v46 = vld [vmem:[%s533_s11 + $0x160] sm:$0xff]  ;;  %v134_v52 = vld [vmem:[%s533_s11 + $0x88] sm:$0x3f] }
  0x25   : > { %329 = vst.msk [vmem:[%s547_s15 + $0x58] sm:$0x3f] %vm318_vm1, %v299_v28  ;;  %v479_v44 = vld [vmem:[%s533_s11 + $0x318] sm:$0x3f]  ;;  %v190_v49 = vmax.f32 %v133_v45, %v424_v46  ;;  %v452_v50 = vld [vmem:[%s533_s11 + $0x240] sm:$0xff]  ;;  %v135_v59 = vld [vmem:[%s533_s11 + $0x90] sm:$0xff] }
  0x26   : > { %330 = vst.msk [vmem:[%s547_s15 + $0x60] sm:$0xff] %vm316_vm0, %v300_v33  ;;  %v301_v42 = vmax.f32 %v187_v29, %v273_v34  ;;  %v302_v47 = vmax.f32 %v188_v35, %v274_v39  ;;  %v275_v48 = vmax.f32 %v451_v41, %v479_v44  ;;  %v480_v51 = vld [vmem:[%s533_s11 + $0x320] sm:$0xff]  ;;  %v425_v54 = vld [vmem:[%s533_s11 + $0x168] sm:$0x3f]  ;;  %v426_v60 = vld [vmem:[%s533_s11 + $0x170] sm:$0xff] }
  0x27   : > { %v276_v53 = vmax.f32 %v452_v50, %v480_v51  ;;  %v453_v55 = vld [vmem:[%s533_s11 + $0x248] sm:$0x3f]  ;;  %v191_v57 = vmax.f32 %v134_v52, %v425_v54  ;;  %v192_v63 = vmax.f32 %v135_v59, %v426_v60  ;;  %v454_v0 = vld [vmem:[%s533_s11 + $0x250] sm:$0xff]  ;;  %v136_v2 = vld [vmem:[%s533_s11 + $0x98] sm:$0x3f] }
  0x28   : > { %331 = vst.msk [vmem:[%s547_s15 + $0x68] sm:$0x3f] %vm318_vm1, %v301_v42  ;;  %v303_v56 = vmax.f32 %v189_v43, %v275_v48  ;;  %v481_v58 = vld [vmem:[%s533_s11 + $0x328] sm:$0x3f]  ;;  %v482_v1 = vld [vmem:[%s533_s11 + $0x330] sm:$0xff]  ;;  %v137_v9 = vld [vmem:[%s533_s11 + $0xa0] sm:$0xff] }
  0x29   : > { %332 = vst.msk [vmem:[%s547_s15 + $0x70] sm:$0xff] %vm316_vm0, %v302_v47  ;;  %v304_v61 = vmax.f32 %v190_v49, %v276_v53  ;;  %v277_v62 = vmax.f32 %v453_v55, %v481_v58  ;;  %v278_v3 = vmax.f32 %v454_v0, %v482_v1  ;;  %v427_v4 = vld [vmem:[%s533_s11 + $0x178] sm:$0x3f]  ;;  %v428_v10 = vld [vmem:[%s533_s11 + $0x180] sm:$0xff]  ;;  %v138_v16 = vld [vmem:[%s533_s11 + $0xa8] sm:$0x3f] }
  0x2a   : > { %333 = vst.msk [vmem:[%s547_s15 + $0x78] sm:$0x3f] %vm318_vm1, %v303_v56  ;;  %v455_v5 = vld [vmem:[%s533_s11 + $0x258] sm:$0x3f]  ;;  %v193_v7 = vmax.f32 %v136_v2, %v427_v4  ;;  %v194_v13 = vmax.f32 %v137_v9, %v428_v10  ;;  %v456_v14 = vld [vmem:[%s533_s11 + $0x260] sm:$0xff]  ;;  %v139_v23 = vld [vmem:[%s533_s11 + $0xb0] sm:$0xff] }
  0x2b   : > { %334 = vst.msk [vmem:[%s547_s15 + $0x80] sm:$0xff] %vm316_vm0, %v304_v61  ;;  %v305_v6 = vmax.f32 %v191_v57, %v277_v62  ;;  %v483_v8 = vld [vmem:[%s533_s11 + $0x338] sm:$0x3f]  ;;  %v306_v11 = vmax.f32 %v192_v63, %v278_v3  ;;  %v484_v15 = vld [vmem:[%s533_s11 + $0x340] sm:$0xff]  ;;  %v429_v18 = vld [vmem:[%s533_s11 + $0x188] sm:$0x3f] }
  0x2c   : > { %v279_v12 = vmax.f32 %v455_v5, %v483_v8  ;;  %v280_v17 = vmax.f32 %v456_v14, %v484_v15  ;;  %v457_v19 = vld [vmem:[%s533_s11 + $0x268] sm:$0x3f]  ;;  %v195_v21 = vmax.f32 %v138_v16, %v429_v18  ;;  %v430_v24 = vld [vmem:[%s533_s11 + $0x190] sm:$0xff]  ;;  %v140_v30 = vld [vmem:[%s533_s11 + $0xb8] sm:$0x3f] }
  0x2d   : > { %335 = vst.msk [vmem:[%s547_s15 + $0x88] sm:$0x3f] %vm318_vm1, %v305_v6  ;;  %v485_v22 = vld [vmem:[%s533_s11 + $0x348] sm:$0x3f]  ;;  %v196_v27 = vmax.f32 %v139_v23, %v430_v24  ;;  %v458_v28 = vld [vmem:[%s533_s11 + $0x270] sm:$0xff]  ;;  %v141_v37 = vld [vmem:[%s533_s11 + $0xc0] sm:$0xff] }
  0x2e   : > { %336 = vst.msk [vmem:[%s547_s15 + $0x90] sm:$0xff] %vm316_vm0, %v306_v11  ;;  %v307_v20 = vmax.f32 %v193_v7, %v279_v12  ;;  %v308_v25 = vmax.f32 %v194_v13, %v280_v17  ;;  %v281_v26 = vmax.f32 %v457_v19, %v485_v22  ;;  %v486_v29 = vld [vmem:[%s533_s11 + $0x350] sm:$0xff]  ;;  %v431_v32 = vld [vmem:[%s533_s11 + $0x198] sm:$0x3f]  ;;  %v432_v38 = vld [vmem:[%s533_s11 + $0x1a0] sm:$0xff] }
  0x2f   : > { %v282_v31 = vmax.f32 %v458_v28, %v486_v29  ;;  %v459_v33 = vld [vmem:[%s533_s11 + $0x278] sm:$0x3f]  ;;  %v197_v35 = vmax.f32 %v140_v30, %v431_v32  ;;  %v198_v41 = vmax.f32 %v141_v37, %v432_v38  ;;  %v460_v42 = vld [vmem:[%s533_s11 + $0x280] sm:$0xff]  ;;  %v142_v44 = vld [vmem:[%s533_s11 + $0xc8] sm:$0x3f] }
  0x30   : > { %337 = vst.msk [vmem:[%s547_s15 + $0x98] sm:$0x3f] %vm318_vm1, %v307_v20  ;;  %v309_v34 = vmax.f32 %v195_v21, %v281_v26  ;;  %v487_v36 = vld [vmem:[%s533_s11 + $0x358] sm:$0x3f]  ;;  %v488_v43 = vld [vmem:[%s533_s11 + $0x360] sm:$0xff]  ;;  %v143_v51 = vld [vmem:[%s533_s11 + $0xd0] sm:$0xff] }
  0x31   : > { %338 = vst.msk [vmem:[%s547_s15 + $0xa0] sm:$0xff] %vm316_vm0, %v308_v25  ;;  %v310_v39 = vmax.f32 %v196_v27, %v282_v31  ;;  %v283_v40 = vmax.f32 %v459_v33, %v487_v36  ;;  %v284_v45 = vmax.f32 %v460_v42, %v488_v43  ;;  %v433_v46 = vld [vmem:[%s533_s11 + $0x1a8] sm:$0x3f]  ;;  %v434_v52 = vld [vmem:[%s533_s11 + $0x1b0] sm:$0xff]  ;;  %v144_v58 = vld [vmem:[%s533_s11 + $0xd8] sm:$0x3f] }
  0x32   : > { %339 = vst.msk [vmem:[%s547_s15 + $0xa8] sm:$0x3f] %vm318_vm1, %v309_v34  ;;  %v461_v47 = vld [vmem:[%s533_s11 + $0x288] sm:$0x3f]  ;;  %v199_v49 = vmax.f32 %v142_v44, %v433_v46  ;;  %v200_v55 = vmax.f32 %v143_v51, %v434_v52  ;;  %v462_v56 = vld [vmem:[%s533_s11 + $0x290] sm:$0xff] }
  0x33   : > { %340 = vst.msk [vmem:[%s547_s15 + $0xb0] sm:$0xff] %vm316_vm0, %v310_v39  ;;  %v311_v48 = vmax.f32 %v197_v35, %v283_v40  ;;  %v489_v50 = vld [vmem:[%s533_s11 + $0x368] sm:$0x3f]  ;;  %v312_v53 = vmax.f32 %v198_v41, %v284_v45  ;;  %v490_v57 = vld [vmem:[%s533_s11 + $0x370] sm:$0xff]  ;;  %v435_v60 = vld [vmem:[%s533_s11 + $0x1b8] sm:$0x3f] }
  0x34   : > { %v285_v54 = vmax.f32 %v461_v47, %v489_v50  ;;  %v286_v59 = vmax.f32 %v462_v56, %v490_v57  ;;  %v463_v61 = vld [vmem:[%s533_s11 + $0x298] sm:$0x3f]  ;;  %v201_v63 = vmax.f32 %v144_v58, %v435_v60 }
  0x35   : > { %341 = vst.msk [vmem:[%s547_s15 + $0xb8] sm:$0x3f] %vm318_vm1, %v311_v48  ;;  %v491_v0 = vld [vmem:[%s533_s11 + $0x378] sm:$0x3f] }
  0x36   : > { %342 = vst.msk [vmem:[%s547_s15 + $0xc0] sm:$0xff] %vm316_vm0, %v312_v53  ;;  %v313_v62 = vmax.f32 %v199_v49, %v285_v54  ;;  %v314_v1 = vmax.f32 %v200_v55, %v286_v59  ;;  %v287_v2 = vmax.f32 %v463_v61, %v491_v0 }
  0x38   : > { %343 = vst.msk [vmem:[%s547_s15 + $0xc8] sm:$0x3f] %vm318_vm1, %v313_v62  ;;  %v315_v3 = vmax.f32 %v201_v63, %v287_v2 }
  0x39   : > { %344 = vst.msk [vmem:[%s547_s15 + $0xd0] sm:$0xff] %vm316_vm0, %v314_v1 }
  0x3a   : > { %345 = vst.msk [vmem:[%s547_s15 + $0xd8] sm:$0x3f] %vm318_vm1, %v315_v3 }
  0x3b PF: > { %s11_s6 = sadd.s32 1, %s510_s6  }
  0x3c   : > { %p8_p4 = scmp.ge.s32.totalorder %s11_s6, 4  }
  0x3e   :  { %10 = sbr.rel (!%p8_p4) target bundleno = 1 (0x1), region = 57 }

// kernel: encoder_cnn.12
= control target key start
LH: loop header
LB: loop body
LE: loop exit
PB: predicated region body
PF: predicated region fallthrough
CT: control target
= control target key end

     0   :  { %s797_s12 = smov 0   ;;  %s1112_s0 = inlined_call_operand.vmem [shape: f32[2,16,16,64], index: 0, kind: input, shape index: {}]   ;;  %s1113_s1 = inlined_call_operand.vmem [shape: f32[9,64,128], index: 1, kind: input, shape index: {}]   ;;  %s1114_s2 = inlined_call_operand.vmem [shape: f32[1,128], index: 2, kind: input, shape index: {}]   ;;  %s1115_s3 = inlined_call_operand.vmem [shape: f32[2,14,14,128], index: 3, kind: output, shape index: {}]  }
   0x1 LB: > { %s636_s13 = sadd.s32 4294967295, %s771_s12   ;;  %p640_p0 = scmp.ge.s32.totalorder %s771_s12, 1  ;;  %s771_s12 = sphi %s797_s12, %s13_s12  }
   0x2   : > { %p137_p1 = scmp.lt.s32.totalorder %s771_s12, 3 }
   0x4   : > { %p138_p2 = pnand %p640_p0, %p137_p1 }
   0x5   : > { %p161_p3 = scmp.lt.s32.totalorder (!%p138_p2), %s636_s13, 1  ;;  %s820_s24 = smov (!%p138_p2), 0  }
   0x6   : > { %141 = sbr.rel (%p138_p2) target bundleno = 204 (0xcc), region = 32 }
   0xb   : > { %v808_v0 = vld [vmem:[%s1114_s2] sm:$0x1]  ;;  %s1117_s13 = smov (!%p161_p3, %s636_s13), 1 }
   0xc   : > { %s735_s16 = sshll.u32 %s1117_s13, 8  ;;  %s744_s17 = smul.u32 224, %s1117_s13 }
   0xd   : > { %s813_s20 = scalar_lea.vmem %s1112_s0, %s735_s16 }
   0xe   : > { %s818_s23 = scalar_lea.vmem %s1115_s3, %s744_s17 }
   0xf LB: >> { %v652_v1 = vld [vmem:[%s1113_s1 + $0x78] sm:$0xff]  ;;  %v651_v3 = vld [vmem:[%s1113_s1 + $0x70] sm:$0xff]  ;;  %v650_v7 = vld [vmem:[%s1113_s1 + $0x68] sm:$0xff]  ;;  %s644_s30 = sshll.u32 %s775_s24, 4  ;;  %vm201_vm0 = vcmask 1046528   ;;  %vm269_vm1 = vcmask 1045504   ;;  %s775_s24 = sphi %s820_s24, %s177_s24  }
  0x10   : >> { %v664_v2 = vld [vmem:[%s1113_s1 + $0xb8] sm:$0xff]  ;;  %218 = vmatpush.msra.mxu0 %v652_v1  ;;  %v663_v5 = vld [vmem:[%s1113_s1 + $0xb0] sm:$0xff]  ;;  %v662_v9 = vld [vmem:[%s1113_s1 + $0xa8] sm:$0xff]  ;;  %s889_s17 = scalar_lea.vmem %s813_s20, %s644_s30  ;;  %vm205_vm2 = vcmask 523264   ;;  %s563_s14 = scalar_lea.vmem %s818_s23, %s644_s30 }
  0x11   : >> { %285 = vmatpush.msra.mxu2 %v664_v2  ;;  %v189_v4 = vld [vmem:[%s1113_s1 + $0x38] sm:$0xff]  ;;  %v188_v8 = vld [vmem:[%s1113_s1 + $0x30] sm:$0xff]  ;;  %v187_v11 = vld [vmem:[%s1113_s1 + $0x28] sm:$0xff]  ;;  %s177_s24 = sadd.s32 1, %s775_s24  }
  0x12   : >> { %v677_v6 = vld [vmem:[%s1113_s1 + $0xf8] sm:$0xff]  ;;  %245 = vmatpush.msra.mxu1 %v189_v4  ;;  %219 = vmatpush.msra.mxu0 %v651_v3  ;;  %v676_v10 = vld [vmem:[%s1113_s1 + $0xf0] sm:$0xff]  ;;  %v649_v12 = vld [vmem:[%s1113_s1 + $0x60] sm:$0xff]  ;;  %p174_p4 = scmp.ge.s32.totalorder %s177_s24, 14  }
  0x13   : >> { %330 = vmatpush.msra.mxu3 %v677_v6  ;;  %286 = vmatpush.msra.mxu2 %v663_v5  ;;  %v661_v13 = vld [vmem:[%s1113_s1 + $0xa0] sm:$0xff]  ;;  %v675_v14 = vld [vmem:[%s1113_s1 + $0xe8] sm:$0xff]  ;;  %v648_v17 = vld [vmem:[%s1113_s1 + $0x58] sm:$0xff] }
  0x14   : >> { %246 = vmatpush.msra.mxu1 %v188_v8  ;;  %220 = vmatpush.msra.mxu0 %v650_v7  ;;  %v186_v15 = vld [vmem:[%s1113_s1 + $0x20] sm:$0xff]  ;;  %v660_v18 = vld [vmem:[%s1113_s1 + $0x98] sm:$0xff]  ;;  %v647_v21 = vld [vmem:[%s1113_s1 + $0x50] sm:$0xff] }
  0x15   : >> { %331 = vmatpush.msra.mxu3 %v676_v10  ;;  %287 = vmatpush.msra.mxu2 %v662_v9  ;;  %v674_v16 = vld [vmem:[%s1113_s1 + $0xe0] sm:$0xff]  ;;  %v185_v19 = vld [vmem:[%s1113_s1 + $0x18] sm:$0xff]  ;;  %v659_v22 = vld [vmem:[%s1113_s1 + $0x90] sm:$0xff] }
  0x16   : >> { %247 = vmatpush.msra.mxu1 %v187_v11  ;;  %221 = vmatpush.msra.mxu0 %v649_v12  ;;  %v673_v20 = vld [vmem:[%s1113_s1 + $0xd8] sm:$0xff]  ;;  %v646_v23 = vld [vmem:[%s1113_s1 + $0x48] sm:$0xff]  ;;  %v184_v24 = vld [vmem:[%s1113_s1 + $0x10] sm:$0xff] }
  0x17   : >> { %332 = vmatpush.msra.mxu3 %v675_v14  ;;  %288 = vmatpush.msra.mxu2 %v661_v13  ;;  %v672_v25 = vld [vmem:[%s1113_s1 + $0xd0] sm:$0xff]  ;;  %v658_v26 = vld [vmem:[%s1113_s1 + $0x88] sm:$0xff]  ;;  %v180_v27 = vld [vmem:[%s889_s17] sm:$0xff] }
  0x18   : >> { %248 = vmatpush.msra.mxu1 %v186_v15  ;;  %222 = vmatpush.msra.mxu0 %v648_v17  ;;  %v911_v28 = vld [vmem:[%s889_s17 + $0x8] sm:$0xff]  ;;  %v202_v31 = vrot.slane %v180_v27, 1  ;;  %v270_v33 = vrot.slane %v180_v27, 2  ;;  %v645_v35 = vld [vmem:[%s1113_s1 + $0x40] sm:$0xff]  ;;  %v710_v39 = vld [vmem:[%s1113_s1 + $0x1b8] sm:$0xff] }
  0x19   : >> { %333 = vmatpush.msra.mxu3 %v674_v16  ;;  %289 = vmatpush.msra.mxu2 %v660_v18  ;;  %v183_v29 = vld [vmem:[%s1113_s1 + $0x8] sm:$0xff]  ;;  %v203_v32 = vrot.slane %v911_v28, 1  ;;  %v271_v34 = vrot.slane %v911_v28, 2  ;;  %v657_v36 = vld [vmem:[%s1113_s1 + $0x80] sm:$0xff]  ;;  %v687_v42 = vld [vmem:[%s1113_s1 + $0x138] sm:$0xff] }
  0x1a   : >> { %249 = vmatpush.msra.mxu1 %v185_v19  ;;  %223 = vmatpush.msra.mxu0 %v647_v21  ;;  %v671_v30 = vld [vmem:[%s1113_s1 + $0xc8] sm:$0xff]  ;;  %v182_v40 = vld [vmem:[%s1113_s1] sm:$0xff]  ;;  %v944_v43 = vld [vmem:[%s889_s17 + $0x10] sm:$0xff] }
  0x1b   : >> { %334 = vmatpush.msra.mxu3 %v673_v20  ;;  %290 = vmatpush.msra.mxu2 %v659_v22  ;;  %v204_v37 = vsel %vm201_vm0, %v202_v31, %v203_v32  ;;  %v272_v38 = vsel %vm269_vm1, %v270_v33, %v271_v34  ;;  %v670_v41 = vld [vmem:[%s1113_s1 + $0xc0] sm:$0xff]  ;;  %v697_v44 = vld [vmem:[%s1113_s1 + $0x178] sm:$0xff]  ;;  %v709_v45 = vld [vmem:[%s1113_s1 + $0x1b0] sm:$0xff]  ;;  %v356_v3 = vrot.slane %v944_v43, 1  ;;  %v397_v10 = vrot.slane %v944_v43, 2 }
  0x1c   : >> { %250 = vmatpush.msra.mxu1 %v184_v24  ;;  %224 = vmatpush.msra.mxu0 %v646_v23  ;;  %v720_v46 = vld [vmem:[%s1113_s1 + $0x1f8] sm:$0xff]  ;;  %v686_v47 = vld [vmem:[%s1113_s1 + $0x130] sm:$0xff]  ;;  %v708_v49 = vld [vmem:[%s1113_s1 + $0x1a8] sm:$0xff] }
  0x1d   : >> { %335 = vmatpush.msra.mxu3 %v672_v25  ;;  %291 = vmatpush.msra.mxu2 %v658_v26  ;;  %v696_v48 = vld [vmem:[%s1113_s1 + $0x170] sm:$0xff]  ;;  %v685_v51 = vld [vmem:[%s1113_s1 + $0x128] sm:$0xff]  ;;  %v707_v53 = vld [vmem:[%s1113_s1 + $0x1a0] sm:$0xff] }
  0x1e   : >> { %251 = vmatpush.msra.mxu1 %v183_v29  ;;  %225 = vmatpush.msra.mxu0 %v645_v35  ;;  %v719_v50 = vld [vmem:[%s1113_s1 + $0x1f0] sm:$0xff]  ;;  %v695_v52 = vld [vmem:[%s1113_s1 + $0x168] sm:$0xff]  ;;  %v684_v55 = vld [vmem:[%s1113_s1 + $0x120] sm:$0xff] }
  0x1f   : >> { %336 = vmatpush.msra.mxu3 %v671_v30  ;;  %292 = vmatpush.msra.mxu2 %v657_v36  ;;  %v718_v54 = vld [vmem:[%s1113_s1 + $0x1e8] sm:$0xff]  ;;  %v694_v56 = vld [vmem:[%s1113_s1 + $0x160] sm:$0xff]  ;;  %v706_v57 = vld [vmem:[%s1113_s1 + $0x198] sm:$0xff] }
  0x20   : >> { %653 = vmatmul.msk.f32.vlgmr.msra.gmra.mxu0 %vm205_vm2, %v204_v37  ;;  %665 = vmatmul.msk.f32.vlgmr.msra.gmra.mxu2 %vm205_vm2, %v272_v38  ;;  %v717_v58 = vld [vmem:[%s1113_s1 + $0x1e0] sm:$0xff]  ;;  %v683_v59 = vld [vmem:[%s1113_s1 + $0x118] sm:$0xff]  ;;  %v705_v62 = vld [vmem:[%s1113_s1 + $0x190] sm:$0xff] }
  0x21   : >> { %457 = vmatpush.msrb.mxu2 %v710_v39  ;;  %252 = vmatpush.msra.mxu1 %v182_v40  ;;  %v1000_v60 = vld [vmem:[%s889_s17 + $0x18] sm:$0xff]  ;;  %v682_v1 = vld [vmem:[%s1113_s1 + $0x110] sm:$0xff]  ;;  %v704_v5 = vld [vmem:[%s1113_s1 + $0x188] sm:$0xff] }
  0x22   : >> { %337 = vmatpush.msra.mxu3 %v670_v41  ;;  %371 = vmatpush.msrb.mxu0 %v687_v42  ;;  %v693_v61 = vld [vmem:[%s1113_s1 + $0x158] sm:$0xff]  ;;  %v692_v2 = vld [vmem:[%s1113_s1 + $0x150] sm:$0xff]  ;;  %v357_v4 = vrot.slane %v1000_v60, 1  ;;  %v1027_v6 = vld [vmem:[%s889_s17 + $0x20] sm:$0xff]  ;;  %v398_v11 = vrot.slane %v1000_v60, 2 }
  0x23   : >> { %655 = vmatmul.msk.f32.vlgmr.msra.gmra.mxu1 %vm205_vm2, %v180_v27  ;;  %678 = vmatmul.msk.f32.vlgmr.msra.gmra.mxu3 %vm205_vm2, %v944_v43  ;;  %v716_v63 = vld [vmem:[%s1113_s1 + $0x1d8] sm:$0xff]  ;;  %v1030_v7 = vld [vmem:[%s889_s17 + $0x28] sm:$0xff]  ;;  %v715_v8 = vld [vmem:[%s1113_s1 + $0x1d0] sm:$0xff]  ;;  %v483_v16 = vrot.slane %v1027_v6, 1  ;;  %v524_v29 = vrot.slane %v1027_v6, 2 }
  0x24   : >> { %412 = vmatpush.msrb.mxu1 %v697_v44  ;;  %458 = vmatpush.msrb.mxu2 %v709_v45  ;;  %v681_v9 = vld [vmem:[%s1113_s1 + $0x108] sm:$0xff]  ;;  %v703_v13 = vld [vmem:[%s1113_s1 + $0x180] sm:$0xff]  ;;  %v484_v17 = vrot.slane %v1030_v7, 1  ;;  %v358_v18 = vsel %vm201_vm0, %v356_v3, %v357_v4  ;;  %v730_v21 = vld [vmem:[%s1113_s1 + $0x238] sm:$0xff]  ;;  %v399_v22 = vsel %vm269_vm1, %v397_v10, %v398_v11  ;;  %v525_v30 = vrot.slane %v1030_v7, 2 }
  0x25   : >> { %498 = vmatpush.msrb.mxu3 %v720_v46  ;;  %372 = vmatpush.msrb.mxu0 %v686_v47  ;;  %v691_v12 = vld [vmem:[%s1113_s1 + $0x148] sm:$0xff]  ;;  %v680_v15 = vld [vmem:[%s1113_s1 + $0x100] sm:$0xff]  ;;  %v729_v24 = vld [vmem:[%s1113_s1 + $0x230] sm:$0xff] }
  0x26   : >> { %413 = vmatpush.msrb.mxu1 %v696_v48  ;;  %459 = vmatpush.msrb.mxu2 %v708_v49  ;;  %v714_v14 = vld [vmem:[%s1113_s1 + $0x1c8] sm:$0xff]  ;;  %v690_v19 = vld [vmem:[%s1113_s1 + $0x140] sm:$0xff]  ;;  %v485_v23 = vsel %vm201_vm0, %v483_v16, %v484_v17  ;;  %v726_v27 = vld [vmem:[%s1113_s1 + $0x218] sm:$0xff]  ;;  %v526_v33 = vsel %vm269_vm1, %v524_v29, %v525_v30 }
  0x27   : >> { %499 = vmatpush.msrb.mxu3 %v719_v50  ;;  %373 = vmatpush.msrb.mxu0 %v685_v51  ;;  %v713_v20 = vld [vmem:[%s1113_s1 + $0x1c0] sm:$0xff]  ;;  %v728_v25 = vld [vmem:[%s1113_s1 + $0x228] sm:$0xff] }
  0x28   : >> { %414 = vmatpush.msrb.mxu1 %v695_v52  ;;  %460 = vmatpush.msrb.mxu2 %v707_v53  ;;  %v727_v26 = vld [vmem:[%s1113_s1 + $0x220] sm:$0xff]  ;;  %v724_v31 = vld [vmem:[%s1113_s1 + $0x208] sm:$0xff] }
  0x29   : >> { %500 = vmatpush.msrb.mxu3 %v718_v54  ;;  %374 = vmatpush.msrb.mxu0 %v684_v55 }
  0x2a   : >> { %654 = vmatmul.msk.f32.gmra.mxu0 %vm205_vm2, %v203_v32  ;;  %666 = vmatmul.msk.f32.gmra.mxu2 %vm205_vm2, %v271_v34  ;;  %v723_v32 = vld [vmem:[%s1113_s1 + $0x200] sm:$0xff] }
  0x2b   : >> { %415 = vmatpush.msrb.mxu1 %v694_v56  ;;  %461 = vmatpush.msrb.mxu2 %v706_v57 }
  0x2c   : >> { %501 = vmatpush.msrb.mxu3 %v717_v58  ;;  %375 = vmatpush.msrb.mxu0 %v683_v59 }
  0x2d   : >> { %656 = vmatmul.msk.f32.gmra.mxu1 %vm205_vm2, %v911_v28  ;;  %679 = vmatmul.msk.f32.gmra.mxu3 %vm205_vm2, %v1000_v60  ;;  %v725_v28 = vld [vmem:[%s1113_s1 + $0x210] sm:$0xff] }
  0x2e   : >> { %416 = vmatpush.msrb.mxu1 %v693_v61  ;;  %462 = vmatpush.msrb.mxu2 %v705_v62  ;;  %v557_v62 = vperm.slane %v808_v0, 0 }
  0x2f   : >> { %502 = vmatpush.msrb.mxu3 %v716_v63  ;;  %376 = vmatpush.msrb.mxu0 %v682_v1 }
  0x30   : >> { %417 = vmatpush.msrb.mxu1 %v692_v2  ;;  %463 = vmatpush.msrb.mxu2 %v704_v5 }
  0x31   : >> { %503 = vmatpush.msrb.mxu3 %v715_v8  ;;  %377 = vmatpush.msrb.mxu0 %v681_v9 }
  0x32   : >> { %418 = vmatpush.msrb.mxu1 %v691_v12  ;;  %464 = vmatpush.msrb.mxu2 %v703_v13 }
  0x33   : >> { %504 = vmatpush.msrb.mxu3 %v714_v14  ;;  %378 = vmatpush.msrb.mxu0 %v680_v15 }
  0x34   : >> { %688 = vmatmul.msk.f32.vlgmr.msrb.gmra.mxu0 %vm205_vm2, %v358_v18  ;;  %419 = vmatpush.msrb.mxu1 %v690_v19 }
  0x35   : >> { %711 = vmatmul.msk.f32.vlgmr.msrb.gmra.mxu2 %vm205_vm2, %v1027_v6  ;;  %505 = vmatpush.msrb.mxu3 %v713_v20 }
  0x36   : >> { %539 = vmatpush.msra.mxu0 %v730_v21  ;;  %698 = vmatmul.msk.f32.vlgmr.msrb.gmra.mxu1 %vm205_vm2, %v399_v22 }
  0x37   : >> { %721 = vmatmul.msk.f32.vlgmr.msrb.gmra.mxu3 %vm205_vm2, %v485_v23  ;;  %736 = vmatpush.msra.mxu1 %v730_v21 }
  0x38   : >> { %540 = vmatpush.msra.mxu0 %v729_v24 }
  0x39   : >> { %737 = vmatpush.msra.mxu1 %v729_v24 }
  0x3a   : >> { %541 = vmatpush.msra.mxu0 %v728_v25 }
  0x3b   : >> { %738 = vmatpush.msra.mxu1 %v728_v25 }
  0x3c   : >> { %542 = vmatpush.msra.mxu0 %v727_v26 }
  0x3d   : >> { %689 = vmatmul.msk.f32.gmra.mxu0 %vm205_vm2, %v357_v4  ;;  %712 = vmatmul.msk.f32.gmra.mxu2 %vm205_vm2, %v1030_v7 }
  0x3e   : >> { %739 = vmatpush.msra.mxu1 %v727_v26  ;;  %543 = vmatpush.msra.mxu0 %v726_v27 }
  0x3f   : >> { %699 = vmatmul.msk.f32.gmra.mxu1 %vm205_vm2, %v398_v11  ;;  %722 = vmatmul.msk.f32.gmra.mxu3 %vm205_vm2, %v484_v17 }
  0x40   : >> { %740 = vmatpush.msra.mxu1 %v726_v27  ;;  %544 = vmatpush.msra.mxu0 %v725_v28 }
  0x42   : >> { %741 = vmatpush.msra.mxu1 %v725_v28  ;;  %545 = vmatpush.msra.mxu0 %v724_v31 }
  0x44   : >> { %742 = vmatpush.msra.mxu1 %v724_v31  ;;  %546 = vmatpush.msra.mxu0 %v723_v32 }
  0x45   : >> { %731 = vmatmul.msk.f32.vlgmr.msra.gmra.mxu0 %vm205_vm2, %v526_v33 }
  0x46   : >> { %743 = vmatpush.msra.mxu1 %v723_v32 }
  0x47   : >> { %732 = vmatmul.msk.f32.vlgmr.msra.gmra.mxu1 %vm205_vm2, %v525_v30 }
  0x9d   : >> { %v227_v34 = vpop.f32.mrf.mxu0 }
  0xa0   : >> { %v254_v35 = vpop.f32.mrf.mxu1 }
  0xa1   : >> { %v255_v41 = vadd.f32 %v254_v35, %v227_v34 }
  0xa3   : >> { %v294_v36 = vpop.f32.mrf.mxu2 }
  0xa4   : >> { %v300_v43 = vadd.f32 %v294_v36, %v255_v41 }
  0xa6   : >> { %v339_v37 = vpop.f32.mrf.mxu3 }
  0xa7   : >> { %v230_v38 = vpop.f32.mrf.mxu0  ;;  %v345_v47 = vadd.f32 %v339_v37, %v300_v43 }
  0xaa   : >> { %v257_v39 = vpop.f32.mrf.mxu1 }
  0xab   : >> { %v258_v45 = vadd.f32 %v257_v39, %v230_v38 }
  0xad   : >> { %v297_v40 = vpop.f32.mrf.mxu2 }
  0xae   : >> { %v301_v48 = vadd.f32 %v297_v40, %v258_v45 }
  0xb0   : >> { %v342_v42 = vpop.f32.mrf.mxu3 }
  0xb1   : >> { %v380_v44 = vpop.f32.mrf.mxu0  ;;  %v346_v51 = vadd.f32 %v342_v42, %v301_v48 }
  0xb2   : >> { %v386_v49 = vadd.f32 %v380_v44, %v345_v47 }
  0xb3   : >> { %v421_v46 = vpop.f32.mrf.mxu1 }
  0xb4   : >> { %v427_v54 = vadd.f32 %v421_v46, %v386_v49 }
  0xb8   : >> { %v466_v50 = vpop.f32.mrf.mxu2 }
  0xb9   : >> { %v472_v57 = vadd.f32 %v466_v50, %v427_v54 }
  0xba   : >> { %v383_v52 = vpop.f32.mrf.mxu0  ;;  %v507_v53 = vpop.f32.mrf.mxu3 }
  0xbb   : >> { %v387_v55 = vadd.f32 %v383_v52, %v346_v51  ;;  %v513_v60 = vadd.f32 %v507_v53, %v472_v57 }
  0xbc   : >> { %v424_v56 = vpop.f32.mrf.mxu1 }
  0xbd   : >> { %v428_v58 = vadd.f32 %v424_v56, %v387_v55 }
  0xc0   : >> { %v469_v59 = vpop.f32.mrf.mxu2 }
  0xc1   : >> { %v473_v61 = vadd.f32 %v469_v59, %v428_v58 }
  0xc2   : >> { %v510_v63 = vpop.f32.mrf.mxu3  ;;  %v548_v1 = vpop.f32.mrf.mxu0 }
  0xc3   : >> { %v514_v2 = vadd.f32 %v510_v63, %v473_v61  ;;  %v554_v3 = vadd.f32 %v548_v1, %v513_v60 }
  0xc4   : >> { %v551_v4 = vpop.f32.mrf.mxu1 }
  0xc5   : >> { %v559_v5 = vadd.f32 %v557_v62, %v554_v3  ;;  %v555_v6 = vadd.f32 %v551_v4, %v514_v2 }
  0xc7   : >> { %v561_v7 = vmax.f32 %v559_v5, 0.0  ;;  %v560_v8 = vadd.f32 %v557_v62, %v555_v6  ;;  %176 = sbr.rel (!%p174_p4) target bundleno = 15 (0xf), region = 81 }
  0xc9   : >> { %564 = vst [vmem:[%s563_s14] sm:$0xff] %v561_v7  ;;  %v562_v9 = vmax.f32 %v560_v8, 0.0 }
  0xcb   : >> { %565 = vst [vmem:[%s563_s14 + $0x8] sm:$0x3f] %v562_v9 }
  0xcc PF: > { %s13_s12 = sadd.s32 1, %s771_s12  }
  0xcd   : > { %p10_p5 = scmp.ge.s32.totalorder %s13_s12, 4  }
  0xcf   :  { %12 = sbr.rel (!%p10_p5) target bundleno = 1 (0x1), region = 92 }

// kernel: encoder_cnn.13
= control target key start
LH: loop header
LB: loop body
LE: loop exit
PB: predicated region body
PF: predicated region fallthrough
CT: control target
= control target key end

     0   :  { %s898_s12 = smov 0   ;;  %s1424_s0 = inlined_call_operand.vmem [shape: f32[2,16,16,128], index: 0, kind: input, shape index: {}]   ;;  %s1425_s1 = inlined_call_operand.vmem [shape: f32[9,128,128], index: 1, kind: input, shape index: {}]   ;;  %s1426_s2 = inlined_call_operand.vmem [shape: f32[1,128], index: 2, kind: input, shape index: {}]   ;;  %s1427_s3 = inlined_call_operand.vmem [shape: f32[2,14,14,128], index: 3, kind: output, shape index: {}]  }
   0x1 LB: > { %s683_s13 = sadd.s32 4294967295, %s872_s12   ;;  %p687_p0 = scmp.ge.s32.totalorder %s872_s12, 1  ;;  %s872_s12 = sphi %s898_s12, %s13_s12  }
   0x2   : > { %p137_p1 = scmp.lt.s32.totalorder %s872_s12, 3 }
   0x4   : > { %p138_p2 = pnand %p687_p0, %p137_p1 }
   0x5   : > { %p161_p3 = scmp.lt.s32.totalorder (!%p138_p2), %s683_s13, 1  ;;  %s921_s24 = smov (!%p138_p2), 0  }
   0x6   : > { %141 = sbr.rel (%p138_p2) target bundleno = 248 (0xf8), region = 32 }
   0xb   : > { %v909_v0 = vld [vmem:[%s1426_s2] sm:$0x1]  ;;  %s1429_s13 = smov (!%p161_p3, %s683_s13), 1 }
   0xc   : > { %s828_s16 = sshll.u32 %s1429_s13, 8  ;;  %s845_s17 = smul.u32 224, %s1429_s13 }
   0xd   : > { %s914_s20 = scalar_lea.vmem %s1424_s0, %s828_s16 }
   0xe   : > { %s919_s23 = scalar_lea.vmem %s1427_s3, %s845_s17 }
   0xf LB: >> { %v707_v1 = vld [vmem:[%s1425_s1 + $0xf8] sm:$0xff]  ;;  %v706_v3 = vld [vmem:[%s1425_s1 + $0xf0] sm:$0xff]  ;;  %v705_v6 = vld [vmem:[%s1425_s1 + $0xe8] sm:$0xff]  ;;  %s691_s6 = sshll.u32 %s876_s24, 4  ;;  %vm286_vm0 = vcmask 1045504   ;;  %vm217_vm1 = vcmask 1046528   ;;  %s876_s24 = sphi %s921_s24, %s177_s24  }
  0x10   : >> { %v197_v2 = vld [vmem:[%s1425_s1 + $0x78] sm:$0xff]  ;;  %223 = vmatpush.msra.mxu0 %v707_v1  ;;  %v196_v4 = vld [vmem:[%s1425_s1 + $0x70] sm:$0xff]  ;;  %v195_v7 = vld [vmem:[%s1425_s1 + $0x68] sm:$0xff]  ;;  %s1167_s21 = scalar_lea.vmem %s914_s20, %s691_s6  ;;  %s610_s26 = scalar_lea.vmem %s919_s23, %s691_s6 }
  0x11   : >> { %246 = vmatpush.msra.mxu1 %v197_v2  ;;  %v723_v5 = vld [vmem:[%s1425_s1 + $0x178] sm:$0xff]  ;;  %v722_v8 = vld [vmem:[%s1425_s1 + $0x170] sm:$0xff]  ;;  %v721_v10 = vld [vmem:[%s1425_s1 + $0x168] sm:$0xff]  ;;  %s177_s24 = sadd.s32 1, %s876_s24  }
  0x12   : >> { %292 = vmatpush.msra.mxu2 %v723_v5  ;;  %v742_v9 = vld [vmem:[%s1425_s1 + $0x1f8] sm:$0xff]  ;;  %224 = vmatpush.msra.mxu0 %v706_v3  ;;  %v704_v11 = vld [vmem:[%s1425_s1 + $0xe0] sm:$0xff]  ;;  %v741_v13 = vld [vmem:[%s1425_s1 + $0x1f0] sm:$0xff]  ;;  %p174_p4 = scmp.ge.s32.totalorder %s177_s24, 14  }
  0x13   : >> { %247 = vmatpush.msra.mxu1 %v196_v4  ;;  %339 = vmatpush.msra.mxu3 %v742_v9  ;;  %v194_v12 = vld [vmem:[%s1425_s1 + $0x60] sm:$0xff]  ;;  %v740_v15 = vld [vmem:[%s1425_s1 + $0x1e8] sm:$0xff]  ;;  %v703_v16 = vld [vmem:[%s1425_s1 + $0xd8] sm:$0xff] }
  0x14   : >> { %293 = vmatpush.msra.mxu2 %v722_v8  ;;  %225 = vmatpush.msra.mxu0 %v705_v6  ;;  %v720_v14 = vld [vmem:[%s1425_s1 + $0x160] sm:$0xff]  ;;  %v193_v17 = vld [vmem:[%s1425_s1 + $0x58] sm:$0xff]  ;;  %v702_v20 = vld [vmem:[%s1425_s1 + $0xd0] sm:$0xff] }
  0x15   : >> { %248 = vmatpush.msra.mxu1 %v195_v7  ;;  %340 = vmatpush.msra.mxu3 %v741_v13  ;;  %v719_v18 = vld [vmem:[%s1425_s1 + $0x158] sm:$0xff]  ;;  %v739_v19 = vld [vmem:[%s1425_s1 + $0x1e0] sm:$0xff]  ;;  %v192_v21 = vld [vmem:[%s1425_s1 + $0x50] sm:$0xff] }
  0x16   : >> { %294 = vmatpush.msra.mxu2 %v721_v10  ;;  %226 = vmatpush.msra.mxu0 %v704_v11  ;;  %v718_v22 = vld [vmem:[%s1425_s1 + $0x150] sm:$0xff]  ;;  %v738_v23 = vld [vmem:[%s1425_s1 + $0x1d8] sm:$0xff]  ;;  %v701_v24 = vld [vmem:[%s1425_s1 + $0xc8] sm:$0xff] }
  0x17   : >> { %249 = vmatpush.msra.mxu1 %v194_v12  ;;  %341 = vmatpush.msra.mxu3 %v740_v15  ;;  %v191_v25 = vld [vmem:[%s1425_s1 + $0x48] sm:$0xff]  ;;  %v737_v27 = vld [vmem:[%s1425_s1 + $0x1d0] sm:$0xff]  ;;  %v700_v28 = vld [vmem:[%s1425_s1 + $0xc0] sm:$0xff] }
  0x18   : >> { %295 = vmatpush.msra.mxu2 %v720_v14  ;;  %227 = vmatpush.msra.mxu0 %v703_v16  ;;  %v717_v26 = vld [vmem:[%s1425_s1 + $0x148] sm:$0xff]  ;;  %v190_v29 = vld [vmem:[%s1425_s1 + $0x40] sm:$0xff]  ;;  %v699_v32 = vld [vmem:[%s1425_s1 + $0xb8] sm:$0xff] }
  0x19   : >> { %250 = vmatpush.msra.mxu1 %v193_v17  ;;  %342 = vmatpush.msra.mxu3 %v739_v19  ;;  %v716_v30 = vld [vmem:[%s1425_s1 + $0x140] sm:$0xff]  ;;  %v736_v31 = vld [vmem:[%s1425_s1 + $0x1c8] sm:$0xff]  ;;  %v189_v33 = vld [vmem:[%s1425_s1 + $0x38] sm:$0xff] }
  0x1a   : >> { %296 = vmatpush.msra.mxu2 %v719_v18  ;;  %228 = vmatpush.msra.mxu0 %v702_v20  ;;  %v715_v34 = vld [vmem:[%s1425_s1 + $0x138] sm:$0xff]  ;;  %v735_v35 = vld [vmem:[%s1425_s1 + $0x1c0] sm:$0xff]  ;;  %v698_v36 = vld [vmem:[%s1425_s1 + $0xb0] sm:$0xff] }
  0x1b   : >> { %251 = vmatpush.msra.mxu1 %v192_v21  ;;  %343 = vmatpush.msra.mxu3 %v738_v23  ;;  %v188_v37 = vld [vmem:[%s1425_s1 + $0x30] sm:$0xff]  ;;  %v734_v39 = vld [vmem:[%s1425_s1 + $0x1b8] sm:$0xff]  ;;  %v697_v40 = vld [vmem:[%s1425_s1 + $0xa8] sm:$0xff] }
  0x1c   : >> { %297 = vmatpush.msra.mxu2 %v718_v22  ;;  %229 = vmatpush.msra.mxu0 %v701_v24  ;;  %v714_v38 = vld [vmem:[%s1425_s1 + $0x130] sm:$0xff]  ;;  %v187_v41 = vld [vmem:[%s1425_s1 + $0x28] sm:$0xff]  ;;  %v696_v44 = vld [vmem:[%s1425_s1 + $0xa0] sm:$0xff] }
  0x1d   : >> { %252 = vmatpush.msra.mxu1 %v191_v25  ;;  %344 = vmatpush.msra.mxu3 %v737_v27  ;;  %v713_v42 = vld [vmem:[%s1425_s1 + $0x128] sm:$0xff]  ;;  %v733_v43 = vld [vmem:[%s1425_s1 + $0x1b0] sm:$0xff]  ;;  %v186_v45 = vld [vmem:[%s1425_s1 + $0x20] sm:$0xff] }
  0x1e   : >> { %298 = vmatpush.msra.mxu2 %v717_v26  ;;  %230 = vmatpush.msra.mxu0 %v700_v28  ;;  %v712_v46 = vld [vmem:[%s1425_s1 + $0x120] sm:$0xff]  ;;  %v732_v47 = vld [vmem:[%s1425_s1 + $0x1a8] sm:$0xff]  ;;  %v695_v48 = vld [vmem:[%s1425_s1 + $0x98] sm:$0xff] }
  0x1f   : >> { %253 = vmatpush.msra.mxu1 %v190_v29  ;;  %345 = vmatpush.msra.mxu3 %v736_v31  ;;  %v185_v49 = vld [vmem:[%s1425_s1 + $0x18] sm:$0xff]  ;;  %v731_v51 = vld [vmem:[%s1425_s1 + $0x1a0] sm:$0xff]  ;;  %v694_v52 = vld [vmem:[%s1425_s1 + $0x90] sm:$0xff] }
  0x20   : >> { %299 = vmatpush.msra.mxu2 %v716_v30  ;;  %231 = vmatpush.msra.mxu0 %v699_v32  ;;  %v711_v50 = vld [vmem:[%s1425_s1 + $0x118] sm:$0xff]  ;;  %v184_v53 = vld [vmem:[%s1425_s1 + $0x10] sm:$0xff]  ;;  %v693_v56 = vld [vmem:[%s1425_s1 + $0x88] sm:$0xff] }
  0x21   : >> { %254 = vmatpush.msra.mxu1 %v189_v33  ;;  %346 = vmatpush.msra.mxu3 %v735_v35  ;;  %v710_v54 = vld [vmem:[%s1425_s1 + $0x110] sm:$0xff]  ;;  %v730_v55 = vld [vmem:[%s1425_s1 + $0x198] sm:$0xff]  ;;  %v183_v57 = vld [vmem:[%s1425_s1 + $0x8] sm:$0xff] }
  0x22   : >> { %300 = vmatpush.msra.mxu2 %v715_v34  ;;  %232 = vmatpush.msra.mxu0 %v698_v36  ;;  %v709_v58 = vld [vmem:[%s1425_s1 + $0x108] sm:$0xff]  ;;  %v729_v59 = vld [vmem:[%s1425_s1 + $0x190] sm:$0xff]  ;;  %v692_v60 = vld [vmem:[%s1425_s1 + $0x80] sm:$0xff] }
  0x23   : >> { %255 = vmatpush.msra.mxu1 %v188_v37  ;;  %347 = vmatpush.msra.mxu3 %v734_v39  ;;  %v182_v61 = vld [vmem:[%s1425_s1] sm:$0xff]  ;;  %v758_v62 = vld [vmem:[%s1425_s1 + $0x278] sm:$0xff]  ;;  %v728_v2 = vld [vmem:[%s1425_s1 + $0x188] sm:$0xff] }
  0x24   : >> { %301 = vmatpush.msra.mxu2 %v714_v38  ;;  %233 = vmatpush.msra.mxu0 %v697_v40  ;;  %v774_v63 = vld [vmem:[%s1425_s1 + $0x2f8] sm:$0xff]  ;;  %v708_v1 = vld [vmem:[%s1425_s1 + $0x100] sm:$0xff]  ;;  %v757_v3 = vld [vmem:[%s1425_s1 + $0x270] sm:$0xff] }
  0x25   : >> { %256 = vmatpush.msra.mxu1 %v187_v41  ;;  %348 = vmatpush.msra.mxu3 %v733_v43  ;;  %v773_v4 = vld [vmem:[%s1425_s1 + $0x2f0] sm:$0xff]  ;;  %v793_v5 = vld [vmem:[%s1425_s1 + $0x378] sm:$0xff]  ;;  %v727_v6 = vld [vmem:[%s1425_s1 + $0x180] sm:$0xff] }
  0x26   : >> { %302 = vmatpush.msra.mxu2 %v713_v42  ;;  %234 = vmatpush.msra.mxu0 %v696_v44  ;;  %v756_v7 = vld [vmem:[%s1425_s1 + $0x268] sm:$0xff]  ;;  %v792_v9 = vld [vmem:[%s1425_s1 + $0x370] sm:$0xff]  ;;  %v809_v10 = vld [vmem:[%s1425_s1 + $0x3f8] sm:$0xff] }
  0x27   : >> { %257 = vmatpush.msra.mxu1 %v186_v45  ;;  %349 = vmatpush.msra.mxu3 %v732_v47  ;;  %v772_v8 = vld [vmem:[%s1425_s1 + $0x2e8] sm:$0xff]  ;;  %v755_v11 = vld [vmem:[%s1425_s1 + $0x260] sm:$0xff]  ;;  %v808_v14 = vld [vmem:[%s1425_s1 + $0x3f0] sm:$0xff] }
  0x28   : >> { %303 = vmatpush.msra.mxu2 %v712_v46  ;;  %235 = vmatpush.msra.mxu0 %v695_v48  ;;  %v771_v12 = vld [vmem:[%s1425_s1 + $0x2e0] sm:$0xff]  ;;  %v791_v13 = vld [vmem:[%s1425_s1 + $0x368] sm:$0xff]  ;;  %v754_v15 = vld [vmem:[%s1425_s1 + $0x258] sm:$0xff] }
  0x29   : >> { %258 = vmatpush.msra.mxu1 %v185_v49  ;;  %350 = vmatpush.msra.mxu3 %v731_v51  ;;  %v770_v16 = vld [vmem:[%s1425_s1 + $0x2d8] sm:$0xff]  ;;  %v790_v17 = vld [vmem:[%s1425_s1 + $0x360] sm:$0xff]  ;;  %v807_v18 = vld [vmem:[%s1425_s1 + $0x3e8] sm:$0xff] }
  0x2a   : >> { %304 = vmatpush.msra.mxu2 %v711_v50  ;;  %236 = vmatpush.msra.mxu0 %v694_v52  ;;  %v753_v19 = vld [vmem:[%s1425_s1 + $0x250] sm:$0xff]  ;;  %v789_v21 = vld [vmem:[%s1425_s1 + $0x358] sm:$0xff]  ;;  %v806_v22 = vld [vmem:[%s1425_s1 + $0x3e0] sm:$0xff] }
  0x2b   : >> { %259 = vmatpush.msra.mxu1 %v184_v53  ;;  %351 = vmatpush.msra.mxu3 %v730_v55  ;;  %v769_v20 = vld [vmem:[%s1425_s1 + $0x2d0] sm:$0xff]  ;;  %v1188_v23 = vld [vmem:[%s1167_s21] sm:$0xff]  ;;  %v1191_v24 = vld [vmem:[%s1167_s21 + $0x8] sm:$0xff] }
  0x2c   : >> { %305 = vmatpush.msra.mxu2 %v710_v54  ;;  %237 = vmatpush.msra.mxu0 %v693_v56  ;;  %v752_v25 = vld [vmem:[%s1425_s1 + $0x248] sm:$0xff]  ;;  %v788_v27 = vld [vmem:[%s1425_s1 + $0x350] sm:$0xff]  ;;  %v805_v28 = vld [vmem:[%s1425_s1 + $0x3d8] sm:$0xff]  ;;  %v287_v31 = vrot.slane %v1188_v23, 2  ;;  %v288_v32 = vrot.slane %v1191_v24, 2  ;;  %v218_v37 = vrot.slane %v1188_v23, 1 }
  0x2d   : >> { %260 = vmatpush.msra.mxu1 %v183_v57  ;;  %352 = vmatpush.msra.mxu3 %v729_v59  ;;  %v768_v26 = vld [vmem:[%s1425_s1 + $0x2c8] sm:$0xff]  ;;  %v751_v29 = vld [vmem:[%s1425_s1 + $0x240] sm:$0xff]  ;;  %v804_v34 = vld [vmem:[%s1425_s1 + $0x3d0] sm:$0xff]  ;;  %v219_v38 = vrot.slane %v1191_v24, 1 }
  0x2e   : >> { %306 = vmatpush.msra.mxu2 %v709_v58  ;;  %238 = vmatpush.msra.mxu0 %v692_v60  ;;  %v767_v30 = vld [vmem:[%s1425_s1 + $0x2c0] sm:$0xff]  ;;  %v787_v33 = vld [vmem:[%s1425_s1 + $0x348] sm:$0xff]  ;;  %v750_v35 = vld [vmem:[%s1425_s1 + $0x238] sm:$0xff]  ;;  %v289_v41 = vsel %vm286_vm0, %v287_v31, %v288_v32 }
  0x2f   : >> { %261 = vmatpush.msra.mxu1 %v182_v61  ;;  %353 = vmatpush.msra.mxu3 %v728_v2  ;;  %v766_v36 = vld [vmem:[%s1425_s1 + $0x2b8] sm:$0xff]  ;;  %v786_v39 = vld [vmem:[%s1425_s1 + $0x340] sm:$0xff]  ;;  %v803_v40 = vld [vmem:[%s1425_s1 + $0x3c8] sm:$0xff]  ;;  %v220_v46 = vsel %vm217_vm1, %v218_v37, %v219_v38 }
  0x30   : >> { %388 = vmatpush.msrb.mxu0 %v758_v62  ;;  %307 = vmatpush.msra.mxu2 %v708_v1  ;;  %v749_v42 = vld [vmem:[%s1425_s1 + $0x230] sm:$0xff]  ;;  %v785_v44 = vld [vmem:[%s1425_s1 + $0x338] sm:$0xff]  ;;  %v802_v45 = vld [vmem:[%s1425_s1 + $0x3c0] sm:$0xff] }
  0x31   : >> { %435 = vmatpush.msrb.mxu1 %v774_v63  ;;  %354 = vmatpush.msra.mxu3 %v727_v6  ;;  %v765_v43 = vld [vmem:[%s1425_s1 + $0x2b0] sm:$0xff]  ;;  %v748_v48 = vld [vmem:[%s1425_s1 + $0x228] sm:$0xff]  ;;  %v801_v51 = vld [vmem:[%s1425_s1 + $0x3b8] sm:$0xff] }
  0x32   : >> { %389 = vmatpush.msrb.mxu0 %v757_v3  ;;  %482 = vmatpush.msrb.mxu2 %v793_v5  ;;  %v1252_v47 = vld [vmem:[%s1167_s21 + $0x10] sm:$0xff]  ;;  %v764_v49 = vld [vmem:[%s1425_s1 + $0x2a8] sm:$0xff]  ;;  %v747_v52 = vld [vmem:[%s1425_s1 + $0x220] sm:$0xff] }
  0x33   : >> { %436 = vmatpush.msrb.mxu1 %v773_v4  ;;  %531 = vmatpush.msrb.mxu3 %v809_v10  ;;  %v784_v50 = vld [vmem:[%s1425_s1 + $0x330] sm:$0xff]  ;;  %v763_v53 = vld [vmem:[%s1425_s1 + $0x2a0] sm:$0xff]  ;;  %v783_v54 = vld [vmem:[%s1425_s1 + $0x328] sm:$0xff] }
  0x34   : >> { %390 = vmatpush.msrb.mxu0 %v756_v7  ;;  %483 = vmatpush.msrb.mxu2 %v792_v9  ;;  %v800_v55 = vld [vmem:[%s1425_s1 + $0x3b0] sm:$0xff]  ;;  %v746_v56 = vld [vmem:[%s1425_s1 + $0x218] sm:$0xff]  ;;  %v782_v58 = vld [vmem:[%s1425_s1 + $0x320] sm:$0xff] }
  0x35   : >> { %437 = vmatpush.msrb.mxu1 %v772_v8  ;;  %532 = vmatpush.msrb.mxu3 %v808_v14  ;;  %v762_v57 = vld [vmem:[%s1425_s1 + $0x298] sm:$0xff]  ;;  %v799_v59 = vld [vmem:[%s1425_s1 + $0x3a8] sm:$0xff]  ;;  %v745_v60 = vld [vmem:[%s1425_s1 + $0x210] sm:$0xff] }
  0x36   : >> { %391 = vmatpush.msrb.mxu0 %v755_v11  ;;  %484 = vmatpush.msrb.mxu2 %v791_v13  ;;  %v761_v61 = vld [vmem:[%s1425_s1 + $0x290] sm:$0xff]  ;;  %v781_v62 = vld [vmem:[%s1425_s1 + $0x318] sm:$0xff]  ;;  %v798_v63 = vld [vmem:[%s1425_s1 + $0x3a0] sm:$0xff]  ;;  %v383_v13 = vrot.slane %v1252_v47, 1 }
  0x37   : >> { %438 = vmatpush.msrb.mxu1 %v771_v12  ;;  %533 = vmatpush.msrb.mxu3 %v807_v18  ;;  %v1307_v1 = vld [vmem:[%s1167_s21 + $0x18] sm:$0xff]  ;;  %v744_v2 = vld [vmem:[%s1425_s1 + $0x208] sm:$0xff]  ;;  %v780_v4 = vld [vmem:[%s1425_s1 + $0x310] sm:$0xff] }
  0x38   : >> { %392 = vmatpush.msrb.mxu0 %v754_v15  ;;  %485 = vmatpush.msrb.mxu2 %v790_v17  ;;  %v760_v3 = vld [vmem:[%s1425_s1 + $0x288] sm:$0xff]  ;;  %v797_v5 = vld [vmem:[%s1425_s1 + $0x398] sm:$0xff]  ;;  %v743_v6 = vld [vmem:[%s1425_s1 + $0x200] sm:$0xff]  ;;  %v384_v14 = vrot.slane %v1307_v1, 1 }
  0x39   : >> { %439 = vmatpush.msrb.mxu1 %v770_v16  ;;  %534 = vmatpush.msrb.mxu3 %v806_v22  ;;  %v759_v7 = vld [vmem:[%s1425_s1 + $0x280] sm:$0xff]  ;;  %v1334_v9 = vld [vmem:[%s1167_s21 + $0x28] sm:$0xff]  ;;  %v796_v11 = vld [vmem:[%s1425_s1 + $0x390] sm:$0xff] }
  0x3a   : >> { %393 = vmatpush.msrb.mxu0 %v753_v19  ;;  %486 = vmatpush.msrb.mxu2 %v789_v21  ;;  %v1331_v8 = vld [vmem:[%s1167_s21 + $0x20] sm:$0xff]  ;;  %v779_v10 = vld [vmem:[%s1425_s1 + $0x308] sm:$0xff]  ;;  %v825_v12 = vld [vmem:[%s1425_s1 + $0x478] sm:$0xff]  ;;  %v527_v18 = vrot.slane %v1334_v9, 1  ;;  %v431_v21 = vrot.slane %v1307_v1, 2 }
  0x3b   : >> { %440 = vmatpush.msrb.mxu1 %v769_v20  ;;  %535 = vmatpush.msrb.mxu3 %v805_v28  ;;  %v778_v15 = vld [vmem:[%s1425_s1 + $0x300] sm:$0xff]  ;;  %v795_v16 = vld [vmem:[%s1425_s1 + $0x388] sm:$0xff]  ;;  %v526_v17 = vrot.slane %v1331_v8, 1  ;;  %v824_v19 = vld [vmem:[%s1425_s1 + $0x470] sm:$0xff]  ;;  %v430_v20 = vrot.slane %v1252_v47, 2 }
  0x3c   : >> { %394 = vmatpush.msrb.mxu0 %v752_v25  ;;  %487 = vmatpush.msrb.mxu2 %v788_v27  ;;  %v794_v22 = vld [vmem:[%s1425_s1 + $0x380] sm:$0xff]  ;;  %v821_v28 = vld [vmem:[%s1425_s1 + $0x458] sm:$0xff]  ;;  %v812_v37 = vld [vmem:[%s1425_s1 + $0x410] sm:$0xff] }
  0x3d   : >> { %441 = vmatpush.msrb.mxu1 %v768_v26  ;;  %536 = vmatpush.msrb.mxu3 %v804_v34  ;;  %v528_v25 = vsel %vm217_vm1, %v526_v17, %v527_v18  ;;  %v822_v26 = vld [vmem:[%s1425_s1 + $0x460] sm:$0xff]  ;;  %v432_v27 = vsel %vm286_vm0, %v430_v20, %v431_v21  ;;  %v815_v34 = vld [vmem:[%s1425_s1 + $0x428] sm:$0xff] }
  0x3e   : >> { %395 = vmatpush.msrb.mxu0 %v751_v29  ;;  %488 = vmatpush.msrb.mxu2 %v787_v33  ;;  %v820_v29 = vld [vmem:[%s1425_s1 + $0x450] sm:$0xff]  ;;  %v818_v31 = vld [vmem:[%s1425_s1 + $0x440] sm:$0xff] }
  0x3f   : >> { %442 = vmatpush.msrb.mxu1 %v767_v30  ;;  %537 = vmatpush.msrb.mxu3 %v803_v40  ;;  %v819_v30 = vld [vmem:[%s1425_s1 + $0x448] sm:$0xff]  ;;  %v816_v33 = vld [vmem:[%s1425_s1 + $0x430] sm:$0xff] }
  0x40   : >> { %396 = vmatpush.msrb.mxu0 %v750_v35  ;;  %489 = vmatpush.msrb.mxu2 %v786_v39  ;;  %v814_v35 = vld [vmem:[%s1425_s1 + $0x420] sm:$0xff]  ;;  %v574_v39 = vrot.slane %v1334_v9, 2  ;;  %v811_v40 = vld [vmem:[%s1425_s1 + $0x408] sm:$0xff] }
  0x41   : >> { %443 = vmatpush.msrb.mxu1 %v766_v36  ;;  %308 = vmatmul.f32.vlgmr.msra.gmra.mxu2 %v289_v41  ;;  %v813_v36 = vld [vmem:[%s1425_s1 + $0x418] sm:$0xff]  ;;  %v810_v41 = vld [vmem:[%s1425_s1 + $0x400] sm:$0xff] }
  0x42   : >> { %397 = vmatpush.msrb.mxu0 %v749_v42  ;;  %490 = vmatpush.msrb.mxu2 %v785_v44 }
  0x43   : >> { %444 = vmatpush.msrb.mxu1 %v765_v43  ;;  %538 = vmatpush.msrb.mxu3 %v802_v45 }
  0x44   : >> { %239 = vmatmul.f32.vlgmr.msra.gmra.mxu0 %v220_v46  ;;  %355 = vmatmul.f32.vlgmr.msra.gmra.mxu3 %v1252_v47 }
  0x45   : >> { %398 = vmatpush.msrb.mxu0 %v748_v48  ;;  %445 = vmatpush.msrb.mxu1 %v764_v49 }
  0x46   : >> { %491 = vmatpush.msrb.mxu2 %v784_v50  ;;  %539 = vmatpush.msrb.mxu3 %v801_v51 }
  0x47   : >> { %262 = vmatmul.f32.vlgmr.msra.gmra.mxu1 %v1188_v23  ;;  %399 = vmatpush.msrb.mxu0 %v747_v52  ;;  %v823_v23 = vld [vmem:[%s1425_s1 + $0x468] sm:$0xff] }
  0x48   : >> { %446 = vmatpush.msrb.mxu1 %v763_v53  ;;  %492 = vmatpush.msrb.mxu2 %v783_v54 }
  0x49   : >> { %540 = vmatpush.msrb.mxu3 %v800_v55  ;;  %400 = vmatpush.msrb.mxu0 %v746_v56 }
  0x4a   : >> { %447 = vmatpush.msrb.mxu1 %v762_v57  ;;  %493 = vmatpush.msrb.mxu2 %v782_v58 }
  0x4b   : >> { %541 = vmatpush.msrb.mxu3 %v799_v59  ;;  %311 = vmatmul.f32.gmra.mxu2 %v288_v32  ;;  %v817_v32 = vld [vmem:[%s1425_s1 + $0x438] sm:$0xff] }
  0x4c   : >> { %401 = vmatpush.msrb.mxu0 %v745_v60  ;;  %448 = vmatpush.msrb.mxu1 %v761_v61 }
  0x4d   : >> { %494 = vmatpush.msrb.mxu2 %v781_v62  ;;  %542 = vmatpush.msrb.mxu3 %v798_v63 }
  0x4e   : >> { %242 = vmatmul.f32.gmra.mxu0 %v219_v38  ;;  %358 = vmatmul.f32.gmra.mxu3 %v1307_v1  ;;  %v573_v38 = vrot.slane %v1331_v8, 2 }
  0x4f   : >> { %402 = vmatpush.msrb.mxu0 %v744_v2  ;;  %449 = vmatpush.msrb.mxu1 %v760_v3 }
  0x50   : >> { %495 = vmatpush.msrb.mxu2 %v780_v4  ;;  %543 = vmatpush.msrb.mxu3 %v797_v5  ;;  %v575_v42 = vsel %vm286_vm0, %v573_v38, %v574_v39 }
  0x51   : >> { %265 = vmatmul.f32.gmra.mxu1 %v1191_v24  ;;  %403 = vmatpush.msrb.mxu0 %v743_v6  ;;  %v385_v24 = vsel %vm217_vm1, %v383_v13, %v384_v14 }
  0x52   : >> { %450 = vmatpush.msrb.mxu1 %v759_v7  ;;  %496 = vmatpush.msrb.mxu2 %v779_v10  ;;  %v604_v10 = vperm.slane %v909_v0, 0 }
  0x53   : >> { %544 = vmatpush.msrb.mxu3 %v796_v11  ;;  %578 = vmatpush.msra.mxu0 %v825_v12 }
  0x54   : >> { %829 = vmatpush.msra.mxu1 %v825_v12  ;;  %497 = vmatpush.msrb.mxu2 %v778_v15 }
  0x55   : >> { %545 = vmatpush.msrb.mxu3 %v795_v16  ;;  %579 = vmatpush.msra.mxu0 %v824_v19 }
  0x56   : >> { %830 = vmatpush.msra.mxu1 %v824_v19  ;;  %498 = vmatmul.f32.vlgmr.msrb.gmra.mxu2 %v1331_v8 }
  0x57   : >> { %546 = vmatpush.msrb.mxu3 %v794_v22  ;;  %580 = vmatpush.msra.mxu0 %v823_v23 }
  0x58   : >> { %831 = vmatpush.msra.mxu1 %v823_v23  ;;  %404 = vmatmul.f32.vlgmr.msrb.gmra.mxu0 %v385_v24 }
  0x59   : >> { %547 = vmatmul.f32.vlgmr.msrb.gmra.mxu3 %v528_v25  ;;  %581 = vmatpush.msra.mxu0 %v822_v26 }
  0x5a   : >> { %832 = vmatpush.msra.mxu1 %v822_v26 }
  0x5b   : >> { %451 = vmatmul.f32.vlgmr.msrb.gmra.mxu1 %v432_v27  ;;  %582 = vmatpush.msra.mxu0 %v821_v28 }
  0x5c   : >> { %833 = vmatpush.msra.mxu1 %v821_v28 }
  0x5d   : >> { %583 = vmatpush.msra.mxu0 %v820_v29 }
  0x5e   : >> { %834 = vmatpush.msra.mxu1 %v820_v29  ;;  %501 = vmatmul.f32.gmra.mxu2 %v1334_v9 }
  0x5f   : >> { %584 = vmatpush.msra.mxu0 %v819_v30 }
  0x60   : >> { %835 = vmatpush.msra.mxu1 %v819_v30  ;;  %407 = vmatmul.f32.gmra.mxu0 %v384_v14 }
  0x61   : >> { %550 = vmatmul.f32.gmra.mxu3 %v527_v18  ;;  %585 = vmatpush.msra.mxu0 %v818_v31 }
  0x62   : >> { %836 = vmatpush.msra.mxu1 %v818_v31 }
  0x63   : >> { %454 = vmatmul.f32.gmra.mxu1 %v431_v21  ;;  %586 = vmatpush.msra.mxu0 %v817_v32 }
  0x64   : >> { %837 = vmatpush.msra.mxu1 %v817_v32 }
  0x65   : >> { %587 = vmatpush.msra.mxu0 %v816_v33 }
  0x66   : >> { %838 = vmatpush.msra.mxu1 %v816_v33 }
  0x67   : >> { %588 = vmatpush.msra.mxu0 %v815_v34 }
  0x68   : >> { %839 = vmatpush.msra.mxu1 %v815_v34 }
  0x69   : >> { %589 = vmatpush.msra.mxu0 %v814_v35 }
  0x6a   : >> { %840 = vmatpush.msra.mxu1 %v814_v35 }
  0x6b   : >> { %590 = vmatpush.msra.mxu0 %v813_v36 }
  0x6c   : >> { %841 = vmatpush.msra.mxu1 %v813_v36 }
  0x6d   : >> { %591 = vmatpush.msra.mxu0 %v812_v37 }
  0x6e   : >> { %842 = vmatpush.msra.mxu1 %v812_v37 }
  0x6f   : >> { %592 = vmatpush.msra.mxu0 %v811_v40 }
  0x70   : >> { %843 = vmatpush.msra.mxu1 %v811_v40 }
  0x71   : >> { %593 = vmatpush.msra.mxu0 %v810_v41 }
  0x72   : >> { %844 = vmatpush.msra.mxu1 %v810_v41  ;;  %594 = vmatmul.f32.vlgmr.msra.gmra.mxu0 %v575_v42 }
  0x73   : >> { %597 = vmatmul.f32.vlgmr.msra.gmra.mxu1 %v574_v39 }
  0xc1   : >> { %v240_v43 = vpop.f32.mrf.mxu0 }
  0xc4   : >> { %v263_v44 = vpop.f32.mrf.mxu1  ;;  %v309_v45 = vpop.f32.mrf.mxu2 }
  0xc5   : >> { %v264_v51 = vadd.f32 %v263_v44, %v240_v43 }
  0xc7   : >> { %v356_v47 = vpop.f32.mrf.mxu3  ;;  %v315_v55 = vadd.f32 %v309_v45, %v264_v51 }
  0xc9   : >> { %v362_v58 = vadd.f32 %v356_v47, %v315_v55 }
  0xcb   : >> { %v243_v46 = vpop.f32.mrf.mxu0 }
  0xce   : >> { %v266_v48 = vpop.f32.mrf.mxu1  ;;  %v312_v49 = vpop.f32.mrf.mxu2 }
  0xcf   : >> { %v267_v52 = vadd.f32 %v266_v48, %v243_v46 }
  0xd1   : >> { %v359_v53 = vpop.f32.mrf.mxu3  ;;  %v316_v56 = vadd.f32 %v312_v49, %v267_v52 }
  0xd3   : >> { %v363_v59 = vadd.f32 %v359_v53, %v316_v56 }
  0xd5   : >> { %v405_v50 = vpop.f32.mrf.mxu0 }
  0xd6   : >> { %v411_v62 = vadd.f32 %v405_v50, %v362_v58 }
  0xd8   : >> { %v452_v54 = vpop.f32.mrf.mxu1 }
  0xd9   : >> { %v499_v57 = vpop.f32.mrf.mxu2  ;;  %v458_v2 = vadd.f32 %v452_v54, %v411_v62 }
  0xdb   : >> { %v505_v5 = vadd.f32 %v499_v57, %v458_v2 }
  0xdc   : >> { %v548_v61 = vpop.f32.mrf.mxu3 }
  0xdd   : >> { %v408_v60 = vpop.f32.mrf.mxu0  ;;  %v554_v8 = vadd.f32 %v548_v61, %v505_v5 }
  0xde   : >> { %v412_v63 = vadd.f32 %v408_v60, %v363_v59 }
  0xe0   : >> { %v455_v1 = vpop.f32.mrf.mxu1 }
  0xe1   : >> { %v459_v3 = vadd.f32 %v455_v1, %v412_v63  ;;  %v502_v4 = vpop.f32.mrf.mxu2 }
  0xe3   : >> { %v506_v6 = vadd.f32 %v502_v4, %v459_v3 }
  0xe4   : >> { %v551_v7 = vpop.f32.mrf.mxu3 }
  0xe5   : >> { %v555_v9 = vadd.f32 %v551_v7, %v506_v6 }
  0xef   : >> { %v595_v11 = vpop.f32.mrf.mxu0 }
  0xf0   : >> { %v598_v12 = vpop.f32.mrf.mxu1  ;;  %v601_v13 = vadd.f32 %v595_v11, %v554_v8 }
  0xf1   : >> { %v602_v14 = vadd.f32 %v598_v12, %v555_v9 }
  0xf2   : >> { %v606_v15 = vadd.f32 %v604_v10, %v601_v13 }
  0xf3   : >> { %v607_v16 = vadd.f32 %v604_v10, %v602_v14  ;;  %176 = sbr.rel (!%p174_p4) target bundleno = 15 (0xf), region = 81 }
  0xf4   : >> { %v608_v17 = vmax.f32 %v606_v15, 0.0 }
  0xf5   : >> { %v609_v18 = vmax.f32 %v607_v16, 0.0 }
  0xf6   : >> { %611 = vst [vmem:[%s610_s26] sm:$0xff] %v608_v17 }
  0xf7   : >> { %612 = vst [vmem:[%s610_s26 + $0x8] sm:$0x3f] %v609_v18 }
  0xf8 PF: > { %s13_s12 = sadd.s32 1, %s872_s12  }
  0xf9   : > { %p10_p5 = scmp.ge.s32.totalorder %s13_s12, 4  }
  0xfb   :  { %12 = sbr.rel (!%p10_p5) target bundleno = 1 (0x1), region = 92 }

// kernel: encoder_cnn.14
= control target key start
LH: loop header
LB: loop body
LE: loop exit
PB: predicated region body
PF: predicated region fallthrough
CT: control target
= control target key end

     0   :  { %s289_s6 = smov 0   ;;  %s345_s0 = inlined_call_operand.vmem [shape: f32[2,4,7,7,128], index: 0, kind: input, shape index: {}]   ;;  %s346_s1 = inlined_call_operand.vmem [shape: f32[2,7,7,128], index: 1, kind: output, shape index: {}]  }
   0x1 LB: > { %s231_s7 = sadd.s32 4294967295, %s277_s6   ;;  %p235_p0 = scmp.ge.s32.totalorder %s277_s6, 1  ;;  %s277_s6 = sphi %s289_s6, %s11_s6  }
   0x2   : > { %p87_p1 = scmp.lt.s32.totalorder %s277_s6, 3 }
   0x4   : > { %p88_p2 = pnand %p235_p0, %p87_p1 }
   0x5   : > { %p107_p3 = scmp.lt.s32.totalorder (!%p88_p2), %s231_s7, 1 }
   0x6   : > { %91 = sbr.rel (%p88_p2) target bundleno = 31 (0x1f), region = 24 }
   0xb   : > { %s348_s7 = smov (!%p107_p3, %s231_s7), 1 }
   0xc   : > { %s261_s8 = smul.u32 224, %s348_s7 }
   0xd   : > { %s262_s12 = smul.u32 56, %s348_s7 }
   0xe   : > { %s300_s11 = scalar_lea.vmem %s345_s0, %s261_s8 }
   0xf   : > { %v117_v0 = vld [vmem:[%s300_s11] sm:$0x7f]  ;;  %v238_v1 = vld [vmem:[%s300_s11 + $0x38] sm:$0x7f]  ;;  %v245_v2 = vld [vmem:[%s300_s11 + $0x70] sm:$0x7f]  ;;  %s314_s15 = scalar_lea.vmem %s346_s1, %s262_s12 }
  0x10   : > { %v132_v3 = vmax.f32 %v117_v0, %v238_v1  ;;  %v252_v4 = vld [vmem:[%s300_s11 + $0xa8] sm:$0x7f]  ;;  %v239_v6 = vld [vmem:[%s300_s11 + $0x40] sm:$0x7f]  ;;  %v246_v9 = vld [vmem:[%s300_s11 + $0x78] sm:$0x7f] }
  0x11   : > { %v118_v5 = vld [vmem:[%s300_s11 + $0x8] sm:$0x7f]  ;;  %v155_v7 = vmax.f32 %v245_v2, %v252_v4  ;;  %v253_v10 = vld [vmem:[%s300_s11 + $0xb0] sm:$0x7f]  ;;  %v247_v14 = vld [vmem:[%s300_s11 + $0x80] sm:$0x7f] }
  0x12   : > { %v133_v8 = vmax.f32 %v118_v5, %v239_v6  ;;  %v119_v11 = vld [vmem:[%s300_s11 + $0x10] sm:$0x7f]  ;;  %v156_v12 = vmax.f32 %v246_v9, %v253_v10  ;;  %v240_v13 = vld [vmem:[%s300_s11 + $0x48] sm:$0x7f]  ;;  %v254_v15 = vld [vmem:[%s300_s11 + $0xb8] sm:$0x7f] }
  0x13   : > { %v162_v16 = vmax.f32 %v132_v3, %v155_v7  ;;  %v134_v17 = vmax.f32 %v119_v11, %v240_v13  ;;  %v157_v18 = vmax.f32 %v247_v14, %v254_v15  ;;  %v120_v19 = vld [vmem:[%s300_s11 + $0x18] sm:$0x7f]  ;;  %v241_v20 = vld [vmem:[%s300_s11 + $0x50] sm:$0x7f]  ;;  %v248_v21 = vld [vmem:[%s300_s11 + $0x88] sm:$0x7f] }
  0x14   : > { %v163_v22 = vmax.f32 %v133_v8, %v156_v12  ;;  %v135_v23 = vmax.f32 %v120_v19, %v241_v20  ;;  %v255_v24 = vld [vmem:[%s300_s11 + $0xc0] sm:$0x7f]  ;;  %v242_v26 = vld [vmem:[%s300_s11 + $0x58] sm:$0x7f]  ;;  %v249_v30 = vld [vmem:[%s300_s11 + $0x90] sm:$0x7f] }
  0x15   : > { %v121_v25 = vld [vmem:[%s300_s11 + $0x20] sm:$0x7f]  ;;  %169 = vst [vmem:[%s314_s15] sm:$0x7f] %v162_v16  ;;  %v164_v27 = vmax.f32 %v134_v17, %v157_v18  ;;  %v158_v28 = vmax.f32 %v248_v21, %v255_v24  ;;  %v256_v31 = vld [vmem:[%s300_s11 + $0xc8] sm:$0x7f] }
  0x16   : > { %v136_v29 = vmax.f32 %v121_v25, %v242_v26  ;;  %170 = vst [vmem:[%s314_s15 + $0x8] sm:$0x7f] %v163_v22  ;;  %v159_v32 = vmax.f32 %v249_v30, %v256_v31  ;;  %v122_v33 = vld [vmem:[%s300_s11 + $0x28] sm:$0x7f]  ;;  %v243_v34 = vld [vmem:[%s300_s11 + $0x60] sm:$0x7f] }
  0x17   : > { %171 = vst [vmem:[%s314_s15 + $0x10] sm:$0x7f] %v164_v27  ;;  %v165_v35 = vmax.f32 %v135_v23, %v158_v28  ;;  %v137_v36 = vmax.f32 %v122_v33, %v243_v34  ;;  %v250_v37 = vld [vmem:[%s300_s11 + $0x98] sm:$0x7f]  ;;  %v257_v38 = vld [vmem:[%s300_s11 + $0xd0] sm:$0x7f] }
  0x18   : > { %v166_v39 = vmax.f32 %v136_v29, %v159_v32  ;;  %v160_v40 = vmax.f32 %v250_v37, %v257_v38  ;;  %v123_v41 = vld [vmem:[%s300_s11 + $0x30] sm:$0x7f]  ;;  %v244_v42 = vld [vmem:[%s300_s11 + $0x68] sm:$0x7f]  ;;  %v251_v43 = vld [vmem:[%s300_s11 + $0xa0] sm:$0x7f] }
  0x19   : > { %172 = vst [vmem:[%s314_s15 + $0x18] sm:$0x7f] %v165_v35  ;;  %v138_v44 = vmax.f32 %v123_v41, %v244_v42  ;;  %v258_v45 = vld [vmem:[%s300_s11 + $0xd8] sm:$0x7f] }
  0x1a   : > { %173 = vst [vmem:[%s314_s15 + $0x20] sm:$0x7f] %v166_v39  ;;  %v167_v46 = vmax.f32 %v137_v36, %v160_v40  ;;  %v161_v47 = vmax.f32 %v251_v43, %v258_v45 }
  0x1c   : > { %174 = vst [vmem:[%s314_s15 + $0x28] sm:$0x7f] %v167_v46  ;;  %v168_v48 = vmax.f32 %v138_v44, %v161_v47 }
  0x1e   : > { %175 = vst [vmem:[%s314_s15 + $0x30] sm:$0x7f] %v168_v48 }
  0x1f PF: > { %s11_s6 = sadd.s32 1, %s277_s6  }
  0x20   : > { %p8_p4 = scmp.ge.s32.totalorder %s11_s6, 4  }
  0x22   :  { %10 = sbr.rel (!%p8_p4) target bundleno = 1 (0x1), region = 57 }

// kernel: encoder_cnn.15
= control target key start
LH: loop header
LB: loop body
LE: loop exit
PB: predicated region body
PF: predicated region fallthrough
CT: control target
= control target key end

     0   :  { %s1300_s12 = smov 0   ;;  %s2230_s0 = inlined_call_operand.vmem [shape: f32[2,9,9,128], index: 0, kind: input, shape index: {}]   ;;  %s2231_s1 = inlined_call_operand.vmem [shape: f32[9,128,256], index: 1, kind: input, shape index: {}]   ;;  %s2232_s2 = inlined_call_operand.vmem [shape: f32[1,256], index: 2, kind: input, shape index: {}]   ;;  %s2233_s3 = inlined_call_operand.vmem [shape: f32[2,7,7,256], index: 3, kind: output, shape index: {}]  }
   0x1 LB: > { %s971_s13 = sadd.s32 4294967295, %s1274_s12   ;;  %p975_p0 = scmp.ge.s32.totalorder %s1274_s12, 1  ;;  %s1274_s12 = sphi %s1300_s12, %s13_s12  }
   0x2   : > { %p137_p1 = scmp.lt.s32.totalorder %s1274_s12, 3 }
   0x4   : > { %p138_p2 = pnand %p975_p0, %p137_p1 }
   0x5   : > { %p161_p3 = scmp.lt.s32.totalorder (!%p138_p2), %s971_s13, 1  ;;  %s1323_s24 = smov (!%p138_p2), 0  }
   0x6   : > { %141 = sbr.rel (%p138_p2) target bundleno = 318 (0x13e), region = 32 }
   0xb   : > { %v1311_v0 = vld [vmem:[%s2232_s2] sm:$0x3]  ;;  %s2235_s13 = smov (!%p161_p3, %s971_s13), 1 }
   0xc   : > { %s1246_s16 = smul.u32 144, %s2235_s13 }
   0xd   : > { %s1247_s17 = smul.u32 112, %s2235_s13 }
   0xe   : > { %s1316_s20 = scalar_lea.vmem %s2230_s0, %s1246_s16 }
   0xf   : > { %s1321_s23 = scalar_lea.vmem %s2233_s3, %s1247_s17 }
  0x10 LB: >> { %v1009_v1 = vld [vmem:[%s2231_s1 + $0x1f0] sm:$0xff]  ;;  %v1010_v2 = vld [vmem:[%s2231_s1 + $0x1f8] sm:$0xff]  ;;  %v1007_v5 = vld [vmem:[%s2231_s1 + $0x1e0] sm:$0xff]  ;;  %s978_s15 = sshll.u32 %s1278_s24, 4  ;;  %vm364_vm0 = vcmask 1045504   ;;  %s177_s24 = sadd.s32 1, %s1278_s24   ;;  %s1278_s24 = sphi %s1323_s24, %s177_s24  }
  0x11   : >> { %v212_v3 = vld [vmem:[%s2231_s1 + $0xf0] sm:$0xff]  ;;  %250 = vmatpush.msra.mxu0 %v1009_v1  ;;  %270 = vmatpush.msra.mxu1 %v1010_v2  ;;  %v213_v4 = vld [vmem:[%s2231_s1 + $0xf8] sm:$0xff]  ;;  %v1008_v6 = vld [vmem:[%s2231_s1 + $0x1e8] sm:$0xff]  ;;  %s1650_s4 = scalar_lea.vmem %s1316_s20, %s978_s15  ;;  %s898_s11 = scalar_lea.vmem %s1321_s23, %s978_s15 }
  0x12   : >> { %290 = vmatpush.msra.mxu2 %v212_v3  ;;  %310 = vmatpush.msra.mxu3 %v213_v4  ;;  %v210_v7 = vld [vmem:[%s2231_s1 + $0xe0] sm:$0xff]  ;;  %v211_v8 = vld [vmem:[%s2231_s1 + $0xe8] sm:$0xff]  ;;  %v1005_v9 = vld [vmem:[%s2231_s1 + $0x1d0] sm:$0xff]  ;;  %p174_p4 = scmp.ge.s32.totalorder %s177_s24, 7  }
  0x13   : >> { %251 = vmatpush.msra.mxu0 %v1007_v5  ;;  %271 = vmatpush.msra.mxu1 %v1008_v6  ;;  %v1006_v10 = vld [vmem:[%s2231_s1 + $0x1d8] sm:$0xff]  ;;  %v208_v11 = vld [vmem:[%s2231_s1 + $0xd0] sm:$0xff]  ;;  %v1003_v13 = vld [vmem:[%s2231_s1 + $0x1c0] sm:$0xff] }
  0x14   : >> { %v209_v12 = vld [vmem:[%s2231_s1 + $0xd8] sm:$0xff]  ;;  %291 = vmatpush.msra.mxu2 %v210_v7  ;;  %311 = vmatpush.msra.mxu3 %v211_v8  ;;  %v1004_v14 = vld [vmem:[%s2231_s1 + $0x1c8] sm:$0xff]  ;;  %v206_v15 = vld [vmem:[%s2231_s1 + $0xc0] sm:$0xff] }
  0x15   : >> { %252 = vmatpush.msra.mxu0 %v1005_v9  ;;  %272 = vmatpush.msra.mxu1 %v1006_v10  ;;  %v207_v16 = vld [vmem:[%s2231_s1 + $0xc8] sm:$0xff]  ;;  %v1001_v17 = vld [vmem:[%s2231_s1 + $0x1b0] sm:$0xff]  ;;  %v1002_v18 = vld [vmem:[%s2231_s1 + $0x1b8] sm:$0xff] }
  0x16   : >> { %292 = vmatpush.msra.mxu2 %v208_v11  ;;  %312 = vmatpush.msra.mxu3 %v209_v12  ;;  %v204_v19 = vld [vmem:[%s2231_s1 + $0xb0] sm:$0xff]  ;;  %v205_v20 = vld [vmem:[%s2231_s1 + $0xb8] sm:$0xff]  ;;  %v999_v21 = vld [vmem:[%s2231_s1 + $0x1a0] sm:$0xff] }
  0x17   : >> { %253 = vmatpush.msra.mxu0 %v1003_v13  ;;  %273 = vmatpush.msra.mxu1 %v1004_v14  ;;  %v1000_v22 = vld [vmem:[%s2231_s1 + $0x1a8] sm:$0xff]  ;;  %v202_v23 = vld [vmem:[%s2231_s1 + $0xa0] sm:$0xff]  ;;  %v997_v25 = vld [vmem:[%s2231_s1 + $0x190] sm:$0xff] }
  0x18   : >> { %293 = vmatpush.msra.mxu2 %v206_v15  ;;  %313 = vmatpush.msra.mxu3 %v207_v16  ;;  %v203_v24 = vld [vmem:[%s2231_s1 + $0xa8] sm:$0xff]  ;;  %v998_v26 = vld [vmem:[%s2231_s1 + $0x198] sm:$0xff]  ;;  %v200_v27 = vld [vmem:[%s2231_s1 + $0x90] sm:$0xff] }
  0x19   : >> { %254 = vmatpush.msra.mxu0 %v1001_v17  ;;  %274 = vmatpush.msra.mxu1 %v1002_v18  ;;  %v201_v28 = vld [vmem:[%s2231_s1 + $0x98] sm:$0xff]  ;;  %v995_v29 = vld [vmem:[%s2231_s1 + $0x180] sm:$0xff]  ;;  %v996_v30 = vld [vmem:[%s2231_s1 + $0x188] sm:$0xff] }
  0x1a   : >> { %294 = vmatpush.msra.mxu2 %v204_v19  ;;  %314 = vmatpush.msra.mxu3 %v205_v20  ;;  %v198_v31 = vld [vmem:[%s2231_s1 + $0x80] sm:$0xff]  ;;  %v199_v32 = vld [vmem:[%s2231_s1 + $0x88] sm:$0xff]  ;;  %v993_v33 = vld [vmem:[%s2231_s1 + $0x170] sm:$0xff] }
  0x1b   : >> { %255 = vmatpush.msra.mxu0 %v999_v21  ;;  %275 = vmatpush.msra.mxu1 %v1000_v22  ;;  %v994_v34 = vld [vmem:[%s2231_s1 + $0x178] sm:$0xff]  ;;  %v196_v35 = vld [vmem:[%s2231_s1 + $0x70] sm:$0xff]  ;;  %v991_v37 = vld [vmem:[%s2231_s1 + $0x160] sm:$0xff] }
  0x1c   : >> { %295 = vmatpush.msra.mxu2 %v202_v23  ;;  %315 = vmatpush.msra.mxu3 %v203_v24  ;;  %v197_v36 = vld [vmem:[%s2231_s1 + $0x78] sm:$0xff]  ;;  %v992_v38 = vld [vmem:[%s2231_s1 + $0x168] sm:$0xff]  ;;  %v194_v39 = vld [vmem:[%s2231_s1 + $0x60] sm:$0xff] }
  0x1d   : >> { %256 = vmatpush.msra.mxu0 %v997_v25  ;;  %276 = vmatpush.msra.mxu1 %v998_v26  ;;  %v195_v40 = vld [vmem:[%s2231_s1 + $0x68] sm:$0xff]  ;;  %v989_v41 = vld [vmem:[%s2231_s1 + $0x150] sm:$0xff]  ;;  %v990_v42 = vld [vmem:[%s2231_s1 + $0x158] sm:$0xff] }
  0x1e   : >> { %296 = vmatpush.msra.mxu2 %v200_v27  ;;  %316 = vmatpush.msra.mxu3 %v201_v28  ;;  %v192_v43 = vld [vmem:[%s2231_s1 + $0x50] sm:$0xff]  ;;  %v193_v44 = vld [vmem:[%s2231_s1 + $0x58] sm:$0xff]  ;;  %v987_v45 = vld [vmem:[%s2231_s1 + $0x140] sm:$0xff] }
  0x1f   : >> { %257 = vmatpush.msra.mxu0 %v995_v29  ;;  %277 = vmatpush.msra.mxu1 %v996_v30  ;;  %v988_v46 = vld [vmem:[%s2231_s1 + $0x148] sm:$0xff]  ;;  %v190_v47 = vld [vmem:[%s2231_s1 + $0x40] sm:$0xff]  ;;  %v985_v49 = vld [vmem:[%s2231_s1 + $0x130] sm:$0xff] }
  0x20   : >> { %297 = vmatpush.msra.mxu2 %v198_v31  ;;  %317 = vmatpush.msra.mxu3 %v199_v32  ;;  %v191_v48 = vld [vmem:[%s2231_s1 + $0x48] sm:$0xff]  ;;  %v986_v50 = vld [vmem:[%s2231_s1 + $0x138] sm:$0xff]  ;;  %v188_v51 = vld [vmem:[%s2231_s1 + $0x30] sm:$0xff] }
  0x21   : >> { %258 = vmatpush.msra.mxu0 %v993_v33  ;;  %278 = vmatpush.msra.mxu1 %v994_v34  ;;  %v189_v52 = vld [vmem:[%s2231_s1 + $0x38] sm:$0xff]  ;;  %v983_v53 = vld [vmem:[%s2231_s1 + $0x120] sm:$0xff]  ;;  %v984_v54 = vld [vmem:[%s2231_s1 + $0x128] sm:$0xff] }
  0x22   : >> { %298 = vmatpush.msra.mxu2 %v196_v35  ;;  %318 = vmatpush.msra.mxu3 %v197_v36  ;;  %v186_v55 = vld [vmem:[%s2231_s1 + $0x20] sm:$0xff]  ;;  %v187_v56 = vld [vmem:[%s2231_s1 + $0x28] sm:$0xff]  ;;  %v981_v57 = vld [vmem:[%s2231_s1 + $0x110] sm:$0xff] }
  0x23   : >> { %259 = vmatpush.msra.mxu0 %v991_v37  ;;  %279 = vmatpush.msra.mxu1 %v992_v38  ;;  %v982_v58 = vld [vmem:[%s2231_s1 + $0x118] sm:$0xff]  ;;  %v184_v59 = vld [vmem:[%s2231_s1 + $0x10] sm:$0xff]  ;;  %v979_v61 = vld [vmem:[%s2231_s1 + $0x100] sm:$0xff] }
  0x24   : >> { %299 = vmatpush.msra.mxu2 %v194_v39  ;;  %319 = vmatpush.msra.mxu3 %v195_v40  ;;  %v185_v60 = vld [vmem:[%s2231_s1 + $0x18] sm:$0xff]  ;;  %v980_v62 = vld [vmem:[%s2231_s1 + $0x108] sm:$0xff]  ;;  %v182_v63 = vld [vmem:[%s2231_s1] sm:$0xff] }
  0x25   : >> { %260 = vmatpush.msra.mxu0 %v989_v41  ;;  %280 = vmatpush.msra.mxu1 %v990_v42  ;;  %v183_v1 = vld [vmem:[%s2231_s1 + $0x8] sm:$0xff]  ;;  %v1041_v2 = vld [vmem:[%s2231_s1 + $0x2f0] sm:$0xff]  ;;  %v1042_v3 = vld [vmem:[%s2231_s1 + $0x2f8] sm:$0xff] }
  0x26   : >> { %300 = vmatpush.msra.mxu2 %v192_v43  ;;  %320 = vmatpush.msra.mxu3 %v193_v44  ;;  %v1076_v4 = vld [vmem:[%s2231_s1 + $0x3f0] sm:$0xff]  ;;  %v1077_v5 = vld [vmem:[%s2231_s1 + $0x3f8] sm:$0xff]  ;;  %v1039_v6 = vld [vmem:[%s2231_s1 + $0x2e0] sm:$0xff] }
  0x27   : >> { %261 = vmatpush.msra.mxu0 %v987_v45  ;;  %281 = vmatpush.msra.mxu1 %v988_v46  ;;  %v1040_v7 = vld [vmem:[%s2231_s1 + $0x2e8] sm:$0xff]  ;;  %v1074_v8 = vld [vmem:[%s2231_s1 + $0x3e0] sm:$0xff]  ;;  %v1037_v10 = vld [vmem:[%s2231_s1 + $0x2d0] sm:$0xff] }
  0x28   : >> { %301 = vmatpush.msra.mxu2 %v190_v47  ;;  %321 = vmatpush.msra.mxu3 %v191_v48  ;;  %v1075_v9 = vld [vmem:[%s2231_s1 + $0x3e8] sm:$0xff]  ;;  %v1038_v11 = vld [vmem:[%s2231_s1 + $0x2d8] sm:$0xff]  ;;  %v1072_v12 = vld [vmem:[%s2231_s1 + $0x3d0] sm:$0xff] }
  0x29   : >> { %262 = vmatpush.msra.mxu0 %v985_v49  ;;  %282 = vmatpush.msra.mxu1 %v986_v50  ;;  %v1073_v13 = vld [vmem:[%s2231_s1 + $0x3d8] sm:$0xff]  ;;  %v1035_v14 = vld [vmem:[%s2231_s1 + $0x2c0] sm:$0xff]  ;;  %v1036_v15 = vld [vmem:[%s2231_s1 + $0x2c8] sm:$0xff] }
  0x2a   : >> { %302 = vmatpush.msra.mxu2 %v188_v51  ;;  %322 = vmatpush.msra.mxu3 %v189_v52  ;;  %v1070_v16 = vld [vmem:[%s2231_s1 + $0x3c0] sm:$0xff]  ;;  %v1071_v17 = vld [vmem:[%s2231_s1 + $0x3c8] sm:$0xff]  ;;  %v1033_v18 = vld [vmem:[%s2231_s1 + $0x2b0] sm:$0xff] }
  0x2b   : >> { %263 = vmatpush.msra.mxu0 %v983_v53  ;;  %283 = vmatpush.msra.mxu1 %v984_v54  ;;  %v1034_v19 = vld [vmem:[%s2231_s1 + $0x2b8] sm:$0xff]  ;;  %v1068_v20 = vld [vmem:[%s2231_s1 + $0x3b0] sm:$0xff]  ;;  %v1031_v22 = vld [vmem:[%s2231_s1 + $0x2a0] sm:$0xff] }
  0x2c   : >> { %303 = vmatpush.msra.mxu2 %v186_v55  ;;  %323 = vmatpush.msra.mxu3 %v187_v56  ;;  %v1069_v21 = vld [vmem:[%s2231_s1 + $0x3b8] sm:$0xff]  ;;  %v1032_v23 = vld [vmem:[%s2231_s1 + $0x2a8] sm:$0xff]  ;;  %v1066_v24 = vld [vmem:[%s2231_s1 + $0x3a0] sm:$0xff] }
  0x2d   : >> { %264 = vmatpush.msra.mxu0 %v981_v57  ;;  %284 = vmatpush.msra.mxu1 %v982_v58  ;;  %v1067_v25 = vld [vmem:[%s2231_s1 + $0x3a8] sm:$0xff]  ;;  %v1029_v26 = vld [vmem:[%s2231_s1 + $0x290] sm:$0xff]  ;;  %v1030_v27 = vld [vmem:[%s2231_s1 + $0x298] sm:$0xff] }
  0x2e   : >> { %304 = vmatpush.msra.mxu2 %v184_v59  ;;  %324 = vmatpush.msra.mxu3 %v185_v60  ;;  %v1064_v28 = vld [vmem:[%s2231_s1 + $0x390] sm:$0xff]  ;;  %v1065_v29 = vld [vmem:[%s2231_s1 + $0x398] sm:$0xff]  ;;  %v1027_v30 = vld [vmem:[%s2231_s1 + $0x280] sm:$0xff] }
  0x2f   : >> { %265 = vmatpush.msra.mxu0 %v979_v61  ;;  %285 = vmatpush.msra.mxu1 %v980_v62  ;;  %v1028_v31 = vld [vmem:[%s2231_s1 + $0x288] sm:$0xff]  ;;  %v1062_v32 = vld [vmem:[%s2231_s1 + $0x380] sm:$0xff]  ;;  %v1025_v34 = vld [vmem:[%s2231_s1 + $0x270] sm:$0xff] }
  0x30   : >> { %305 = vmatpush.msra.mxu2 %v182_v63  ;;  %325 = vmatpush.msra.mxu3 %v183_v1  ;;  %v1063_v33 = vld [vmem:[%s2231_s1 + $0x388] sm:$0xff]  ;;  %v1026_v35 = vld [vmem:[%s2231_s1 + $0x278] sm:$0xff]  ;;  %v1060_v36 = vld [vmem:[%s2231_s1 + $0x370] sm:$0xff] }
  0x31   : >> { %369 = vmatpush.msrb.mxu0 %v1041_v2  ;;  %389 = vmatpush.msrb.mxu1 %v1042_v3  ;;  %v1061_v37 = vld [vmem:[%s2231_s1 + $0x378] sm:$0xff]  ;;  %v1023_v38 = vld [vmem:[%s2231_s1 + $0x260] sm:$0xff]  ;;  %v1024_v39 = vld [vmem:[%s2231_s1 + $0x268] sm:$0xff] }
  0x32   : >> { %449 = vmatpush.msrb.mxu2 %v1076_v4  ;;  %469 = vmatpush.msrb.mxu3 %v1077_v5  ;;  %v1058_v40 = vld [vmem:[%s2231_s1 + $0x360] sm:$0xff]  ;;  %v1059_v41 = vld [vmem:[%s2231_s1 + $0x368] sm:$0xff]  ;;  %v1021_v42 = vld [vmem:[%s2231_s1 + $0x250] sm:$0xff] }
  0x33   : >> { %370 = vmatpush.msrb.mxu0 %v1039_v6  ;;  %390 = vmatpush.msrb.mxu1 %v1040_v7  ;;  %v1022_v43 = vld [vmem:[%s2231_s1 + $0x258] sm:$0xff]  ;;  %v1056_v44 = vld [vmem:[%s2231_s1 + $0x350] sm:$0xff]  ;;  %v1019_v46 = vld [vmem:[%s2231_s1 + $0x240] sm:$0xff] }
  0x34   : >> { %450 = vmatpush.msrb.mxu2 %v1074_v8  ;;  %470 = vmatpush.msrb.mxu3 %v1075_v9  ;;  %v1057_v45 = vld [vmem:[%s2231_s1 + $0x358] sm:$0xff]  ;;  %v1020_v47 = vld [vmem:[%s2231_s1 + $0x248] sm:$0xff]  ;;  %v1054_v48 = vld [vmem:[%s2231_s1 + $0x340] sm:$0xff] }
  0x35   : >> { %371 = vmatpush.msrb.mxu0 %v1037_v10  ;;  %391 = vmatpush.msrb.mxu1 %v1038_v11  ;;  %v1055_v49 = vld [vmem:[%s2231_s1 + $0x348] sm:$0xff]  ;;  %v180_v50 = vld [vmem:[%s1650_s4] sm:$0xff]  ;;  %v1017_v51 = vld [vmem:[%s2231_s1 + $0x230] sm:$0xff] }
  0x36   : >> { %451 = vmatpush.msrb.mxu2 %v1072_v12  ;;  %471 = vmatpush.msrb.mxu3 %v1073_v13  ;;  %v1018_v52 = vld [vmem:[%s2231_s1 + $0x238] sm:$0xff]  ;;  %v1052_v53 = vld [vmem:[%s2231_s1 + $0x330] sm:$0xff]  ;;  %v248_v55 = vrot.slane %v180_v50, 1  ;;  %v1015_v56 = vld [vmem:[%s2231_s1 + $0x220] sm:$0xff]  ;;  %v365_v6 = vrot.slane %v180_v50, 2 }
  0x37   : >> { %372 = vmatpush.msrb.mxu0 %v1035_v14  ;;  %392 = vmatpush.msrb.mxu1 %v1036_v15  ;;  %v1053_v54 = vld [vmem:[%s2231_s1 + $0x338] sm:$0xff]  ;;  %v1016_v57 = vld [vmem:[%s2231_s1 + $0x228] sm:$0xff]  ;;  %v1050_v58 = vld [vmem:[%s2231_s1 + $0x320] sm:$0xff] }
  0x38   : >> { %452 = vmatpush.msrb.mxu2 %v1070_v16  ;;  %472 = vmatpush.msrb.mxu3 %v1071_v17  ;;  %v1051_v59 = vld [vmem:[%s2231_s1 + $0x328] sm:$0xff]  ;;  %v1013_v60 = vld [vmem:[%s2231_s1 + $0x210] sm:$0xff]  ;;  %v1014_v61 = vld [vmem:[%s2231_s1 + $0x218] sm:$0xff] }
  0x39   : >> { %373 = vmatpush.msrb.mxu0 %v1033_v18  ;;  %393 = vmatpush.msrb.mxu1 %v1034_v19  ;;  %v181_v62 = vld [vmem:[%s1650_s4 + $0x8] sm:$0x1]  ;;  %v1048_v63 = vld [vmem:[%s2231_s1 + $0x310] sm:$0xff]  ;;  %v1049_v1 = vld [vmem:[%s2231_s1 + $0x318] sm:$0xff] }
  0x3a   : >> { %453 = vmatpush.msrb.mxu2 %v1068_v20  ;;  %473 = vmatpush.msrb.mxu3 %v1069_v21  ;;  %v1011_v2 = vld [vmem:[%s2231_s1 + $0x200] sm:$0xff]  ;;  %v1012_v3 = vld [vmem:[%s2231_s1 + $0x208] sm:$0xff]  ;;  %v366_v7 = vrot.slane %v181_v62, 2  ;;  %v1721_v8 = vld [vmem:[%s1650_s4 + $0x10] sm:$0xff] }
  0x3b   : >> { %374 = vmatpush.msrb.mxu0 %v1031_v22  ;;  %394 = vmatpush.msrb.mxu1 %v1032_v23  ;;  %v1046_v4 = vld [vmem:[%s2231_s1 + $0x300] sm:$0xff]  ;;  %v1047_v5 = vld [vmem:[%s2231_s1 + $0x308] sm:$0xff]  ;;  %v1108_v9 = vld [vmem:[%s2231_s1 + $0x4f0] sm:$0xff] }
  0x3c   : >> { %454 = vmatpush.msrb.mxu2 %v1066_v24  ;;  %474 = vmatpush.msrb.mxu3 %v1067_v25  ;;  %v1109_v10 = vld [vmem:[%s2231_s1 + $0x4f8] sm:$0xff]  ;;  %v1140_v11 = vld [vmem:[%s2231_s1 + $0x5f0] sm:$0xff]  ;;  %v367_v13 = vsel %vm364_vm0, %v365_v6, %v366_v7  ;;  %v1106_v14 = vld [vmem:[%s2231_s1 + $0x4e0] sm:$0xff]  ;;  %v603_v6 = vrot.slane %v1721_v8, 2 }
  0x3d   : >> { %375 = vmatpush.msrb.mxu0 %v1029_v26  ;;  %395 = vmatpush.msrb.mxu1 %v1030_v27  ;;  %v1141_v12 = vld [vmem:[%s2231_s1 + $0x5f8] sm:$0xff]  ;;  %v1107_v15 = vld [vmem:[%s2231_s1 + $0x4e8] sm:$0xff]  ;;  %v1138_v16 = vld [vmem:[%s2231_s1 + $0x5e0] sm:$0xff] }
  0x3e   : >> { %455 = vmatpush.msrb.mxu2 %v1064_v28  ;;  %475 = vmatpush.msrb.mxu3 %v1065_v29  ;;  %v1139_v17 = vld [vmem:[%s2231_s1 + $0x5e8] sm:$0xff]  ;;  %v1104_v18 = vld [vmem:[%s2231_s1 + $0x4d0] sm:$0xff]  ;;  %v1105_v19 = vld [vmem:[%s2231_s1 + $0x4d8] sm:$0xff] }
  0x3f   : >> { %376 = vmatpush.msrb.mxu0 %v1027_v30  ;;  %396 = vmatpush.msrb.mxu1 %v1028_v31  ;;  %v1136_v20 = vld [vmem:[%s2231_s1 + $0x5d0] sm:$0xff]  ;;  %v1137_v21 = vld [vmem:[%s2231_s1 + $0x5d8] sm:$0xff]  ;;  %v1102_v22 = vld [vmem:[%s2231_s1 + $0x4c0] sm:$0xff] }
  0x40   : >> { %456 = vmatpush.msrb.mxu2 %v1062_v32  ;;  %476 = vmatpush.msrb.mxu3 %v1063_v33  ;;  %v1103_v23 = vld [vmem:[%s2231_s1 + $0x4c8] sm:$0xff]  ;;  %v1134_v24 = vld [vmem:[%s2231_s1 + $0x5c0] sm:$0xff]  ;;  %v1100_v26 = vld [vmem:[%s2231_s1 + $0x4b0] sm:$0xff] }
  0x41   : >> { %377 = vmatpush.msrb.mxu0 %v1025_v34  ;;  %397 = vmatpush.msrb.mxu1 %v1026_v35  ;;  %v1135_v25 = vld [vmem:[%s2231_s1 + $0x5c8] sm:$0xff]  ;;  %v1101_v27 = vld [vmem:[%s2231_s1 + $0x4b8] sm:$0xff]  ;;  %v1132_v28 = vld [vmem:[%s2231_s1 + $0x5b0] sm:$0xff] }
  0x42   : >> { %457 = vmatpush.msrb.mxu2 %v1060_v36  ;;  %477 = vmatpush.msrb.mxu3 %v1061_v37  ;;  %v1133_v29 = vld [vmem:[%s2231_s1 + $0x5b8] sm:$0xff]  ;;  %v1098_v30 = vld [vmem:[%s2231_s1 + $0x4a0] sm:$0xff]  ;;  %v1099_v31 = vld [vmem:[%s2231_s1 + $0x4a8] sm:$0xff] }
  0x43   : >> { %378 = vmatpush.msrb.mxu0 %v1023_v38  ;;  %398 = vmatpush.msrb.mxu1 %v1024_v39  ;;  %v1130_v32 = vld [vmem:[%s2231_s1 + $0x5a0] sm:$0xff]  ;;  %v1131_v33 = vld [vmem:[%s2231_s1 + $0x5a8] sm:$0xff]  ;;  %v1096_v34 = vld [vmem:[%s2231_s1 + $0x490] sm:$0xff] }
  0x44   : >> { %458 = vmatpush.msrb.mxu2 %v1058_v40  ;;  %478 = vmatpush.msrb.mxu3 %v1059_v41  ;;  %v1097_v35 = vld [vmem:[%s2231_s1 + $0x498] sm:$0xff]  ;;  %v1128_v36 = vld [vmem:[%s2231_s1 + $0x590] sm:$0xff]  ;;  %v1094_v38 = vld [vmem:[%s2231_s1 + $0x480] sm:$0xff] }
  0x45   : >> { %379 = vmatpush.msrb.mxu0 %v1021_v42  ;;  %399 = vmatpush.msrb.mxu1 %v1022_v43  ;;  %v1129_v37 = vld [vmem:[%s2231_s1 + $0x598] sm:$0xff]  ;;  %v1095_v39 = vld [vmem:[%s2231_s1 + $0x488] sm:$0xff]  ;;  %v1126_v40 = vld [vmem:[%s2231_s1 + $0x580] sm:$0xff] }
  0x46   : >> { %459 = vmatpush.msrb.mxu2 %v1056_v44  ;;  %479 = vmatpush.msrb.mxu3 %v1057_v45  ;;  %v1127_v41 = vld [vmem:[%s2231_s1 + $0x588] sm:$0xff]  ;;  %v1092_v42 = vld [vmem:[%s2231_s1 + $0x470] sm:$0xff]  ;;  %v1093_v43 = vld [vmem:[%s2231_s1 + $0x478] sm:$0xff] }
  0x47   : >> { %380 = vmatpush.msrb.mxu0 %v1019_v46  ;;  %400 = vmatpush.msrb.mxu1 %v1020_v47  ;;  %v1124_v44 = vld [vmem:[%s2231_s1 + $0x570] sm:$0xff]  ;;  %v1125_v45 = vld [vmem:[%s2231_s1 + $0x578] sm:$0xff]  ;;  %v1090_v46 = vld [vmem:[%s2231_s1 + $0x460] sm:$0xff] }
  0x48   : >> { %460 = vmatpush.msrb.mxu2 %v1054_v48  ;;  %480 = vmatpush.msrb.mxu3 %v1055_v49  ;;  %v1091_v47 = vld [vmem:[%s2231_s1 + $0x468] sm:$0xff]  ;;  %v1122_v48 = vld [vmem:[%s2231_s1 + $0x560] sm:$0xff]  ;;  %v1112_v7 = vld [vmem:[%s2231_s1 + $0x510] sm:$0xff] }
  0x49   : >> { %306 = vmatmul.f32.vlgmr.msra.gmra.mxu2 %v180_v50  ;;  %326 = vmatmul.f32.vlgmr.msra.gmra.mxu3 %v180_v50  ;;  %v1123_v49 = vld [vmem:[%s2231_s1 + $0x568] sm:$0xff]  ;;  %v1088_v50 = vld [vmem:[%s2231_s1 + $0x450] sm:$0xff]  ;;  %v1082_v62 = vld [vmem:[%s2231_s1 + $0x420] sm:$0xff] }
  0x4a   : >> { %381 = vmatpush.msrb.mxu0 %v1017_v51  ;;  %401 = vmatpush.msrb.mxu1 %v1018_v52  ;;  %v1089_v51 = vld [vmem:[%s2231_s1 + $0x458] sm:$0xff]  ;;  %v1120_v52 = vld [vmem:[%s2231_s1 + $0x550] sm:$0xff] }
  0x4b   : >> { %461 = vmatpush.msrb.mxu2 %v1052_v53  ;;  %481 = vmatpush.msrb.mxu3 %v1053_v54  ;;  %v1121_v53 = vld [vmem:[%s2231_s1 + $0x558] sm:$0xff]  ;;  %v1086_v54 = vld [vmem:[%s2231_s1 + $0x440] sm:$0xff] }
  0x4c   : >> { %266 = vmatmul.f32.vlgmr.msra.gmra.mxu0 %v248_v55  ;;  %286 = vmatmul.f32.vlgmr.msra.gmra.mxu1 %v248_v55  ;;  %v1087_v55 = vld [vmem:[%s2231_s1 + $0x448] sm:$0xff] }
  0x4d   : >> { %382 = vmatpush.msrb.mxu0 %v1015_v56  ;;  %402 = vmatpush.msrb.mxu1 %v1016_v57  ;;  %v1118_v56 = vld [vmem:[%s2231_s1 + $0x540] sm:$0xff]  ;;  %v1119_v57 = vld [vmem:[%s2231_s1 + $0x548] sm:$0xff] }
  0x4e   : >> { %462 = vmatpush.msrb.mxu2 %v1050_v58  ;;  %482 = vmatpush.msrb.mxu3 %v1051_v59  ;;  %v1084_v58 = vld [vmem:[%s2231_s1 + $0x430] sm:$0xff]  ;;  %v1085_v59 = vld [vmem:[%s2231_s1 + $0x438] sm:$0xff] }
  0x4f   : >> { %383 = vmatpush.msrb.mxu0 %v1013_v60  ;;  %403 = vmatpush.msrb.mxu1 %v1014_v61  ;;  %v1116_v60 = vld [vmem:[%s2231_s1 + $0x530] sm:$0xff]  ;;  %v1117_v61 = vld [vmem:[%s2231_s1 + $0x538] sm:$0xff] }
  0x50   : >> { %463 = vmatpush.msrb.mxu2 %v1048_v63  ;;  %483 = vmatpush.msrb.mxu3 %v1049_v1  ;;  %v1083_v63 = vld [vmem:[%s2231_s1 + $0x428] sm:$0xff]  ;;  %v1045_v1 = vld [vmem:[%s1650_s4 + $0x18] sm:$0x1] }
  0x51   : >> { %384 = vmatpush.msrb.mxu0 %v1011_v2  ;;  %404 = vmatpush.msrb.mxu1 %v1012_v3  ;;  %v1114_v2 = vld [vmem:[%s2231_s1 + $0x520] sm:$0xff]  ;;  %v1115_v3 = vld [vmem:[%s2231_s1 + $0x528] sm:$0xff] }
  0x52   : >> { %464 = vmatpush.msrb.mxu2 %v1046_v4  ;;  %484 = vmatpush.msrb.mxu3 %v1047_v5  ;;  %v1080_v4 = vld [vmem:[%s2231_s1 + $0x410] sm:$0xff]  ;;  %v1081_v5 = vld [vmem:[%s2231_s1 + $0x418] sm:$0xff] }
  0x53   : >> { %465 = vmatmul.f32.vlgmr.msrb.gmra.mxu2 %v1721_v8  ;;  %485 = vmatmul.f32.vlgmr.msrb.gmra.mxu3 %v1721_v8 }
  0x54   : >> { %527 = vmatpush.msra.mxu0 %v1108_v9  ;;  %547 = vmatpush.msra.mxu1 %v1109_v10  ;;  %v1113_v9 = vld [vmem:[%s2231_s1 + $0x518] sm:$0xff]  ;;  %v604_v10 = vrot.slane %v1045_v1, 2  ;;  %v1151_v1 = vld [vmem:[%s2231_s1 + $0x630] sm:$0xff] }
  0x55   : >> { %607 = vmatpush.msra.mxu2 %v1140_v11  ;;  %627 = vmatpush.msra.mxu3 %v1141_v12  ;;  %v1078_v11 = vld [vmem:[%s2231_s1 + $0x400] sm:$0xff]  ;;  %v1079_v12 = vld [vmem:[%s2231_s1 + $0x408] sm:$0xff] }
  0x56   : >> { %385 = vmatmul.f32.vlgmr.msrb.gmra.mxu0 %v367_v13  ;;  %405 = vmatmul.f32.vlgmr.msrb.gmra.mxu1 %v367_v13  ;;  %v1110_v13 = vld [vmem:[%s2231_s1 + $0x500] sm:$0xff] }
  0x57   : >> { %528 = vmatpush.msra.mxu0 %v1106_v14  ;;  %548 = vmatpush.msra.mxu1 %v1107_v15  ;;  %v1111_v14 = vld [vmem:[%s2231_s1 + $0x508] sm:$0xff]  ;;  %v525_v15 = vrot.slane %v1721_v8, 1  ;;  %v1207_v8 = vld [vmem:[%s2231_s1 + $0x7f0] sm:$0xff] }
  0x58   : >> { %608 = vmatpush.msra.mxu2 %v1138_v16  ;;  %628 = vmatpush.msra.mxu3 %v1139_v17  ;;  %v605_v16 = vsel %vm364_vm0, %v603_v6, %v604_v10  ;;  %v1175_v17 = vld [vmem:[%s2231_s1 + $0x6f0] sm:$0xff]  ;;  %v1150_v6 = vld [vmem:[%s2231_s1 + $0x628] sm:$0xff] }
  0x59   : >> { %529 = vmatpush.msra.mxu0 %v1104_v18  ;;  %549 = vmatpush.msra.mxu1 %v1105_v19  ;;  %v1176_v18 = vld [vmem:[%s2231_s1 + $0x6f8] sm:$0xff]  ;;  %v1147_v10 = vld [vmem:[%s2231_s1 + $0x610] sm:$0xff] }
  0x5a   : >> { %609 = vmatpush.msra.mxu2 %v1136_v20  ;;  %629 = vmatpush.msra.mxu3 %v1137_v21  ;;  %v1208_v19 = vld [vmem:[%s2231_s1 + $0x7f8] sm:$0xff]  ;;  %v1173_v20 = vld [vmem:[%s2231_s1 + $0x6e0] sm:$0xff]  ;;  %v1174_v21 = vld [vmem:[%s2231_s1 + $0x6e8] sm:$0xff] }
  0x5b   : >> { %530 = vmatpush.msra.mxu0 %v1102_v22  ;;  %550 = vmatpush.msra.mxu1 %v1103_v23  ;;  %v1205_v22 = vld [vmem:[%s2231_s1 + $0x7e0] sm:$0xff]  ;;  %v1206_v23 = vld [vmem:[%s2231_s1 + $0x7e8] sm:$0xff] }
  0x5c   : >> { %610 = vmatpush.msra.mxu2 %v1134_v24  ;;  %630 = vmatpush.msra.mxu3 %v1135_v25  ;;  %v1171_v24 = vld [vmem:[%s2231_s1 + $0x6d0] sm:$0xff]  ;;  %v1172_v25 = vld [vmem:[%s2231_s1 + $0x6d8] sm:$0xff] }
  0x5d   : >> { %531 = vmatpush.msra.mxu0 %v1100_v26  ;;  %551 = vmatpush.msra.mxu1 %v1101_v27  ;;  %v1203_v26 = vld [vmem:[%s2231_s1 + $0x7d0] sm:$0xff]  ;;  %v1204_v27 = vld [vmem:[%s2231_s1 + $0x7d8] sm:$0xff] }
  0x5e   : >> { %611 = vmatpush.msra.mxu2 %v1132_v28  ;;  %631 = vmatpush.msra.mxu3 %v1133_v29  ;;  %v1169_v28 = vld [vmem:[%s2231_s1 + $0x6c0] sm:$0xff]  ;;  %v1170_v29 = vld [vmem:[%s2231_s1 + $0x6c8] sm:$0xff] }
  0x5f   : >> { %532 = vmatpush.msra.mxu0 %v1098_v30  ;;  %552 = vmatpush.msra.mxu1 %v1099_v31  ;;  %v1201_v30 = vld [vmem:[%s2231_s1 + $0x7c0] sm:$0xff]  ;;  %v1202_v31 = vld [vmem:[%s2231_s1 + $0x7c8] sm:$0xff] }
  0x60   : >> { %612 = vmatpush.msra.mxu2 %v1130_v32  ;;  %632 = vmatpush.msra.mxu3 %v1131_v33  ;;  %v1167_v32 = vld [vmem:[%s2231_s1 + $0x6b0] sm:$0xff]  ;;  %v1168_v33 = vld [vmem:[%s2231_s1 + $0x6b8] sm:$0xff] }
  0x61   : >> { %533 = vmatpush.msra.mxu0 %v1096_v34  ;;  %553 = vmatpush.msra.mxu1 %v1097_v35  ;;  %v1199_v34 = vld [vmem:[%s2231_s1 + $0x7b0] sm:$0xff]  ;;  %v1200_v35 = vld [vmem:[%s2231_s1 + $0x7b8] sm:$0xff] }
  0x62   : >> { %613 = vmatpush.msra.mxu2 %v1128_v36  ;;  %633 = vmatpush.msra.mxu3 %v1129_v37  ;;  %v1165_v36 = vld [vmem:[%s2231_s1 + $0x6a0] sm:$0xff]  ;;  %v1166_v37 = vld [vmem:[%s2231_s1 + $0x6a8] sm:$0xff] }
  0x63   : >> { %534 = vmatpush.msra.mxu0 %v1094_v38  ;;  %554 = vmatpush.msra.mxu1 %v1095_v39  ;;  %v1197_v38 = vld [vmem:[%s2231_s1 + $0x7a0] sm:$0xff]  ;;  %v1198_v39 = vld [vmem:[%s2231_s1 + $0x7a8] sm:$0xff] }
  0x64   : >> { %614 = vmatpush.msra.mxu2 %v1126_v40  ;;  %634 = vmatpush.msra.mxu3 %v1127_v41  ;;  %v1163_v40 = vld [vmem:[%s2231_s1 + $0x690] sm:$0xff]  ;;  %v1164_v41 = vld [vmem:[%s2231_s1 + $0x698] sm:$0xff] }
  0x65   : >> { %535 = vmatpush.msra.mxu0 %v1092_v42  ;;  %555 = vmatpush.msra.mxu1 %v1093_v43  ;;  %v1195_v42 = vld [vmem:[%s2231_s1 + $0x790] sm:$0xff]  ;;  %v1196_v43 = vld [vmem:[%s2231_s1 + $0x798] sm:$0xff] }
  0x66   : >> { %615 = vmatpush.msra.mxu2 %v1124_v44  ;;  %635 = vmatpush.msra.mxu3 %v1125_v45  ;;  %v1161_v44 = vld [vmem:[%s2231_s1 + $0x680] sm:$0xff]  ;;  %v1162_v45 = vld [vmem:[%s2231_s1 + $0x688] sm:$0xff] }
  0x67   : >> { %536 = vmatpush.msra.mxu0 %v1090_v46  ;;  %556 = vmatpush.msra.mxu1 %v1091_v47  ;;  %v1193_v46 = vld [vmem:[%s2231_s1 + $0x780] sm:$0xff]  ;;  %v1194_v47 = vld [vmem:[%s2231_s1 + $0x788] sm:$0xff] }
  0x68   : >> { %616 = vmatpush.msra.mxu2 %v1122_v48  ;;  %636 = vmatpush.msra.mxu3 %v1123_v49  ;;  %v1159_v48 = vld [vmem:[%s2231_s1 + $0x670] sm:$0xff]  ;;  %v1160_v49 = vld [vmem:[%s2231_s1 + $0x678] sm:$0xff] }
  0x69   : >> { %537 = vmatpush.msra.mxu0 %v1088_v50  ;;  %557 = vmatpush.msra.mxu1 %v1089_v51  ;;  %v1191_v50 = vld [vmem:[%s2231_s1 + $0x770] sm:$0xff]  ;;  %v1192_v51 = vld [vmem:[%s2231_s1 + $0x778] sm:$0xff] }
  0x6a   : >> { %617 = vmatpush.msra.mxu2 %v1120_v52  ;;  %637 = vmatpush.msra.mxu3 %v1121_v53  ;;  %v1157_v52 = vld [vmem:[%s2231_s1 + $0x660] sm:$0xff]  ;;  %v1158_v53 = vld [vmem:[%s2231_s1 + $0x668] sm:$0xff] }
  0x6b   : >> { %538 = vmatpush.msra.mxu0 %v1086_v54  ;;  %558 = vmatpush.msra.mxu1 %v1087_v55  ;;  %v1189_v54 = vld [vmem:[%s2231_s1 + $0x760] sm:$0xff]  ;;  %v1190_v55 = vld [vmem:[%s2231_s1 + $0x768] sm:$0xff] }
  0x6c   : >> { %618 = vmatpush.msra.mxu2 %v1118_v56  ;;  %638 = vmatpush.msra.mxu3 %v1119_v57  ;;  %v1155_v56 = vld [vmem:[%s2231_s1 + $0x650] sm:$0xff]  ;;  %v1156_v57 = vld [vmem:[%s2231_s1 + $0x658] sm:$0xff] }
  0x6d   : >> { %539 = vmatpush.msra.mxu0 %v1084_v58  ;;  %559 = vmatpush.msra.mxu1 %v1085_v59  ;;  %v1187_v58 = vld [vmem:[%s2231_s1 + $0x750] sm:$0xff]  ;;  %v1188_v59 = vld [vmem:[%s2231_s1 + $0x758] sm:$0xff] }
  0x6e   : >> { %619 = vmatpush.msra.mxu2 %v1116_v60  ;;  %639 = vmatpush.msra.mxu3 %v1117_v61  ;;  %v1153_v60 = vld [vmem:[%s2231_s1 + $0x640] sm:$0xff]  ;;  %v1154_v61 = vld [vmem:[%s2231_s1 + $0x648] sm:$0xff] }
  0x6f   : >> { %540 = vmatpush.msra.mxu0 %v1082_v62  ;;  %560 = vmatpush.msra.mxu1 %v1083_v63  ;;  %v1185_v62 = vld [vmem:[%s2231_s1 + $0x740] sm:$0xff]  ;;  %v1186_v63 = vld [vmem:[%s2231_s1 + $0x748] sm:$0xff] }
  0x70   : >> { %620 = vmatpush.msra.mxu2 %v1114_v2  ;;  %640 = vmatpush.msra.mxu3 %v1115_v3  ;;  %v1152_v2 = vld [vmem:[%s2231_s1 + $0x638] sm:$0xff]  ;;  %v1183_v3 = vld [vmem:[%s2231_s1 + $0x730] sm:$0xff] }
  0x71   : >> { %541 = vmatpush.msra.mxu0 %v1080_v4  ;;  %561 = vmatpush.msra.mxu1 %v1081_v5  ;;  %v1184_v4 = vld [vmem:[%s2231_s1 + $0x738] sm:$0xff]  ;;  %v1149_v5 = vld [vmem:[%s2231_s1 + $0x620] sm:$0xff] }
  0x72   : >> { %621 = vmatpush.msra.mxu2 %v1112_v7  ;;  %641 = vmatpush.msra.mxu3 %v1113_v9  ;;  %v1181_v7 = vld [vmem:[%s2231_s1 + $0x720] sm:$0xff]  ;;  %v1182_v9 = vld [vmem:[%s2231_s1 + $0x728] sm:$0xff] }
  0x73   : >> { %542 = vmatpush.msra.mxu0 %v1078_v11  ;;  %562 = vmatpush.msra.mxu1 %v1079_v12  ;;  %v1148_v11 = vld [vmem:[%s2231_s1 + $0x618] sm:$0xff]  ;;  %v1179_v12 = vld [vmem:[%s2231_s1 + $0x710] sm:$0xff] }
  0x74   : >> { %622 = vmatpush.msra.mxu2 %v1110_v13  ;;  %642 = vmatpush.msra.mxu3 %v1111_v14  ;;  %v1180_v13 = vld [vmem:[%s2231_s1 + $0x718] sm:$0xff]  ;;  %v2103_v14 = vld [vmem:[%s1650_s4 + $0x20] sm:$0xff] }
  0x75   : >> { %543 = vmatmul.f32.vlgmr.msra.gmra.mxu0 %v525_v15  ;;  %563 = vmatmul.f32.vlgmr.msra.gmra.mxu1 %v525_v15  ;;  %v1145_v15 = vld [vmem:[%s2231_s1 + $0x600] sm:$0xff] }
  0x76   : >> { %623 = vmatmul.f32.vlgmr.msra.gmra.mxu2 %v605_v16  ;;  %643 = vmatmul.f32.vlgmr.msra.gmra.mxu3 %v605_v16  ;;  %v1146_v16 = vld [vmem:[%s2231_s1 + $0x608] sm:$0xff] }
  0x77   : >> { %687 = vmatpush.msrb.mxu0 %v1175_v17  ;;  %707 = vmatpush.msrb.mxu1 %v1176_v18  ;;  %v1177_v17 = vld [vmem:[%s2231_s1 + $0x700] sm:$0xff]  ;;  %v1178_v18 = vld [vmem:[%s2231_s1 + $0x708] sm:$0xff] }
  0x78   : >> { %765 = vmatpush.msrb.mxu2 %v1207_v8  ;;  %785 = vmatpush.msrb.mxu3 %v1208_v19  ;;  %v763_v8 = vrot.slane %v2103_v14, 1  ;;  %v1239_v19 = vld [vmem:[%s2231_s1 + $0x8f0] sm:$0xff] }
  0x79   : >> { %688 = vmatpush.msrb.mxu0 %v1173_v20  ;;  %708 = vmatpush.msrb.mxu1 %v1174_v21  ;;  %v1240_v20 = vld [vmem:[%s2231_s1 + $0x8f8] sm:$0xff]  ;;  %v1237_v21 = vld [vmem:[%s2231_s1 + $0x8e0] sm:$0xff] }
  0x7a   : >> { %766 = vmatpush.msrb.mxu2 %v1205_v22  ;;  %786 = vmatpush.msrb.mxu3 %v1206_v23  ;;  %v1238_v22 = vld [vmem:[%s2231_s1 + $0x8e8] sm:$0xff]  ;;  %v1235_v23 = vld [vmem:[%s2231_s1 + $0x8d0] sm:$0xff] }
  0x7b   : >> { %689 = vmatpush.msrb.mxu0 %v1171_v24  ;;  %709 = vmatpush.msrb.mxu1 %v1172_v25  ;;  %v1236_v24 = vld [vmem:[%s2231_s1 + $0x8d8] sm:$0xff]  ;;  %v1233_v25 = vld [vmem:[%s2231_s1 + $0x8c0] sm:$0xff] }
  0x7c   : >> { %767 = vmatpush.msrb.mxu2 %v1203_v26  ;;  %787 = vmatpush.msrb.mxu3 %v1204_v27  ;;  %v1234_v26 = vld [vmem:[%s2231_s1 + $0x8c8] sm:$0xff]  ;;  %v1231_v27 = vld [vmem:[%s2231_s1 + $0x8b0] sm:$0xff] }
  0x7d   : >> { %690 = vmatpush.msrb.mxu0 %v1169_v28  ;;  %710 = vmatpush.msrb.mxu1 %v1170_v29  ;;  %v1232_v28 = vld [vmem:[%s2231_s1 + $0x8b8] sm:$0xff]  ;;  %v1229_v29 = vld [vmem:[%s2231_s1 + $0x8a0] sm:$0xff] }
  0x7e   : >> { %768 = vmatpush.msrb.mxu2 %v1201_v30  ;;  %788 = vmatpush.msrb.mxu3 %v1202_v31  ;;  %v1230_v30 = vld [vmem:[%s2231_s1 + $0x8a8] sm:$0xff]  ;;  %v1227_v31 = vld [vmem:[%s2231_s1 + $0x890] sm:$0xff] }
  0x7f   : >> { %691 = vmatpush.msrb.mxu0 %v1167_v32  ;;  %711 = vmatpush.msrb.mxu1 %v1168_v33  ;;  %v1228_v32 = vld [vmem:[%s2231_s1 + $0x898] sm:$0xff]  ;;  %v1225_v33 = vld [vmem:[%s2231_s1 + $0x880] sm:$0xff] }
  0x80   : >> { %769 = vmatpush.msrb.mxu2 %v1199_v34  ;;  %789 = vmatpush.msrb.mxu3 %v1200_v35  ;;  %v1226_v34 = vld [vmem:[%s2231_s1 + $0x888] sm:$0xff]  ;;  %v1223_v35 = vld [vmem:[%s2231_s1 + $0x870] sm:$0xff] }
  0x81   : >> { %692 = vmatpush.msrb.mxu0 %v1165_v36  ;;  %712 = vmatpush.msrb.mxu1 %v1166_v37  ;;  %v1224_v36 = vld [vmem:[%s2231_s1 + $0x878] sm:$0xff]  ;;  %v1221_v37 = vld [vmem:[%s2231_s1 + $0x860] sm:$0xff] }
  0x82   : >> { %770 = vmatpush.msrb.mxu2 %v1197_v38  ;;  %790 = vmatpush.msrb.mxu3 %v1198_v39  ;;  %v1222_v38 = vld [vmem:[%s2231_s1 + $0x868] sm:$0xff]  ;;  %v1219_v39 = vld [vmem:[%s2231_s1 + $0x850] sm:$0xff] }
  0x83   : >> { %693 = vmatpush.msrb.mxu0 %v1163_v40  ;;  %713 = vmatpush.msrb.mxu1 %v1164_v41  ;;  %v1220_v40 = vld [vmem:[%s2231_s1 + $0x858] sm:$0xff]  ;;  %v1217_v41 = vld [vmem:[%s2231_s1 + $0x840] sm:$0xff] }
  0x84   : >> { %771 = vmatpush.msrb.mxu2 %v1195_v42  ;;  %791 = vmatpush.msrb.mxu3 %v1196_v43  ;;  %v1218_v42 = vld [vmem:[%s2231_s1 + $0x848] sm:$0xff]  ;;  %v1215_v43 = vld [vmem:[%s2231_s1 + $0x830] sm:$0xff] }
  0x85   : >> { %694 = vmatpush.msrb.mxu0 %v1161_v44  ;;  %714 = vmatpush.msrb.mxu1 %v1162_v45  ;;  %v1216_v44 = vld [vmem:[%s2231_s1 + $0x838] sm:$0xff]  ;;  %v1144_v45 = vld [vmem:[%s1650_s4 + $0x28] sm:$0x1] }
  0x86   : >> { %772 = vmatpush.msrb.mxu2 %v1193_v46  ;;  %792 = vmatpush.msrb.mxu3 %v1194_v47  ;;  %v1213_v46 = vld [vmem:[%s2231_s1 + $0x820] sm:$0xff]  ;;  %v1214_v47 = vld [vmem:[%s2231_s1 + $0x828] sm:$0xff] }
  0x87   : >> { %695 = vmatpush.msrb.mxu0 %v1159_v48  ;;  %715 = vmatpush.msrb.mxu1 %v1160_v49  ;;  %v841_v48 = vrot.slane %v2103_v14, 2  ;;  %v842_v49 = vrot.slane %v1144_v45, 2 }
  0x88   : >> { %773 = vmatpush.msrb.mxu2 %v1191_v50  ;;  %793 = vmatpush.msrb.mxu3 %v1192_v51  ;;  %v1211_v50 = vld [vmem:[%s2231_s1 + $0x810] sm:$0xff]  ;;  %v1212_v51 = vld [vmem:[%s2231_s1 + $0x818] sm:$0xff] }
  0x89   : >> { %696 = vmatpush.msrb.mxu0 %v1157_v52  ;;  %716 = vmatpush.msrb.mxu1 %v1158_v53  ;;  %v1209_v52 = vld [vmem:[%s2231_s1 + $0x800] sm:$0xff]  ;;  %v1210_v53 = vld [vmem:[%s2231_s1 + $0x808] sm:$0xff] }
  0x8a   : >> { %774 = vmatpush.msrb.mxu2 %v1189_v54  ;;  %794 = vmatpush.msrb.mxu3 %v1190_v55  ;;  %v843_v54 = vsel %vm364_vm0, %v841_v48, %v842_v49 }
  0x8b   : >> { %697 = vmatpush.msrb.mxu0 %v1155_v56  ;;  %717 = vmatpush.msrb.mxu1 %v1156_v57 }
  0x8c   : >> { %775 = vmatpush.msrb.mxu2 %v1187_v58  ;;  %795 = vmatpush.msrb.mxu3 %v1188_v59 }
  0x8d   : >> { %698 = vmatpush.msrb.mxu0 %v1153_v60  ;;  %718 = vmatpush.msrb.mxu1 %v1154_v61 }
  0x8e   : >> { %776 = vmatpush.msrb.mxu2 %v1185_v62  ;;  %796 = vmatpush.msrb.mxu3 %v1186_v63 }
  0x8f   : >> { %699 = vmatpush.msrb.mxu0 %v1151_v1  ;;  %719 = vmatpush.msrb.mxu1 %v1152_v2 }
  0x90   : >> { %777 = vmatpush.msrb.mxu2 %v1183_v3  ;;  %797 = vmatpush.msrb.mxu3 %v1184_v4 }
  0x91   : >> { %700 = vmatpush.msrb.mxu0 %v1149_v5  ;;  %720 = vmatpush.msrb.mxu1 %v1150_v6 }
  0x92   : >> { %778 = vmatpush.msrb.mxu2 %v1181_v7  ;;  %798 = vmatpush.msrb.mxu3 %v1182_v9 }
  0x93   : >> { %701 = vmatpush.msrb.mxu0 %v1147_v10  ;;  %721 = vmatpush.msrb.mxu1 %v1148_v11 }
  0x94   : >> { %779 = vmatpush.msrb.mxu2 %v1179_v12  ;;  %799 = vmatpush.msrb.mxu3 %v1180_v13 }
  0x95   : >> { %702 = vmatpush.msrb.mxu0 %v1145_v15  ;;  %722 = vmatpush.msrb.mxu1 %v1146_v16 }
  0x96   : >> { %780 = vmatpush.msrb.mxu2 %v1177_v17  ;;  %800 = vmatpush.msrb.mxu3 %v1178_v18 }
  0x97   : >> { %703 = vmatmul.f32.vlgmr.msrb.gmra.mxu0 %v2103_v14  ;;  %723 = vmatmul.f32.vlgmr.msrb.gmra.mxu1 %v2103_v14 }
  0x98   : >> { %781 = vmatmul.f32.vlgmr.msrb.gmra.mxu2 %v763_v8  ;;  %801 = vmatmul.f32.vlgmr.msrb.gmra.mxu3 %v763_v8 }
  0x99   : >> { %845 = vmatpush.msra.mxu0 %v1239_v19  ;;  %865 = vmatpush.msra.mxu1 %v1240_v20 }
  0x9b   : >> { %846 = vmatpush.msra.mxu0 %v1237_v21  ;;  %866 = vmatpush.msra.mxu1 %v1238_v22  ;;  %v888_v22 = vperm.slane %v1311_v0, 0 }
  0x9d   : >> { %847 = vmatpush.msra.mxu0 %v1235_v23  ;;  %867 = vmatpush.msra.mxu1 %v1236_v24  ;;  %v889_v23 = vperm.slane %v1311_v0, 1 }
  0x9f   : >> { %848 = vmatpush.msra.mxu0 %v1233_v25  ;;  %868 = vmatpush.msra.mxu1 %v1234_v26 }
  0xa1   : >> { %849 = vmatpush.msra.mxu0 %v1231_v27  ;;  %869 = vmatpush.msra.mxu1 %v1232_v28 }
  0xa3   : >> { %850 = vmatpush.msra.mxu0 %v1229_v29  ;;  %870 = vmatpush.msra.mxu1 %v1230_v30 }
  0xa5   : >> { %851 = vmatpush.msra.mxu0 %v1227_v31  ;;  %871 = vmatpush.msra.mxu1 %v1228_v32 }
  0xa7   : >> { %852 = vmatpush.msra.mxu0 %v1225_v33  ;;  %872 = vmatpush.msra.mxu1 %v1226_v34 }
  0xa9   : >> { %853 = vmatpush.msra.mxu0 %v1223_v35  ;;  %873 = vmatpush.msra.mxu1 %v1224_v36 }
  0xab   : >> { %854 = vmatpush.msra.mxu0 %v1221_v37  ;;  %874 = vmatpush.msra.mxu1 %v1222_v38 }
  0xad   : >> { %855 = vmatpush.msra.mxu0 %v1219_v39  ;;  %875 = vmatpush.msra.mxu1 %v1220_v40 }
  0xaf   : >> { %856 = vmatpush.msra.mxu0 %v1217_v41  ;;  %876 = vmatpush.msra.mxu1 %v1218_v42 }
  0xb1   : >> { %857 = vmatpush.msra.mxu0 %v1215_v43  ;;  %877 = vmatpush.msra.mxu1 %v1216_v44 }
  0xb3   : >> { %858 = vmatpush.msra.mxu0 %v1213_v46  ;;  %878 = vmatpush.msra.mxu1 %v1214_v47 }
  0xb5   : >> { %859 = vmatpush.msra.mxu0 %v1211_v50  ;;  %879 = vmatpush.msra.mxu1 %v1212_v51 }
  0xb7   : >> { %860 = vmatpush.msra.mxu0 %v1209_v52  ;;  %880 = vmatpush.msra.mxu1 %v1210_v53 }
  0xb8   : >> { %861 = vmatmul.f32.vlgmr.msra.gmra.mxu0 %v843_v54  ;;  %881 = vmatmul.f32.vlgmr.msra.gmra.mxu1 %v843_v54 }
  0xc9   : >> { %v267_v55 = vpop.f32.mrf.mxu0  ;;  %v287_v56 = vpop.f32.mrf.mxu1 }
  0xcc   : >> { %v307_v57 = vpop.f32.mrf.mxu2  ;;  %v327_v58 = vpop.f32.mrf.mxu3 }
  0xcd   : >> { %v308_v2 = vadd.f32 %v307_v57, %v267_v55  ;;  %v328_v3 = vadd.f32 %v327_v58, %v287_v56 }
  0xd3   : >> { %v386_v59 = vpop.f32.mrf.mxu0  ;;  %v406_v60 = vpop.f32.mrf.mxu1 }
  0xd4   : >> { %v409_v6 = vadd.f32 %v386_v59, %v308_v2  ;;  %v410_v7 = vadd.f32 %v406_v60, %v328_v3 }
  0xd6   : >> { %v466_v61 = vpop.f32.mrf.mxu2  ;;  %v486_v62 = vpop.f32.mrf.mxu3 }
  0xd7   : >> { %v489_v9 = vadd.f32 %v466_v61, %v409_v6  ;;  %v490_v10 = vadd.f32 %v486_v62, %v410_v7 }
  0xf2   : >> { %v544_v63 = vpop.f32.mrf.mxu0  ;;  %v564_v1 = vpop.f32.mrf.mxu1 }
  0xf3   : >> { %v567_v13 = vadd.f32 %v544_v63, %v489_v9  ;;  %v568_v14 = vadd.f32 %v564_v1, %v490_v10 }
  0xf9   : >> { %v624_v4 = vpop.f32.mrf.mxu2  ;;  %v644_v5 = vpop.f32.mrf.mxu3 }
  0xfa   : >> { %v647_v15 = vadd.f32 %v624_v4, %v567_v13  ;;  %v648_v16 = vadd.f32 %v644_v5, %v568_v14 }
 0x114   : >> { %v704_v11 = vpop.f32.mrf.mxu0  ;;  %v724_v12 = vpop.f32.mrf.mxu1 }
 0x115   : >> { %v727_v8 = vadd.f32 %v704_v11, %v647_v15  ;;  %v728_v19 = vadd.f32 %v724_v12, %v648_v16 }
 0x11b   : >> { %v782_v17 = vpop.f32.mrf.mxu2  ;;  %v802_v18 = vpop.f32.mrf.mxu3 }
 0x11c   : >> { %v805_v20 = vadd.f32 %v782_v17, %v727_v8  ;;  %v806_v21 = vadd.f32 %v802_v18, %v728_v19 }
 0x135   : >> { %v862_v24 = vpop.f32.mrf.mxu0  ;;  %v882_v25 = vpop.f32.mrf.mxu1 }
 0x136   : >> { %v885_v26 = vadd.f32 %v862_v24, %v805_v20  ;;  %v886_v27 = vadd.f32 %v882_v25, %v806_v21 }
 0x138   : >> { %v892_v28 = vadd.f32 %v888_v22, %v885_v26  ;;  %v893_v29 = vadd.f32 %v889_v23, %v886_v27 }
 0x139   : > { %176 = sbr.rel (!%p174_p4) target bundleno = 16 (0x10), region = 81 }
 0x13a   : >> { %v894_v30 = vmax.f32 %v892_v28, 0.0  ;;  %v895_v31 = vmax.f32 %v893_v29, 0.0 }
 0x13c   : >> { %899 = vst [vmem:[%s898_s11] sm:$0x7f] %v894_v30 }
 0x13d   : >> { %900 = vst [vmem:[%s898_s11 + $0x8] sm:$0x7f] %v895_v31 }
 0x13e PF: > { %s13_s12 = sadd.s32 1, %s1274_s12  }
 0x13f   : > { %p10_p5 = scmp.ge.s32.totalorder %s13_s12, 4  }
 0x141   :  { %12 = sbr.rel (!%p10_p5) target bundleno = 1 (0x1), region = 92 }

// kernel: encoder_cnn.16
= control target key start
LH: loop header
LB: loop body
LE: loop exit
PB: predicated region body
PF: predicated region fallthrough
CT: control target
= control target key end

     0   :  { %s2243_s12 = smov 0   ;;  %s4067_s0 = inlined_call_operand.vmem [shape: f32[2,9,9,256], index: 0, kind: input, shape index: {}]   ;;  %s4068_s1 = inlined_call_operand.vmem [shape: f32[9,256,256], index: 1, kind: input, shape index: {}]   ;;  %s4069_s2 = inlined_call_operand.vmem [shape: f32[1,256], index: 2, kind: input, shape index: {}]   ;;  %s4070_s3 = inlined_call_operand.vmem [shape: f32[2,7,7,256], index: 3, kind: output, shape index: {}]  }
   0x1 LB: > { %s1652_s13 = sadd.s32 4294967295, %s2217_s12   ;;  %p1656_p0 = scmp.ge.s32.totalorder %s2217_s12, 1  ;;  %s2217_s12 = sphi %s2243_s12, %s13_s12  }
   0x2   : > { %p137_p1 = scmp.lt.s32.totalorder %s2217_s12, 3 }
   0x4   : > { %p138_p2 = pnand %p1656_p0, %p137_p1 }
   0x5   : > { %p161_p3 = scmp.lt.s32.totalorder (!%p138_p2), %s1652_s13, 1  ;;  %s2266_s24 = smov (!%p138_p2), 0  }
   0x6   : > { %141 = sbr.rel (%p138_p2) target bundleno = 463 (0x1cf), region = 32 }
   0xb   : > { %v2254_v0 = vld [vmem:[%s4069_s2] sm:$0x3]  ;;  %s4072_s13 = smov (!%p161_p3, %s1652_s13), 1 }
   0xc   : > { %s2189_s16 = smul.u32 288, %s4072_s13 }
   0xd   : > { %s2190_s17 = smul.u32 112, %s4072_s13 }
   0xe   : > { %s2259_s20 = scalar_lea.vmem %s4067_s0, %s2189_s16 }
   0xf   : > { %s2264_s23 = scalar_lea.vmem %s4070_s3, %s2190_s17 }
  0x10 LB: >> { %v1691_v1 = vld [vmem:[%s4068_s1 + $0x2f0] sm:$0xff]  ;;  %v1692_v3 = vld [vmem:[%s4068_s1 + $0x2f8] sm:$0xff]  ;;  %v1689_v5 = vld [vmem:[%s4068_s1 + $0x2e0] sm:$0xff]  ;;  %s2187_s10 = sshll.u32 %s2221_s24, 5  ;;  %vm547_vm0 = vcmask 1045504   ;;  %s2188_s22 = sshll.u32 %s2221_s24, 4  ;;  %s2221_s24 = sphi %s2266_s24, %s177_s24  }
  0x11   : >> { %v1723_v2 = vld [vmem:[%s4068_s1 + $0x3f0] sm:$0xff]  ;;  %320 = vmatpush.msra.mxu0 %v1691_v1  ;;  %v1724_v4 = vld [vmem:[%s4068_s1 + $0x3f8] sm:$0xff]  ;;  %v1721_v6 = vld [vmem:[%s4068_s1 + $0x3e0] sm:$0xff]  ;;  %360 = vmatpush.msra.mxu2 %v1692_v3  ;;  %s2585_s27 = scalar_lea.vmem %s2259_s20, %s2187_s10  ;;  %s1579_s25 = scalar_lea.vmem %s2264_s23, %s2188_s22 }
  0x12   : >> { %340 = vmatpush.msra.mxu1 %v1723_v2  ;;  %380 = vmatpush.msra.mxu3 %v1724_v4  ;;  %v1690_v7 = vld [vmem:[%s4068_s1 + $0x2e8] sm:$0xff]  ;;  %v1687_v9 = vld [vmem:[%s4068_s1 + $0x2d0] sm:$0xff]  ;;  %v1688_v11 = vld [vmem:[%s4068_s1 + $0x2d8] sm:$0xff]  ;;  %s177_s24 = sadd.s32 1, %s2221_s24  }
  0x13   : >> { %v1722_v8 = vld [vmem:[%s4068_s1 + $0x3e8] sm:$0xff]  ;;  %321 = vmatpush.msra.mxu0 %v1689_v5  ;;  %v1719_v10 = vld [vmem:[%s4068_s1 + $0x3d0] sm:$0xff]  ;;  %v1720_v12 = vld [vmem:[%s4068_s1 + $0x3d8] sm:$0xff]  ;;  %361 = vmatpush.msra.mxu2 %v1690_v7  ;;  %p174_p4 = scmp.ge.s32.totalorder %s177_s24, 7  }
  0x14   : >> { %341 = vmatpush.msra.mxu1 %v1721_v6  ;;  %381 = vmatpush.msra.mxu3 %v1722_v8  ;;  %v1685_v13 = vld [vmem:[%s4068_s1 + $0x2c0] sm:$0xff]  ;;  %v1686_v15 = vld [vmem:[%s4068_s1 + $0x2c8] sm:$0xff]  ;;  %v1683_v17 = vld [vmem:[%s4068_s1 + $0x2b0] sm:$0xff] }
  0x15   : >> { %v1717_v14 = vld [vmem:[%s4068_s1 + $0x3c0] sm:$0xff]  ;;  %322 = vmatpush.msra.mxu0 %v1687_v9  ;;  %v1718_v16 = vld [vmem:[%s4068_s1 + $0x3c8] sm:$0xff]  ;;  %362 = vmatpush.msra.mxu2 %v1688_v11  ;;  %v1715_v18 = vld [vmem:[%s4068_s1 + $0x3b0] sm:$0xff] }
  0x16   : >> { %342 = vmatpush.msra.mxu1 %v1719_v10  ;;  %382 = vmatpush.msra.mxu3 %v1720_v12  ;;  %v1684_v19 = vld [vmem:[%s4068_s1 + $0x2b8] sm:$0xff]  ;;  %v1681_v21 = vld [vmem:[%s4068_s1 + $0x2a0] sm:$0xff]  ;;  %v1682_v23 = vld [vmem:[%s4068_s1 + $0x2a8] sm:$0xff] }
  0x17   : >> { %323 = vmatpush.msra.mxu0 %v1685_v13  ;;  %v1716_v20 = vld [vmem:[%s4068_s1 + $0x3b8] sm:$0xff]  ;;  %363 = vmatpush.msra.mxu2 %v1686_v15  ;;  %v1713_v22 = vld [vmem:[%s4068_s1 + $0x3a0] sm:$0xff]  ;;  %v1714_v24 = vld [vmem:[%s4068_s1 + $0x3a8] sm:$0xff] }
  0x18   : >> { %343 = vmatpush.msra.mxu1 %v1717_v14  ;;  %383 = vmatpush.msra.mxu3 %v1718_v16  ;;  %v1679_v25 = vld [vmem:[%s4068_s1 + $0x290] sm:$0xff]  ;;  %v1680_v27 = vld [vmem:[%s4068_s1 + $0x298] sm:$0xff]  ;;  %v1677_v29 = vld [vmem:[%s4068_s1 + $0x280] sm:$0xff] }
  0x19   : >> { %324 = vmatpush.msra.mxu0 %v1683_v17  ;;  %364 = vmatpush.msra.mxu2 %v1684_v19  ;;  %v1711_v26 = vld [vmem:[%s4068_s1 + $0x390] sm:$0xff]  ;;  %v1712_v28 = vld [vmem:[%s4068_s1 + $0x398] sm:$0xff]  ;;  %v1709_v30 = vld [vmem:[%s4068_s1 + $0x380] sm:$0xff] }
  0x1a   : >> { %344 = vmatpush.msra.mxu1 %v1715_v18  ;;  %384 = vmatpush.msra.mxu3 %v1716_v20  ;;  %v1678_v31 = vld [vmem:[%s4068_s1 + $0x288] sm:$0xff]  ;;  %v1675_v33 = vld [vmem:[%s4068_s1 + $0x270] sm:$0xff]  ;;  %v1676_v35 = vld [vmem:[%s4068_s1 + $0x278] sm:$0xff] }
  0x1b   : >> { %325 = vmatpush.msra.mxu0 %v1681_v21  ;;  %365 = vmatpush.msra.mxu2 %v1682_v23  ;;  %v1710_v32 = vld [vmem:[%s4068_s1 + $0x388] sm:$0xff]  ;;  %v1707_v34 = vld [vmem:[%s4068_s1 + $0x370] sm:$0xff]  ;;  %v1708_v36 = vld [vmem:[%s4068_s1 + $0x378] sm:$0xff] }
  0x1c   : >> { %345 = vmatpush.msra.mxu1 %v1713_v22  ;;  %385 = vmatpush.msra.mxu3 %v1714_v24  ;;  %v1673_v37 = vld [vmem:[%s4068_s1 + $0x260] sm:$0xff]  ;;  %v1674_v39 = vld [vmem:[%s4068_s1 + $0x268] sm:$0xff]  ;;  %v1671_v41 = vld [vmem:[%s4068_s1 + $0x250] sm:$0xff] }
  0x1d   : >> { %326 = vmatpush.msra.mxu0 %v1679_v25  ;;  %366 = vmatpush.msra.mxu2 %v1680_v27  ;;  %v1705_v38 = vld [vmem:[%s4068_s1 + $0x360] sm:$0xff]  ;;  %v1706_v40 = vld [vmem:[%s4068_s1 + $0x368] sm:$0xff]  ;;  %v1703_v42 = vld [vmem:[%s4068_s1 + $0x350] sm:$0xff] }
  0x1e   : >> { %346 = vmatpush.msra.mxu1 %v1711_v26  ;;  %386 = vmatpush.msra.mxu3 %v1712_v28  ;;  %v1672_v43 = vld [vmem:[%s4068_s1 + $0x258] sm:$0xff]  ;;  %v1669_v45 = vld [vmem:[%s4068_s1 + $0x240] sm:$0xff]  ;;  %v1670_v47 = vld [vmem:[%s4068_s1 + $0x248] sm:$0xff] }
  0x1f   : >> { %327 = vmatpush.msra.mxu0 %v1677_v29  ;;  %367 = vmatpush.msra.mxu2 %v1678_v31  ;;  %v1704_v44 = vld [vmem:[%s4068_s1 + $0x358] sm:$0xff]  ;;  %v1701_v46 = vld [vmem:[%s4068_s1 + $0x340] sm:$0xff]  ;;  %v1702_v48 = vld [vmem:[%s4068_s1 + $0x348] sm:$0xff] }
  0x20   : >> { %347 = vmatpush.msra.mxu1 %v1709_v30  ;;  %387 = vmatpush.msra.mxu3 %v1710_v32  ;;  %v1667_v49 = vld [vmem:[%s4068_s1 + $0x230] sm:$0xff]  ;;  %v1668_v51 = vld [vmem:[%s4068_s1 + $0x238] sm:$0xff]  ;;  %v1665_v53 = vld [vmem:[%s4068_s1 + $0x220] sm:$0xff] }
  0x21   : >> { %328 = vmatpush.msra.mxu0 %v1675_v33  ;;  %368 = vmatpush.msra.mxu2 %v1676_v35  ;;  %v1699_v50 = vld [vmem:[%s4068_s1 + $0x330] sm:$0xff]  ;;  %v1700_v52 = vld [vmem:[%s4068_s1 + $0x338] sm:$0xff]  ;;  %v1697_v54 = vld [vmem:[%s4068_s1 + $0x320] sm:$0xff] }
  0x22   : >> { %348 = vmatpush.msra.mxu1 %v1707_v34  ;;  %388 = vmatpush.msra.mxu3 %v1708_v36  ;;  %v1666_v55 = vld [vmem:[%s4068_s1 + $0x228] sm:$0xff]  ;;  %v1663_v57 = vld [vmem:[%s4068_s1 + $0x210] sm:$0xff]  ;;  %v1664_v59 = vld [vmem:[%s4068_s1 + $0x218] sm:$0xff] }
  0x23   : >> { %329 = vmatpush.msra.mxu0 %v1673_v37  ;;  %369 = vmatpush.msra.mxu2 %v1674_v39  ;;  %v1698_v56 = vld [vmem:[%s4068_s1 + $0x328] sm:$0xff]  ;;  %v1695_v58 = vld [vmem:[%s4068_s1 + $0x310] sm:$0xff]  ;;  %v1696_v60 = vld [vmem:[%s4068_s1 + $0x318] sm:$0xff] }
  0x24   : >> { %349 = vmatpush.msra.mxu1 %v1705_v38  ;;  %389 = vmatpush.msra.mxu3 %v1706_v40  ;;  %v1661_v61 = vld [vmem:[%s4068_s1 + $0x200] sm:$0xff]  ;;  %v1662_v63 = vld [vmem:[%s4068_s1 + $0x208] sm:$0xff]  ;;  %v215_v2 = vld [vmem:[%s4068_s1 + $0xf0] sm:$0xff] }
  0x25   : >> { %330 = vmatpush.msra.mxu0 %v1671_v41  ;;  %370 = vmatpush.msra.mxu2 %v1672_v43  ;;  %v1693_v62 = vld [vmem:[%s4068_s1 + $0x300] sm:$0xff]  ;;  %v1694_v1 = vld [vmem:[%s4068_s1 + $0x308] sm:$0xff]  ;;  %v247_v3 = vld [vmem:[%s4068_s1 + $0x1f0] sm:$0xff] }
  0x26   : >> { %350 = vmatpush.msra.mxu1 %v1703_v42  ;;  %390 = vmatpush.msra.mxu3 %v1704_v44  ;;  %v216_v4 = vld [vmem:[%s4068_s1 + $0xf8] sm:$0xff]  ;;  %v213_v6 = vld [vmem:[%s4068_s1 + $0xe0] sm:$0xff]  ;;  %v214_v8 = vld [vmem:[%s4068_s1 + $0xe8] sm:$0xff] }
  0x27   : >> { %331 = vmatpush.msra.mxu0 %v1669_v45  ;;  %371 = vmatpush.msra.mxu2 %v1670_v47  ;;  %v248_v5 = vld [vmem:[%s4068_s1 + $0x1f8] sm:$0xff]  ;;  %v245_v7 = vld [vmem:[%s4068_s1 + $0x1e0] sm:$0xff]  ;;  %v246_v9 = vld [vmem:[%s4068_s1 + $0x1e8] sm:$0xff] }
  0x28   : >> { %351 = vmatpush.msra.mxu1 %v1701_v46  ;;  %391 = vmatpush.msra.mxu3 %v1702_v48  ;;  %v211_v10 = vld [vmem:[%s4068_s1 + $0xd0] sm:$0xff]  ;;  %v212_v12 = vld [vmem:[%s4068_s1 + $0xd8] sm:$0xff]  ;;  %v209_v14 = vld [vmem:[%s4068_s1 + $0xc0] sm:$0xff] }
  0x29   : >> { %332 = vmatpush.msra.mxu0 %v1667_v49  ;;  %372 = vmatpush.msra.mxu2 %v1668_v51  ;;  %v243_v11 = vld [vmem:[%s4068_s1 + $0x1d0] sm:$0xff]  ;;  %v244_v13 = vld [vmem:[%s4068_s1 + $0x1d8] sm:$0xff]  ;;  %v241_v15 = vld [vmem:[%s4068_s1 + $0x1c0] sm:$0xff] }
  0x2a   : >> { %352 = vmatpush.msra.mxu1 %v1699_v50  ;;  %392 = vmatpush.msra.mxu3 %v1700_v52  ;;  %v210_v16 = vld [vmem:[%s4068_s1 + $0xc8] sm:$0xff]  ;;  %v207_v18 = vld [vmem:[%s4068_s1 + $0xb0] sm:$0xff]  ;;  %v208_v20 = vld [vmem:[%s4068_s1 + $0xb8] sm:$0xff] }
  0x2b   : >> { %333 = vmatpush.msra.mxu0 %v1665_v53  ;;  %373 = vmatpush.msra.mxu2 %v1666_v55  ;;  %v242_v17 = vld [vmem:[%s4068_s1 + $0x1c8] sm:$0xff]  ;;  %v239_v19 = vld [vmem:[%s4068_s1 + $0x1b0] sm:$0xff]  ;;  %v240_v21 = vld [vmem:[%s4068_s1 + $0x1b8] sm:$0xff] }
  0x2c   : >> { %353 = vmatpush.msra.mxu1 %v1697_v54  ;;  %393 = vmatpush.msra.mxu3 %v1698_v56  ;;  %v205_v22 = vld [vmem:[%s4068_s1 + $0xa0] sm:$0xff]  ;;  %v206_v24 = vld [vmem:[%s4068_s1 + $0xa8] sm:$0xff]  ;;  %v203_v26 = vld [vmem:[%s4068_s1 + $0x90] sm:$0xff] }
  0x2d   : >> { %334 = vmatpush.msra.mxu0 %v1663_v57  ;;  %374 = vmatpush.msra.mxu2 %v1664_v59  ;;  %v237_v23 = vld [vmem:[%s4068_s1 + $0x1a0] sm:$0xff]  ;;  %v238_v25 = vld [vmem:[%s4068_s1 + $0x1a8] sm:$0xff]  ;;  %v235_v27 = vld [vmem:[%s4068_s1 + $0x190] sm:$0xff] }
  0x2e   : >> { %354 = vmatpush.msra.mxu1 %v1695_v58  ;;  %394 = vmatpush.msra.mxu3 %v1696_v60  ;;  %v204_v28 = vld [vmem:[%s4068_s1 + $0x98] sm:$0xff]  ;;  %v201_v30 = vld [vmem:[%s4068_s1 + $0x80] sm:$0xff]  ;;  %v202_v32 = vld [vmem:[%s4068_s1 + $0x88] sm:$0xff] }
  0x2f   : >> { %335 = vmatpush.msra.mxu0 %v1661_v61  ;;  %375 = vmatpush.msra.mxu2 %v1662_v63  ;;  %v236_v29 = vld [vmem:[%s4068_s1 + $0x198] sm:$0xff]  ;;  %v233_v31 = vld [vmem:[%s4068_s1 + $0x180] sm:$0xff]  ;;  %v234_v33 = vld [vmem:[%s4068_s1 + $0x188] sm:$0xff] }
  0x30   : >> { %355 = vmatpush.msra.mxu1 %v1693_v62  ;;  %395 = vmatpush.msra.mxu3 %v1694_v1  ;;  %v199_v34 = vld [vmem:[%s4068_s1 + $0x70] sm:$0xff]  ;;  %v200_v36 = vld [vmem:[%s4068_s1 + $0x78] sm:$0xff]  ;;  %v197_v38 = vld [vmem:[%s4068_s1 + $0x60] sm:$0xff] }
  0x31   : >> { %400 = vmatpush.msrb.mxu0 %v215_v2  ;;  %440 = vmatpush.msrb.mxu2 %v216_v4  ;;  %v231_v35 = vld [vmem:[%s4068_s1 + $0x170] sm:$0xff]  ;;  %v232_v37 = vld [vmem:[%s4068_s1 + $0x178] sm:$0xff]  ;;  %v229_v39 = vld [vmem:[%s4068_s1 + $0x160] sm:$0xff] }
  0x32   : >> { %420 = vmatpush.msrb.mxu1 %v247_v3  ;;  %460 = vmatpush.msrb.mxu3 %v248_v5  ;;  %v198_v40 = vld [vmem:[%s4068_s1 + $0x68] sm:$0xff]  ;;  %v195_v42 = vld [vmem:[%s4068_s1 + $0x50] sm:$0xff]  ;;  %v196_v44 = vld [vmem:[%s4068_s1 + $0x58] sm:$0xff] }
  0x33   : >> { %401 = vmatpush.msrb.mxu0 %v213_v6  ;;  %441 = vmatpush.msrb.mxu2 %v214_v8  ;;  %v230_v41 = vld [vmem:[%s4068_s1 + $0x168] sm:$0xff]  ;;  %v227_v43 = vld [vmem:[%s4068_s1 + $0x150] sm:$0xff]  ;;  %v228_v45 = vld [vmem:[%s4068_s1 + $0x158] sm:$0xff] }
  0x34   : >> { %421 = vmatpush.msrb.mxu1 %v245_v7  ;;  %461 = vmatpush.msrb.mxu3 %v246_v9  ;;  %v193_v46 = vld [vmem:[%s4068_s1 + $0x40] sm:$0xff]  ;;  %v194_v49 = vld [vmem:[%s4068_s1 + $0x48] sm:$0xff]  ;;  %v191_v51 = vld [vmem:[%s4068_s1 + $0x30] sm:$0xff] }
  0x35   : >> { %402 = vmatpush.msrb.mxu0 %v211_v10  ;;  %442 = vmatpush.msrb.mxu2 %v212_v12  ;;  %v225_v47 = vld [vmem:[%s4068_s1 + $0x140] sm:$0xff]  ;;  %v226_v50 = vld [vmem:[%s4068_s1 + $0x148] sm:$0xff]  ;;  %v223_v52 = vld [vmem:[%s4068_s1 + $0x130] sm:$0xff] }
  0x36   : >> { %422 = vmatpush.msrb.mxu1 %v243_v11  ;;  %462 = vmatpush.msrb.mxu3 %v244_v13  ;;  %v2606_v48 = vld [vmem:[%s2585_s27] sm:$0xff]  ;;  %v192_v53 = vld [vmem:[%s4068_s1 + $0x38] sm:$0xff]  ;;  %v2628_v56 = vld [vmem:[%s2585_s27 + $0x8] sm:$0xff] }
  0x37   : >> { %403 = vmatpush.msrb.mxu0 %v209_v14  ;;  %443 = vmatpush.msrb.mxu2 %v210_v16  ;;  %v224_v54 = vld [vmem:[%s4068_s1 + $0x138] sm:$0xff]  ;;  %v316_v55 = vrot.slane %v2606_v48, 1  ;;  %v189_v57 = vld [vmem:[%s4068_s1 + $0x20] sm:$0xff]  ;;  %v190_v59 = vld [vmem:[%s4068_s1 + $0x28] sm:$0xff]  ;;  %v317_v61 = vrot.slane %v2628_v56, 1 }
  0x38   : >> { %423 = vmatpush.msrb.mxu1 %v241_v15  ;;  %463 = vmatpush.msrb.mxu3 %v242_v17  ;;  %v221_v58 = vld [vmem:[%s4068_s1 + $0x120] sm:$0xff]  ;;  %v222_v60 = vld [vmem:[%s4068_s1 + $0x128] sm:$0xff]  ;;  %v187_v62 = vld [vmem:[%s4068_s1 + $0x10] sm:$0xff] }
  0x39   : >> { %404 = vmatpush.msrb.mxu0 %v207_v18  ;;  %444 = vmatpush.msrb.mxu2 %v208_v20  ;;  %v219_v63 = vld [vmem:[%s4068_s1 + $0x110] sm:$0xff]  ;;  %v188_v1 = vld [vmem:[%s4068_s1 + $0x18] sm:$0xff]  ;;  %v185_v3 = vld [vmem:[%s4068_s1] sm:$0xff] }
  0x3a   : >> { %424 = vmatpush.msrb.mxu1 %v239_v19  ;;  %464 = vmatpush.msrb.mxu3 %v240_v21  ;;  %v220_v2 = vld [vmem:[%s4068_s1 + $0x118] sm:$0xff]  ;;  %v217_v4 = vld [vmem:[%s4068_s1 + $0x100] sm:$0xff]  ;;  %v186_v5 = vld [vmem:[%s4068_s1 + $0x8] sm:$0xff] }
  0x3b   : >> { %405 = vmatpush.msrb.mxu0 %v205_v22  ;;  %445 = vmatpush.msrb.mxu2 %v206_v24  ;;  %v218_v6 = vld [vmem:[%s4068_s1 + $0x108] sm:$0xff]  ;;  %v1755_v7 = vld [vmem:[%s4068_s1 + $0x4f0] sm:$0xff]  ;;  %v1756_v9 = vld [vmem:[%s4068_s1 + $0x4f8] sm:$0xff] }
  0x3c   : >> { %425 = vmatpush.msrb.mxu1 %v237_v23  ;;  %465 = vmatpush.msrb.mxu3 %v238_v25  ;;  %v1787_v8 = vld [vmem:[%s4068_s1 + $0x5f0] sm:$0xff]  ;;  %v1788_v10 = vld [vmem:[%s4068_s1 + $0x5f8] sm:$0xff]  ;;  %v1753_v11 = vld [vmem:[%s4068_s1 + $0x4e0] sm:$0xff] }
  0x3d   : >> { %406 = vmatpush.msrb.mxu0 %v203_v26  ;;  %446 = vmatpush.msrb.mxu2 %v204_v28  ;;  %v1785_v12 = vld [vmem:[%s4068_s1 + $0x5e0] sm:$0xff]  ;;  %v1754_v13 = vld [vmem:[%s4068_s1 + $0x4e8] sm:$0xff]  ;;  %v1751_v15 = vld [vmem:[%s4068_s1 + $0x4d0] sm:$0xff] }
  0x3e   : >> { %426 = vmatpush.msrb.mxu1 %v235_v27  ;;  %466 = vmatpush.msrb.mxu3 %v236_v29  ;;  %v1786_v14 = vld [vmem:[%s4068_s1 + $0x5e8] sm:$0xff]  ;;  %v1783_v16 = vld [vmem:[%s4068_s1 + $0x5d0] sm:$0xff]  ;;  %v1752_v17 = vld [vmem:[%s4068_s1 + $0x4d8] sm:$0xff] }
  0x3f   : >> { %407 = vmatpush.msrb.mxu0 %v201_v30  ;;  %447 = vmatpush.msrb.mxu2 %v202_v32  ;;  %v1784_v18 = vld [vmem:[%s4068_s1 + $0x5d8] sm:$0xff]  ;;  %v1749_v19 = vld [vmem:[%s4068_s1 + $0x4c0] sm:$0xff]  ;;  %v1750_v21 = vld [vmem:[%s4068_s1 + $0x4c8] sm:$0xff] }
  0x40   : >> { %427 = vmatpush.msrb.mxu1 %v233_v31  ;;  %467 = vmatpush.msrb.mxu3 %v234_v33  ;;  %v1781_v20 = vld [vmem:[%s4068_s1 + $0x5c0] sm:$0xff]  ;;  %v1782_v22 = vld [vmem:[%s4068_s1 + $0x5c8] sm:$0xff]  ;;  %v1779_v23 = vld [vmem:[%s4068_s1 + $0x5b0] sm:$0xff] }
  0x41   : >> { %408 = vmatpush.msrb.mxu0 %v199_v34  ;;  %448 = vmatpush.msrb.mxu2 %v200_v36  ;;  %v1747_v24 = vld [vmem:[%s4068_s1 + $0x4b0] sm:$0xff]  ;;  %v1748_v25 = vld [vmem:[%s4068_s1 + $0x4b8] sm:$0xff]  ;;  %v1745_v27 = vld [vmem:[%s4068_s1 + $0x4a0] sm:$0xff] }
  0x42   : >> { %428 = vmatpush.msrb.mxu1 %v231_v35  ;;  %468 = vmatpush.msrb.mxu3 %v232_v37  ;;  %v1780_v26 = vld [vmem:[%s4068_s1 + $0x5b8] sm:$0xff]  ;;  %v1777_v28 = vld [vmem:[%s4068_s1 + $0x5a0] sm:$0xff]  ;;  %v1746_v29 = vld [vmem:[%s4068_s1 + $0x4a8] sm:$0xff] }
  0x43   : >> { %409 = vmatpush.msrb.mxu0 %v197_v38  ;;  %449 = vmatpush.msrb.mxu2 %v198_v40  ;;  %v1778_v30 = vld [vmem:[%s4068_s1 + $0x5a8] sm:$0xff]  ;;  %v1743_v31 = vld [vmem:[%s4068_s1 + $0x490] sm:$0xff]  ;;  %v1744_v33 = vld [vmem:[%s4068_s1 + $0x498] sm:$0xff] }
  0x44   : >> { %429 = vmatpush.msrb.mxu1 %v229_v39  ;;  %469 = vmatpush.msrb.mxu3 %v230_v41  ;;  %v1775_v32 = vld [vmem:[%s4068_s1 + $0x590] sm:$0xff]  ;;  %v1776_v34 = vld [vmem:[%s4068_s1 + $0x598] sm:$0xff]  ;;  %v1741_v35 = vld [vmem:[%s4068_s1 + $0x480] sm:$0xff] }
  0x45   : >> { %410 = vmatpush.msrb.mxu0 %v195_v42  ;;  %450 = vmatpush.msrb.mxu2 %v196_v44  ;;  %v1773_v36 = vld [vmem:[%s4068_s1 + $0x580] sm:$0xff]  ;;  %v1742_v37 = vld [vmem:[%s4068_s1 + $0x488] sm:$0xff]  ;;  %v1739_v39 = vld [vmem:[%s4068_s1 + $0x470] sm:$0xff] }
  0x46   : >> { %430 = vmatpush.msrb.mxu1 %v227_v43  ;;  %470 = vmatpush.msrb.mxu3 %v228_v45  ;;  %v1774_v38 = vld [vmem:[%s4068_s1 + $0x588] sm:$0xff]  ;;  %v1771_v40 = vld [vmem:[%s4068_s1 + $0x570] sm:$0xff]  ;;  %v1740_v41 = vld [vmem:[%s4068_s1 + $0x478] sm:$0xff] }
  0x47   : >> { %411 = vmatpush.msrb.mxu0 %v193_v46  ;;  %451 = vmatpush.msrb.mxu2 %v194_v49  ;;  %v1772_v42 = vld [vmem:[%s4068_s1 + $0x578] sm:$0xff]  ;;  %v1737_v43 = vld [vmem:[%s4068_s1 + $0x460] sm:$0xff]  ;;  %v1738_v45 = vld [vmem:[%s4068_s1 + $0x468] sm:$0xff] }
  0x48   : >> { %431 = vmatpush.msrb.mxu1 %v225_v47  ;;  %471 = vmatpush.msrb.mxu3 %v226_v50  ;;  %v1769_v44 = vld [vmem:[%s4068_s1 + $0x560] sm:$0xff]  ;;  %v1770_v46 = vld [vmem:[%s4068_s1 + $0x568] sm:$0xff]  ;;  %v1735_v47 = vld [vmem:[%s4068_s1 + $0x450] sm:$0xff] }
  0x49   : >> { %412 = vmatpush.msrb.mxu0 %v191_v51  ;;  %452 = vmatpush.msrb.mxu2 %v192_v53  ;;  %v1767_v49 = vld [vmem:[%s4068_s1 + $0x550] sm:$0xff]  ;;  %v1736_v50 = vld [vmem:[%s4068_s1 + $0x458] sm:$0xff]  ;;  %v1765_v53 = vld [vmem:[%s4068_s1 + $0x540] sm:$0xff] }
  0x4a   : >> { %432 = vmatpush.msrb.mxu1 %v223_v52  ;;  %472 = vmatpush.msrb.mxu3 %v224_v54  ;;  %v1768_v51 = vld [vmem:[%s4068_s1 + $0x558] sm:$0xff]  ;;  %v1733_v52 = vld [vmem:[%s4068_s1 + $0x440] sm:$0xff]  ;;  %v1734_v54 = vld [vmem:[%s4068_s1 + $0x448] sm:$0xff] }
  0x4b   : >> { %376 = vmatmul.f32.vlgmr.msra.gmra.mxu2 %v316_v55  ;;  %413 = vmatpush.msrb.mxu0 %v189_v57  ;;  %v1731_v57 = vld [vmem:[%s4068_s1 + $0x430] sm:$0xff] }
  0x4c   : >> { %433 = vmatpush.msrb.mxu1 %v221_v58  ;;  %453 = vmatpush.msrb.mxu2 %v190_v59  ;;  %v1763_v58 = vld [vmem:[%s4068_s1 + $0x530] sm:$0xff]  ;;  %v1732_v59 = vld [vmem:[%s4068_s1 + $0x438] sm:$0xff] }
  0x4d   : >> { %473 = vmatpush.msrb.mxu3 %v222_v60  ;;  %414 = vmatpush.msrb.mxu0 %v187_v62  ;;  %v1764_v60 = vld [vmem:[%s4068_s1 + $0x538] sm:$0xff] }
  0x4e   : >> { %396 = vmatmul.f32.vlgmr.msra.gmra.mxu3 %v317_v61  ;;  %434 = vmatpush.msrb.mxu1 %v219_v63  ;;  %v184_v62 = vld [vmem:[%s2585_s27 + $0x18] sm:$0x1]  ;;  %v1729_v63 = vld [vmem:[%s4068_s1 + $0x420] sm:$0xff] }
  0x4f   : >> { %454 = vmatpush.msrb.mxu2 %v188_v1  ;;  %474 = vmatpush.msrb.mxu3 %v220_v2  ;;  %v1761_v1 = vld [vmem:[%s4068_s1 + $0x520] sm:$0xff]  ;;  %v1730_v2 = vld [vmem:[%s4068_s1 + $0x428] sm:$0xff] }
  0x50   : >> { %415 = vmatpush.msrb.mxu0 %v185_v3  ;;  %435 = vmatpush.msrb.mxu1 %v217_v4  ;;  %v1762_v3 = vld [vmem:[%s4068_s1 + $0x528] sm:$0xff]  ;;  %v1727_v4 = vld [vmem:[%s4068_s1 + $0x410] sm:$0xff] }
  0x51   : >> { %455 = vmatpush.msrb.mxu2 %v186_v5  ;;  %475 = vmatpush.msrb.mxu3 %v218_v6  ;;  %v1759_v5 = vld [vmem:[%s4068_s1 + $0x510] sm:$0xff]  ;;  %v548_v6 = vrot.slane %v2606_v48, 2 }
  0x52   : >> { %336 = vmatmul.f32.vlgmr.msra.gmra.mxu0 %v316_v55  ;;  %356 = vmatmul.f32.vlgmr.msra.gmra.mxu1 %v317_v61  ;;  %v1766_v55 = vld [vmem:[%s4068_s1 + $0x548] sm:$0xff]  ;;  %v183_v61 = vld [vmem:[%s2585_s27 + $0x10] sm:$0x1] }
  0x53   : >> { %556 = vmatpush.msra.mxu0 %v1755_v7  ;;  %576 = vmatpush.msra.mxu1 %v1787_v8  ;;  %v549_v7 = vrot.slane %v183_v61, 2  ;;  %v551_v8 = vrot.slane %v2628_v56, 2  ;;  %v1837_v61 = vld [vmem:[%s4068_s1 + $0x758] sm:$0xff] }
  0x54   : >> { %596 = vmatpush.msra.mxu2 %v1756_v9  ;;  %616 = vmatpush.msra.mxu3 %v1788_v10  ;;  %v552_v9 = vrot.slane %v184_v62, 2  ;;  %v1728_v10 = vld [vmem:[%s4068_s1 + $0x418] sm:$0xff]  ;;  %v1802_v62 = vld [vmem:[%s4068_s1 + $0x640] sm:$0xff] }
  0x55   : >> { %456 = vmatmul.f32.vlgmr.msrb.gmra.mxu2 %v2606_v48  ;;  %557 = vmatpush.msra.mxu0 %v1753_v11  ;;  %v1760_v11 = vld [vmem:[%s4068_s1 + $0x518] sm:$0xff] }
  0x56   : >> { %577 = vmatpush.msra.mxu1 %v1785_v12  ;;  %597 = vmatpush.msra.mxu2 %v1754_v13  ;;  %v1726_v12 = vld [vmem:[%s4068_s1 + $0x408] sm:$0xff] }
  0x57   : >> { %617 = vmatpush.msra.mxu3 %v1786_v14  ;;  %558 = vmatpush.msra.mxu0 %v1751_v15  ;;  %v1758_v13 = vld [vmem:[%s4068_s1 + $0x508] sm:$0xff]  ;;  %v550_v14 = vsel %vm547_vm0, %v548_v6, %v549_v7  ;;  %v553_v15 = vsel %vm547_vm0, %v551_v8, %v552_v9  ;;  %v1833_v6 = vld [vmem:[%s4068_s1 + $0x738] sm:$0xff]  ;;  %v1798_v7 = vld [vmem:[%s4068_s1 + $0x620] sm:$0xff] }
  0x58   : >> { %476 = vmatmul.f32.vlgmr.msrb.gmra.mxu3 %v2628_v56  ;;  %578 = vmatpush.msra.mxu1 %v1783_v16  ;;  %v1824_v16 = vld [vmem:[%s4068_s1 + $0x6f0] sm:$0xff]  ;;  %v1830_v8 = vld [vmem:[%s4068_s1 + $0x720] sm:$0xff]  ;;  %v1799_v9 = vld [vmem:[%s4068_s1 + $0x628] sm:$0xff] }
  0x59   : >> { %598 = vmatpush.msra.mxu2 %v1752_v17  ;;  %618 = vmatpush.msra.mxu3 %v1784_v18  ;;  %v1856_v17 = vld [vmem:[%s4068_s1 + $0x7f0] sm:$0xff]  ;;  %v1825_v18 = vld [vmem:[%s4068_s1 + $0x6f8] sm:$0xff] }
  0x5a   : >> { %559 = vmatpush.msra.mxu0 %v1749_v19  ;;  %579 = vmatpush.msra.mxu1 %v1781_v20  ;;  %v1857_v19 = vld [vmem:[%s4068_s1 + $0x7f8] sm:$0xff]  ;;  %v1822_v20 = vld [vmem:[%s4068_s1 + $0x6e0] sm:$0xff] }
  0x5b   : >> { %599 = vmatpush.msra.mxu2 %v1750_v21  ;;  %619 = vmatpush.msra.mxu3 %v1782_v22  ;;  %v1854_v21 = vld [vmem:[%s4068_s1 + $0x7e0] sm:$0xff]  ;;  %v1823_v22 = vld [vmem:[%s4068_s1 + $0x6e8] sm:$0xff] }
  0x5c   : >> { %416 = vmatmul.f32.vlgmr.msrb.gmra.mxu0 %v2606_v48  ;;  %580 = vmatpush.msra.mxu1 %v1779_v23  ;;  %v1725_v48 = vld [vmem:[%s4068_s1 + $0x400] sm:$0xff]  ;;  %v1855_v23 = vld [vmem:[%s4068_s1 + $0x7e8] sm:$0xff] }
  0x5d   : >> { %560 = vmatpush.msra.mxu0 %v1747_v24  ;;  %600 = vmatpush.msra.mxu2 %v1748_v25  ;;  %v1820_v24 = vld [vmem:[%s4068_s1 + $0x6d0] sm:$0xff] }
  0x5e   : >> { %620 = vmatpush.msra.mxu3 %v1780_v26  ;;  %436 = vmatmul.f32.vlgmr.msrb.gmra.mxu1 %v2628_v56  ;;  %v1757_v56 = vld [vmem:[%s4068_s1 + $0x500] sm:$0xff]  ;;  %v1852_v25 = vld [vmem:[%s4068_s1 + $0x7d0] sm:$0xff]  ;;  %v1821_v26 = vld [vmem:[%s4068_s1 + $0x6d8] sm:$0xff] }
  0x5f   : >> { %561 = vmatpush.msra.mxu0 %v1745_v27  ;;  %581 = vmatpush.msra.mxu1 %v1777_v28  ;;  %v1853_v27 = vld [vmem:[%s4068_s1 + $0x7d8] sm:$0xff]  ;;  %v1818_v28 = vld [vmem:[%s4068_s1 + $0x6c0] sm:$0xff] }
  0x60   : >> { %601 = vmatpush.msra.mxu2 %v1746_v29  ;;  %621 = vmatpush.msra.mxu3 %v1778_v30  ;;  %v1850_v29 = vld [vmem:[%s4068_s1 + $0x7c0] sm:$0xff]  ;;  %v1819_v30 = vld [vmem:[%s4068_s1 + $0x6c8] sm:$0xff] }
  0x61   : >> { %562 = vmatpush.msra.mxu0 %v1743_v31  ;;  %582 = vmatpush.msra.mxu1 %v1775_v32  ;;  %v1851_v31 = vld [vmem:[%s4068_s1 + $0x7c8] sm:$0xff]  ;;  %v1816_v32 = vld [vmem:[%s4068_s1 + $0x6b0] sm:$0xff] }
  0x62   : >> { %602 = vmatpush.msra.mxu2 %v1744_v33  ;;  %622 = vmatpush.msra.mxu3 %v1776_v34  ;;  %v1848_v33 = vld [vmem:[%s4068_s1 + $0x7b0] sm:$0xff]  ;;  %v1817_v34 = vld [vmem:[%s4068_s1 + $0x6b8] sm:$0xff] }
  0x63   : >> { %563 = vmatpush.msra.mxu0 %v1741_v35  ;;  %583 = vmatpush.msra.mxu1 %v1773_v36  ;;  %v1849_v35 = vld [vmem:[%s4068_s1 + $0x7b8] sm:$0xff]  ;;  %v1814_v36 = vld [vmem:[%s4068_s1 + $0x6a0] sm:$0xff] }
  0x64   : >> { %603 = vmatpush.msra.mxu2 %v1742_v37  ;;  %623 = vmatpush.msra.mxu3 %v1774_v38  ;;  %v1846_v37 = vld [vmem:[%s4068_s1 + $0x7a0] sm:$0xff]  ;;  %v1815_v38 = vld [vmem:[%s4068_s1 + $0x6a8] sm:$0xff] }
  0x65   : >> { %564 = vmatpush.msra.mxu0 %v1739_v39  ;;  %584 = vmatpush.msra.mxu1 %v1771_v40  ;;  %v1847_v39 = vld [vmem:[%s4068_s1 + $0x7a8] sm:$0xff]  ;;  %v1812_v40 = vld [vmem:[%s4068_s1 + $0x690] sm:$0xff] }
  0x66   : >> { %604 = vmatpush.msra.mxu2 %v1740_v41  ;;  %624 = vmatpush.msra.mxu3 %v1772_v42  ;;  %v1844_v41 = vld [vmem:[%s4068_s1 + $0x790] sm:$0xff]  ;;  %v1813_v42 = vld [vmem:[%s4068_s1 + $0x698] sm:$0xff] }
  0x67   : >> { %565 = vmatpush.msra.mxu0 %v1737_v43  ;;  %585 = vmatpush.msra.mxu1 %v1769_v44  ;;  %v1845_v43 = vld [vmem:[%s4068_s1 + $0x798] sm:$0xff]  ;;  %v1810_v44 = vld [vmem:[%s4068_s1 + $0x680] sm:$0xff] }
  0x68   : >> { %605 = vmatpush.msra.mxu2 %v1738_v45  ;;  %625 = vmatpush.msra.mxu3 %v1770_v46  ;;  %v1842_v45 = vld [vmem:[%s4068_s1 + $0x780] sm:$0xff]  ;;  %v1811_v46 = vld [vmem:[%s4068_s1 + $0x688] sm:$0xff] }
  0x69   : >> { %566 = vmatpush.msra.mxu0 %v1735_v47  ;;  %586 = vmatpush.msra.mxu1 %v1767_v49  ;;  %v1843_v47 = vld [vmem:[%s4068_s1 + $0x788] sm:$0xff]  ;;  %v1808_v49 = vld [vmem:[%s4068_s1 + $0x670] sm:$0xff] }
  0x6a   : >> { %606 = vmatpush.msra.mxu2 %v1736_v50  ;;  %626 = vmatpush.msra.mxu3 %v1768_v51  ;;  %v1840_v50 = vld [vmem:[%s4068_s1 + $0x770] sm:$0xff]  ;;  %v1809_v51 = vld [vmem:[%s4068_s1 + $0x678] sm:$0xff] }
  0x6b   : >> { %567 = vmatpush.msra.mxu0 %v1733_v52  ;;  %587 = vmatpush.msra.mxu1 %v1765_v53  ;;  %v1841_v52 = vld [vmem:[%s4068_s1 + $0x778] sm:$0xff]  ;;  %v1806_v53 = vld [vmem:[%s4068_s1 + $0x660] sm:$0xff] }
  0x6c   : >> { %607 = vmatpush.msra.mxu2 %v1734_v54  ;;  %627 = vmatpush.msra.mxu3 %v1766_v55  ;;  %v1838_v54 = vld [vmem:[%s4068_s1 + $0x760] sm:$0xff]  ;;  %v1807_v55 = vld [vmem:[%s4068_s1 + $0x668] sm:$0xff] }
  0x6d   : >> { %568 = vmatpush.msra.mxu0 %v1731_v57  ;;  %588 = vmatpush.msra.mxu1 %v1763_v58  ;;  %v1839_v57 = vld [vmem:[%s4068_s1 + $0x768] sm:$0xff]  ;;  %v1804_v58 = vld [vmem:[%s4068_s1 + $0x650] sm:$0xff] }
  0x6e   : >> { %608 = vmatpush.msra.mxu2 %v1732_v59  ;;  %628 = vmatpush.msra.mxu3 %v1764_v60  ;;  %v1836_v59 = vld [vmem:[%s4068_s1 + $0x750] sm:$0xff]  ;;  %v1805_v60 = vld [vmem:[%s4068_s1 + $0x658] sm:$0xff] }
  0x6f   : >> { %569 = vmatpush.msra.mxu0 %v1729_v63  ;;  %589 = vmatpush.msra.mxu1 %v1761_v1  ;;  %v1834_v63 = vld [vmem:[%s4068_s1 + $0x740] sm:$0xff]  ;;  %v1803_v1 = vld [vmem:[%s4068_s1 + $0x648] sm:$0xff] }
  0x70   : >> { %609 = vmatpush.msra.mxu2 %v1730_v2  ;;  %629 = vmatpush.msra.mxu3 %v1762_v3  ;;  %v1835_v2 = vld [vmem:[%s4068_s1 + $0x748] sm:$0xff]  ;;  %v1800_v3 = vld [vmem:[%s4068_s1 + $0x630] sm:$0xff] }
  0x71   : >> { %570 = vmatpush.msra.mxu0 %v1727_v4  ;;  %590 = vmatpush.msra.mxu1 %v1759_v5  ;;  %v1832_v4 = vld [vmem:[%s4068_s1 + $0x730] sm:$0xff]  ;;  %v1801_v5 = vld [vmem:[%s4068_s1 + $0x638] sm:$0xff] }
  0x72   : >> { %610 = vmatpush.msra.mxu2 %v1728_v10  ;;  %630 = vmatpush.msra.mxu3 %v1760_v11  ;;  %v1831_v10 = vld [vmem:[%s4068_s1 + $0x728] sm:$0xff]  ;;  %v1796_v11 = vld [vmem:[%s4068_s1 + $0x610] sm:$0xff] }
  0x73   : >> { %571 = vmatpush.msra.mxu0 %v1725_v48  ;;  %591 = vmatpush.msra.mxu1 %v1757_v56  ;;  %v1828_v48 = vld [vmem:[%s4068_s1 + $0x710] sm:$0xff]  ;;  %v1797_v56 = vld [vmem:[%s4068_s1 + $0x618] sm:$0xff] }
  0x74   : >> { %611 = vmatpush.msra.mxu2 %v1726_v12  ;;  %631 = vmatpush.msra.mxu3 %v1758_v13  ;;  %v1829_v12 = vld [vmem:[%s4068_s1 + $0x718] sm:$0xff]  ;;  %v1794_v13 = vld [vmem:[%s4068_s1 + $0x600] sm:$0xff] }
  0x75   : >> { %572 = vmatmul.f32.vlgmr.msra.gmra.mxu0 %v550_v14  ;;  %592 = vmatmul.f32.vlgmr.msra.gmra.mxu1 %v553_v15 }
  0x76   : >> { %612 = vmatmul.f32.vlgmr.msra.gmra.mxu2 %v550_v14  ;;  %632 = vmatmul.f32.vlgmr.msra.gmra.mxu3 %v553_v15  ;;  %v1826_v14 = vld [vmem:[%s4068_s1 + $0x700] sm:$0xff]  ;;  %v1795_v15 = vld [vmem:[%s4068_s1 + $0x608] sm:$0xff] }
  0x77   : >> { %711 = vmatpush.msrb.mxu0 %v1824_v16  ;;  %731 = vmatpush.msrb.mxu1 %v1856_v17  ;;  %v1827_v16 = vld [vmem:[%s4068_s1 + $0x708] sm:$0xff]  ;;  %v3062_v17 = vld [vmem:[%s2585_s27 + $0x20] sm:$0xff] }
  0x78   : >> { %751 = vmatpush.msrb.mxu2 %v1825_v18  ;;  %771 = vmatpush.msrb.mxu3 %v1857_v19  ;;  %v3065_v18 = vld [vmem:[%s2585_s27 + $0x28] sm:$0xff]  ;;  %v1888_v19 = vld [vmem:[%s4068_s1 + $0x8f0] sm:$0xff] }
  0x79   : >> { %712 = vmatpush.msrb.mxu0 %v1822_v20  ;;  %732 = vmatpush.msrb.mxu1 %v1854_v21  ;;  %v1920_v20 = vld [vmem:[%s4068_s1 + $0x9f0] sm:$0xff]  ;;  %v1889_v21 = vld [vmem:[%s4068_s1 + $0x8f8] sm:$0xff] }
  0x7a   : >> { %752 = vmatpush.msrb.mxu2 %v1823_v22  ;;  %772 = vmatpush.msrb.mxu3 %v1855_v23  ;;  %v1921_v22 = vld [vmem:[%s4068_s1 + $0x9f8] sm:$0xff]  ;;  %v1886_v23 = vld [vmem:[%s4068_s1 + $0x8e0] sm:$0xff] }
  0x7b   : >> { %713 = vmatpush.msrb.mxu0 %v1820_v24  ;;  %733 = vmatpush.msrb.mxu1 %v1852_v25  ;;  %v1918_v24 = vld [vmem:[%s4068_s1 + $0x9e0] sm:$0xff]  ;;  %v1887_v25 = vld [vmem:[%s4068_s1 + $0x8e8] sm:$0xff] }
  0x7c   : >> { %753 = vmatpush.msrb.mxu2 %v1821_v26  ;;  %773 = vmatpush.msrb.mxu3 %v1853_v27  ;;  %v1919_v26 = vld [vmem:[%s4068_s1 + $0x9e8] sm:$0xff]  ;;  %v1884_v27 = vld [vmem:[%s4068_s1 + $0x8d0] sm:$0xff] }
  0x7d   : >> { %714 = vmatpush.msrb.mxu0 %v1818_v28  ;;  %734 = vmatpush.msrb.mxu1 %v1850_v29  ;;  %v1916_v28 = vld [vmem:[%s4068_s1 + $0x9d0] sm:$0xff]  ;;  %v1885_v29 = vld [vmem:[%s4068_s1 + $0x8d8] sm:$0xff] }
  0x7e   : >> { %754 = vmatpush.msrb.mxu2 %v1819_v30  ;;  %774 = vmatpush.msrb.mxu3 %v1851_v31  ;;  %v1917_v30 = vld [vmem:[%s4068_s1 + $0x9d8] sm:$0xff]  ;;  %v1882_v31 = vld [vmem:[%s4068_s1 + $0x8c0] sm:$0xff] }
  0x7f   : >> { %715 = vmatpush.msrb.mxu0 %v1816_v32  ;;  %735 = vmatpush.msrb.mxu1 %v1848_v33  ;;  %v1914_v32 = vld [vmem:[%s4068_s1 + $0x9c0] sm:$0xff]  ;;  %v1883_v33 = vld [vmem:[%s4068_s1 + $0x8c8] sm:$0xff] }
  0x80   : >> { %755 = vmatpush.msrb.mxu2 %v1817_v34  ;;  %775 = vmatpush.msrb.mxu3 %v1849_v35  ;;  %v1915_v34 = vld [vmem:[%s4068_s1 + $0x9c8] sm:$0xff]  ;;  %v1880_v35 = vld [vmem:[%s4068_s1 + $0x8b0] sm:$0xff] }
  0x81   : >> { %716 = vmatpush.msrb.mxu0 %v1814_v36  ;;  %736 = vmatpush.msrb.mxu1 %v1846_v37  ;;  %v1912_v36 = vld [vmem:[%s4068_s1 + $0x9b0] sm:$0xff]  ;;  %v1881_v37 = vld [vmem:[%s4068_s1 + $0x8b8] sm:$0xff] }
  0x82   : >> { %756 = vmatpush.msrb.mxu2 %v1815_v38  ;;  %776 = vmatpush.msrb.mxu3 %v1847_v39  ;;  %v1913_v38 = vld [vmem:[%s4068_s1 + $0x9b8] sm:$0xff]  ;;  %v1878_v39 = vld [vmem:[%s4068_s1 + $0x8a0] sm:$0xff] }
  0x83   : >> { %717 = vmatpush.msrb.mxu0 %v1812_v40  ;;  %737 = vmatpush.msrb.mxu1 %v1844_v41  ;;  %v1910_v40 = vld [vmem:[%s4068_s1 + $0x9a0] sm:$0xff]  ;;  %v1879_v41 = vld [vmem:[%s4068_s1 + $0x8a8] sm:$0xff] }
  0x84   : >> { %757 = vmatpush.msrb.mxu2 %v1813_v42  ;;  %777 = vmatpush.msrb.mxu3 %v1845_v43  ;;  %v1911_v42 = vld [vmem:[%s4068_s1 + $0x9a8] sm:$0xff]  ;;  %v1876_v43 = vld [vmem:[%s4068_s1 + $0x890] sm:$0xff] }
  0x85   : >> { %718 = vmatpush.msrb.mxu0 %v1810_v44  ;;  %738 = vmatpush.msrb.mxu1 %v1842_v45  ;;  %v1908_v44 = vld [vmem:[%s4068_s1 + $0x990] sm:$0xff]  ;;  %v1877_v45 = vld [vmem:[%s4068_s1 + $0x898] sm:$0xff] }
  0x86   : >> { %758 = vmatpush.msrb.mxu2 %v1811_v46  ;;  %778 = vmatpush.msrb.mxu3 %v1843_v47  ;;  %v1909_v46 = vld [vmem:[%s4068_s1 + $0x998] sm:$0xff]  ;;  %v1874_v47 = vld [vmem:[%s4068_s1 + $0x880] sm:$0xff] }
  0x87   : >> { %719 = vmatpush.msrb.mxu0 %v1808_v49  ;;  %739 = vmatpush.msrb.mxu1 %v1840_v50  ;;  %v1906_v49 = vld [vmem:[%s4068_s1 + $0x980] sm:$0xff]  ;;  %v1875_v50 = vld [vmem:[%s4068_s1 + $0x888] sm:$0xff] }
  0x88   : >> { %759 = vmatpush.msrb.mxu2 %v1809_v51  ;;  %779 = vmatpush.msrb.mxu3 %v1841_v52  ;;  %v1907_v51 = vld [vmem:[%s4068_s1 + $0x988] sm:$0xff]  ;;  %v1872_v52 = vld [vmem:[%s4068_s1 + $0x870] sm:$0xff] }
  0x89   : >> { %720 = vmatpush.msrb.mxu0 %v1806_v53  ;;  %740 = vmatpush.msrb.mxu1 %v1838_v54  ;;  %v1904_v53 = vld [vmem:[%s4068_s1 + $0x970] sm:$0xff]  ;;  %v1873_v54 = vld [vmem:[%s4068_s1 + $0x878] sm:$0xff] }
  0x8a   : >> { %760 = vmatpush.msrb.mxu2 %v1807_v55  ;;  %780 = vmatpush.msrb.mxu3 %v1839_v57  ;;  %v1905_v55 = vld [vmem:[%s4068_s1 + $0x978] sm:$0xff]  ;;  %v1870_v57 = vld [vmem:[%s4068_s1 + $0x860] sm:$0xff] }
  0x8b   : >> { %721 = vmatpush.msrb.mxu0 %v1804_v58  ;;  %741 = vmatpush.msrb.mxu1 %v1836_v59  ;;  %v1902_v58 = vld [vmem:[%s4068_s1 + $0x960] sm:$0xff]  ;;  %v1871_v59 = vld [vmem:[%s4068_s1 + $0x868] sm:$0xff] }
  0x8c   : >> { %761 = vmatpush.msrb.mxu2 %v1805_v60  ;;  %781 = vmatpush.msrb.mxu3 %v1837_v61  ;;  %v1903_v60 = vld [vmem:[%s4068_s1 + $0x968] sm:$0xff]  ;;  %v1868_v61 = vld [vmem:[%s4068_s1 + $0x850] sm:$0xff] }
  0x8d   : >> { %722 = vmatpush.msrb.mxu0 %v1802_v62  ;;  %742 = vmatpush.msrb.mxu1 %v1834_v63  ;;  %v1900_v62 = vld [vmem:[%s4068_s1 + $0x950] sm:$0xff]  ;;  %v1869_v63 = vld [vmem:[%s4068_s1 + $0x858] sm:$0xff] }
  0x8e   : >> { %762 = vmatpush.msrb.mxu2 %v1803_v1  ;;  %782 = vmatpush.msrb.mxu3 %v1835_v2  ;;  %v1901_v1 = vld [vmem:[%s4068_s1 + $0x958] sm:$0xff]  ;;  %v1866_v2 = vld [vmem:[%s4068_s1 + $0x840] sm:$0xff] }
  0x8f   : >> { %723 = vmatpush.msrb.mxu0 %v1800_v3  ;;  %743 = vmatpush.msrb.mxu1 %v1832_v4  ;;  %v1898_v3 = vld [vmem:[%s4068_s1 + $0x940] sm:$0xff]  ;;  %v1867_v4 = vld [vmem:[%s4068_s1 + $0x848] sm:$0xff] }
  0x90   : >> { %763 = vmatpush.msrb.mxu2 %v1801_v5  ;;  %783 = vmatpush.msrb.mxu3 %v1833_v6  ;;  %v1899_v5 = vld [vmem:[%s4068_s1 + $0x948] sm:$0xff]  ;;  %v1864_v6 = vld [vmem:[%s4068_s1 + $0x830] sm:$0xff] }
  0x91   : >> { %724 = vmatpush.msrb.mxu0 %v1798_v7  ;;  %744 = vmatpush.msrb.mxu1 %v1830_v8  ;;  %v1896_v7 = vld [vmem:[%s4068_s1 + $0x930] sm:$0xff]  ;;  %v1865_v8 = vld [vmem:[%s4068_s1 + $0x838] sm:$0xff] }
  0x92   : >> { %764 = vmatpush.msrb.mxu2 %v1799_v9  ;;  %784 = vmatpush.msrb.mxu3 %v1831_v10  ;;  %v1897_v9 = vld [vmem:[%s4068_s1 + $0x938] sm:$0xff]  ;;  %v1862_v10 = vld [vmem:[%s4068_s1 + $0x820] sm:$0xff] }
  0x93   : >> { %725 = vmatpush.msrb.mxu0 %v1796_v11  ;;  %745 = vmatpush.msrb.mxu1 %v1828_v48  ;;  %v1894_v11 = vld [vmem:[%s4068_s1 + $0x920] sm:$0xff]  ;;  %v1863_v48 = vld [vmem:[%s4068_s1 + $0x828] sm:$0xff] }
  0x94   : >> { %765 = vmatpush.msrb.mxu2 %v1797_v56  ;;  %785 = vmatpush.msrb.mxu3 %v1829_v12  ;;  %v1895_v56 = vld [vmem:[%s4068_s1 + $0x928] sm:$0xff]  ;;  %v1860_v12 = vld [vmem:[%s4068_s1 + $0x810] sm:$0xff] }
  0x95   : >> { %726 = vmatpush.msrb.mxu0 %v1794_v13  ;;  %746 = vmatpush.msrb.mxu1 %v1826_v14  ;;  %v1892_v13 = vld [vmem:[%s4068_s1 + $0x910] sm:$0xff]  ;;  %v1861_v14 = vld [vmem:[%s4068_s1 + $0x818] sm:$0xff] }
  0x96   : >> { %766 = vmatpush.msrb.mxu2 %v1795_v15  ;;  %786 = vmatpush.msrb.mxu3 %v1827_v16  ;;  %v1893_v15 = vld [vmem:[%s4068_s1 + $0x918] sm:$0xff]  ;;  %v1858_v16 = vld [vmem:[%s4068_s1 + $0x800] sm:$0xff] }
  0x97   : >> { %727 = vmatmul.f32.vlgmr.msrb.gmra.mxu0 %v3062_v17  ;;  %747 = vmatmul.f32.vlgmr.msrb.gmra.mxu1 %v3065_v18 }
  0x98   : >> { %767 = vmatmul.f32.vlgmr.msrb.gmra.mxu2 %v3062_v17  ;;  %787 = vmatmul.f32.vlgmr.msrb.gmra.mxu3 %v3065_v18 }
  0x99   : >> { %864 = vmatpush.msra.mxu0 %v1888_v19  ;;  %884 = vmatpush.msra.mxu1 %v1920_v20  ;;  %v1890_v19 = vld [vmem:[%s4068_s1 + $0x900] sm:$0xff]  ;;  %v1859_v20 = vld [vmem:[%s4068_s1 + $0x808] sm:$0xff] }
  0x9a   : >> { %904 = vmatpush.msra.mxu2 %v1889_v21  ;;  %924 = vmatpush.msra.mxu3 %v1921_v22  ;;  %v1891_v21 = vld [vmem:[%s4068_s1 + $0x908] sm:$0xff]  ;;  %v860_v22 = vrot.slane %v3062_v17, 1 }
  0x9b   : >> { %865 = vmatpush.msra.mxu0 %v1886_v23  ;;  %885 = vmatpush.msra.mxu1 %v1918_v24  ;;  %v861_v23 = vrot.slane %v3065_v18, 1  ;;  %v1952_v24 = vld [vmem:[%s4068_s1 + $0xaf0] sm:$0xff] }
  0x9c   : >> { %905 = vmatpush.msra.mxu2 %v1887_v25  ;;  %925 = vmatpush.msra.mxu3 %v1919_v26  ;;  %v1984_v25 = vld [vmem:[%s4068_s1 + $0xbf0] sm:$0xff]  ;;  %v1953_v26 = vld [vmem:[%s4068_s1 + $0xaf8] sm:$0xff] }
  0x9d   : >> { %866 = vmatpush.msra.mxu0 %v1884_v27  ;;  %886 = vmatpush.msra.mxu1 %v1916_v28  ;;  %v1985_v27 = vld [vmem:[%s4068_s1 + $0xbf8] sm:$0xff]  ;;  %v1950_v28 = vld [vmem:[%s4068_s1 + $0xae0] sm:$0xff] }
  0x9e   : >> { %906 = vmatpush.msra.mxu2 %v1885_v29  ;;  %926 = vmatpush.msra.mxu3 %v1917_v30  ;;  %v1982_v29 = vld [vmem:[%s4068_s1 + $0xbe0] sm:$0xff]  ;;  %v1951_v30 = vld [vmem:[%s4068_s1 + $0xae8] sm:$0xff] }
  0x9f   : >> { %867 = vmatpush.msra.mxu0 %v1882_v31  ;;  %887 = vmatpush.msra.mxu1 %v1914_v32  ;;  %v1983_v31 = vld [vmem:[%s4068_s1 + $0xbe8] sm:$0xff]  ;;  %v1948_v32 = vld [vmem:[%s4068_s1 + $0xad0] sm:$0xff] }
  0xa0   : >> { %907 = vmatpush.msra.mxu2 %v1883_v33  ;;  %927 = vmatpush.msra.mxu3 %v1915_v34  ;;  %v1980_v33 = vld [vmem:[%s4068_s1 + $0xbd0] sm:$0xff]  ;;  %v1949_v34 = vld [vmem:[%s4068_s1 + $0xad8] sm:$0xff] }
  0xa1   : >> { %868 = vmatpush.msra.mxu0 %v1880_v35  ;;  %888 = vmatpush.msra.mxu1 %v1912_v36  ;;  %v1981_v35 = vld [vmem:[%s4068_s1 + $0xbd8] sm:$0xff]  ;;  %v1946_v36 = vld [vmem:[%s4068_s1 + $0xac0] sm:$0xff] }
  0xa2   : >> { %908 = vmatpush.msra.mxu2 %v1881_v37  ;;  %928 = vmatpush.msra.mxu3 %v1913_v38  ;;  %v1978_v37 = vld [vmem:[%s4068_s1 + $0xbc0] sm:$0xff]  ;;  %v1947_v38 = vld [vmem:[%s4068_s1 + $0xac8] sm:$0xff] }
  0xa3   : >> { %869 = vmatpush.msra.mxu0 %v1878_v39  ;;  %889 = vmatpush.msra.mxu1 %v1910_v40  ;;  %v1979_v39 = vld [vmem:[%s4068_s1 + $0xbc8] sm:$0xff]  ;;  %v1944_v40 = vld [vmem:[%s4068_s1 + $0xab0] sm:$0xff] }
  0xa4   : >> { %909 = vmatpush.msra.mxu2 %v1879_v41  ;;  %929 = vmatpush.msra.mxu3 %v1911_v42  ;;  %v1976_v41 = vld [vmem:[%s4068_s1 + $0xbb0] sm:$0xff]  ;;  %v1945_v42 = vld [vmem:[%s4068_s1 + $0xab8] sm:$0xff] }
  0xa5   : >> { %870 = vmatpush.msra.mxu0 %v1876_v43  ;;  %890 = vmatpush.msra.mxu1 %v1908_v44  ;;  %v1977_v43 = vld [vmem:[%s4068_s1 + $0xbb8] sm:$0xff]  ;;  %v1942_v44 = vld [vmem:[%s4068_s1 + $0xaa0] sm:$0xff] }
  0xa6   : >> { %910 = vmatpush.msra.mxu2 %v1877_v45  ;;  %930 = vmatpush.msra.mxu3 %v1909_v46  ;;  %v1974_v45 = vld [vmem:[%s4068_s1 + $0xba0] sm:$0xff]  ;;  %v1943_v46 = vld [vmem:[%s4068_s1 + $0xaa8] sm:$0xff] }
  0xa7   : >> { %871 = vmatpush.msra.mxu0 %v1874_v47  ;;  %891 = vmatpush.msra.mxu1 %v1906_v49  ;;  %v1975_v47 = vld [vmem:[%s4068_s1 + $0xba8] sm:$0xff]  ;;  %v1940_v49 = vld [vmem:[%s4068_s1 + $0xa90] sm:$0xff] }
  0xa8   : >> { %911 = vmatpush.msra.mxu2 %v1875_v50  ;;  %931 = vmatpush.msra.mxu3 %v1907_v51  ;;  %v1972_v50 = vld [vmem:[%s4068_s1 + $0xb90] sm:$0xff]  ;;  %v1941_v51 = vld [vmem:[%s4068_s1 + $0xa98] sm:$0xff] }
  0xa9   : >> { %872 = vmatpush.msra.mxu0 %v1872_v52  ;;  %892 = vmatpush.msra.mxu1 %v1904_v53  ;;  %v1973_v52 = vld [vmem:[%s4068_s1 + $0xb98] sm:$0xff]  ;;  %v1938_v53 = vld [vmem:[%s4068_s1 + $0xa80] sm:$0xff] }
  0xaa   : >> { %912 = vmatpush.msra.mxu2 %v1873_v54  ;;  %932 = vmatpush.msra.mxu3 %v1905_v55  ;;  %v1970_v54 = vld [vmem:[%s4068_s1 + $0xb80] sm:$0xff]  ;;  %v1939_v55 = vld [vmem:[%s4068_s1 + $0xa88] sm:$0xff] }
  0xab   : >> { %873 = vmatpush.msra.mxu0 %v1870_v57  ;;  %893 = vmatpush.msra.mxu1 %v1902_v58  ;;  %v1971_v57 = vld [vmem:[%s4068_s1 + $0xb88] sm:$0xff]  ;;  %v1936_v58 = vld [vmem:[%s4068_s1 + $0xa70] sm:$0xff] }
  0xac   : >> { %913 = vmatpush.msra.mxu2 %v1871_v59  ;;  %933 = vmatpush.msra.mxu3 %v1903_v60  ;;  %v1968_v59 = vld [vmem:[%s4068_s1 + $0xb70] sm:$0xff]  ;;  %v1937_v60 = vld [vmem:[%s4068_s1 + $0xa78] sm:$0xff] }
  0xad   : >> { %874 = vmatpush.msra.mxu0 %v1868_v61  ;;  %894 = vmatpush.msra.mxu1 %v1900_v62  ;;  %v1969_v61 = vld [vmem:[%s4068_s1 + $0xb78] sm:$0xff]  ;;  %v1934_v62 = vld [vmem:[%s4068_s1 + $0xa60] sm:$0xff] }
  0xae   : >> { %914 = vmatpush.msra.mxu2 %v1869_v63  ;;  %934 = vmatpush.msra.mxu3 %v1901_v1  ;;  %v1966_v63 = vld [vmem:[%s4068_s1 + $0xb60] sm:$0xff]  ;;  %v1935_v1 = vld [vmem:[%s4068_s1 + $0xa68] sm:$0xff] }
  0xaf   : >> { %875 = vmatpush.msra.mxu0 %v1866_v2  ;;  %895 = vmatpush.msra.mxu1 %v1898_v3  ;;  %v1967_v2 = vld [vmem:[%s4068_s1 + $0xb68] sm:$0xff]  ;;  %v1932_v3 = vld [vmem:[%s4068_s1 + $0xa50] sm:$0xff] }
  0xb0   : >> { %915 = vmatpush.msra.mxu2 %v1867_v4  ;;  %935 = vmatpush.msra.mxu3 %v1899_v5  ;;  %v1964_v4 = vld [vmem:[%s4068_s1 + $0xb50] sm:$0xff]  ;;  %v1933_v5 = vld [vmem:[%s4068_s1 + $0xa58] sm:$0xff] }
  0xb1   : >> { %876 = vmatpush.msra.mxu0 %v1864_v6  ;;  %896 = vmatpush.msra.mxu1 %v1896_v7  ;;  %v1965_v6 = vld [vmem:[%s4068_s1 + $0xb58] sm:$0xff]  ;;  %v1930_v7 = vld [vmem:[%s4068_s1 + $0xa40] sm:$0xff] }
  0xb2   : >> { %916 = vmatpush.msra.mxu2 %v1865_v8  ;;  %936 = vmatpush.msra.mxu3 %v1897_v9  ;;  %v1962_v8 = vld [vmem:[%s4068_s1 + $0xb40] sm:$0xff]  ;;  %v1931_v9 = vld [vmem:[%s4068_s1 + $0xa48] sm:$0xff] }
  0xb3   : >> { %877 = vmatpush.msra.mxu0 %v1862_v10  ;;  %897 = vmatpush.msra.mxu1 %v1894_v11  ;;  %v1963_v10 = vld [vmem:[%s4068_s1 + $0xb48] sm:$0xff]  ;;  %v1928_v11 = vld [vmem:[%s4068_s1 + $0xa30] sm:$0xff] }
  0xb4   : >> { %917 = vmatpush.msra.mxu2 %v1863_v48  ;;  %937 = vmatpush.msra.mxu3 %v1895_v56  ;;  %v1960_v48 = vld [vmem:[%s4068_s1 + $0xb30] sm:$0xff]  ;;  %v1929_v56 = vld [vmem:[%s4068_s1 + $0xa38] sm:$0xff] }
  0xb5   : >> { %878 = vmatpush.msra.mxu0 %v1860_v12  ;;  %898 = vmatpush.msra.mxu1 %v1892_v13  ;;  %v1961_v12 = vld [vmem:[%s4068_s1 + $0xb38] sm:$0xff]  ;;  %v1792_v13 = vld [vmem:[%s2585_s27 + $0x30] sm:$0x1] }
  0xb6   : >> { %918 = vmatpush.msra.mxu2 %v1861_v14  ;;  %938 = vmatpush.msra.mxu3 %v1893_v15  ;;  %v1793_v14 = vld [vmem:[%s2585_s27 + $0x38] sm:$0x1]  ;;  %v1926_v15 = vld [vmem:[%s4068_s1 + $0xa20] sm:$0xff] }
  0xb7   : >> { %879 = vmatpush.msra.mxu0 %v1858_v16  ;;  %899 = vmatpush.msra.mxu1 %v1890_v19  ;;  %v1958_v16 = vld [vmem:[%s4068_s1 + $0xb20] sm:$0xff]  ;;  %v1927_v19 = vld [vmem:[%s4068_s1 + $0xa28] sm:$0xff] }
  0xb8   : >> { %919 = vmatpush.msra.mxu2 %v1859_v20  ;;  %939 = vmatpush.msra.mxu3 %v1891_v21  ;;  %v1959_v20 = vld [vmem:[%s4068_s1 + $0xb28] sm:$0xff]  ;;  %v1013_v21 = vrot.slane %v3062_v17, 2  ;;  %v1925_v17 = vld [vmem:[%s4068_s1 + $0xa18] sm:$0xff] }
  0xb9   : >> { %880 = vmatmul.f32.vlgmr.msra.gmra.mxu0 %v860_v22  ;;  %900 = vmatmul.f32.vlgmr.msra.gmra.mxu1 %v861_v23 }
  0xba   : >> { %920 = vmatmul.f32.vlgmr.msra.gmra.mxu2 %v860_v22  ;;  %940 = vmatmul.f32.vlgmr.msra.gmra.mxu3 %v861_v23  ;;  %v1016_v22 = vrot.slane %v3065_v18, 2  ;;  %v1924_v23 = vld [vmem:[%s4068_s1 + $0xa10] sm:$0xff]  ;;  %v1957_v18 = vld [vmem:[%s4068_s1 + $0xb18] sm:$0xff] }
  0xbb   : >> { %1021 = vmatpush.msrb.mxu0 %v1952_v24  ;;  %1041 = vmatpush.msrb.mxu1 %v1984_v25  ;;  %v1956_v24 = vld [vmem:[%s4068_s1 + $0xb10] sm:$0xff]  ;;  %v1014_v25 = vrot.slane %v1792_v13, 2  ;;  %v2034_v13 = vld [vmem:[%s4068_s1 + $0xd58] sm:$0xff] }
  0xbc   : >> { %1061 = vmatpush.msrb.mxu2 %v1953_v26  ;;  %1081 = vmatpush.msrb.mxu3 %v1985_v27  ;;  %v1017_v26 = vrot.slane %v1793_v14, 2  ;;  %v1922_v27 = vld [vmem:[%s4068_s1 + $0xa00] sm:$0xff] }
  0xbd   : >> { %1022 = vmatpush.msrb.mxu0 %v1950_v28  ;;  %1042 = vmatpush.msrb.mxu1 %v1982_v29  ;;  %v1954_v28 = vld [vmem:[%s4068_s1 + $0xb00] sm:$0xff]  ;;  %v1923_v29 = vld [vmem:[%s4068_s1 + $0xa08] sm:$0xff] }
  0xbe   : >> { %1062 = vmatpush.msrb.mxu2 %v1951_v30  ;;  %1082 = vmatpush.msrb.mxu3 %v1983_v31  ;;  %v1955_v30 = vld [vmem:[%s4068_s1 + $0xb08] sm:$0xff]  ;;  %v1015_v31 = vsel %vm547_vm0, %v1013_v21, %v1014_v25  ;;  %v1999_v14 = vld [vmem:[%s4068_s1 + $0xc40] sm:$0xff]  ;;  %v2029_v21 = vld [vmem:[%s4068_s1 + $0xd30] sm:$0xff] }
  0xbf   : >> { %1023 = vmatpush.msrb.mxu0 %v1948_v32  ;;  %1043 = vmatpush.msrb.mxu1 %v1980_v33  ;;  %v1018_v32 = vsel %vm547_vm0, %v1016_v22, %v1017_v26  ;;  %v2021_v33 = vld [vmem:[%s4068_s1 + $0xcf0] sm:$0xff]  ;;  %v1998_v22 = vld [vmem:[%s4068_s1 + $0xc38] sm:$0xff]  ;;  %v2027_v25 = vld [vmem:[%s4068_s1 + $0xd20] sm:$0xff] }
  0xc0   : >> { %1063 = vmatpush.msrb.mxu2 %v1949_v34  ;;  %1083 = vmatpush.msrb.mxu3 %v1981_v35  ;;  %v2053_v34 = vld [vmem:[%s4068_s1 + $0xdf0] sm:$0xff]  ;;  %v2022_v35 = vld [vmem:[%s4068_s1 + $0xcf8] sm:$0xff]  ;;  %v1996_v26 = vld [vmem:[%s4068_s1 + $0xc28] sm:$0xff] }
  0xc1   : >> { %1024 = vmatpush.msrb.mxu0 %v1946_v36  ;;  %1044 = vmatpush.msrb.mxu1 %v1978_v37  ;;  %v2054_v36 = vld [vmem:[%s4068_s1 + $0xdf8] sm:$0xff]  ;;  %v2019_v37 = vld [vmem:[%s4068_s1 + $0xce0] sm:$0xff] }
  0xc2   : >> { %1064 = vmatpush.msrb.mxu2 %v1947_v38  ;;  %1084 = vmatpush.msrb.mxu3 %v1979_v39  ;;  %v2051_v38 = vld [vmem:[%s4068_s1 + $0xde0] sm:$0xff]  ;;  %v2020_v39 = vld [vmem:[%s4068_s1 + $0xce8] sm:$0xff] }
  0xc3   : >> { %1025 = vmatpush.msrb.mxu0 %v1944_v40  ;;  %1045 = vmatpush.msrb.mxu1 %v1976_v41  ;;  %v2052_v40 = vld [vmem:[%s4068_s1 + $0xde8] sm:$0xff]  ;;  %v2017_v41 = vld [vmem:[%s4068_s1 + $0xcd0] sm:$0xff] }
  0xc4   : >> { %1065 = vmatpush.msrb.mxu2 %v1945_v42  ;;  %1085 = vmatpush.msrb.mxu3 %v1977_v43  ;;  %v2049_v42 = vld [vmem:[%s4068_s1 + $0xdd0] sm:$0xff]  ;;  %v2018_v43 = vld [vmem:[%s4068_s1 + $0xcd8] sm:$0xff] }
  0xc5   : >> { %1026 = vmatpush.msrb.mxu0 %v1942_v44  ;;  %1046 = vmatpush.msrb.mxu1 %v1974_v45  ;;  %v2050_v44 = vld [vmem:[%s4068_s1 + $0xdd8] sm:$0xff]  ;;  %v2015_v45 = vld [vmem:[%s4068_s1 + $0xcc0] sm:$0xff] }
  0xc6   : >> { %1066 = vmatpush.msrb.mxu2 %v1943_v46  ;;  %1086 = vmatpush.msrb.mxu3 %v1975_v47  ;;  %v2047_v46 = vld [vmem:[%s4068_s1 + $0xdc0] sm:$0xff]  ;;  %v2016_v47 = vld [vmem:[%s4068_s1 + $0xcc8] sm:$0xff] }
  0xc7   : >> { %1027 = vmatpush.msrb.mxu0 %v1940_v49  ;;  %1047 = vmatpush.msrb.mxu1 %v1972_v50  ;;  %v2048_v49 = vld [vmem:[%s4068_s1 + $0xdc8] sm:$0xff]  ;;  %v2013_v50 = vld [vmem:[%s4068_s1 + $0xcb0] sm:$0xff] }
  0xc8   : >> { %1067 = vmatpush.msrb.mxu2 %v1941_v51  ;;  %1087 = vmatpush.msrb.mxu3 %v1973_v52  ;;  %v2045_v51 = vld [vmem:[%s4068_s1 + $0xdb0] sm:$0xff]  ;;  %v2014_v52 = vld [vmem:[%s4068_s1 + $0xcb8] sm:$0xff] }
  0xc9   : >> { %1028 = vmatpush.msrb.mxu0 %v1938_v53  ;;  %1048 = vmatpush.msrb.mxu1 %v1970_v54  ;;  %v2046_v53 = vld [vmem:[%s4068_s1 + $0xdb8] sm:$0xff]  ;;  %v2011_v54 = vld [vmem:[%s4068_s1 + $0xca0] sm:$0xff] }
  0xca   : >> { %1068 = vmatpush.msrb.mxu2 %v1939_v55  ;;  %1088 = vmatpush.msrb.mxu3 %v1971_v57  ;;  %v2043_v55 = vld [vmem:[%s4068_s1 + $0xda0] sm:$0xff]  ;;  %v2012_v57 = vld [vmem:[%s4068_s1 + $0xca8] sm:$0xff] }
  0xcb   : >> { %1029 = vmatpush.msrb.mxu0 %v1936_v58  ;;  %1049 = vmatpush.msrb.mxu1 %v1968_v59  ;;  %v2044_v58 = vld [vmem:[%s4068_s1 + $0xda8] sm:$0xff]  ;;  %v2009_v59 = vld [vmem:[%s4068_s1 + $0xc90] sm:$0xff] }
  0xcc   : >> { %1069 = vmatpush.msrb.mxu2 %v1937_v60  ;;  %1089 = vmatpush.msrb.mxu3 %v1969_v61  ;;  %v2041_v60 = vld [vmem:[%s4068_s1 + $0xd90] sm:$0xff]  ;;  %v2010_v61 = vld [vmem:[%s4068_s1 + $0xc98] sm:$0xff] }
  0xcd   : >> { %1030 = vmatpush.msrb.mxu0 %v1934_v62  ;;  %1050 = vmatpush.msrb.mxu1 %v1966_v63  ;;  %v2042_v62 = vld [vmem:[%s4068_s1 + $0xd98] sm:$0xff]  ;;  %v2007_v63 = vld [vmem:[%s4068_s1 + $0xc80] sm:$0xff] }
  0xce   : >> { %1070 = vmatpush.msrb.mxu2 %v1935_v1  ;;  %1090 = vmatpush.msrb.mxu3 %v1967_v2  ;;  %v2039_v1 = vld [vmem:[%s4068_s1 + $0xd80] sm:$0xff]  ;;  %v2008_v2 = vld [vmem:[%s4068_s1 + $0xc88] sm:$0xff] }
  0xcf   : >> { %1031 = vmatpush.msrb.mxu0 %v1932_v3  ;;  %1051 = vmatpush.msrb.mxu1 %v1964_v4  ;;  %v2040_v3 = vld [vmem:[%s4068_s1 + $0xd88] sm:$0xff]  ;;  %v2005_v4 = vld [vmem:[%s4068_s1 + $0xc70] sm:$0xff] }
  0xd0   : >> { %1071 = vmatpush.msrb.mxu2 %v1933_v5  ;;  %1091 = vmatpush.msrb.mxu3 %v1965_v6  ;;  %v2037_v5 = vld [vmem:[%s4068_s1 + $0xd70] sm:$0xff]  ;;  %v2006_v6 = vld [vmem:[%s4068_s1 + $0xc78] sm:$0xff] }
  0xd1   : >> { %1032 = vmatpush.msrb.mxu0 %v1930_v7  ;;  %1052 = vmatpush.msrb.mxu1 %v1962_v8  ;;  %v2038_v7 = vld [vmem:[%s4068_s1 + $0xd78] sm:$0xff]  ;;  %v2003_v8 = vld [vmem:[%s4068_s1 + $0xc60] sm:$0xff] }
  0xd2   : >> { %1072 = vmatpush.msrb.mxu2 %v1931_v9  ;;  %1092 = vmatpush.msrb.mxu3 %v1963_v10  ;;  %v2035_v9 = vld [vmem:[%s4068_s1 + $0xd60] sm:$0xff]  ;;  %v2004_v10 = vld [vmem:[%s4068_s1 + $0xc68] sm:$0xff] }
  0xd3   : >> { %1033 = vmatpush.msrb.mxu0 %v1928_v11  ;;  %1053 = vmatpush.msrb.mxu1 %v1960_v48  ;;  %v2036_v11 = vld [vmem:[%s4068_s1 + $0xd68] sm:$0xff]  ;;  %v2001_v48 = vld [vmem:[%s4068_s1 + $0xc50] sm:$0xff] }
  0xd4   : >> { %1073 = vmatpush.msrb.mxu2 %v1929_v56  ;;  %1093 = vmatpush.msrb.mxu3 %v1961_v12  ;;  %v2033_v56 = vld [vmem:[%s4068_s1 + $0xd50] sm:$0xff]  ;;  %v2002_v12 = vld [vmem:[%s4068_s1 + $0xc58] sm:$0xff] }
  0xd5   : >> { %1034 = vmatpush.msrb.mxu0 %v1926_v15  ;;  %1054 = vmatpush.msrb.mxu1 %v1958_v16  ;;  %v2031_v15 = vld [vmem:[%s4068_s1 + $0xd40] sm:$0xff]  ;;  %v2000_v16 = vld [vmem:[%s4068_s1 + $0xc48] sm:$0xff] }
  0xd6   : >> { %1074 = vmatpush.msrb.mxu2 %v1927_v19  ;;  %1094 = vmatpush.msrb.mxu3 %v1959_v20  ;;  %v2032_v19 = vld [vmem:[%s4068_s1 + $0xd48] sm:$0xff]  ;;  %v1997_v20 = vld [vmem:[%s4068_s1 + $0xc30] sm:$0xff] }
  0xd7   : >> { %1035 = vmatpush.msrb.mxu0 %v1924_v23  ;;  %1055 = vmatpush.msrb.mxu1 %v1956_v24  ;;  %v2030_v23 = vld [vmem:[%s4068_s1 + $0xd38] sm:$0xff]  ;;  %v1995_v24 = vld [vmem:[%s4068_s1 + $0xc20] sm:$0xff] }
  0xd8   : >> { %1075 = vmatpush.msrb.mxu2 %v1925_v17  ;;  %1095 = vmatpush.msrb.mxu3 %v1957_v18  ;;  %v2028_v17 = vld [vmem:[%s4068_s1 + $0xd28] sm:$0xff]  ;;  %v1993_v18 = vld [vmem:[%s4068_s1 + $0xc10] sm:$0xff] }
  0xd9   : >> { %1036 = vmatpush.msrb.mxu0 %v1922_v27  ;;  %1056 = vmatpush.msrb.mxu1 %v1954_v28  ;;  %v2025_v27 = vld [vmem:[%s4068_s1 + $0xd10] sm:$0xff]  ;;  %v1994_v28 = vld [vmem:[%s4068_s1 + $0xc18] sm:$0xff] }
  0xda   : >> { %1076 = vmatpush.msrb.mxu2 %v1923_v29  ;;  %1096 = vmatpush.msrb.mxu3 %v1955_v30  ;;  %v2026_v29 = vld [vmem:[%s4068_s1 + $0xd18] sm:$0xff]  ;;  %v1991_v30 = vld [vmem:[%s4068_s1 + $0xc00] sm:$0xff] }
  0xdb   : >> { %1037 = vmatmul.f32.vlgmr.msrb.gmra.mxu0 %v1015_v31  ;;  %1057 = vmatmul.f32.vlgmr.msrb.gmra.mxu1 %v1018_v32 }
  0xdc   : >> { %1077 = vmatmul.f32.vlgmr.msrb.gmra.mxu2 %v1015_v31  ;;  %1097 = vmatmul.f32.vlgmr.msrb.gmra.mxu3 %v1018_v32  ;;  %v2023_v31 = vld [vmem:[%s4068_s1 + $0xd00] sm:$0xff]  ;;  %v1992_v32 = vld [vmem:[%s4068_s1 + $0xc08] sm:$0xff] }
  0xdd   : >> { %1176 = vmatpush.msra.mxu0 %v2021_v33  ;;  %1196 = vmatpush.msra.mxu1 %v2053_v34  ;;  %v2024_v33 = vld [vmem:[%s4068_s1 + $0xd08] sm:$0xff]  ;;  %v3656_v34 = vld [vmem:[%s2585_s27 + $0x40] sm:$0xff] }
  0xde   : >> { %1216 = vmatpush.msra.mxu2 %v2022_v35  ;;  %1236 = vmatpush.msra.mxu3 %v2054_v36  ;;  %v3659_v35 = vld [vmem:[%s2585_s27 + $0x48] sm:$0xff]  ;;  %v2085_v36 = vld [vmem:[%s4068_s1 + $0xef0] sm:$0xff] }
  0xdf   : >> { %1177 = vmatpush.msra.mxu0 %v2019_v37  ;;  %1197 = vmatpush.msra.mxu1 %v2051_v38  ;;  %v2117_v37 = vld [vmem:[%s4068_s1 + $0xff0] sm:$0xff]  ;;  %v2086_v38 = vld [vmem:[%s4068_s1 + $0xef8] sm:$0xff] }
  0xe0   : >> { %1217 = vmatpush.msra.mxu2 %v2020_v39  ;;  %1237 = vmatpush.msra.mxu3 %v2052_v40  ;;  %v2118_v39 = vld [vmem:[%s4068_s1 + $0xff8] sm:$0xff]  ;;  %v2083_v40 = vld [vmem:[%s4068_s1 + $0xee0] sm:$0xff] }
  0xe1   : >> { %1178 = vmatpush.msra.mxu0 %v2017_v41  ;;  %1198 = vmatpush.msra.mxu1 %v2049_v42  ;;  %v2115_v41 = vld [vmem:[%s4068_s1 + $0xfe0] sm:$0xff]  ;;  %v2084_v42 = vld [vmem:[%s4068_s1 + $0xee8] sm:$0xff] }
  0xe2   : >> { %1218 = vmatpush.msra.mxu2 %v2018_v43  ;;  %1238 = vmatpush.msra.mxu3 %v2050_v44  ;;  %v2116_v43 = vld [vmem:[%s4068_s1 + $0xfe8] sm:$0xff]  ;;  %v2081_v44 = vld [vmem:[%s4068_s1 + $0xed0] sm:$0xff] }
  0xe3   : >> { %1179 = vmatpush.msra.mxu0 %v2015_v45  ;;  %1199 = vmatpush.msra.mxu1 %v2047_v46  ;;  %v2113_v45 = vld [vmem:[%s4068_s1 + $0xfd0] sm:$0xff]  ;;  %v2082_v46 = vld [vmem:[%s4068_s1 + $0xed8] sm:$0xff] }
  0xe4   : >> { %1219 = vmatpush.msra.mxu2 %v2016_v47  ;;  %1239 = vmatpush.msra.mxu3 %v2048_v49  ;;  %v2114_v47 = vld [vmem:[%s4068_s1 + $0xfd8] sm:$0xff]  ;;  %v2079_v49 = vld [vmem:[%s4068_s1 + $0xec0] sm:$0xff] }
  0xe5   : >> { %1180 = vmatpush.msra.mxu0 %v2013_v50  ;;  %1200 = vmatpush.msra.mxu1 %v2045_v51  ;;  %v2111_v50 = vld [vmem:[%s4068_s1 + $0xfc0] sm:$0xff]  ;;  %v2080_v51 = vld [vmem:[%s4068_s1 + $0xec8] sm:$0xff] }
  0xe6   : >> { %1220 = vmatpush.msra.mxu2 %v2014_v52  ;;  %1240 = vmatpush.msra.mxu3 %v2046_v53  ;;  %v2112_v52 = vld [vmem:[%s4068_s1 + $0xfc8] sm:$0xff]  ;;  %v2077_v53 = vld [vmem:[%s4068_s1 + $0xeb0] sm:$0xff] }
  0xe7   : >> { %1181 = vmatpush.msra.mxu0 %v2011_v54  ;;  %1201 = vmatpush.msra.mxu1 %v2043_v55  ;;  %v2109_v54 = vld [vmem:[%s4068_s1 + $0xfb0] sm:$0xff]  ;;  %v2078_v55 = vld [vmem:[%s4068_s1 + $0xeb8] sm:$0xff] }
  0xe8   : >> { %1221 = vmatpush.msra.mxu2 %v2012_v57  ;;  %1241 = vmatpush.msra.mxu3 %v2044_v58  ;;  %v2110_v57 = vld [vmem:[%s4068_s1 + $0xfb8] sm:$0xff]  ;;  %v2075_v58 = vld [vmem:[%s4068_s1 + $0xea0] sm:$0xff] }
  0xe9   : >> { %1182 = vmatpush.msra.mxu0 %v2009_v59  ;;  %1202 = vmatpush.msra.mxu1 %v2041_v60  ;;  %v2107_v59 = vld [vmem:[%s4068_s1 + $0xfa0] sm:$0xff]  ;;  %v2076_v60 = vld [vmem:[%s4068_s1 + $0xea8] sm:$0xff] }
  0xea   : >> { %1222 = vmatpush.msra.mxu2 %v2010_v61  ;;  %1242 = vmatpush.msra.mxu3 %v2042_v62  ;;  %v2108_v61 = vld [vmem:[%s4068_s1 + $0xfa8] sm:$0xff]  ;;  %v2073_v62 = vld [vmem:[%s4068_s1 + $0xe90] sm:$0xff] }
  0xeb   : >> { %1183 = vmatpush.msra.mxu0 %v2007_v63  ;;  %1203 = vmatpush.msra.mxu1 %v2039_v1  ;;  %v2105_v63 = vld [vmem:[%s4068_s1 + $0xf90] sm:$0xff]  ;;  %v2074_v1 = vld [vmem:[%s4068_s1 + $0xe98] sm:$0xff] }
  0xec   : >> { %1223 = vmatpush.msra.mxu2 %v2008_v2  ;;  %1243 = vmatpush.msra.mxu3 %v2040_v3  ;;  %v2106_v2 = vld [vmem:[%s4068_s1 + $0xf98] sm:$0xff]  ;;  %v2071_v3 = vld [vmem:[%s4068_s1 + $0xe80] sm:$0xff] }
  0xed   : >> { %1184 = vmatpush.msra.mxu0 %v2005_v4  ;;  %1204 = vmatpush.msra.mxu1 %v2037_v5  ;;  %v2103_v4 = vld [vmem:[%s4068_s1 + $0xf80] sm:$0xff]  ;;  %v2072_v5 = vld [vmem:[%s4068_s1 + $0xe88] sm:$0xff] }
  0xee   : >> { %1224 = vmatpush.msra.mxu2 %v2006_v6  ;;  %1244 = vmatpush.msra.mxu3 %v2038_v7  ;;  %v2104_v6 = vld [vmem:[%s4068_s1 + $0xf88] sm:$0xff]  ;;  %v2069_v7 = vld [vmem:[%s4068_s1 + $0xe70] sm:$0xff] }
  0xef   : >> { %1185 = vmatpush.msra.mxu0 %v2003_v8  ;;  %1205 = vmatpush.msra.mxu1 %v2035_v9  ;;  %v2101_v8 = vld [vmem:[%s4068_s1 + $0xf70] sm:$0xff]  ;;  %v2070_v9 = vld [vmem:[%s4068_s1 + $0xe78] sm:$0xff] }
  0xf0   : >> { %1225 = vmatpush.msra.mxu2 %v2004_v10  ;;  %1245 = vmatpush.msra.mxu3 %v2036_v11  ;;  %v2102_v10 = vld [vmem:[%s4068_s1 + $0xf78] sm:$0xff]  ;;  %v2067_v11 = vld [vmem:[%s4068_s1 + $0xe60] sm:$0xff] }
  0xf1   : >> { %1186 = vmatpush.msra.mxu0 %v2001_v48  ;;  %1206 = vmatpush.msra.mxu1 %v2033_v56  ;;  %v2099_v48 = vld [vmem:[%s4068_s1 + $0xf60] sm:$0xff]  ;;  %v2068_v56 = vld [vmem:[%s4068_s1 + $0xe68] sm:$0xff] }
  0xf2   : >> { %1226 = vmatpush.msra.mxu2 %v2002_v12  ;;  %1246 = vmatpush.msra.mxu3 %v2034_v13  ;;  %v2100_v12 = vld [vmem:[%s4068_s1 + $0xf68] sm:$0xff]  ;;  %v2065_v13 = vld [vmem:[%s4068_s1 + $0xe50] sm:$0xff] }
  0xf3   : >> { %1187 = vmatpush.msra.mxu0 %v1999_v14  ;;  %1207 = vmatpush.msra.mxu1 %v2031_v15  ;;  %v2097_v14 = vld [vmem:[%s4068_s1 + $0xf50] sm:$0xff]  ;;  %v2066_v15 = vld [vmem:[%s4068_s1 + $0xe58] sm:$0xff] }
  0xf4   : >> { %1227 = vmatpush.msra.mxu2 %v2000_v16  ;;  %1247 = vmatpush.msra.mxu3 %v2032_v19  ;;  %v2098_v16 = vld [vmem:[%s4068_s1 + $0xf58] sm:$0xff]  ;;  %v2063_v19 = vld [vmem:[%s4068_s1 + $0xe40] sm:$0xff] }
  0xf5   : >> { %1188 = vmatpush.msra.mxu0 %v1997_v20  ;;  %1208 = vmatpush.msra.mxu1 %v2029_v21  ;;  %v2095_v20 = vld [vmem:[%s4068_s1 + $0xf40] sm:$0xff]  ;;  %v2064_v21 = vld [vmem:[%s4068_s1 + $0xe48] sm:$0xff] }
  0xf6   : >> { %1228 = vmatpush.msra.mxu2 %v1998_v22  ;;  %1248 = vmatpush.msra.mxu3 %v2030_v23  ;;  %v2096_v22 = vld [vmem:[%s4068_s1 + $0xf48] sm:$0xff]  ;;  %v2061_v23 = vld [vmem:[%s4068_s1 + $0xe30] sm:$0xff] }
  0xf7   : >> { %1189 = vmatpush.msra.mxu0 %v1995_v24  ;;  %1209 = vmatpush.msra.mxu1 %v2027_v25  ;;  %v2093_v24 = vld [vmem:[%s4068_s1 + $0xf30] sm:$0xff]  ;;  %v2062_v25 = vld [vmem:[%s4068_s1 + $0xe38] sm:$0xff] }
  0xf8   : >> { %1229 = vmatpush.msra.mxu2 %v1996_v26  ;;  %1249 = vmatpush.msra.mxu3 %v2028_v17  ;;  %v2094_v26 = vld [vmem:[%s4068_s1 + $0xf38] sm:$0xff]  ;;  %v2059_v17 = vld [vmem:[%s4068_s1 + $0xe20] sm:$0xff] }
  0xf9   : >> { %1190 = vmatpush.msra.mxu0 %v1993_v18  ;;  %1210 = vmatpush.msra.mxu1 %v2025_v27  ;;  %v2091_v18 = vld [vmem:[%s4068_s1 + $0xf20] sm:$0xff]  ;;  %v2060_v27 = vld [vmem:[%s4068_s1 + $0xe28] sm:$0xff] }
  0xfa   : >> { %1230 = vmatpush.msra.mxu2 %v1994_v28  ;;  %1250 = vmatpush.msra.mxu3 %v2026_v29  ;;  %v2092_v28 = vld [vmem:[%s4068_s1 + $0xf28] sm:$0xff]  ;;  %v2057_v29 = vld [vmem:[%s4068_s1 + $0xe10] sm:$0xff] }
  0xfb   : >> { %1191 = vmatpush.msra.mxu0 %v1991_v30  ;;  %1211 = vmatpush.msra.mxu1 %v2023_v31  ;;  %v2089_v30 = vld [vmem:[%s4068_s1 + $0xf10] sm:$0xff]  ;;  %v2058_v31 = vld [vmem:[%s4068_s1 + $0xe18] sm:$0xff] }
  0xfc   : >> { %1231 = vmatpush.msra.mxu2 %v1992_v32  ;;  %1251 = vmatpush.msra.mxu3 %v2024_v33  ;;  %v2090_v32 = vld [vmem:[%s4068_s1 + $0xf18] sm:$0xff]  ;;  %v2055_v33 = vld [vmem:[%s4068_s1 + $0xe00] sm:$0xff] }
  0xfd   : >> { %1192 = vmatmul.f32.vlgmr.msra.gmra.mxu0 %v3656_v34  ;;  %1212 = vmatmul.f32.vlgmr.msra.gmra.mxu1 %v3659_v35 }
  0xfe   : >> { %1232 = vmatmul.f32.vlgmr.msra.gmra.mxu2 %v3656_v34  ;;  %1252 = vmatmul.f32.vlgmr.msra.gmra.mxu3 %v3659_v35 }
  0xff   : >> { %1329 = vmatpush.msrb.mxu0 %v2085_v36  ;;  %1349 = vmatpush.msrb.mxu1 %v2117_v37  ;;  %v2087_v36 = vld [vmem:[%s4068_s1 + $0xf00] sm:$0xff]  ;;  %v2056_v37 = vld [vmem:[%s4068_s1 + $0xe08] sm:$0xff] }
 0x100   : >> { %1369 = vmatpush.msrb.mxu2 %v2086_v38  ;;  %1389 = vmatpush.msrb.mxu3 %v2118_v39  ;;  %v2088_v38 = vld [vmem:[%s4068_s1 + $0xf08] sm:$0xff]  ;;  %v1325_v39 = vrot.slane %v3656_v34, 1 }
 0x101   : >> { %1330 = vmatpush.msrb.mxu0 %v2083_v40  ;;  %1350 = vmatpush.msrb.mxu1 %v2115_v41  ;;  %v1326_v40 = vrot.slane %v3659_v35, 1  ;;  %v2149_v41 = vld [vmem:[%s4068_s1 + $0x10f0] sm:$0xff] }
 0x102   : >> { %1370 = vmatpush.msrb.mxu2 %v2084_v42  ;;  %1390 = vmatpush.msrb.mxu3 %v2116_v43  ;;  %v2181_v42 = vld [vmem:[%s4068_s1 + $0x11f0] sm:$0xff]  ;;  %v2150_v43 = vld [vmem:[%s4068_s1 + $0x10f8] sm:$0xff] }
 0x103   : >> { %1331 = vmatpush.msrb.mxu0 %v2081_v44  ;;  %1351 = vmatpush.msrb.mxu1 %v2113_v45  ;;  %v2182_v44 = vld [vmem:[%s4068_s1 + $0x11f8] sm:$0xff]  ;;  %v2147_v45 = vld [vmem:[%s4068_s1 + $0x10e0] sm:$0xff] }
 0x104   : >> { %1371 = vmatpush.msrb.mxu2 %v2082_v46  ;;  %1391 = vmatpush.msrb.mxu3 %v2114_v47  ;;  %v2179_v46 = vld [vmem:[%s4068_s1 + $0x11e0] sm:$0xff]  ;;  %v2148_v47 = vld [vmem:[%s4068_s1 + $0x10e8] sm:$0xff] }
 0x105   : >> { %1332 = vmatpush.msrb.mxu0 %v2079_v49  ;;  %1352 = vmatpush.msrb.mxu1 %v2111_v50  ;;  %v2180_v49 = vld [vmem:[%s4068_s1 + $0x11e8] sm:$0xff]  ;;  %v2145_v50 = vld [vmem:[%s4068_s1 + $0x10d0] sm:$0xff] }
 0x106   : >> { %1372 = vmatpush.msrb.mxu2 %v2080_v51  ;;  %1392 = vmatpush.msrb.mxu3 %v2112_v52  ;;  %v2177_v51 = vld [vmem:[%s4068_s1 + $0x11d0] sm:$0xff]  ;;  %v2146_v52 = vld [vmem:[%s4068_s1 + $0x10d8] sm:$0xff] }
 0x107   : >> { %1333 = vmatpush.msrb.mxu0 %v2077_v53  ;;  %1353 = vmatpush.msrb.mxu1 %v2109_v54  ;;  %v2178_v53 = vld [vmem:[%s4068_s1 + $0x11d8] sm:$0xff]  ;;  %v2143_v54 = vld [vmem:[%s4068_s1 + $0x10c0] sm:$0xff] }
 0x108   : >> { %1373 = vmatpush.msrb.mxu2 %v2078_v55  ;;  %1393 = vmatpush.msrb.mxu3 %v2110_v57  ;;  %v2175_v55 = vld [vmem:[%s4068_s1 + $0x11c0] sm:$0xff]  ;;  %v2144_v57 = vld [vmem:[%s4068_s1 + $0x10c8] sm:$0xff] }
 0x109   : >> { %1334 = vmatpush.msrb.mxu0 %v2075_v58  ;;  %1354 = vmatpush.msrb.mxu1 %v2107_v59  ;;  %v2176_v58 = vld [vmem:[%s4068_s1 + $0x11c8] sm:$0xff]  ;;  %v2141_v59 = vld [vmem:[%s4068_s1 + $0x10b0] sm:$0xff] }
 0x10a   : >> { %1374 = vmatpush.msrb.mxu2 %v2076_v60  ;;  %1394 = vmatpush.msrb.mxu3 %v2108_v61  ;;  %v2173_v60 = vld [vmem:[%s4068_s1 + $0x11b0] sm:$0xff]  ;;  %v2142_v61 = vld [vmem:[%s4068_s1 + $0x10b8] sm:$0xff] }
 0x10b   : >> { %1335 = vmatpush.msrb.mxu0 %v2073_v62  ;;  %1355 = vmatpush.msrb.mxu1 %v2105_v63  ;;  %v2174_v62 = vld [vmem:[%s4068_s1 + $0x11b8] sm:$0xff]  ;;  %v2139_v63 = vld [vmem:[%s4068_s1 + $0x10a0] sm:$0xff] }
 0x10c   : >> { %1375 = vmatpush.msrb.mxu2 %v2074_v1  ;;  %1395 = vmatpush.msrb.mxu3 %v2106_v2  ;;  %v2171_v1 = vld [vmem:[%s4068_s1 + $0x11a0] sm:$0xff]  ;;  %v2140_v2 = vld [vmem:[%s4068_s1 + $0x10a8] sm:$0xff] }
 0x10d   : >> { %1336 = vmatpush.msrb.mxu0 %v2071_v3  ;;  %1356 = vmatpush.msrb.mxu1 %v2103_v4  ;;  %v2172_v3 = vld [vmem:[%s4068_s1 + $0x11a8] sm:$0xff]  ;;  %v2137_v4 = vld [vmem:[%s4068_s1 + $0x1090] sm:$0xff] }
 0x10e   : >> { %1376 = vmatpush.msrb.mxu2 %v2072_v5  ;;  %1396 = vmatpush.msrb.mxu3 %v2104_v6  ;;  %v2169_v5 = vld [vmem:[%s4068_s1 + $0x1190] sm:$0xff]  ;;  %v2138_v6 = vld [vmem:[%s4068_s1 + $0x1098] sm:$0xff] }
 0x10f   : >> { %1337 = vmatpush.msrb.mxu0 %v2069_v7  ;;  %1357 = vmatpush.msrb.mxu1 %v2101_v8  ;;  %v2170_v7 = vld [vmem:[%s4068_s1 + $0x1198] sm:$0xff]  ;;  %v2135_v8 = vld [vmem:[%s4068_s1 + $0x1080] sm:$0xff] }
 0x110   : >> { %1377 = vmatpush.msrb.mxu2 %v2070_v9  ;;  %1397 = vmatpush.msrb.mxu3 %v2102_v10  ;;  %v2167_v9 = vld [vmem:[%s4068_s1 + $0x1180] sm:$0xff]  ;;  %v2136_v10 = vld [vmem:[%s4068_s1 + $0x1088] sm:$0xff] }
 0x111   : >> { %1338 = vmatpush.msrb.mxu0 %v2067_v11  ;;  %1358 = vmatpush.msrb.mxu1 %v2099_v48  ;;  %v2168_v11 = vld [vmem:[%s4068_s1 + $0x1188] sm:$0xff]  ;;  %v2133_v48 = vld [vmem:[%s4068_s1 + $0x1070] sm:$0xff] }
 0x112   : >> { %1378 = vmatpush.msrb.mxu2 %v2068_v56  ;;  %1398 = vmatpush.msrb.mxu3 %v2100_v12  ;;  %v2165_v56 = vld [vmem:[%s4068_s1 + $0x1170] sm:$0xff]  ;;  %v2134_v12 = vld [vmem:[%s4068_s1 + $0x1078] sm:$0xff] }
 0x113   : >> { %1339 = vmatpush.msrb.mxu0 %v2065_v13  ;;  %1359 = vmatpush.msrb.mxu1 %v2097_v14  ;;  %v2166_v13 = vld [vmem:[%s4068_s1 + $0x1178] sm:$0xff]  ;;  %v2131_v14 = vld [vmem:[%s4068_s1 + $0x1060] sm:$0xff] }
 0x114   : >> { %1379 = vmatpush.msrb.mxu2 %v2066_v15  ;;  %1399 = vmatpush.msrb.mxu3 %v2098_v16  ;;  %v2163_v15 = vld [vmem:[%s4068_s1 + $0x1160] sm:$0xff]  ;;  %v2132_v16 = vld [vmem:[%s4068_s1 + $0x1068] sm:$0xff] }
 0x115   : >> { %1340 = vmatpush.msrb.mxu0 %v2063_v19  ;;  %1360 = vmatpush.msrb.mxu1 %v2095_v20  ;;  %v2164_v19 = vld [vmem:[%s4068_s1 + $0x1168] sm:$0xff]  ;;  %v2129_v20 = vld [vmem:[%s4068_s1 + $0x1050] sm:$0xff] }
 0x116   : >> { %1380 = vmatpush.msrb.mxu2 %v2064_v21  ;;  %1400 = vmatpush.msrb.mxu3 %v2096_v22  ;;  %v2161_v21 = vld [vmem:[%s4068_s1 + $0x1150] sm:$0xff]  ;;  %v2130_v22 = vld [vmem:[%s4068_s1 + $0x1058] sm:$0xff] }
 0x117   : >> { %1341 = vmatpush.msrb.mxu0 %v2061_v23  ;;  %1361 = vmatpush.msrb.mxu1 %v2093_v24  ;;  %v2162_v23 = vld [vmem:[%s4068_s1 + $0x1158] sm:$0xff]  ;;  %v2127_v24 = vld [vmem:[%s4068_s1 + $0x1040] sm:$0xff] }
 0x118   : >> { %1381 = vmatpush.msrb.mxu2 %v2062_v25  ;;  %1401 = vmatpush.msrb.mxu3 %v2094_v26  ;;  %v2159_v25 = vld [vmem:[%s4068_s1 + $0x1140] sm:$0xff]  ;;  %v2128_v26 = vld [vmem:[%s4068_s1 + $0x1048] sm:$0xff] }
 0x119   : >> { %1342 = vmatpush.msrb.mxu0 %v2059_v17  ;;  %1362 = vmatpush.msrb.mxu1 %v2091_v18  ;;  %v2160_v17 = vld [vmem:[%s4068_s1 + $0x1148] sm:$0xff]  ;;  %v2125_v18 = vld [vmem:[%s4068_s1 + $0x1030] sm:$0xff] }
 0x11a   : >> { %1382 = vmatpush.msrb.mxu2 %v2060_v27  ;;  %1402 = vmatpush.msrb.mxu3 %v2092_v28  ;;  %v2157_v27 = vld [vmem:[%s4068_s1 + $0x1130] sm:$0xff]  ;;  %v2126_v28 = vld [vmem:[%s4068_s1 + $0x1038] sm:$0xff] }
 0x11b   : >> { %1343 = vmatpush.msrb.mxu0 %v2057_v29  ;;  %1363 = vmatpush.msrb.mxu1 %v2089_v30  ;;  %v2158_v29 = vld [vmem:[%s4068_s1 + $0x1138] sm:$0xff]  ;;  %v1989_v30 = vld [vmem:[%s2585_s27 + $0x50] sm:$0x1] }
 0x11c   : >> { %1383 = vmatpush.msrb.mxu2 %v2058_v31  ;;  %1403 = vmatpush.msrb.mxu3 %v2090_v32  ;;  %v1990_v31 = vld [vmem:[%s2585_s27 + $0x58] sm:$0x1]  ;;  %v2123_v32 = vld [vmem:[%s4068_s1 + $0x1020] sm:$0xff] }
 0x11d   : >> { %1344 = vmatpush.msrb.mxu0 %v2055_v33  ;;  %1364 = vmatpush.msrb.mxu1 %v2087_v36  ;;  %v2155_v33 = vld [vmem:[%s4068_s1 + $0x1120] sm:$0xff]  ;;  %v2124_v36 = vld [vmem:[%s4068_s1 + $0x1028] sm:$0xff] }
 0x11e   : >> { %1384 = vmatpush.msrb.mxu2 %v2056_v37  ;;  %1404 = vmatpush.msrb.mxu3 %v2088_v38  ;;  %v2156_v37 = vld [vmem:[%s4068_s1 + $0x1128] sm:$0xff]  ;;  %v1478_v38 = vrot.slane %v3656_v34, 2  ;;  %v2122_v34 = vld [vmem:[%s4068_s1 + $0x1018] sm:$0xff] }
 0x11f   : >> { %1345 = vmatmul.f32.vlgmr.msrb.gmra.mxu0 %v1325_v39  ;;  %1365 = vmatmul.f32.vlgmr.msrb.gmra.mxu1 %v1326_v40 }
 0x120   : >> { %1385 = vmatmul.f32.vlgmr.msrb.gmra.mxu2 %v1325_v39  ;;  %1405 = vmatmul.f32.vlgmr.msrb.gmra.mxu3 %v1326_v40  ;;  %v1481_v39 = vrot.slane %v3659_v35, 2  ;;  %v2121_v40 = vld [vmem:[%s4068_s1 + $0x1010] sm:$0xff]  ;;  %v2154_v35 = vld [vmem:[%s4068_s1 + $0x1118] sm:$0xff] }
 0x121   : >> { %1486 = vmatpush.msra.mxu0 %v2149_v41  ;;  %1506 = vmatpush.msra.mxu1 %v2181_v42  ;;  %v2153_v41 = vld [vmem:[%s4068_s1 + $0x1110] sm:$0xff]  ;;  %v1479_v42 = vrot.slane %v1989_v30, 2 }
 0x122   : >> { %1526 = vmatpush.msra.mxu2 %v2150_v43  ;;  %1546 = vmatpush.msra.mxu3 %v2182_v44  ;;  %v1482_v43 = vrot.slane %v1990_v31, 2  ;;  %v2119_v44 = vld [vmem:[%s4068_s1 + $0x1000] sm:$0xff] }
 0x123   : >> { %1487 = vmatpush.msra.mxu0 %v2147_v45  ;;  %1507 = vmatpush.msra.mxu1 %v2179_v46  ;;  %v2151_v45 = vld [vmem:[%s4068_s1 + $0x1100] sm:$0xff]  ;;  %v2120_v46 = vld [vmem:[%s4068_s1 + $0x1008] sm:$0xff] }
 0x124   : >> { %1527 = vmatpush.msra.mxu2 %v2148_v47  ;;  %1547 = vmatpush.msra.mxu3 %v2180_v49  ;;  %v2152_v47 = vld [vmem:[%s4068_s1 + $0x1108] sm:$0xff]  ;;  %v1480_v49 = vsel %vm547_vm0, %v1478_v38, %v1479_v42 }
 0x125   : >> { %1488 = vmatpush.msra.mxu0 %v2145_v50  ;;  %1508 = vmatpush.msra.mxu1 %v2177_v51  ;;  %v1483_v50 = vsel %vm547_vm0, %v1481_v39, %v1482_v43  ;;  %v337_v51 = vpop.f32.mrf.mxu0 }
 0x126   : >> { %1528 = vmatpush.msra.mxu2 %v2146_v52  ;;  %1548 = vmatpush.msra.mxu3 %v2178_v53  ;;  %v357_v52 = vpop.f32.mrf.mxu1  ;;  %v377_v53 = vpop.f32.mrf.mxu2 }
 0x127   : >> { %1489 = vmatpush.msra.mxu0 %v2143_v54  ;;  %1509 = vmatpush.msra.mxu1 %v2175_v55  ;;  %v397_v54 = vpop.f32.mrf.mxu3 }
 0x128   : >> { %1529 = vmatpush.msra.mxu2 %v2144_v57  ;;  %1549 = vmatpush.msra.mxu3 %v2176_v58 }
 0x129   : >> { %1490 = vmatpush.msra.mxu0 %v2141_v59  ;;  %1510 = vmatpush.msra.mxu1 %v2173_v60 }
 0x12a   : >> { %1530 = vmatpush.msra.mxu2 %v2142_v61  ;;  %1550 = vmatpush.msra.mxu3 %v2174_v62 }
 0x12b   : >> { %1491 = vmatpush.msra.mxu0 %v2139_v63  ;;  %1511 = vmatpush.msra.mxu1 %v2171_v1 }
 0x12c   : >> { %1531 = vmatpush.msra.mxu2 %v2140_v2  ;;  %1551 = vmatpush.msra.mxu3 %v2172_v3 }
 0x12d   : >> { %1492 = vmatpush.msra.mxu0 %v2137_v4  ;;  %1512 = vmatpush.msra.mxu1 %v2169_v5  ;;  %v417_v55 = vpop.f32.mrf.mxu0 }
 0x12e   : >> { %1532 = vmatpush.msra.mxu2 %v2138_v6  ;;  %1552 = vmatpush.msra.mxu3 %v2170_v7  ;;  %v437_v57 = vpop.f32.mrf.mxu1  ;;  %v457_v58 = vpop.f32.mrf.mxu2 }
 0x12f   : >> { %1493 = vmatpush.msra.mxu0 %v2135_v8  ;;  %1513 = vmatpush.msra.mxu1 %v2167_v9  ;;  %v477_v59 = vpop.f32.mrf.mxu3 }
 0x130   : >> { %1533 = vmatpush.msra.mxu2 %v2136_v10  ;;  %1553 = vmatpush.msra.mxu3 %v2168_v11  ;;  %v358_v11 = vadd.f32 %v357_v52, %v337_v51 }
 0x131   : >> { %1494 = vmatpush.msra.mxu0 %v2133_v48  ;;  %1514 = vmatpush.msra.mxu1 %v2165_v56 }
 0x132   : >> { %1534 = vmatpush.msra.mxu2 %v2134_v12  ;;  %1554 = vmatpush.msra.mxu3 %v2166_v13 }
 0x133   : >> { %1495 = vmatpush.msra.mxu0 %v2131_v14  ;;  %1515 = vmatpush.msra.mxu1 %v2163_v15  ;;  %v418_v14 = vadd.f32 %v417_v55, %v358_v11 }
 0x134   : >> { %1535 = vmatpush.msra.mxu2 %v2132_v16  ;;  %1555 = vmatpush.msra.mxu3 %v2164_v19  ;;  %v398_v16 = vadd.f32 %v397_v54, %v377_v53 }
 0x135   : >> { %1496 = vmatpush.msra.mxu0 %v2129_v20  ;;  %1516 = vmatpush.msra.mxu1 %v2161_v21  ;;  %v573_v60 = vpop.f32.mrf.mxu0  ;;  %v438_v19 = vadd.f32 %v437_v57, %v418_v14 }
 0x136   : >> { %1536 = vmatpush.msra.mxu2 %v2130_v22  ;;  %1556 = vmatpush.msra.mxu3 %v2162_v23  ;;  %v593_v61 = vpop.f32.mrf.mxu1  ;;  %v613_v62 = vpop.f32.mrf.mxu2 }
 0x137   : >> { %1497 = vmatpush.msra.mxu0 %v2127_v24  ;;  %1517 = vmatpush.msra.mxu1 %v2159_v25  ;;  %v633_v63 = vpop.f32.mrf.mxu3  ;;  %v594_v15 = vadd.f32 %v593_v61, %v573_v60  ;;  %v458_v25 = vadd.f32 %v457_v58, %v398_v16  ;;  %v1570_v61 = vperm.slane %v2254_v0, 1 }
 0x138   : >> { %1537 = vmatpush.msra.mxu2 %v2128_v26  ;;  %1557 = vmatpush.msra.mxu3 %v2160_v17 }
 0x139   : >> { %1498 = vmatpush.msra.mxu0 %v2125_v18  ;;  %1518 = vmatpush.msra.mxu1 %v2157_v27  ;;  %v636_v21 = vadd.f32 %v594_v15, %v438_v19  ;;  %v478_v31 = vadd.f32 %v477_v59, %v458_v25 }
 0x13a   : >> { %1538 = vmatpush.msra.mxu2 %v2126_v28  ;;  %1558 = vmatpush.msra.mxu3 %v2158_v29  ;;  %v634_v28 = vadd.f32 %v633_v63, %v613_v62 }
 0x13b   : >> { %1499 = vmatpush.msra.mxu0 %v2123_v32  ;;  %1519 = vmatpush.msra.mxu1 %v2155_v33 }
 0x13c   : >> { %1539 = vmatpush.msra.mxu2 %v2124_v36  ;;  %1559 = vmatpush.msra.mxu3 %v2156_v37  ;;  %v637_v37 = vadd.f32 %v634_v28, %v478_v31 }
 0x13d   : >> { %1500 = vmatpush.msra.mxu0 %v2121_v40  ;;  %1520 = vmatpush.msra.mxu1 %v2153_v41  ;;  %v728_v1 = vpop.f32.mrf.mxu0 }
 0x13e   : >> { %1540 = vmatpush.msra.mxu2 %v2122_v34  ;;  %1560 = vmatpush.msra.mxu3 %v2154_v35  ;;  %v748_v2 = vpop.f32.mrf.mxu1  ;;  %v768_v3 = vpop.f32.mrf.mxu2 }
 0x13f   : >> { %1501 = vmatpush.msra.mxu0 %v2119_v44  ;;  %1521 = vmatpush.msra.mxu1 %v2151_v45  ;;  %v788_v4 = vpop.f32.mrf.mxu3  ;;  %v749_v20 = vadd.f32 %v748_v2, %v728_v1 }
 0x140   : >> { %1541 = vmatpush.msra.mxu2 %v2120_v46  ;;  %1561 = vmatpush.msra.mxu3 %v2152_v47  ;;  %v789_v32 = vadd.f32 %v788_v4, %v768_v3  ;;  %v1569_v46 = vperm.slane %v2254_v0, 0 }
 0x141   : >> { %1502 = vmatmul.f32.vlgmr.msra.gmra.mxu0 %v1480_v49  ;;  %1522 = vmatmul.f32.vlgmr.msra.gmra.mxu1 %v1483_v50  ;;  %v791_v18 = vadd.f32 %v749_v20, %v636_v21 }
 0x142   : >> { %1542 = vmatmul.f32.vlgmr.msra.gmra.mxu2 %v1480_v49  ;;  %1562 = vmatmul.f32.vlgmr.msra.gmra.mxu3 %v1483_v50  ;;  %v792_v42 = vadd.f32 %v789_v32, %v637_v37 }
 0x145   : >> { %v881_v5 = vpop.f32.mrf.mxu0 }
 0x146   : >> { %v901_v6 = vpop.f32.mrf.mxu1  ;;  %v921_v7 = vpop.f32.mrf.mxu2 }
 0x147   : >> { %v941_v8 = vpop.f32.mrf.mxu3  ;;  %v902_v22 = vadd.f32 %v901_v6, %v881_v5 }
 0x148   : >> { %v942_v38 = vadd.f32 %v941_v8, %v921_v7 }
 0x149   : >> { %v944_v29 = vadd.f32 %v902_v22, %v791_v18 }
 0x14a   : >> { %v945_v47 = vadd.f32 %v942_v38, %v792_v42 }
 0x158   : >> { %v1038_v9 = vpop.f32.mrf.mxu0  ;;  %v1058_v10 = vpop.f32.mrf.mxu1 }
 0x159   : >> { %v1059_v27 = vadd.f32 %v1058_v10, %v1038_v9 }
 0x15b   : >> { %v1101_v33 = vadd.f32 %v1059_v27, %v944_v29 }
 0x15f   : >> { %v1078_v48 = vpop.f32.mrf.mxu2  ;;  %v1098_v56 = vpop.f32.mrf.mxu3 }
 0x160   : >> { %v1099_v43 = vadd.f32 %v1098_v56, %v1078_v48 }
 0x162   : >> { %v1102_v51 = vadd.f32 %v1099_v43, %v945_v47 }
 0x17a   : >> { %v1193_v12 = vpop.f32.mrf.mxu0  ;;  %v1213_v13 = vpop.f32.mrf.mxu1 }
 0x17b   : >> { %v1214_v30 = vadd.f32 %v1213_v13, %v1193_v12 }
 0x17d   : >> { %v1256_v39 = vadd.f32 %v1214_v30, %v1101_v33 }
 0x181   : >> { %v1233_v23 = vpop.f32.mrf.mxu2  ;;  %v1253_v24 = vpop.f32.mrf.mxu3 }
 0x182   : >> { %v1254_v49 = vadd.f32 %v1253_v24, %v1233_v23 }
 0x184   : >> { %v1257_v54 = vadd.f32 %v1254_v49, %v1102_v51 }
 0x19c   : >> { %v1346_v26 = vpop.f32.mrf.mxu0  ;;  %v1366_v17 = vpop.f32.mrf.mxu1 }
 0x19d   : >> { %v1367_v36 = vadd.f32 %v1366_v17, %v1346_v26 }
 0x19f   : >> { %v1409_v44 = vadd.f32 %v1367_v36, %v1256_v39 }
 0x1a3   : >> { %v1386_v40 = vpop.f32.mrf.mxu2  ;;  %v1406_v41 = vpop.f32.mrf.mxu3 }
 0x1a4   : >> { %v1407_v52 = vadd.f32 %v1406_v41, %v1386_v40 }
 0x1a6   : >> { %v1410_v59 = vadd.f32 %v1407_v52, %v1257_v54 }
 0x1be   : >> { %v1503_v34 = vpop.f32.mrf.mxu0  ;;  %v1523_v35 = vpop.f32.mrf.mxu1 }
 0x1bf   : >> { %v1524_v45 = vadd.f32 %v1523_v35, %v1503_v34 }
 0x1c1   : >> { %v1566_v50 = vadd.f32 %v1524_v45, %v1409_v44 }
 0x1c3   : >> { %v1573_v53 = vadd.f32 %v1569_v46, %v1566_v50 }
 0x1c5   : >> { %v1575_v55 = vmax.f32 %v1573_v53, 0.0  ;;  %v1543_v57 = vpop.f32.mrf.mxu2  ;;  %v1563_v58 = vpop.f32.mrf.mxu3 }
 0x1c6   : >> { %v1564_v60 = vadd.f32 %v1563_v58, %v1543_v57 }
 0x1c7   : >> { %1580 = vst [vmem:[%s1579_s25] sm:$0x7f] %v1575_v55 }
 0x1c8   : >> { %v1567_v62 = vadd.f32 %v1564_v60, %v1410_v59 }
 0x1ca   : >> { %v1574_v63 = vadd.f32 %v1570_v61, %v1567_v62  ;;  %176 = sbr.rel (!%p174_p4) target bundleno = 16 (0x10), region = 81 }
 0x1cc   : >> { %v1576_v1 = vmax.f32 %v1574_v63, 0.0 }
 0x1ce   : >> { %1581 = vst [vmem:[%s1579_s25 + $0x8] sm:$0x7f] %v1576_v1 }
 0x1cf PF: > { %s13_s12 = sadd.s32 1, %s2217_s12  }
 0x1d0   : > { %p10_p5 = scmp.ge.s32.totalorder %s13_s12, 4  }
 0x1d2   :  { %12 = sbr.rel (!%p10_p5) target bundleno = 1 (0x1), region = 92 }

</bundles_post_ra>
